<compile_context>
chip_gen: v6e
topology: v6e:2x2x1
jax: 0.10.0
libtpu: 0.0.40
codegen_flags: <defaults>
</compile_context>

<pallas_src>
import functools
import math

import jax
import jax.numpy as jnp
from jax.experimental import pallas as pl
from jax.experimental.pallas import tpu as pltpu

# ----------------------------- config ---------------------------------------
BATCH = 2
IN_NC = 3
CIN_PAD = 8            # encoder input channels padded (Cin=3 -> 8)
IN_RES = 16            # encoder input spatial size
OUTPUT_SIZE = 16       # decoder output resolution (synthetic stand-in for 1024)
N_STYLES = int(math.log(OUTPUT_SIZE, 2)) * 2 - 2       # = 6
STYLE_DIM = 512        # matches Generator(output_size, 512, 8, ...)
ENC_FEAT = 128         # encoder stem width
GEN_CH = 128           # synthesis feature channels (MXU-friendly; stand-in for 512)
RGB_PAD = 128          # lane-dense rgb slab width (real channels = 3)
POOL_OUT = 8           # face_pool target (synthetic stand-in for (256, 256))
LRELU_GAIN = math.sqrt(2.0)

N_UP = int(math.log2(OUTPUT_SIZE)) - 2                 # upsample blocks: 8 .. OUTPUT_SIZE
L_LAYERS = 2 + 3 * N_UP                                # modulated layers total
N_FEAT = 1 + 2 * N_UP                                  # demodulated (feature) layers
N_RGB = 1 + N_UP                                       # to_rgb layers


def _style_schedule(n_up):
    # conv1 -> latent[:,0], to_rgb1 -> latent[:,1], block i -> (1+2i, 2+2i, 3+2i)
    idx = [0, 1]
    si = 1
    for _ in range(n_up):
        idx += [si, si + 1, si + 2]
        si += 2
    return tuple(idx)


STYLE_IDX = _style_schedule(N_UP)


# ----------------------------- small helpers --------------------------------
def _fixed(shape):
    """BlockSpec for a grid-invariant, whole-array input/output."""
    return pl.BlockSpec(shape, lambda *_, _n=len(shape): (0,) * _n)


def _modconv(x, s, w, b, *, d=None, act=False):
    """StyleGAN2 modulated 1x1 conv on a (B, hw, Cin) tile; batch folded into M.

    x: (B, hw, Cin) f32, s: (B, Cin) f32, w: (Cin, Cout) bf16, b: (1, Cout) f32,
    d: optional hoisted demodulation factor (B, Cout) f32 (computed in the encoder kernel).
    Modulating the input is equivalent to modulating the weight for a 1x1 conv.
    """
    bn, hw, cin = x.shape
    cout = w.shape[1]
    xs = (x * s[:, None, :]).reshape(bn * hw, cin).astype(jnp.bfloat16)
    y = jnp.dot(xs, w, preferred_element_type=jnp.float32).reshape(bn, hw, cout)
    if d is not None:
        y = y * d[:, None, :]                     # demod as a cheap VPU multiply
    y = y + b
    if act:
        y = jnp.where(y >= 0.0, y, 0.2 * y) * LRELU_GAIN   # FusedLeakyReLU
    return y


def _spmat(m, x):
    """Apply a batch-block-diagonal spatial matrix (nearest-2x upsample / avg-pool).

    m: (B*hw_out, B*hw_in) bf16 (0/1 or 1/4 entries, exact in bf16),
    x: (B, hw_in, C) f32 -> (B, hw_out, C) f32.  bf16 MXU operands, f32 accumulation.
    TODO(synk): replace with in-register replication / fused upsampling conv for the real
    3x3 + blur model — a dense spatial matrix cannot scale to 1024^2.
    """
    bn, hw_in, c = x.shape
    hw_out = m.shape[0] // bn
    y = jnp.dot(m, x.reshape(bn * hw_in, c).astype(jnp.bfloat16),
                preferred_element_type=jnp.float32)
    return y.reshape(bn, hw_out, c)


def nearest_upsample_matrix(h, w):
    """(h*w,) row-major -> (2h*2w,) row-major nearest-neighbour 2x upsample matrix."""
    w2 = 2 * w
    out_r = jnp.arange(2 * h * w2)
    oy, ox = out_r // w2, out_r % w2
    src = (oy // 2) * w + (ox // 2)
    return (src[:, None] == jnp.arange(h * w)[None, :]).astype(jnp.float32)


def avgpool_matrix(h, w, ho, wo):
    """Uniform average-pool matrix: (ho*wo, h*w), row-major flattening."""
    kh, kw = h // ho, w // wo
    out_r = jnp.arange(ho * wo)
    oy, ox = out_r // wo, out_r % wo
    in_r = jnp.arange(h * w)
    iy, ix = in_r // w, in_r % w
    m = (iy[None, :] // kh == oy[:, None]) & (ix[None, :] // kw == ox[:, None])
    return m.astype(jnp.float32) / float(kh * kw)


# -------- kernel 1: encoder + hoisted style affines + hoisted demodulation ----
def _encoder_kernel(x_ref, w1_ref, b1_ref, w2_ref, b2_ref, lat_ref,
                    aw_ref, ab_ref, wsq_ref, s_ref, d_ref, *, B, HW):
    # stem: 1x1 mix + ReLU, batch folded into M
    x = x_ref[...].astype(jnp.bfloat16)                               # (B*HW, CIN_PAD)
    h = jnp.dot(x, w1_ref[...], preferred_element_type=jnp.float32) + b1_ref[...]
    h = jnp.maximum(h, 0.0)                                           # (B*HW, F)
    # global average pool: in-kernel reshape + sublane-axis mean (no pooling matmul)
    pooled = jnp.mean(h.reshape(B, HW, ENC_FEAT), axis=1)             # (B, F)
    # style head + latent_avg
    flat = (jnp.dot(pooled.astype(jnp.bfloat16), w2_ref[...],
                    preferred_element_type=jnp.float32)
            + b2_ref[...] + lat_ref[...])                             # (B, NSD)
    # all L per-layer style affines as ONE batched matmul over gathered codes
    codes = jnp.stack([flat[:, i * STYLE_DIM:(i + 1) * STYLE_DIM]
                       for i in STYLE_IDX])                           # (L, B, 512)
    styles = (jnp.einsum("lbk,lkc->lbc", codes.astype(jnp.bfloat16), aw_ref[...],
                         preferred_element_type=jnp.float32) + ab_ref[...])
    s_ref[...] = styles
    # hoisted demodulation: d[l] = rsqrt((s_l^2) @ (w_l^2) + eps); to_rgb rows unused.
    ssq = (styles * styles).astype(jnp.bfloat16)
    d_ref[...] = jax.lax.rsqrt(
        jnp.einsum("lbc,lcd->lbd", ssq, wsq_ref[...],
                   preferred_element_type=jnp.float32) + 1e-8)


def encode(x2d, enc, B):
    HW = IN_RES * IN_RES
    NSD = N_STYLES * STYLE_DIM
    kern = functools.partial(_encoder_kernel, B=B, HW=HW)
    return pl.pallas_call(
        kern,
        out_shape=[jax.ShapeDtypeStruct((L_LAYERS, B, GEN_CH), jnp.float32),
                   jax.ShapeDtypeStruct((L_LAYERS, B, GEN_CH), jnp.float32)],
        grid=(1,),
        in_specs=[
            _fixed((B * HW, CIN_PAD)),
            _fixed((CIN_PAD, ENC_FEAT)),
            _fixed((1, ENC_FEAT)),
            _fixed((ENC_FEAT, NSD)),
            _fixed((1, NSD)),
            _fixed((1, NSD)),
            _fixed((L_LAYERS, STYLE_DIM, GEN_CH)),
            _fixed((L_LAYERS, 1, GEN_CH)),
            _fixed((L_LAYERS, GEN_CH, GEN_CH)),
        ],
        out_specs=[_fixed((L_LAYERS, B, GEN_CH)),
                   _fixed((L_LAYERS, B, GEN_CH))],
        compiler_params=pltpu.CompilerParams(dimension_semantics=("arbitrary",)),
    )(x2d, enc["w1"], enc["b1"], enc["w2"], enc["b2"], enc["lat"],
      enc["aw"], enc["ab"], enc["wsq"])


# -------- kernel 2: fully fused decoder (head + all blocks + face pool) -------
def _decoder_kernel(st_ref, dm_ref, const_ref, wf_ref, bf_ref, wr_ref, br_ref,
                    *rest, B, n_up, pool):
    if pool:
        *u_refs, p_ref, out_ref = rest
    else:
        *u_refs, out_ref = rest

    def feat_layer(x, li, fi):
        return _modconv(x, st_ref[li], wf_ref[fi], bf_ref[fi], d=dm_ref[li], act=True)

    def rgb_layer(x, li, ri):
        return _modconv(x, st_ref[li], wr_ref[ri], br_ref[ri], d=None, act=False)

    # head: conv1 + to_rgb1 at 4x4 on the broadcast constant input
    x = jnp.broadcast_to(const_ref[...][None], (B,) + const_ref.shape)    # (B, 16, C)
    feat = feat_layer(x, 0, 0)
    rgb = rgb_layer(feat, 1, 0)                                           # lane-dense slab
    # resolution blocks — everything stays resident in VMEM / vregs, no HBM roundtrips
    li, fi, ri = 2, 1, 1
    for bi in range(n_up):
        u = u_refs[bi][...]
        feat = _spmat(u, feat)                       # nearest-2x upsample (bf16 matmul)
        rgb = _spmat(u, rgb)                         # rgb skip upsample
        feat = feat_layer(feat, li, fi)              # conv_up
        feat = feat_layer(feat, li + 1, fi + 1)      # conv
        rgb = rgb + rgb_layer(feat, li + 2, ri)      # to_rgb + skip add
        li, fi, ri = li + 3, fi + 2, ri + 1
    if pool:
        rgb = _spmat(p_ref[...], rgb)                # fused face_pool epilogue
    out_ref[...] = rgb
    # TODO(synk): real model needs an HW-tiled "parallel" grid axis here (tile sized for
    #             v7x's 64 MiB VMEM, ~half the v5e/v6e tile) instead of whole-map VMEM residency.


def decode(styles, dmod, dec, B, resize):
    assert dec["umats"][0].shape == (B * 64, B * 16), "params were built for a different batch"
    args = [styles, dmod, dec["const"], dec["wf"], dec["bf"], dec["wr"], dec["br"],
            *dec["umats"]]
    if resize:
        args.append(dec["pool"])
    side = POOL_OUT if resize else OUTPUT_SIZE
    kern = functools.partial(_decoder_kernel, B=B, n_up=N_UP, pool=resize)
    return pl.pallas_call(
        kern,
        out_shape=jax.ShapeDtypeStruct((B, side * side, RGB_PAD), jnp.float32),
        grid=(1,),
        in_specs=[_fixed(a.shape) for a in args],
        out_specs=_fixed((B, side * side, RGB_PAD)),
        compiler_params=pltpu.CompilerParams(dimension_semantics=("arbitrary",)),
    )(*args)


# ----------------------------- public forward --------------------------------
@functools.partial(jax.jit, static_argnames=("resize",))
def e4e_forward(x_nchw, params, resize=True):
    # Default forward path of e4e.forward: input_code=False, latent=None,
    # latent_mask=None, return_latents=False.
    # TODO(synk): latent_mask / inject_latent / alpha mixing branch not implemented.
    B, C, H, W = x_nchw.shape
    x = jnp.transpose(x_nchw, (0, 2, 3, 1)).astype(jnp.float32).reshape(B, H * W, C)
    x = jnp.pad(x, ((0, 0), (0, 0), (0, CIN_PAD - C))).reshape(B * H * W, CIN_PAD)
    styles, dmod = encode(x, params["enc"], B)              # (L, B, C) styles + demod
    rgb = decode(styles, dmod, params["dec"], B, resize)    # lane-dense (B, P, 128) slab
    side = POOL_OUT if resize else OUTPUT_SIZE
    img = rgb[:, :, :3].reshape(B, side, side, 3)           # slice the 3 real channels once
    return jnp.transpose(img, (0, 3, 1, 2))                 # back to NCHW


# ----------------------------- deterministic init ----------------------------
def prepare_params(key):
    ks = jax.random.split(key, 64)
    ki = iter(range(len(ks)))

    def nrm(shape, scale=1.0):
        return scale * jax.random.normal(ks[next(ki)], shape, jnp.float32)

    NSD = N_STYLES * STYLE_DIM
    # encoder stem (synthetic stand-in for the IR-SE50 / ResNet backbone)
    w1 = jnp.pad(nrm((IN_NC, ENC_FEAT), 0.1), ((0, CIN_PAD - IN_NC), (0, 0)))
    enc = {
        "w1": w1.astype(jnp.bfloat16),
        "b1": jnp.zeros((1, ENC_FEAT), jnp.float32),
        "w2": nrm((ENC_FEAT, NSD), 0.02).astype(jnp.bfloat16),
        "b2": jnp.zeros((1, NSD), jnp.float32),
        "lat": nrm((1, NSD), 0.1),                          # latent_avg
    }

    def modlayer(cin, cout, pad_to=None):
        w = nrm((cin, cout)) / math.sqrt(cin)
        b = jnp.zeros((1, cout), jnp.float32)
        if pad_to is not None:
            w = jnp.pad(w, ((0, 0), (0, pad_to - cout)))
            b = jnp.pad(b, ((0, 0), (0, pad_to - cout)))
        return {
            "w": w, "b": b,
            "aw": nrm((STYLE_DIM, cin), 0.02),
            "ab": jnp.ones((1, cin), jnp.float32),          # StyleGAN2 modulation bias init = 1
        }

    conv1 = modlayer(GEN_CH, GEN_CH)
    to_rgb1 = modlayer(GEN_CH, 3, pad_to=RGB_PAD)
    layers = [conv1, to_rgb1]
    feat_layers = [conv1]
    rgb_layers = [to_rgb1]
    for _ in range(N_UP):
        up = modlayer(GEN_CH, GEN_CH)
        cv = modlayer(GEN_CH, GEN_CH)
        rg = modlayer(GEN_CH, 3, pad_to=RGB_PAD)
        layers += [up, cv, rg]
        feat_layers += [up, cv]
        rgb_layers += [rg]

    # hoisted style-affine weights + squared conv weights (for hoisted demod), all L layers
    enc["aw"] = jnp.stack([l["aw"] for l in layers]).astype(jnp.bfloat16)    # (L, 512, GEN_CH)
    enc["ab"] = jnp.stack([l["ab"] for l in layers])                         # (L, 1, GEN_CH)
    enc["wsq"] = jnp.stack([l["w"] * l["w"] for l in layers]).astype(jnp.bfloat16)  # (L, C, C)

    # precomputed batch-block-diagonal spatial matrices (bf16: 0/1 and 1/4 are exact)
    eye_b = jnp.eye(BATCH, dtype=jnp.float32)
    umats = []
    size = 4
    for _ in range(N_UP):
        u = nearest_upsample_matrix(size, size)
        umats.append(jnp.kron(eye_b, u).astype(jnp.bfloat16))
        size *= 2
    pool = jnp.kron(eye_b, avgpool_matrix(size, size, POOL_OUT, POOL_OUT)).astype(jnp.bfloat16)

    dec = {
        "const": nrm((4 * 4, GEN_CH)),                      # constant 4x4 input, flattened
        "wf": jnp.stack([l["w"] for l in feat_layers]).astype(jnp.bfloat16),   # (NF, C, C)
        "bf": jnp.stack([l["b"] for l in feat_layers]),                        # (NF, 1, C)
        "wr": jnp.stack([l["w"] for l in rgb_layers]).astype(jnp.bfloat16),    # (NR, C, RGB_PAD)
        "br": jnp.stack([l["b"] for l in rgb_layers]),                         # (NR, 1, RGB_PAD)
        "umats": tuple(umats),
        "pool": pool,
    }
    return {"enc": enc, "dec": dec}


if __name__ == "__main__":
    key = jax.random.PRNGKey(0)
    pkey, xkey = jax.random.split(key)
    params = prepare_params(pkey)
    x = jax.random.normal(xkey, (BATCH, IN_NC, IN_RES, IN_RES), jnp.float32)  # NCHW like PyTorch
    out = e4e_forward(x, params)
    out = jax.block_until_ready(out)
    assert out.shape == (BATCH, 3, POOL_OUT, POOL_OUT), out.shape
    assert bool(jnp.all(jnp.isfinite(out)))
    print("KERNEL_OK")
</pallas_src>

<mosaic_0001>
module attributes {stable_mosaic.version = 11 : i64} {
  func.func @_encoder_kernel(%arg0: i32, %arg1: memref<512x8xf32, #tpu.memory_space<vmem>>, %arg2: memref<8x128xbf16, #tpu.memory_space<vmem>>, %arg3: memref<1x128xf32, #tpu.memory_space<vmem>>, %arg4: memref<128x3072xbf16, #tpu.memory_space<vmem>>, %arg5: memref<1x3072xf32, #tpu.memory_space<vmem>>, %arg6: memref<1x3072xf32, #tpu.memory_space<vmem>>, %arg7: memref<8x512x128xbf16, #tpu.memory_space<vmem>>, %arg8: memref<8x1x128xf32, #tpu.memory_space<vmem>>, %arg9: memref<8x128x128xbf16, #tpu.memory_space<vmem>>, %arg10: memref<8x2x128xf32, #tpu.memory_space<vmem>>, %arg11: memref<8x2x128xf32, #tpu.memory_space<vmem>>) attributes {dimension_semantics = [#tpu.dimension_semantics<arbitrary>], iteration_bounds = array<i64: 1>, scalar_prefetch = 0 : i64, scratch_operands = 0 : i64, tpu.core_type = #tpu.core_type<tc>, window_params = [{pipeline_mode = #tpu.pipeline_mode<synchronous>, transform_indices = @transform_0, window_bounds = array<i64: 512, 8>}, {pipeline_mode = #tpu.pipeline_mode<synchronous>, transform_indices = @transform_1, window_bounds = array<i64: 8, 128>}, {pipeline_mode = #tpu.pipeline_mode<synchronous>, transform_indices = @transform_2, window_bounds = array<i64: 1, 128>}, {pipeline_mode = #tpu.pipeline_mode<synchronous>, transform_indices = @transform_3, window_bounds = array<i64: 128, 3072>}, {pipeline_mode = #tpu.pipeline_mode<synchronous>, transform_indices = @transform_4, window_bounds = array<i64: 1, 3072>}, {pipeline_mode = #tpu.pipeline_mode<synchronous>, transform_indices = @transform_5, window_bounds = array<i64: 1, 3072>}, {pipeline_mode = #tpu.pipeline_mode<synchronous>, transform_indices = @transform_6, window_bounds = array<i64: 8, 512, 128>}, {pipeline_mode = #tpu.pipeline_mode<synchronous>, transform_indices = @transform_7, window_bounds = array<i64: 8, 1, 128>}, {pipeline_mode = #tpu.pipeline_mode<synchronous>, transform_indices = @transform_8, window_bounds = array<i64: 8, 128, 128>}, {pipeline_mode = #tpu.pipeline_mode<synchronous>, transform_indices = @transform_9, window_bounds = array<i64: 8, 2, 128>}, {pipeline_mode = #tpu.pipeline_mode<synchronous>, transform_indices = @transform_10, window_bounds = array<i64: 8, 2, 128>}]} {
    %c0 = arith.constant 0 : index
    %c0_0 = arith.constant 0 : index
    %0 = vector.load %arg1[%c0, %c0_0] : memref<512x8xf32, #tpu.memory_space<vmem>>, vector<512x8xf32>
    %1 = arith.truncf %0 : vector<512x8xf32> to vector<512x8xbf16>
    %c0_1 = arith.constant 0 : index
    %c0_2 = arith.constant 0 : index
    %2 = vector.load %arg2[%c0_1, %c0_2] : memref<8x128xbf16, #tpu.memory_space<vmem>>, vector<8x128xbf16>
    %cst = arith.constant dense<0.000000e+00> : vector<512x128xf32>
    %3 = tpu.matmul %1, %2, %cst {dimension_numbers = #tpu.dot_dimension_numbers<[1], [0], [0], [1], [0, 0, 1, 1], [], []>} : vector<512x8xbf16>, vector<8x128xbf16>, vector<512x128xf32> -> vector<512x128xf32>
    %c0_3 = arith.constant 0 : index
    %c0_4 = arith.constant 0 : index
    %4 = vector.load %arg3[%c0_3, %c0_4] : memref<1x128xf32, #tpu.memory_space<vmem>>, vector<1x128xf32>
    %5 = vector.broadcast %4 : vector<1x128xf32> to vector<512x128xf32>
    %6 = arith.addf %3, %5 : vector<512x128xf32>
    %cst_5 = arith.constant 0.000000e+00 : f32
    %7 = vector.broadcast %cst_5 : f32 to vector<512x128xf32>
    %8 = arith.maximumf %6, %7 : vector<512x128xf32>
    %9 = vector.shape_cast %8 : vector<512x128xf32> to vector<2x256x128xf32>
    %cst_6 = arith.constant dense<0.000000e+00> : vector<2x128xf32>
    %10 = vector.multi_reduction <add>, %9, %cst_6 [1] : vector<2x256x128xf32> to vector<2x128xf32>
    %cst_7 = arith.constant 2.560000e+02 : f32
    %11 = vector.broadcast %cst_7 : f32 to vector<2x128xf32>
    %12 = arith.divf %10, %11 : vector<2x128xf32>
    %13 = arith.truncf %12 : vector<2x128xf32> to vector<2x128xbf16>
    %c0_8 = arith.constant 0 : index
    %c0_9 = arith.constant 0 : index
    %14 = vector.load %arg4[%c0_8, %c0_9] : memref<128x3072xbf16, #tpu.memory_space<vmem>>, vector<128x3072xbf16>
    %cst_10 = arith.constant dense<0.000000e+00> : vector<2x3072xf32>
    %15 = tpu.matmul %13, %14, %cst_10 {dimension_numbers = #tpu.dot_dimension_numbers<[1], [0], [0], [1], [0, 0, 1, 1], [], []>} : vector<2x128xbf16>, vector<128x3072xbf16>, vector<2x3072xf32> -> vector<2x3072xf32>
    %c0_11 = arith.constant 0 : index
    %c0_12 = arith.constant 0 : index
    %16 = vector.load %arg5[%c0_11, %c0_12] : memref<1x3072xf32, #tpu.memory_space<vmem>>, vector<1x3072xf32>
    %17 = vector.broadcast %16 : vector<1x3072xf32> to vector<2x3072xf32>
    %18 = arith.addf %15, %17 : vector<2x3072xf32>
    %c0_13 = arith.constant 0 : index
    %c0_14 = arith.constant 0 : index
    %19 = vector.load %arg6[%c0_13, %c0_14] : memref<1x3072xf32, #tpu.memory_space<vmem>>, vector<1x3072xf32>
    %20 = vector.broadcast %19 : vector<1x3072xf32> to vector<2x3072xf32>
    %21 = arith.addf %18, %20 : vector<2x3072xf32>
    %22 = vector.extract_strided_slice %21 {offsets = [0, 0], sizes = [2, 512], strides = [1, 1]} : vector<2x3072xf32> to vector<2x512xf32>
    %23 = vector.extract_strided_slice %21 {offsets = [0, 512], sizes = [2, 512], strides = [1, 1]} : vector<2x3072xf32> to vector<2x512xf32>
    %24 = vector.extract_strided_slice %21 {offsets = [0, 512], sizes = [2, 512], strides = [1, 1]} : vector<2x3072xf32> to vector<2x512xf32>
    %25 = vector.extract_strided_slice %21 {offsets = [0, 1024], sizes = [2, 512], strides = [1, 1]} : vector<2x3072xf32> to vector<2x512xf32>
    %26 = vector.extract_strided_slice %21 {offsets = [0, 1536], sizes = [2, 512], strides = [1, 1]} : vector<2x3072xf32> to vector<2x512xf32>
    %27 = vector.extract_strided_slice %21 {offsets = [0, 1536], sizes = [2, 512], strides = [1, 1]} : vector<2x3072xf32> to vector<2x512xf32>
    %28 = vector.extract_strided_slice %21 {offsets = [0, 2048], sizes = [2, 512], strides = [1, 1]} : vector<2x3072xf32> to vector<2x512xf32>
    %29 = vector.extract_strided_slice %21 {offsets = [0, 2560], sizes = [2, 512], strides = [1, 1]} : vector<2x3072xf32> to vector<2x512xf32>
    %30 = vector.shape_cast %22 : vector<2x512xf32> to vector<1x2x512xf32>
    %31 = vector.shape_cast %23 : vector<2x512xf32> to vector<1x2x512xf32>
    %32 = vector.shape_cast %24 : vector<2x512xf32> to vector<1x2x512xf32>
    %33 = vector.shape_cast %25 : vector<2x512xf32> to vector<1x2x512xf32>
    %34 = vector.shape_cast %26 : vector<2x512xf32> to vector<1x2x512xf32>
    %35 = vector.shape_cast %27 : vector<2x512xf32> to vector<1x2x512xf32>
    %36 = vector.shape_cast %28 : vector<2x512xf32> to vector<1x2x512xf32>
    %37 = vector.shape_cast %29 : vector<2x512xf32> to vector<1x2x512xf32>
    %38 = tpu.concatenate %30, %31, %32, %33, %34, %35, %36, %37 in 0 : vector<1x2x512xf32>, vector<1x2x512xf32>, vector<1x2x512xf32>, vector<1x2x512xf32>, vector<1x2x512xf32>, vector<1x2x512xf32>, vector<1x2x512xf32>, vector<1x2x512xf32> -> vector<8x2x512xf32>
    %39 = arith.truncf %38 : vector<8x2x512xf32> to vector<8x2x512xbf16>
    %c0_15 = arith.constant 0 : index
    %c0_16 = arith.constant 0 : index
    %c0_17 = arith.constant 0 : index
    %40 = vector.load %arg7[%c0_15, %c0_16, %c0_17] : memref<8x512x128xbf16, #tpu.memory_space<vmem>>, vector<8x512x128xbf16>
    "tpu.trace_start"() <{level = 10 : i32, message = "lbk,lkc->lbc"}> : () -> ()
    %cst_18 = arith.constant dense<0.000000e+00> : vector<8x2x128xf32>
    %41 = tpu.matmul %39, %40, %cst_18 {dimension_numbers = #tpu.dot_dimension_numbers<[2], [1], [1], [2], [0, 0, 0, 1, 1, 2], [0], [0]>} : vector<8x2x512xbf16>, vector<8x512x128xbf16>, vector<8x2x128xf32> -> vector<8x2x128xf32>
    "tpu.trace_stop"() : () -> ()
    %c0_19 = arith.constant 0 : index
    %c0_20 = arith.constant 0 : index
    %c0_21 = arith.constant 0 : index
    %42 = vector.load %arg8[%c0_19, %c0_20, %c0_21] : memref<8x1x128xf32, #tpu.memory_space<vmem>>, vector<8x1x128xf32>
    %43 = vector.broadcast %42 : vector<8x1x128xf32> to vector<8x2x128xf32>
    %44 = arith.addf %41, %43 : vector<8x2x128xf32>
    %c0_22 = arith.constant 0 : index
    %c0_23 = arith.constant 0 : index
    %c0_24 = arith.constant 0 : index
    %45 = vector.load %arg10[%c0_22, %c0_23, %c0_24] : memref<8x2x128xf32, #tpu.memory_space<vmem>>, vector<8x2x128xf32>
    tpu.vector_store %arg10[%c0_22, %c0_23, %c0_24], %44 {strides = array<i32>} : memref<8x2x128xf32, #tpu.memory_space<vmem>>, vector<8x2x128xf32>,
    %46 = arith.mulf %44, %44 : vector<8x2x128xf32>
    %47 = arith.truncf %46 : vector<8x2x128xf32> to vector<8x2x128xbf16>
    %c0_25 = arith.constant 0 : index
    %c0_26 = arith.constant 0 : index
    %c0_27 = arith.constant 0 : index
    %48 = vector.load %arg9[%c0_25, %c0_26, %c0_27] : memref<8x128x128xbf16, #tpu.memory_space<vmem>>, vector<8x128x128xbf16>
    "tpu.trace_start"() <{level = 10 : i32, message = "lbc,lcd->lbd"}> : () -> ()
    %cst_28 = arith.constant dense<0.000000e+00> : vector<8x2x128xf32>
    %49 = tpu.matmul %47, %48, %cst_28 {dimension_numbers = #tpu.dot_dimension_numbers<[2], [1], [1], [2], [0, 0, 0, 1, 1, 2], [0], [0]>} : vector<8x2x128xbf16>, vector<8x128x128xbf16>, vector<8x2x128xf32> -> vector<8x2x128xf32>
    "tpu.trace_stop"() : () -> ()
    %cst_29 = arith.constant 9.99999993E-9 : f32
    %50 = vector.broadcast %cst_29 : f32 to vector<8x2x128xf32>
    %51 = arith.addf %49, %50 : vector<8x2x128xf32>
    %52 = math.rsqrt %51 : vector<8x2x128xf32>
    %c0_30 = arith.constant 0 : index
    %c0_31 = arith.constant 0 : index
    %c0_32 = arith.constant 0 : index
    %53 = vector.load %arg11[%c0_30, %c0_31, %c0_32] : memref<8x2x128xf32, #tpu.memory_space<vmem>>, vector<8x2x128xf32>
    tpu.vector_store %arg11[%c0_30, %c0_31, %c0_32], %52 {strides = array<i32>} : memref<8x2x128xf32, #tpu.memory_space<vmem>>, vector<8x2x128xf32>,
    return
  }
  func.func @transform_0(%arg0: i32) -> (i32, i32) {
    %c0_i32 = arith.constant 0 : i32
    %c0_i32_0 = arith.constant 0 : i32
    %c0_i32_1 = arith.constant 0 : i32
    return %c0_i32, %c0_i32_0 : i32, i32
  }
  func.func @transform_1(%arg0: i32) -> (i32, i32) {
    %c0_i32 = arith.constant 0 : i32
    %c0_i32_0 = arith.constant 0 : i32
    %c0_i32_1 = arith.constant 0 : i32
    return %c0_i32, %c0_i32_0 : i32, i32
  }
  func.func @transform_2(%arg0: i32) -> (i32, i32) {
    %c0_i32 = arith.constant 0 : i32
    %c0_i32_0 = arith.constant 0 : i32
    %c0_i32_1 = arith.constant 0 : i32
    return %c0_i32, %c0_i32_0 : i32, i32
  }
  func.func @transform_3(%arg0: i32) -> (i32, i32) {
    %c0_i32 = arith.constant 0 : i32
    %c0_i32_0 = arith.constant 0 : i32
    %c0_i32_1 = arith.constant 0 : i32
    return %c0_i32, %c0_i32_0 : i32, i32
  }
  func.func @transform_4(%arg0: i32) -> (i32, i32) {
    %c0_i32 = arith.constant 0 : i32
    %c0_i32_0 = arith.constant 0 : i32
    %c0_i32_1 = arith.constant 0 : i32
    return %c0_i32, %c0_i32_0 : i32, i32
  }
  func.func @transform_5(%arg0: i32) -> (i32, i32) {
    %c0_i32 = arith.constant 0 : i32
    %c0_i32_0 = arith.constant 0 : i32
    %c0_i32_1 = arith.constant 0 : i32
    return %c0_i32, %c0_i32_0 : i32, i32
  }
  func.func @transform_6(%arg0: i32) -> (i32, i32, i32) {
    %c0_i32 = arith.constant 0 : i32
    %c0_i32_0 = arith.constant 0 : i32
    %c0_i32_1 = arith.constant 0 : i32
    %c0_i32_2 = arith.constant 0 : i32
    return %c0_i32, %c0_i32_0, %c0_i32_1 : i32, i32, i32
  }
  func.func @transform_7(%arg0: i32) -> (i32, i32, i32) {
    %c0_i32 = arith.constant 0 : i32
    %c0_i32_0 = arith.constant 0 : i32
    %c0_i32_1 = arith.constant 0 : i32
    %c0_i32_2 = arith.constant 0 : i32
    return %c0_i32, %c0_i32_0, %c0_i32_1 : i32, i32, i32
  }
  func.func @transform_8(%arg0: i32) -> (i32, i32, i32) {
    %c0_i32 = arith.constant 0 : i32
    %c0_i32_0 = arith.constant 0 : i32
    %c0_i32_1 = arith.constant 0 : i32
    %c0_i32_2 = arith.constant 0 : i32
    return %c0_i32, %c0_i32_0, %c0_i32_1 : i32, i32, i32
  }
  func.func @transform_9(%arg0: i32) -> (i32, i32, i32) {
    %c0_i32 = arith.constant 0 : i32
    %c0_i32_0 = arith.constant 0 : i32
    %c0_i32_1 = arith.constant 0 : i32
    %c0_i32_2 = arith.constant 0 : i32
    return %c0_i32, %c0_i32_0, %c0_i32_1 : i32, i32, i32
  }
  func.func @transform_10(%arg0: i32) -> (i32, i32, i32) {
    %c0_i32 = arith.constant 0 : i32
    %c0_i32_0 = arith.constant 0 : i32
    %c0_i32_1 = arith.constant 0 : i32
    %c0_i32_2 = arith.constant 0 : i32
    return %c0_i32, %c0_i32_0, %c0_i32_1 : i32, i32, i32
  }
}

module attributes {stable_mosaic.version = 11 : i64} {
  func.func @_decoder_kernel(%arg0: i32, %arg1: memref<8x2x128xf32, #tpu.memory_space<vmem>>, %arg2: memref<8x2x128xf32, #tpu.memory_space<vmem>>, %arg3: memref<16x128xf32, #tpu.memory_space<vmem>>, %arg4: memref<5x128x128xbf16, #tpu.memory_space<vmem>>, %arg5: memref<5x1x128xf32, #tpu.memory_space<vmem>>, %arg6: memref<3x128x128xbf16, #tpu.memory_space<vmem>>, %arg7: memref<3x1x128xf32, #tpu.memory_space<vmem>>, %arg8: memref<128x32xbf16, #tpu.memory_space<vmem>>, %arg9: memref<512x128xbf16, #tpu.memory_space<vmem>>, %arg10: memref<128x512xbf16, #tpu.memory_space<vmem>>, %arg11: memref<2x64x128xf32, #tpu.memory_space<vmem>>) attributes {dimension_semantics = [#tpu.dimension_semantics<arbitrary>], iteration_bounds = array<i64: 1>, scalar_prefetch = 0 : i64, scratch_operands = 0 : i64, tpu.core_type = #tpu.core_type<tc>, window_params = [{pipeline_mode = #tpu.pipeline_mode<synchronous>, transform_indices = @transform_0, window_bounds = array<i64: 8, 2, 128>}, {pipeline_mode = #tpu.pipeline_mode<synchronous>, transform_indices = @transform_1, window_bounds = array<i64: 8, 2, 128>}, {pipeline_mode = #tpu.pipeline_mode<synchronous>, transform_indices = @transform_2, window_bounds = array<i64: 16, 128>}, {pipeline_mode = #tpu.pipeline_mode<synchronous>, transform_indices = @transform_3, window_bounds = array<i64: 5, 128, 128>}, {pipeline_mode = #tpu.pipeline_mode<synchronous>, transform_indices = @transform_4, window_bounds = array<i64: 5, 1, 128>}, {pipeline_mode = #tpu.pipeline_mode<synchronous>, transform_indices = @transform_5, window_bounds = array<i64: 3, 128, 128>}, {pipeline_mode = #tpu.pipeline_mode<synchronous>, transform_indices = @transform_6, window_bounds = array<i64: 3, 1, 128>}, {pipeline_mode = #tpu.pipeline_mode<synchronous>, transform_indices = @transform_7, window_bounds = array<i64: 128, 32>}, {pipeline_mode = #tpu.pipeline_mode<synchronous>, transform_indices = @transform_8, window_bounds = array<i64: 512, 128>}, {pipeline_mode = #tpu.pipeline_mode<synchronous>, transform_indices = @transform_9, window_bounds = array<i64: 128, 512>}, {pipeline_mode = #tpu.pipeline_mode<synchronous>, transform_indices = @transform_10, window_bounds = array<i64: 2, 64, 128>}]} {
    %c0 = arith.constant 0 : index
    %c0_0 = arith.constant 0 : index
    %0 = vector.load %arg3[%c0, %c0_0] : memref<16x128xf32, #tpu.memory_space<vmem>>, vector<16x128xf32>
    %1 = vector.shape_cast %0 : vector<16x128xf32> to vector<1x16x128xf32>
    %2 = vector.shape_cast %1 : vector<1x16x128xf32> to vector<1x16x128xf32>
    %3 = vector.broadcast %2 : vector<1x16x128xf32> to vector<2x16x128xf32>
    %c0_1 = arith.constant 0 : index
    %c0_2 = arith.constant 0 : index
    %c0_3 = arith.constant 0 : index
    %4 = vector.load %arg1[%c0_1, %c0_2, %c0_3] : memref<8x2x128xf32, #tpu.memory_space<vmem>>, vector<1x2x128xf32>
    %5 = vector.shape_cast %4 : vector<1x2x128xf32> to vector<2x128xf32>
    %c0_4 = arith.constant 0 : index
    %c0_5 = arith.constant 0 : index
    %c0_6 = arith.constant 0 : index
    %6 = vector.load %arg4[%c0_4, %c0_5, %c0_6] : memref<5x128x128xbf16, #tpu.memory_space<vmem>>, vector<1x128x128xbf16>
    %7 = vector.shape_cast %6 : vector<1x128x128xbf16> to vector<128x128xbf16>
    %c0_7 = arith.constant 0 : index
    %c0_8 = arith.constant 0 : index
    %c0_9 = arith.constant 0 : index
    %8 = vector.load %arg5[%c0_7, %c0_8, %c0_9] : memref<5x1x128xf32, #tpu.memory_space<vmem>>, vector<1x1x128xf32>
    %9 = vector.shape_cast %8 : vector<1x1x128xf32> to vector<1x128xf32>
    %c0_10 = arith.constant 0 : index
    %c0_11 = arith.constant 0 : index
    %c0_12 = arith.constant 0 : index
    %10 = vector.load %arg2[%c0_10, %c0_11, %c0_12] : memref<8x2x128xf32, #tpu.memory_space<vmem>>, vector<1x2x128xf32>
    %11 = vector.shape_cast %10 : vector<1x2x128xf32> to vector<2x128xf32>
    %12 = vector.shape_cast %5 : vector<2x128xf32> to vector<2x1x128xf32>
    %13 = vector.broadcast %12 : vector<2x1x128xf32> to vector<2x16x128xf32>
    %14 = arith.mulf %3, %13 : vector<2x16x128xf32>
    %15 = vector.shape_cast %14 : vector<2x16x128xf32> to vector<32x128xf32>
    %16 = arith.truncf %15 : vector<32x128xf32> to vector<32x128xbf16>
    %cst = arith.constant dense<0.000000e+00> : vector<32x128xf32>
    %17 = tpu.matmul %16, %7, %cst {dimension_numbers = #tpu.dot_dimension_numbers<[1], [0], [0], [1], [0, 0, 1, 1], [], []>} : vector<32x128xbf16>, vector<128x128xbf16>, vector<32x128xf32> -> vector<32x128xf32>
    %18 = vector.shape_cast %17 : vector<32x128xf32> to vector<2x16x128xf32>
    %19 = vector.shape_cast %11 : vector<2x128xf32> to vector<2x1x128xf32>
    %20 = vector.broadcast %19 : vector<2x1x128xf32> to vector<2x16x128xf32>
    %21 = arith.mulf %18, %20 : vector<2x16x128xf32>
    %22 = vector.shape_cast %9 : vector<1x128xf32> to vector<1x1x128xf32>
    %23 = vector.broadcast %22 : vector<1x1x128xf32> to vector<2x16x128xf32>
    %24 = arith.addf %21, %23 : vector<2x16x128xf32>
    %cst_13 = arith.constant 0.000000e+00 : f32
    %25 = vector.broadcast %cst_13 : f32 to vector<2x16x128xf32>
    %26 = arith.cmpf oge, %24, %25 : vector<2x16x128xf32>
    %cst_14 = arith.constant 2.000000e-01 : f32
    %27 = vector.broadcast %cst_14 : f32 to vector<2x16x128xf32>
    %28 = arith.mulf %27, %24 : vector<2x16x128xf32>
    %29 = arith.select %26, %24, %28 : vector<2x16x128xi1>, vector<2x16x128xf32>
    %cst_15 = arith.constant 1.41421354 : f32
    %30 = vector.broadcast %cst_15 : f32 to vector<2x16x128xf32>
    %31 = arith.mulf %29, %30 : vector<2x16x128xf32>
    %c1 = arith.constant 1 : index
    %c0_16 = arith.constant 0 : index
    %c0_17 = arith.constant 0 : index
    %32 = vector.load %arg1[%c1, %c0_16, %c0_17] : memref<8x2x128xf32, #tpu.memory_space<vmem>>, vector<1x2x128xf32>
    %33 = vector.shape_cast %32 : vector<1x2x128xf32> to vector<2x128xf32>
    %c0_18 = arith.constant 0 : index
    %c0_19 = arith.constant 0 : index
    %c0_20 = arith.constant 0 : index
    %34 = vector.load %arg6[%c0_18, %c0_19, %c0_20] : memref<3x128x128xbf16, #tpu.memory_space<vmem>>, vector<1x128x128xbf16>
    %35 = vector.shape_cast %34 : vector<1x128x128xbf16> to vector<128x128xbf16>
    %c0_21 = arith.constant 0 : index
    %c0_22 = arith.constant 0 : index
    %c0_23 = arith.constant 0 : index
    %36 = vector.load %arg7[%c0_21, %c0_22, %c0_23] : memref<3x1x128xf32, #tpu.memory_space<vmem>>, vector<1x1x128xf32>
    %37 = vector.shape_cast %36 : vector<1x1x128xf32> to vector<1x128xf32>
    %38 = vector.shape_cast %33 : vector<2x128xf32> to vector<2x1x128xf32>
    %39 = vector.broadcast %38 : vector<2x1x128xf32> to vector<2x16x128xf32>
    %40 = arith.mulf %31, %39 : vector<2x16x128xf32>
    %41 = vector.shape_cast %40 : vector<2x16x128xf32> to vector<32x128xf32>
    %42 = arith.truncf %41 : vector<32x128xf32> to vector<32x128xbf16>
    %cst_24 = arith.constant dense<0.000000e+00> : vector<32x128xf32>
    %43 = tpu.matmul %42, %35, %cst_24 {dimension_numbers = #tpu.dot_dimension_numbers<[1], [0], [0], [1], [0, 0, 1, 1], [], []>} : vector<32x128xbf16>, vector<128x128xbf16>, vector<32x128xf32> -> vector<32x128xf32>
    %44 = vector.shape_cast %43 : vector<32x128xf32> to vector<2x16x128xf32>
    %45 = vector.shape_cast %37 : vector<1x128xf32> to vector<1x1x128xf32>
    %46 = vector.broadcast %45 : vector<1x1x128xf32> to vector<2x16x128xf32>
    %47 = arith.addf %44, %46 : vector<2x16x128xf32>
    %c0_25 = arith.constant 0 : index
    %c0_26 = arith.constant 0 : index
    %48 = vector.load %arg8[%c0_25, %c0_26] : memref<128x32xbf16, #tpu.memory_space<vmem>>, vector<128x32xbf16>
    %49 = vector.shape_cast %31 : vector<2x16x128xf32> to vector<32x128xf32>
    %50 = arith.truncf %49 : vector<32x128xf32> to vector<32x128xbf16>
    %cst_27 = arith.constant dense<0.000000e+00> : vector<128x128xf32>
    %51 = tpu.matmul %48, %50, %cst_27 {dimension_numbers = #tpu.dot_dimension_numbers<[1], [0], [0], [1], [0, 0, 1, 1], [], []>} : vector<128x32xbf16>, vector<32x128xbf16>, vector<128x128xf32> -> vector<128x128xf32>
    %52 = vector.shape_cast %51 : vector<128x128xf32> to vector<2x64x128xf32>
    %53 = vector.shape_cast %47 : vector<2x16x128xf32> to vector<32x128xf32>
    %54 = arith.truncf %53 : vector<32x128xf32> to vector<32x128xbf16>
    %cst_28 = arith.constant dense<0.000000e+00> : vector<128x128xf32>
    %55 = tpu.matmul %48, %54, %cst_28 {dimension_numbers = #tpu.dot_dimension_numbers<[1], [0], [0], [1], [0, 0, 1, 1], [], []>} : vector<128x32xbf16>, vector<32x128xbf16>, vector<128x128xf32> -> vector<128x128xf32>
    %56 = vector.shape_cast %55 : vector<128x128xf32> to vector<2x64x128xf32>
    %c2 = arith.constant 2 : index
    %c0_29 = arith.constant 0 : index
    %c0_30 = arith.constant 0 : index
    %57 = vector.load %arg1[%c2, %c0_29, %c0_30] : memref<8x2x128xf32, #tpu.memory_space<vmem>>, vector<1x2x128xf32>
    %58 = vector.shape_cast %57 : vector<1x2x128xf32> to vector<2x128xf32>
    %c1_31 = arith.constant 1 : index
    %c0_32 = arith.constant 0 : index
    %c0_33 = arith.constant 0 : index
    %59 = vector.load %arg4[%c1_31, %c0_32, %c0_33] : memref<5x128x128xbf16, #tpu.memory_space<vmem>>, vector<1x128x128xbf16>
    %60 = vector.shape_cast %59 : vector<1x128x128xbf16> to vector<128x128xbf16>
    %c1_34 = arith.constant 1 : index
    %c0_35 = arith.constant 0 : index
    %c0_36 = arith.constant 0 : index
    %61 = vector.load %arg5[%c1_34, %c0_35, %c0_36] : memref<5x1x128xf32, #tpu.memory_space<vmem>>, vector<1x1x128xf32>
    %62 = vector.shape_cast %61 : vector<1x1x128xf32> to vector<1x128xf32>
    %c2_37 = arith.constant 2 : index
    %c0_38 = arith.constant 0 : index
    %c0_39 = arith.constant 0 : index
    %63 = vector.load %arg2[%c2_37, %c0_38, %c0_39] : memref<8x2x128xf32, #tpu.memory_space<vmem>>, vector<1x2x128xf32>
    %64 = vector.shape_cast %63 : vector<1x2x128xf32> to vector<2x128xf32>
    %65 = vector.shape_cast %58 : vector<2x128xf32> to vector<2x1x128xf32>
    %66 = vector.broadcast %65 : vector<2x1x128xf32> to vector<2x64x128xf32>
    %67 = arith.mulf %52, %66 : vector<2x64x128xf32>
    %68 = vector.shape_cast %67 : vector<2x64x128xf32> to vector<128x128xf32>
    %69 = arith.truncf %68 : vector<128x128xf32> to vector<128x128xbf16>
    %cst_40 = arith.constant dense<0.000000e+00> : vector<128x128xf32>
    %70 = tpu.matmul %69, %60, %cst_40 {dimension_numbers = #tpu.dot_dimension_numbers<[1], [0], [0], [1], [0, 0, 1, 1], [], []>} : vector<128x128xbf16>, vector<128x128xbf16>, vector<128x128xf32> -> vector<128x128xf32>
    %71 = vector.shape_cast %70 : vector<128x128xf32> to vector<2x64x128xf32>
    %72 = vector.shape_cast %64 : vector<2x128xf32> to vector<2x1x128xf32>
    %73 = vector.broadcast %72 : vector<2x1x128xf32> to vector<2x64x128xf32>
    %74 = arith.mulf %71, %73 : vector<2x64x128xf32>
    %75 = vector.shape_cast %62 : vector<1x128xf32> to vector<1x1x128xf32>
    %76 = vector.broadcast %75 : vector<1x1x128xf32> to vector<2x64x128xf32>
    %77 = arith.addf %74, %76 : vector<2x64x128xf32>
    %cst_41 = arith.constant 0.000000e+00 : f32
    %78 = vector.broadcast %cst_41 : f32 to vector<2x64x128xf32>
    %79 = arith.cmpf oge, %77, %78 : vector<2x64x128xf32>
    %cst_42 = arith.constant 2.000000e-01 : f32
    %80 = vector.broadcast %cst_42 : f32 to vector<2x64x128xf32>
    %81 = arith.mulf %80, %77 : vector<2x64x128xf32>
    %82 = arith.select %79, %77, %81 : vector<2x64x128xi1>, vector<2x64x128xf32>
    %cst_43 = arith.constant 1.41421354 : f32
    %83 = vector.broadcast %cst_43 : f32 to vector<2x64x128xf32>
    %84 = arith.mulf %82, %83 : vector<2x64x128xf32>
    %c3 = arith.constant 3 : index
    %c0_44 = arith.constant 0 : index
    %c0_45 = arith.constant 0 : index
    %85 = vector.load %arg1[%c3, %c0_44, %c0_45] : memref<8x2x128xf32, #tpu.memory_space<vmem>>, vector<1x2x128xf32>
    %86 = vector.shape_cast %85 : vector<1x2x128xf32> to vector<2x128xf32>
    %c2_46 = arith.constant 2 : index
    %c0_47 = arith.constant 0 : index
    %c0_48 = arith.constant 0 : index
    %87 = vector.load %arg4[%c2_46, %c0_47, %c0_48] : memref<5x128x128xbf16, #tpu.memory_space<vmem>>, vector<1x128x128xbf16>
    %88 = vector.shape_cast %87 : vector<1x128x128xbf16> to vector<128x128xbf16>
    %c2_49 = arith.constant 2 : index
    %c0_50 = arith.constant 0 : index
    %c0_51 = arith.constant 0 : index
    %89 = vector.load %arg5[%c2_49, %c0_50, %c0_51] : memref<5x1x128xf32, #tpu.memory_space<vmem>>, vector<1x1x128xf32>
    %90 = vector.shape_cast %89 : vector<1x1x128xf32> to vector<1x128xf32>
    %c3_52 = arith.constant 3 : index
    %c0_53 = arith.constant 0 : index
    %c0_54 = arith.constant 0 : index
    %91 = vector.load %arg2[%c3_52, %c0_53, %c0_54] : memref<8x2x128xf32, #tpu.memory_space<vmem>>, vector<1x2x128xf32>
    %92 = vector.shape_cast %91 : vector<1x2x128xf32> to vector<2x128xf32>
    %93 = vector.shape_cast %86 : vector<2x128xf32> to vector<2x1x128xf32>
    %94 = vector.broadcast %93 : vector<2x1x128xf32> to vector<2x64x128xf32>
    %95 = arith.mulf %84, %94 : vector<2x64x128xf32>
    %96 = vector.shape_cast %95 : vector<2x64x128xf32> to vector<128x128xf32>
    %97 = arith.truncf %96 : vector<128x128xf32> to vector<128x128xbf16>
    %cst_55 = arith.constant dense<0.000000e+00> : vector<128x128xf32>
    %98 = tpu.matmul %97, %88, %cst_55 {dimension_numbers = #tpu.dot_dimension_numbers<[1], [0], [0], [1], [0, 0, 1, 1], [], []>} : vector<128x128xbf16>, vector<128x128xbf16>, vector<128x128xf32> -> vector<128x128xf32>
    %99 = vector.shape_cast %98 : vector<128x128xf32> to vector<2x64x128xf32>
    %100 = vector.shape_cast %92 : vector<2x128xf32> to vector<2x1x128xf32>
    %101 = vector.broadcast %100 : vector<2x1x128xf32> to vector<2x64x128xf32>
    %102 = arith.mulf %99, %101 : vector<2x64x128xf32>
    %103 = vector.shape_cast %90 : vector<1x128xf32> to vector<1x1x128xf32>
    %104 = vector.broadcast %103 : vector<1x1x128xf32> to vector<2x64x128xf32>
    %105 = arith.addf %102, %104 : vector<2x64x128xf32>
    %cst_56 = arith.constant 0.000000e+00 : f32
    %106 = vector.broadcast %cst_56 : f32 to vector<2x64x128xf32>
    %107 = arith.cmpf oge, %105, %106 : vector<2x64x128xf32>
    %cst_57 = arith.constant 2.000000e-01 : f32
    %108 = vector.broadcast %cst_57 : f32 to vector<2x64x128xf32>
    %109 = arith.mulf %108, %105 : vector<2x64x128xf32>
    %110 = arith.select %107, %105, %109 : vector<2x64x128xi1>, vector<2x64x128xf32>
    %cst_58 = arith.constant 1.41421354 : f32
    %111 = vector.broadcast %cst_58 : f32 to vector<2x64x128xf32>
    %112 = arith.mulf %110, %111 : vector<2x64x128xf32>
    %c4 = arith.constant 4 : index
    %c0_59 = arith.constant 0 : index
    %c0_60 = arith.constant 0 : index
    %113 = vector.load %arg1[%c4, %c0_59, %c0_60] : memref<8x2x128xf32, #tpu.memory_space<vmem>>, vector<1x2x128xf32>
    %114 = vector.shape_cast %113 : vector<1x2x128xf32> to vector<2x128xf32>
    %c1_61 = arith.constant 1 : index
    %c0_62 = arith.constant 0 : index
    %c0_63 = arith.constant 0 : index
    %115 = vector.load %arg6[%c1_61, %c0_62, %c0_63] : memref<3x128x128xbf16, #tpu.memory_space<vmem>>, vector<1x128x128xbf16>
    %116 = vector.shape_cast %115 : vector<1x128x128xbf16> to vector<128x128xbf16>
    %c1_64 = arith.constant 1 : index
    %c0_65 = arith.constant 0 : index
    %c0_66 = arith.constant 0 : index
    %117 = vector.load %arg7[%c1_64, %c0_65, %c0_66] : memref<3x1x128xf32, #tpu.memory_space<vmem>>, vector<1x1x128xf32>
    %118 = vector.shape_cast %117 : vector<1x1x128xf32> to vector<1x128xf32>
    %119 = vector.shape_cast %114 : vector<2x128xf32> to vector<2x1x128xf32>
    %120 = vector.broadcast %119 : vector<2x1x128xf32> to vector<2x64x128xf32>
    %121 = arith.mulf %112, %120 : vector<2x64x128xf32>
    %122 = vector.shape_cast %121 : vector<2x64x128xf32> to vector<128x128xf32>
    %123 = arith.truncf %122 : vector<128x128xf32> to vector<128x128xbf16>
    %cst_67 = arith.constant dense<0.000000e+00> : vector<128x128xf32>
    %124 = tpu.matmul %123, %116, %cst_67 {dimension_numbers = #tpu.dot_dimension_numbers<[1], [0], [0], [1], [0, 0, 1, 1], [], []>} : vector<128x128xbf16>, vector<128x128xbf16>, vector<128x128xf32> -> vector<128x128xf32>
    %125 = vector.shape_cast %124 : vector<128x128xf32> to vector<2x64x128xf32>
    %126 = vector.shape_cast %118 : vector<1x128xf32> to vector<1x1x128xf32>
    %127 = vector.broadcast %126 : vector<1x1x128xf32> to vector<2x64x128xf32>
    %128 = arith.addf %125, %127 : vector<2x64x128xf32>
    %129 = arith.addf %56, %128 : vector<2x64x128xf32>
    %c0_68 = arith.constant 0 : index
    %c0_69 = arith.constant 0 : index
    %130 = vector.load %arg9[%c0_68, %c0_69] : memref<512x128xbf16, #tpu.memory_space<vmem>>, vector<512x128xbf16>
    %131 = vector.shape_cast %112 : vector<2x64x128xf32> to vector<128x128xf32>
    %132 = arith.truncf %131 : vector<128x128xf32> to vector<128x128xbf16>
    %cst_70 = arith.constant dense<0.000000e+00> : vector<512x128xf32>
    %133 = tpu.matmul %130, %132, %cst_70 {dimension_numbers = #tpu.dot_dimension_numbers<[1], [0], [0], [1], [0, 0, 1, 1], [], []>} : vector<512x128xbf16>, vector<128x128xbf16>, vector<512x128xf32> -> vector<512x128xf32>
    %134 = vector.shape_cast %133 : vector<512x128xf32> to vector<2x256x128xf32>
    %135 = vector.shape_cast %129 : vector<2x64x128xf32> to vector<128x128xf32>
    %136 = arith.truncf %135 : vector<128x128xf32> to vector<128x128xbf16>
    %cst_71 = arith.constant dense<0.000000e+00> : vector<512x128xf32>
    %137 = tpu.matmul %130, %136, %cst_71 {dimension_numbers = #tpu.dot_dimension_numbers<[1], [0], [0], [1], [0, 0, 1, 1], [], []>} : vector<512x128xbf16>, vector<128x128xbf16>, vector<512x128xf32> -> vector<512x128xf32>
    %138 = vector.shape_cast %137 : vector<512x128xf32> to vector<2x256x128xf32>
    %c5 = arith.constant 5 : index
    %c0_72 = arith.constant 0 : index
    %c0_73 = arith.constant 0 : index
    %139 = vector.load %arg1[%c5, %c0_72, %c0_73] : memref<8x2x128xf32, #tpu.memory_space<vmem>>, vector<1x2x128xf32>
    %140 = vector.shape_cast %139 : vector<1x2x128xf32> to vector<2x128xf32>
    %c3_74 = arith.constant 3 : index
    %c0_75 = arith.constant 0 : index
    %c0_76 = arith.constant 0 : index
    %141 = vector.load %arg4[%c3_74, %c0_75, %c0_76] : memref<5x128x128xbf16, #tpu.memory_space<vmem>>, vector<1x128x128xbf16>
    %142 = vector.shape_cast %141 : vector<1x128x128xbf16> to vector<128x128xbf16>
    %c3_77 = arith.constant 3 : index
    %c0_78 = arith.constant 0 : index
    %c0_79 = arith.constant 0 : index
    %143 = vector.load %arg5[%c3_77, %c0_78, %c0_79] : memref<5x1x128xf32, #tpu.memory_space<vmem>>, vector<1x1x128xf32>
    %144 = vector.shape_cast %143 : vector<1x1x128xf32> to vector<1x128xf32>
    %c5_80 = arith.constant 5 : index
    %c0_81 = arith.constant 0 : index
    %c0_82 = arith.constant 0 : index
    %145 = vector.load %arg2[%c5_80, %c0_81, %c0_82] : memref<8x2x128xf32, #tpu.memory_space<vmem>>, vector<1x2x128xf32>
    %146 = vector.shape_cast %145 : vector<1x2x128xf32> to vector<2x128xf32>
    %147 = vector.shape_cast %140 : vector<2x128xf32> to vector<2x1x128xf32>
    %148 = vector.broadcast %147 : vector<2x1x128xf32> to vector<2x256x128xf32>
    %149 = arith.mulf %134, %148 : vector<2x256x128xf32>
    %150 = vector.shape_cast %149 : vector<2x256x128xf32> to vector<512x128xf32>
    %151 = arith.truncf %150 : vector<512x128xf32> to vector<512x128xbf16>
    %cst_83 = arith.constant dense<0.000000e+00> : vector<512x128xf32>
    %152 = tpu.matmul %151, %142, %cst_83 {dimension_numbers = #tpu.dot_dimension_numbers<[1], [0], [0], [1], [0, 0, 1, 1], [], []>} : vector<512x128xbf16>, vector<128x128xbf16>, vector<512x128xf32> -> vector<512x128xf32>
    %153 = vector.shape_cast %152 : vector<512x128xf32> to vector<2x256x128xf32>
    %154 = vector.shape_cast %146 : vector<2x128xf32> to vector<2x1x128xf32>
    %155 = vector.broadcast %154 : vector<2x1x128xf32> to vector<2x256x128xf32>
    %156 = arith.mulf %153, %155 : vector<2x256x128xf32>
    %157 = vector.shape_cast %144 : vector<1x128xf32> to vector<1x1x128xf32>
    %158 = vector.broadcast %157 : vector<1x1x128xf32> to vector<2x256x128xf32>
    %159 = arith.addf %156, %158 : vector<2x256x128xf32>
    %cst_84 = arith.constant 0.000000e+00 : f32
    %160 = vector.broadcast %cst_84 : f32 to vector<2x256x128xf32>
    %161 = arith.cmpf oge, %159, %160 : vector<2x256x128xf32>
    %cst_85 = arith.constant 2.000000e-01 : f32
    %162 = vector.broadcast %cst_85 : f32 to vector<2x256x128xf32>
    %163 = arith.mulf %162, %159 : vector<2x256x128xf32>
    %164 = arith.select %161, %159, %163 : vector<2x256x128xi1>, vector<2x256x128xf32>
    %cst_86 = arith.constant 1.41421354 : f32
    %165 = vector.broadcast %cst_86 : f32 to vector<2x256x128xf32>
    %166 = arith.mulf %164, %165 : vector<2x256x128xf32>
    %c6 = arith.constant 6 : index
    %c0_87 = arith.constant 0 : index
    %c0_88 = arith.constant 0 : index
    %167 = vector.load %arg1[%c6, %c0_87, %c0_88] : memref<8x2x128xf32, #tpu.memory_space<vmem>>, vector<1x2x128xf32>
    %168 = vector.shape_cast %167 : vector<1x2x128xf32> to vector<2x128xf32>
    %c4_89 = arith.constant 4 : index
    %c0_90 = arith.constant 0 : index
    %c0_91 = arith.constant 0 : index
    %169 = vector.load %arg4[%c4_89, %c0_90, %c0_91] : memref<5x128x128xbf16, #tpu.memory_space<vmem>>, vector<1x128x128xbf16>
    %170 = vector.shape_cast %169 : vector<1x128x128xbf16> to vector<128x128xbf16>
    %c4_92 = arith.constant 4 : index
    %c0_93 = arith.constant 0 : index
    %c0_94 = arith.constant 0 : index
    %171 = vector.load %arg5[%c4_92, %c0_93, %c0_94] : memref<5x1x128xf32, #tpu.memory_space<vmem>>, vector<1x1x128xf32>
    %172 = vector.shape_cast %171 : vector<1x1x128xf32> to vector<1x128xf32>
    %c6_95 = arith.constant 6 : index
    %c0_96 = arith.constant 0 : index
    %c0_97 = arith.constant 0 : index
    %173 = vector.load %arg2[%c6_95, %c0_96, %c0_97] : memref<8x2x128xf32, #tpu.memory_space<vmem>>, vector<1x2x128xf32>
    %174 = vector.shape_cast %173 : vector<1x2x128xf32> to vector<2x128xf32>
    %175 = vector.shape_cast %168 : vector<2x128xf32> to vector<2x1x128xf32>
    %176 = vector.broadcast %175 : vector<2x1x128xf32> to vector<2x256x128xf32>
    %177 = arith.mulf %166, %176 : vector<2x256x128xf32>
    %178 = vector.shape_cast %177 : vector<2x256x128xf32> to vector<512x128xf32>
    %179 = arith.truncf %178 : vector<512x128xf32> to vector<512x128xbf16>
    %cst_98 = arith.constant dense<0.000000e+00> : vector<512x128xf32>
    %180 = tpu.matmul %179, %170, %cst_98 {dimension_numbers = #tpu.dot_dimension_numbers<[1], [0], [0], [1], [0, 0, 1, 1], [], []>} : vector<512x128xbf16>, vector<128x128xbf16>, vector<512x128xf32> -> vector<512x128xf32>
    %181 = vector.shape_cast %180 : vector<512x128xf32> to vector<2x256x128xf32>
    %182 = vector.shape_cast %174 : vector<2x128xf32> to vector<2x1x128xf32>
    %183 = vector.broadcast %182 : vector<2x1x128xf32> to vector<2x256x128xf32>
    %184 = arith.mulf %181, %183 : vector<2x256x128xf32>
    %185 = vector.shape_cast %172 : vector<1x128xf32> to vector<1x1x128xf32>
    %186 = vector.broadcast %185 : vector<1x1x128xf32> to vector<2x256x128xf32>
    %187 = arith.addf %184, %186 : vector<2x256x128xf32>
    %cst_99 = arith.constant 0.000000e+00 : f32
    %188 = vector.broadcast %cst_99 : f32 to vector<2x256x128xf32>
    %189 = arith.cmpf oge, %187, %188 : vector<2x256x128xf32>
    %cst_100 = arith.constant 2.000000e-01 : f32
    %190 = vector.broadcast %cst_100 : f32 to vector<2x256x128xf32>
    %191 = arith.mulf %190, %187 : vector<2x256x128xf32>
    %192 = arith.select %189, %187, %191 : vector<2x256x128xi1>, vector<2x256x128xf32>
    %cst_101 = arith.constant 1.41421354 : f32
    %193 = vector.broadcast %cst_101 : f32 to vector<2x256x128xf32>
    %194 = arith.mulf %192, %193 : vector<2x256x128xf32>
    %c7 = arith.constant 7 : index
    %c0_102 = arith.constant 0 : index
    %c0_103 = arith.constant 0 : index
    %195 = vector.load %arg1[%c7, %c0_102, %c0_103] : memref<8x2x128xf32, #tpu.memory_space<vmem>>, vector<1x2x128xf32>
    %196 = vector.shape_cast %195 : vector<1x2x128xf32> to vector<2x128xf32>
    %c2_104 = arith.constant 2 : index
    %c0_105 = arith.constant 0 : index
    %c0_106 = arith.constant 0 : index
    %197 = vector.load %arg6[%c2_104, %c0_105, %c0_106] : memref<3x128x128xbf16, #tpu.memory_space<vmem>>, vector<1x128x128xbf16>
    %198 = vector.shape_cast %197 : vector<1x128x128xbf16> to vector<128x128xbf16>
    %c2_107 = arith.constant 2 : index
    %c0_108 = arith.constant 0 : index
    %c0_109 = arith.constant 0 : index
    %199 = vector.load %arg7[%c2_107, %c0_108, %c0_109] : memref<3x1x128xf32, #tpu.memory_space<vmem>>, vector<1x1x128xf32>
    %200 = vector.shape_cast %199 : vector<1x1x128xf32> to vector<1x128xf32>
    %201 = vector.shape_cast %196 : vector<2x128xf32> to vector<2x1x128xf32>
    %202 = vector.broadcast %201 : vector<2x1x128xf32> to vector<2x256x128xf32>
    %203 = arith.mulf %194, %202 : vector<2x256x128xf32>
    %204 = vector.shape_cast %203 : vector<2x256x128xf32> to vector<512x128xf32>
    %205 = arith.truncf %204 : vector<512x128xf32> to vector<512x128xbf16>
    %cst_110 = arith.constant dense<0.000000e+00> : vector<512x128xf32>
    %206 = tpu.matmul %205, %198, %cst_110 {dimension_numbers = #tpu.dot_dimension_numbers<[1], [0], [0], [1], [0, 0, 1, 1], [], []>} : vector<512x128xbf16>, vector<128x128xbf16>, vector<512x128xf32> -> vector<512x128xf32>
    %207 = vector.shape_cast %206 : vector<512x128xf32> to vector<2x256x128xf32>
    %208 = vector.shape_cast %200 : vector<1x128xf32> to vector<1x1x128xf32>
    %209 = vector.broadcast %208 : vector<1x1x128xf32> to vector<2x256x128xf32>
    %210 = arith.addf %207, %209 : vector<2x256x128xf32>
    %211 = arith.addf %138, %210 : vector<2x256x128xf32>
    %c0_111 = arith.constant 0 : index
    %c0_112 = arith.constant 0 : index
    %212 = vector.load %arg10[%c0_111, %c0_112] : memref<128x512xbf16, #tpu.memory_space<vmem>>, vector<128x512xbf16>
    %213 = vector.shape_cast %211 : vector<2x256x128xf32> to vector<512x128xf32>
    %214 = arith.truncf %213 : vector<512x128xf32> to vector<512x128xbf16>
    %cst_113 = arith.constant dense<0.000000e+00> : vector<128x128xf32>
    %215 = tpu.matmul %212, %214, %cst_113 {dimension_numbers = #tpu.dot_dimension_numbers<[1], [0], [0], [1], [0, 0, 1, 1], [], []>} : vector<128x512xbf16>, vector<512x128xbf16>, vector<128x128xf32> -> vector<128x128xf32>
    %216 = vector.shape_cast %215 : vector<128x128xf32> to vector<2x64x128xf32>
    %c0_114 = arith.constant 0 : index
    %c0_115 = arith.constant 0 : index
    %c0_116 = arith.constant 0 : index
    %217 = vector.load %arg11[%c0_114, %c0_115, %c0_116] : memref<2x64x128xf32, #tpu.memory_space<vmem>>, vector<2x64x128xf32>
    tpu.vector_store %arg11[%c0_114, %c0_115, %c0_116], %216 {strides = array<i32>} : memref<2x64x128xf32, #tpu.memory_space<vmem>>, vector<2x64x128xf32>,
    return
  }
  func.func @transform_0(%arg0: i32) -> (i32, i32, i32) {
    %c0_i32 = arith.constant 0 : i32
    %c0_i32_0 = arith.constant 0 : i32
    %c0_i32_1 = arith.constant 0 : i32
    %c0_i32_2 = arith.constant 0 : i32
    return %c0_i32, %c0_i32_0, %c0_i32_1 : i32, i32, i32
  }
  func.func @transform_1(%arg0: i32) -> (i32, i32, i32) {
    %c0_i32 = arith.constant 0 : i32
    %c0_i32_0 = arith.constant 0 : i32
    %c0_i32_1 = arith.constant 0 : i32
    %c0_i32_2 = arith.constant 0 : i32
    return %c0_i32, %c0_i32_0, %c0_i32_1 : i32, i32, i32
  }
  func.func @transform_2(%arg0: i32) -> (i32, i32) {
    %c0_i32 = arith.constant 0 : i32
    %c0_i32_0 = arith.constant 0 : i32
    %c0_i32_1 = arith.constant 0 : i32
    return %c0_i32, %c0_i32_0 : i32, i32
  }
  func.func @transform_3(%arg0: i32) -> (i32, i32, i32) {
    %c0_i32 = arith.constant 0 : i32
    %c0_i32_0 = arith.constant 0 : i32
    %c0_i32_1 = arith.constant 0 : i32
    %c0_i32_2 = arith.constant 0 : i32
    return %c0_i32, %c0_i32_0, %c0_i32_1 : i32, i32, i32
  }
  func.func @transform_4(%arg0: i32) -> (i32, i32, i32) {
    %c0_i32 = arith.constant 0 : i32
    %c0_i32_0 = arith.constant 0 : i32
    %c0_i32_1 = arith.constant 0 : i32
    %c0_i32_2 = arith.constant 0 : i32
    return %c0_i32, %c0_i32_0, %c0_i32_1 : i32, i32, i32
  }
  func.func @transform_5(%arg0: i32) -> (i32, i32, i32) {
    %c0_i32 = arith.constant 0 : i32
    %c0_i32_0 = arith.constant 0 : i32
    %c0_i32_1 = arith.constant 0 : i32
    %c0_i32_2 = arith.constant 0 : i32
    return %c0_i32, %c0_i32_0, %c0_i32_1 : i32, i32, i32
  }
  func.func @transform_6(%arg0: i32) -> (i32, i32, i32) {
    %c0_i32 = arith.constant 0 : i32
    %c0_i32_0 = arith.constant 0 : i32
    %c0_i32_1 = arith.constant 0 : i32
    %c0_i32_2 = arith.constant 0 : i32
    return %c0_i32, %c0_i32_0, %c0_i32_1 : i32, i32, i32
  }
  func.func @transform_7(%arg0: i32) -> (i32, i32) {
    %c0_i32 = arith.constant 0 : i32
    %c0_i32_0 = arith.constant 0 : i32
    %c0_i32_1 = arith.constant 0 : i32
    return %c0_i32, %c0_i32_0 : i32, i32
  }
  func.func @transform_8(%arg0: i32) -> (i32, i32) {
    %c0_i32 = arith.constant 0 : i32
    %c0_i32_0 = arith.constant 0 : i32
    %c0_i32_1 = arith.constant 0 : i32
    return %c0_i32, %c0_i32_0 : i32, i32
  }
  func.func @transform_9(%arg0: i32) -> (i32, i32) {
    %c0_i32 = arith.constant 0 : i32
    %c0_i32_0 = arith.constant 0 : i32
    %c0_i32_1 = arith.constant 0 : i32
    return %c0_i32, %c0_i32_0 : i32, i32
  }
  func.func @transform_10(%arg0: i32) -> (i32, i32, i32) {
    %c0_i32 = arith.constant 0 : i32
    %c0_i32_0 = arith.constant 0 : i32
    %c0_i32_1 = arith.constant 0 : i32
    %c0_i32_2 = arith.constant 0 : i32
    return %c0_i32, %c0_i32_0, %c0_i32_1 : i32, i32, i32
  }
}

</mosaic_0001>

<bundles_post_ra>
// kernel: e4e_forward.3
= control target key start
LH: loop header
LB: loop body
LE: loop exit
PB: predicated region body
PF: predicated region fallthrough
CT: control target
= control target key end

     0   :  { %v69_v0 = vlaneseq  ;;  %v6863_v2 = vmov 1966171168   ;;  %vm479_vm0 = vcmask 261120   ;;  %s8753_s3 = inlined_call_operand.vmem [shape: bf16[5,128,128], index: 3, kind: input, shape index: {}]   ;;  %s8754_s0 = inlined_call_operand.vmem [shape: f32[8,2,128], index: 0, kind: input, shape index: {}]   ;;  %s8755_s2 = inlined_call_operand.vmem [shape: f32[16,128], index: 2, kind: input, shape index: {}]   ;;  %s8756_s5 = inlined_call_operand.vmem [shape: bf16[3,128,128], index: 5, kind: input, shape index: {}]   ;;  %s8757_s7 = inlined_call_operand.vmem [shape: bf16[128,32], index: 7, kind: input, shape index: {}]   ;;  %s8758_s1 = inlined_call_operand.vmem [shape: f32[8,2,128], index: 1, kind: input, shape index: {}]   ;;  %s8759_s4 = inlined_call_operand.vmem [shape: f32[5,1,128], index: 4, kind: input, shape index: {}]   ;;  %s8760_s6 = inlined_call_operand.vmem [shape: f32[3,1,128], index: 6, kind: input, shape index: {}]   ;;  %s8761_s8 = inlined_call_operand.vmem [shape: bf16[512,128], index: 8, kind: input, shape index: {}]   ;;  %s8762_s9 = inlined_call_operand.vmem [shape: bf16[128,512], index: 9, kind: input, shape index: {}]   ;;  %s8763_s10 = inlined_call_operand.vmem [shape: f32[2,64,128], index: 10, kind: output, shape index: {}]  }
   0x1   :  { %v6709_v1 = vld [vmem:[%s8753_s3 + $0x38] sm:$0xff]   ;;  %v67_v3 = vunpack.c.l.s4 %v6863_v2  ;;  %v6710_v4 = vld [vmem:[%s8753_s3 + $0x30] sm:$0xff]   ;;  %v6711_v7 = vld [vmem:[%s8753_s3 + $0x28] sm:$0xff]  }
   0x2   :  { %v70_v5 = vshrl.u32 %v69_v0, 7  ;;  %6116 = vmatprep.subr.bf16.mxu0 %v6709_v1  ;;  %v6712_v10 = vld [vmem:[%s8753_s3 + $0x20] sm:$0xff]   ;;  %v37_v14 = vld [vmem:[%s8755_s2 + $0x8] sm:$0xff]  ;;  %v6717_v16 = vld [vmem:[%s8756_s5 + $0x38] sm:$0xff]  }
   0x3   :  { %v68_v6 = vunpack.c.0.s8 %v67_v3  ;;  %6117 = vmatpush3.bf16.msra.mxu0 %v6709_v1  ;;  %v5414_v11 = vld.sshfl [vmem:[%s8754_s0] sm:$0x11 pattern:$0x75316420]  ;;  %v6713_v17 = vld [vmem:[%s8753_s3 + $0x18] sm:$0xff]   ;;  %6136 = vmatprep.subr.bf16.mxu1 %v6717_v16  ;;  %v6718_v20 = vld [vmem:[%s8756_s5 + $0x30] sm:$0xff]  }
   0x4   :  { %6118 = vmatprep.subr.bf16.mxu0 %v6710_v4  ;;  %v6930_v9 = vsub.s32 0, %v70_v5  ;;  %v36_v13 = vld [vmem:[%s8755_s2] sm:$0xff]  ;;  %v65_v21 = vcombine.high %v5414_v11, %v5414_v11  ;;  %6137 = vmatpush3.bf16.msra.mxu1 %v6717_v16  ;;  %v6714_v22 = vld [vmem:[%s8753_s3 + $0x10] sm:$0xff]   ;;  %v6719_v24 = vld [vmem:[%s8756_s5 + $0x28] sm:$0xff]  }
   0x5   :  { %v6928_v8 = vsub.s32 %v68_v6, %v70_v5  ;;  %6138 = vmatprep.subr.bf16.mxu1 %v6718_v20  ;;  %v6715_v25 = vld [vmem:[%s8753_s3 + $0x8] sm:$0xff]   ;;  %v6716_v27 = vld [vmem:[%s8753_s3] sm:$0xff]   ;;  %v6721_v33 = vld [vmem:[%s8756_s5 + $0x18] sm:$0xff]  }
   0x6   :  { %v6720_v32 = vld [vmem:[%s8756_s5 + $0x20] sm:$0xff]   ;;  %v6722_v34 = vld [vmem:[%s8756_s5 + $0x10] sm:$0xff]   ;;  %v6723_v35 = vld [vmem:[%s8756_s5 + $0x8] sm:$0xff]  }
   0x7   :  { %6119 = vmatpush3.bf16.msra.mxu0 %v6710_v4  ;;  %v72_v12 = vrot.slane %v5414_v11, %v6928_v8  ;;  %v79_v26 = vrot.slane %v65_v21, %v6928_v8  ;;  %v6724_v36 = vld [vmem:[%s8756_s5] sm:$0xff]  }
   0x8   :  { %6120 = vmatprep.subr.bf16.mxu0 %v6711_v7  ;;  %6139 = vmatpush3.bf16.msra.mxu1 %v6718_v20  ;;  %v6987_v37 = vld [vmem:[%s8757_s7] sm:$0xff]   ;;  %v6733_v20 = vld [vmem:[%s8753_s3 + $0x78] sm:$0xff]  }
   0x9   :  { %v83_v15 = vrot.slane %v72_v12, %v6930_v9  ;;  %6140 = vmatprep.subr.bf16.mxu1 %v6719_v24  ;;  %v87_v28 = vrot.slane %v79_v26, %v6930_v9  ;;  %v5423_v38 = vld.sshfl [vmem:[%s8758_s1] sm:$0x11 pattern:$0x75316420]  ;;  %v7036_v26 = vld [vmem:[%s8757_s7 + $0x18] sm:$0xff]  }
   0xa   :  { %v201_v39 = vcombine.high %v5423_v38, %v5423_v38  ;;  %v208_v41 = vrot.slane %v5423_v38, %v6928_v8  ;;  %v5424_v44 = vld [vmem:[%s8759_s4] ss:$0 sm:$0xff]  ;;  %v5426_v47 = vld.sshfl [vmem:[%s8754_s0 + $0x2] sm:$0x11 pattern:$0x75316420] }
   0xb   :  { %6121 = vmatpush3.bf16.msra.mxu0 %v6711_v7  ;;  %v90_v18 = vmul.f32 %v83_v15, %v36_v13  ;;  %v91_v19 = vmul.f32 %v83_v15, %v37_v14  ;;  %v92_v29 = vmul.f32 %v87_v28, %v36_v13  ;;  %v93_v30 = vmul.f32 %v87_v28, %v37_v14  ;;  %v6736_v28 = vld [vmem:[%s8753_s3 + $0x60] sm:$0xff]  }
   0xc   :  { %6122 = vmatprep.subr.bf16.mxu0 %v6712_v10  ;;  %6141 = vmatpush3.bf16.msra.mxu1 %v6719_v24  ;;  %v215_v40 = vrot.slane %v201_v39, %v6928_v8  ;;  %v219_v43 = vrot.slane %v208_v41, %v6930_v9  ;;  %v283_v52 = vcombine.high %v5426_v47, %v5426_v47  ;;  %v6734_v24 = vld [vmem:[%s8753_s3 + $0x70] sm:$0xff]   ;;  %v5435_v38 = vld [vmem:[%s8760_s6] ss:$0 sm:$0xff] }
   0xd   :  { %v94_v23 = vpack.c.bf16 %v91_v19, %v90_v18  ;;  %v95_v31 = vpack.c.bf16 %v93_v30, %v92_v29  ;;  %6142 = vmatprep.subr.bf16.mxu1 %v6720_v32  ;;  %v290_v60 = vrot.slane %v5426_v47, %v6928_v8  ;;  %v6737_v29 = vld [vmem:[%s8753_s3 + $0x58] sm:$0xff]   ;;  %v7056_v30 = vld [vmem:[%s8757_s7 + $0x28] sm:$0xff]  }
   0xe   :  { %v223_v42 = vrot.slane %v215_v40, %v6930_v9  ;;  %v297_v61 = vrot.slane %v283_v52, %v6928_v8 }
   0xf   :  { %6123 = vmatpush3.bf16.msra.mxu0 %v6712_v10  ;;  %6132 = vmatprep.mubr.bf16.mxu0 %v94_v23  ;;  %v301_v7 = vrot.slane %v290_v60, %v6930_v9  ;;  %v7019_v23 = vld [vmem:[%s8757_s7 + $0x10] sm:$0xff]  }
  0x10   :  { %6124 = vmatprep.subr.bf16.mxu0 %v6713_v17  ;;  %6143 = vmatpush3.bf16.msra.mxu1 %v6720_v32  ;;  %v305_v11 = vrot.slane %v297_v61, %v6930_v9  ;;  %v7070_v32 = vld [vmem:[%s8757_s7 + $0x38] sm:$0xff]  }
  0x11   :  { %6144 = vmatprep.subr.bf16.mxu1 %v6721_v33 }
  0x13   :  { %6125 = vmatpush3.bf16.msra.mxu0 %v6713_v17 }
  0x14   :  { %6126 = vmatprep.subr.bf16.mxu0 %v6714_v22  ;;  %6145 = vmatpush3.bf16.msra.mxu1 %v6721_v33  ;;  %v6738_v33 = vld [vmem:[%s8753_s3 + $0x50] sm:$0xff]  }
  0x15   :  { %6146 = vmatprep.subr.bf16.mxu1 %v6722_v34 }
  0x17   :  { %6127 = vmatpush3.bf16.msra.mxu0 %v6714_v22  ;;  %v7014_v22 = vld [vmem:[%s8757_s7 + $0x8] sm:$0xff]  }
  0x18   :  { %6128 = vmatprep.subr.bf16.mxu0 %v6715_v25  ;;  %6147 = vmatpush3.bf16.msra.mxu1 %v6722_v34  ;;  %v6739_v34 = vld [vmem:[%s8753_s3 + $0x48] sm:$0xff]  }
  0x19   :  { %6148 = vmatprep.subr.bf16.mxu1 %v6723_v35 }
  0x1b   :  { %6129 = vmatpush3.bf16.msra.mxu0 %v6715_v25  ;;  %v6735_v25 = vld [vmem:[%s8753_s3 + $0x68] sm:$0xff]  }
  0x1c   :  { %6130 = vmatprep.subr.bf16.mxu0 %v6716_v27  ;;  %6149 = vmatpush3.bf16.msra.mxu1 %v6723_v35  ;;  %v6740_v35 = vld [vmem:[%s8753_s3 + $0x40] sm:$0xff]  }
  0x1d   :  { %6150 = vmatprep.subr.bf16.mxu1 %v6724_v36 }
  0x1f   :  { %6131 = vmatpush3.bf16.msra.mxu0 %v6716_v27  ;;  %v7041_v27 = vld [vmem:[%s8757_s7 + $0x20] sm:$0xff]  }
  0x20   :  { %6151 = vmatpush3.bf16.msra.mxu1 %v6724_v36 }
  0x22   :  { %6133 = vmatmul.mubr.bf16.vlgmr.msra.gmra.mxu0 %v95_v31  ;;  %v7061_v31 = vld [vmem:[%s8757_s7 + $0x30] sm:$0xff]  }
  0x23   :  { %6160 = vmatprep.mubr.msk.bf16.mxu0 %vm479_vm0, %v6987_v37 }
  0xe2   :  { %v6134_v45 = vpop.f32.mrf.mxu0 }
  0xe3   :  { %v228_v46 = vmul.f32 %v6134_v45, %v223_v42 }
  0xe4   :  { %v178_v48 = vpop.f32.mrf.mxu0 }
  0xe5   :  { %v238_v49 = vadd.f32 %v5424_v44, %v228_v46  ;;  %v226_v50 = vmul.f32 %v219_v43, %v178_v48 }
  0xe6   :  { %v6135_v51 = vpop.f32.mrf.mxu0 }
  0xe7   :  { %v246_v53 = vmul.f32 0.2, %v238_v49  ;;  %v236_v54 = vadd.f32 %v5424_v44, %v226_v50  ;;  %v229_v55 = vmul.f32 %v6135_v51, %v223_v42  ;;  %vm242_vm1 = vcmp.ge.f32.partialorder %v238_v49, 0.0 }
  0xe8   :  { %v181_v56 = vpop.f32.mrf.mxu0 }
  0xe9   :  { %vm240_vm2 = vcmp.ge.f32.partialorder %v236_v54, 0.0  ;;  %v244_v57 = vmul.f32 0.2, %v236_v54  ;;  %v239_v58 = vadd.f32 %v5424_v44, %v229_v55  ;;  %v227_v59 = vmul.f32 %v219_v43, %v181_v56 }
  0xea   :  { %v250_v0 = vsel %vm242_vm1, %v238_v49, %v246_v53 }
  0xeb   :  { %vm243_vm3 = vcmp.ge.f32.partialorder %v239_v58, 0.0  ;;  %v247_v62 = vmul.f32 0.2, %v239_v58  ;;  %v237_v63 = vadd.f32 %v5424_v44, %v227_v59  ;;  %v248_v1 = vsel %vm240_vm2, %v236_v54, %v244_v57  ;;  %v6741_v59 = vld [vmem:[%s8753_s3 + $0xb8] sm:$0xff]  }
  0xec   :  { %v254_v4 = vmul.f32 1.4142135, %v250_v0  ;;  %v252_v6 = vmul.f32 1.4142135, %v248_v1  ;;  %v6742_v1 = vld [vmem:[%s8753_s3 + $0xb0] sm:$0xff]  }
  0xed   :  { %vm241_vm4 = vcmp.ge.f32.partialorder %v237_v63, 0.0  ;;  %v245_v2 = vmul.f32 0.2, %v237_v63  ;;  %v251_v3 = vsel %vm243_vm3, %v239_v58, %v247_v62 }
  0xee   :  { %v255_v5 = vmul.f32 1.4142135, %v251_v3  ;;  %v308_v16 = vmul.f32 %v301_v7, %v252_v6  ;;  %v310_v18 = vmul.f32 %v305_v11, %v254_v4 }
  0xef   :  { %v249_v10 = vsel %vm241_vm4, %v237_v63, %v245_v2 }
  0xf0   :  { %v438_v12 = vpack.c.bf16 %v255_v5, %v254_v4  ;;  %v253_v13 = vmul.f32 1.4142135, %v249_v10  ;;  %v311_v14 = vmul.f32 %v305_v11, %v255_v5  ;;  %v6743_v11 = vld [vmem:[%s8753_s3 + $0xa8] sm:$0xff]  }
  0xf2   :  { %6156 = vmatprep.subr.bf16.mxu0 %v438_v12  ;;  %v437_v15 = vpack.c.bf16 %v253_v13, %v252_v6  ;;  %v309_v17 = vmul.f32 %v301_v7, %v253_v13  ;;  %v313_v21 = vpack.c.bf16 %v311_v14, %v310_v18 }
  0xf3   :  { %6157 = vmatpush3.bf16.msra.mxu0 %v438_v12 }
  0xf4   :  { %6158 = vmatprep.subr.bf16.mxu0 %v437_v15  ;;  %v312_v19 = vpack.c.bf16 %v309_v17, %v308_v16 }
  0xf6   :  { %6152 = vmatprep.mubr.bf16.mxu1 %v312_v19 }
  0xf7   :  { %6153 = vmatmul.mubr.bf16.vlgmr.msra.gmra.mxu1 %v313_v21  ;;  %6159 = vmatpush3.bf16.msra.mxu0 %v437_v15 }
  0xf8   :  { %6196 = vmatprep.subr.bf16.mxu0 %v6733_v20  ;;  %6180 = vmatprep.mubr.msk.bf16.mxu1 %vm479_vm0, %v6987_v37  ;;  %v5479_v37 = vld.sshfl [vmem:[%s8754_s0 + $0x4] sm:$0x11 pattern:$0x75316420] }
  0xf9   :  { %v738_v41 = vrot.slane %v5479_v37, %v6928_v8  ;;  %v731_v0 = vcombine.high %v5479_v37, %v5479_v37  ;;  %v6744_v37 = vld [vmem:[%s8753_s3 + $0xa0] sm:$0xff]  }
  0xfa   :  { %6161 = vmatmul.mubr.msk.bf16.vlgmr.msra.gmra.mxu0 %vm479_vm0, %v7014_v22 }
  0xfb   :  { %6164 = vmatprep.mubr.msk.bf16.mxu0 %vm479_vm0, %v7019_v23  ;;  %6197 = vmatpush3.bf16.msra.mxu0 %v6733_v20  ;;  %v749_v48 = vrot.slane %v738_v41, %v6930_v9  ;;  %v745_v10 = vrot.slane %v731_v0, %v6928_v8  ;;  %v6751_v41 = vld [vmem:[%s8756_s5 + $0x68] sm:$0xff]  }
  0xfc   :  { %6198 = vmatprep.subr.bf16.mxu0 %v6734_v24 }
  0xfd   :  { %v753_v15 = vrot.slane %v745_v10, %v6930_v9 }
  0xff   :  { %6199 = vmatpush3.bf16.msra.mxu0 %v6734_v24 }
 0x100   :  { %6200 = vmatprep.subr.bf16.mxu0 %v6735_v25 }
 0x102   :  { %6165 = vmatmul.mubr.msk.bf16.gmra.mxu0 %vm479_vm0, %v7036_v26 }
 0x103   :  { %6168 = vmatprep.mubr.msk.bf16.mxu0 %vm479_vm0, %v7041_v27  ;;  %6201 = vmatpush3.bf16.msra.mxu0 %v6735_v25 }
 0x104   :  { %6202 = vmatprep.subr.bf16.mxu0 %v6736_v28 }
 0x107   :  { %6203 = vmatpush3.bf16.msra.mxu0 %v6736_v28 }
 0x108   :  { %6204 = vmatprep.subr.bf16.mxu0 %v6737_v29 }
 0x10a   :  { %6169 = vmatmul.mubr.msk.bf16.gmra.mxu0 %vm479_vm0, %v7056_v30 }
 0x10b   :  { %6172 = vmatprep.mubr.msk.bf16.mxu0 %vm479_vm0, %v7061_v31  ;;  %6205 = vmatpush3.bf16.msra.mxu0 %v6737_v29 }
 0x10c   :  { %6206 = vmatprep.subr.bf16.mxu0 %v6738_v33 }
 0x10f   :  { %6207 = vmatpush3.bf16.msra.mxu0 %v6738_v33 }
 0x110   :  { %6208 = vmatprep.subr.bf16.mxu0 %v6739_v34 }
 0x112   :  { %6173 = vmatmul.mubr.msk.bf16.gmra.mxu0 %vm479_vm0, %v7070_v32 }
 0x113   :  { %6209 = vmatpush3.bf16.msra.mxu0 %v6739_v34 }
 0x114   :  { %6210 = vmatprep.subr.bf16.mxu0 %v6740_v35 }
 0x117   :  { %6211 = vmatpush3.bf16.msra.mxu0 %v6740_v35 }
 0x1b7   :  { %v6154_v36 = vpop.f32.mrf.mxu1 }
 0x1b8   :  { %v419_v43 = vadd.f32 %v6154_v36, %v5435_v38 }
 0x1b9   :  { %v396_v39 = vpop.f32.mrf.mxu1 }
 0x1ba   :  { %v6162_v40 = vpop.f32.mrf.mxu0  ;;  %v417_v47 = vadd.f32 %v5435_v38, %v396_v39  ;;  %v6749_v39 = vld [vmem:[%s8756_s5 + $0x78] sm:$0xff]  }
 0x1bb   :  { %v6155_v42 = vpop.f32.mrf.mxu1  ;;  %v758_v57 = vmul.f32 %v6162_v40, %v749_v48  ;;  %v6750_v40 = vld [vmem:[%s8756_s5 + $0x70] sm:$0xff]   ;;  %6260 = vmatprep.subr.bf16.mxu0 %v6749_v39 }
 0x1bc   :  { %v420_v44 = vadd.f32 %v6155_v42, %v5435_v38  ;;  %v538_v45 = vpop.f32.mrf.mxu0  ;;  %v5488_v42 = vld.sshfl [vmem:[%s8758_s1 + $0x4] sm:$0x11 pattern:$0x75316420] }
 0x1bd   :  { %v399_v46 = vpop.f32.mrf.mxu1  ;;  %v756_v55 = vmul.f32 %v749_v48, %v538_v45  ;;  %v7148_v45 = vld [vmem:[%s8759_s4 + $0x1] ss:$0 sm:$0xff] }
 0x1be   :  { %v602_v49 = vpack.c.bf16 %v420_v44, %v419_v43  ;;  %v418_v50 = vadd.f32 %v5435_v38, %v399_v46  ;;  %v6163_v51 = vpop.f32.mrf.mxu0  ;;  %v6748_v38 = vld [vmem:[%s8753_s3 + $0x80] sm:$0xff]   ;;  %v940_v43 = vrot.slane %v5488_v42, %v6928_v8 }
 0x1bf   :  { %v759_v53 = vmul.f32 %v6163_v51, %v749_v48  ;;  %v933_v51 = vcombine.high %v5488_v42, %v5488_v42 }
 0x1c0   :  { %v601_v52 = vpack.c.bf16 %v418_v50, %v417_v47  ;;  %v541_v54 = vpop.f32.mrf.mxu0  ;;  %6176 = vmatprep.subr.bf16.mxu1 %v602_v49  ;;  %v951_v44 = vrot.slane %v940_v43, %v6930_v9 }
 0x1c1   :  { %v757_v56 = vmul.f32 %v749_v48, %v541_v54  ;;  %6177 = vmatpush3.bf16.msra.mxu1 %v602_v49  ;;  %v773_v61 = vpack.c.bf16 %v759_v53, %v758_v57  ;;  %v7154_v53 = vld.sshfl [vmem:[%s8754_s0 + $0x6] sm:$0x11 pattern:$0x75316420] }
 0x1c2   :  { %v6166_v58 = vpop.f32.mrf.mxu0  ;;  %6178 = vmatprep.subr.bf16.mxu1 %v601_v52 }
 0x1c3   :  { %v772_v60 = vpack.c.bf16 %v757_v56, %v756_v55  ;;  %v762_v6 = vmul.f32 %v6166_v58, %v749_v48 }
 0x1c4   :  { %v554_v62 = vpop.f32.mrf.mxu0 }
 0x1c5   :  { %6179 = vmatpush3.bf16.msra.mxu1 %v601_v52  ;;  %6212 = vmatprep.mubr.bf16.mxu0 %v772_v60  ;;  %v760_v4 = vmul.f32 %v749_v48, %v554_v62  ;;  %v1098_v60 = vrot.slane %v7154_v53, %v6928_v8 }
 0x1c6   :  { %v6167_v63 = vpop.f32.mrf.mxu0  ;;  %6213 = vmatmul.mubr.bf16.vlgmr.msra.gmra.mxu0 %v773_v61  ;;  %6228 = vmatprep.subr.bf16.mxu1 %v6741_v59  ;;  %v947_v61 = vrot.slane %v933_v51, %v6928_v8 }
 0x1c7   :  { %v763_v2 = vmul.f32 %v6167_v63, %v749_v48  ;;  %6261 = vmatpush3.bf16.msra.mxu0 %v6749_v39 }
 0x1c8   :  { %v557_v3 = vpop.f32.mrf.mxu0  ;;  %6181 = vmatmul.mubr.msk.bf16.vlgmr.msra.gmra.mxu1 %vm479_vm0, %v7014_v22  ;;  %6262 = vmatprep.subr.bf16.mxu0 %v6750_v40 }
 0x1c9   :  { %v761_v5 = vmul.f32 %v749_v48, %v557_v3  ;;  %6184 = vmatprep.mubr.msk.bf16.mxu1 %vm479_vm0, %v7019_v23  ;;  %6229 = vmatpush3.bf16.msra.mxu1 %v6741_v59  ;;  %v775_v13 = vpack.c.bf16 %v763_v2, %v762_v6 }
 0x1ca   :  { %v6170_v7 = vpop.f32.mrf.mxu0  ;;  %6230 = vmatprep.subr.bf16.mxu1 %v6742_v1 }
 0x1cb   :  { %v774_v12 = vpack.c.bf16 %v761_v5, %v760_v4  ;;  %v766_v21 = vmul.f32 %v6170_v7, %v753_v15  ;;  %6263 = vmatpush3.bf16.msra.mxu0 %v6750_v40 }
 0x1cc   :  { %v570_v14 = vpop.f32.mrf.mxu0  ;;  %6264 = vmatprep.subr.bf16.mxu0 %v6751_v41 }
 0x1cd   :  { %6216 = vmatprep.mubr.bf16.mxu0 %v774_v12  ;;  %6231 = vmatpush3.bf16.msra.mxu1 %v6742_v1  ;;  %v764_v19 = vmul.f32 %v753_v15, %v570_v14  ;;  %v7164_v12 = vrot.slane %v1098_v60, %v6930_v9 }
 0x1ce   :  { %v6171_v16 = vpop.f32.mrf.mxu0  ;;  %6217 = vmatmul.mubr.bf16.gmra.mxu0 %v775_v13  ;;  %6232 = vmatprep.subr.bf16.mxu1 %v6743_v11 }
 0x1cf   :  { %v767_v17 = vmul.f32 %v6171_v16, %v753_v15  ;;  %6265 = vmatpush3.bf16.msra.mxu0 %v6751_v41 }
 0x1d0   :  { %v573_v18 = vpop.f32.mrf.mxu0  ;;  %6185 = vmatmul.mubr.msk.bf16.gmra.mxu1 %vm479_vm0, %v7036_v26 }
 0x1d1   :  { %v765_v20 = vmul.f32 %v753_v15, %v573_v18  ;;  %6188 = vmatprep.mubr.msk.bf16.mxu1 %vm479_vm0, %v7041_v27  ;;  %6233 = vmatpush3.bf16.msra.mxu1 %v6743_v11  ;;  %v777_v24 = vpack.c.bf16 %v767_v17, %v766_v21 }
 0x1d2   :  { %v6174_v22 = vpop.f32.mrf.mxu0  ;;  %6234 = vmatprep.subr.bf16.mxu1 %v6744_v37 }
 0x1d3   :  { %v776_v23 = vpack.c.bf16 %v765_v20, %v764_v19  ;;  %v770_v27 = vmul.f32 %v6174_v22, %v753_v15 }
 0x1d4   :  { %v586_v25 = vpop.f32.mrf.mxu0 }
 0x1d5   :  { %6220 = vmatprep.mubr.bf16.mxu0 %v776_v23  ;;  %v768_v26 = vmul.f32 %v753_v15, %v586_v25  ;;  %6235 = vmatpush3.bf16.msra.mxu1 %v6744_v37  ;;  %v1091_v23 = vcombine.high %v7154_v53, %v7154_v53 }
 0x1d6   :  { %v6175_v28 = vpop.f32.mrf.mxu0  ;;  %6221 = vmatmul.mubr.bf16.gmra.mxu0 %v777_v24 }
 0x1d7   :  { %v771_v29 = vmul.f32 %v6175_v28, %v753_v15 }
 0x1d8   :  { %v589_v33 = vpop.f32.mrf.mxu0  ;;  %6189 = vmatmul.mubr.msk.bf16.gmra.mxu1 %vm479_vm0, %v7056_v30  ;;  %v6745_v30 = vld [vmem:[%s8753_s3 + $0x98] sm:$0xff]  }
 0x1d9   :  { %v769_v34 = vmul.f32 %v753_v15, %v589_v33  ;;  %6192 = vmatprep.mubr.msk.bf16.mxu1 %vm479_vm0, %v7061_v31  ;;  %v779_v36 = vpack.c.bf16 %v771_v29, %v770_v27  ;;  %6236 = vmatprep.subr.bf16.mxu1 %v6745_v30  ;;  %v6746_v31 = vld [vmem:[%s8753_s3 + $0x90] sm:$0xff]   ;;  %v7167_v15 = vrot.slane %v947_v61, %v6930_v9 }
 0x1da   :  { %6237 = vmatpush3.bf16.msra.mxu1 %v6745_v30 }
 0x1db   :  { %v778_v35 = vpack.c.bf16 %v769_v34, %v768_v26  ;;  %6238 = vmatprep.subr.bf16.mxu1 %v6746_v31 }
 0x1dd   :  { %6224 = vmatprep.mubr.bf16.mxu0 %v778_v35 }
 0x1de   :  { %6225 = vmatmul.mubr.bf16.gmra.mxu0 %v779_v36  ;;  %6239 = vmatpush3.bf16.msra.mxu1 %v6746_v31 }
 0x1e0   :  { %6193 = vmatmul.mubr.msk.bf16.gmra.mxu1 %vm479_vm0, %v7070_v32  ;;  %v6747_v32 = vld [vmem:[%s8753_s3 + $0x88] sm:$0xff]  }
 0x1e1   :  { %6240 = vmatprep.subr.bf16.mxu1 %v6747_v32 }
 0x1e2   :  { %6241 = vmatpush3.bf16.msra.mxu1 %v6747_v32 }
 0x1e3   :  { %6242 = vmatprep.subr.bf16.mxu1 %v6748_v38 }
 0x1e6   :  { %6243 = vmatpush3.bf16.msra.mxu1 %v6748_v38 }
 0x286   :  { %v6214_v46 = vpop.f32.mrf.mxu0 }
 0x287   :  { %v960_v47 = vmul.f32 %v6214_v46, %v951_v44 }
 0x288   :  { %v862_v48 = vpop.f32.mrf.mxu0 }
 0x289   :  { %v982_v49 = vadd.f32 %v7148_v45, %v960_v47  ;;  %v958_v50 = vmul.f32 %v951_v44, %v862_v48 }
 0x28a   :  { %v6215_v52 = vpop.f32.mrf.mxu0 }
 0x28b   :  { %v1014_v54 = vmul.f32 0.2, %v982_v49  ;;  %v980_v55 = vadd.f32 %v7148_v45, %v958_v50  ;;  %v961_v56 = vmul.f32 %v6215_v52, %v951_v44  ;;  %vm998_vm5 = vcmp.ge.f32.partialorder %v982_v49, 0.0 }
 0x28c   :  { %v865_v57 = vpop.f32.mrf.mxu0 }
 0x28d   :  { %v1012_v58 = vmul.f32 0.2, %v980_v55  ;;  %v983_v59 = vadd.f32 %v7148_v45, %v961_v56  ;;  %vm996_vm6 = vcmp.ge.f32.partialorder %v980_v55, 0.0  ;;  %v959_v62 = vmul.f32 %v951_v44, %v865_v57 }
 0x28e   :  { %v6218_v63 = vpop.f32.mrf.mxu0  ;;  %v1030_v0 = vsel %vm998_vm5, %v982_v49, %v1014_v54  ;;  %v1105_v57 = vrot.slane %v1091_v23, %v6928_v8 }
 0x28f   :  { %vm999_vm7 = vcmp.ge.f32.partialorder %v983_v59, 0.0  ;;  %v1015_v1 = vmul.f32 0.2, %v983_v59  ;;  %v964_v2 = vmul.f32 %v6218_v63, %v951_v44  ;;  %v981_v3 = vadd.f32 %v7148_v45, %v959_v62 }
 0x290   :  { %v878_v4 = vpop.f32.mrf.mxu0  ;;  %v1028_v5 = vsel %vm996_vm6, %v980_v55, %v1012_v58  ;;  %v1046_v11 = vmul.f32 1.4142135, %v1030_v0  ;;  %v1113_v23 = vrot.slane %v1105_v57, %v6930_v9  ;;  %v7215_v57 = vpop.f32.mrf.mxu1 }
 0x291   :  { %v1031_v6 = vsel %vm999_vm7, %v983_v59, %v1015_v1  ;;  %v986_v7 = vadd.f32 %v7148_v45, %v964_v2  ;;  %v962_v10 = vmul.f32 %v951_v44, %v878_v4  ;;  %vm997_vm8 = vcmp.ge.f32.partialorder %v981_v3, 0.0 }
 0x292   :  { %v1013_v13 = vmul.f32 0.2, %v981_v3  ;;  %v6219_v14 = vpop.f32.mrf.mxu0  ;;  %v1047_v16 = vmul.f32 1.4142135, %v1031_v6  ;;  %v1044_v19 = vmul.f32 1.4142135, %v1028_v5  ;;  %v1118_v28 = vmul.f32 %v7164_v12, %v1046_v11 }
 0x293   :  { %v984_v17 = vadd.f32 %v7148_v45, %v962_v10  ;;  %v965_v18 = vmul.f32 %v6219_v14, %v951_v44  ;;  %v1018_v20 = vmul.f32 0.2, %v986_v7  ;;  %vm1002_vm9 = vcmp.ge.f32.partialorder %v986_v7, 0.0 }
 0x294   :  { %v881_v21 = vpop.f32.mrf.mxu0  ;;  %v1029_v22 = vsel %vm997_vm8, %v981_v3, %v1013_v13  ;;  %v1119_v34 = vmul.f32 %v7164_v12, %v1047_v16  ;;  %v1116_v31 = vmul.f32 %v7164_v12, %v1044_v19 }
 0x295   :  { %v1016_v24 = vmul.f32 0.2, %v984_v17  ;;  %v987_v25 = vadd.f32 %v7148_v45, %v965_v18  ;;  %vm1000_vm10 = vcmp.ge.f32.partialorder %v984_v17, 0.0  ;;  %v963_v29 = vmul.f32 %v951_v44, %v881_v21 }
 0x296   :  { %v6222_v33 = vpop.f32.mrf.mxu0  ;;  %v1045_v26 = vmul.f32 1.4142135, %v1029_v22  ;;  %v1034_v36 = vsel %vm1002_vm9, %v986_v7, %v1018_v20  ;;  %v1133_v46 = vpack.c.bf16 %v1119_v34, %v1118_v28 }
 0x297   :  { %vm1003_vm11 = vcmp.ge.f32.partialorder %v987_v25, 0.0  ;;  %v1019_v27 = vmul.f32 0.2, %v987_v25  ;;  %v968_v35 = vmul.f32 %v6222_v33, %v7167_v15  ;;  %v985_v37 = vadd.f32 %v7148_v45, %v963_v29 }
 0x298   :  { %v894_v30 = vpop.f32.mrf.mxu0  ;;  %v1117_v32 = vmul.f32 %v7164_v12, %v1045_v26  ;;  %v1032_v38 = vsel %vm1000_vm10, %v984_v17, %v1016_v24  ;;  %v1050_v50 = vmul.f32 1.4142135, %v1034_v36 }
 0x299   :  { %v1035_v39 = vsel %vm1003_vm11, %v987_v25, %v1019_v27  ;;  %v990_v40 = vadd.f32 %v7148_v45, %v968_v35  ;;  %v966_v41 = vmul.f32 %v7167_v15, %v894_v30  ;;  %vm1001_vm12 = vcmp.ge.f32.partialorder %v985_v37, 0.0 }
 0x29a   :  { %v1017_v42 = vmul.f32 0.2, %v985_v37  ;;  %v6223_v43 = vpop.f32.mrf.mxu0  ;;  %v1132_v44 = vpack.c.bf16 %v1117_v32, %v1116_v31  ;;  %v1051_v47 = vmul.f32 1.4142135, %v1035_v39  ;;  %v1048_v51 = vmul.f32 1.4142135, %v1032_v38 }
 0x29b   :  { %v988_v48 = vadd.f32 %v7148_v45, %v966_v41  ;;  %v969_v49 = vmul.f32 %v6223_v43, %v7167_v15  ;;  %v1022_v54 = vmul.f32 0.2, %v990_v40  ;;  %vm1006_vm13 = vcmp.ge.f32.partialorder %v990_v40, 0.0 }
 0x29c   :  { %6244 = vmatprep.mubr.bf16.mxu1 %v1132_v44  ;;  %v897_v52 = vpop.f32.mrf.mxu0  ;;  %v1033_v53 = vsel %vm1001_vm12, %v985_v37, %v1017_v42  ;;  %v1123_v63 = vmul.f32 %v7164_v12, %v1051_v47  ;;  %v1120_v2 = vmul.f32 %v7164_v12, %v1048_v51  ;;  %v1122_v4 = vmul.f32 %v7164_v12, %v1050_v50 }
 0x29d   :  { %v1020_v55 = vmul.f32 0.2, %v988_v48  ;;  %v991_v56 = vadd.f32 %v7148_v45, %v969_v49  ;;  %6245 = vmatmul.mubr.bf16.vlgmr.msra.gmra.mxu1 %v1133_v46  ;;  %vm1004_vm14 = vcmp.ge.f32.partialorder %v988_v48, 0.0  ;;  %v967_v58 = vmul.f32 %v7167_v15, %v897_v52  ;;  %v6752_v52 = vld [vmem:[%s8756_s5 + $0x60] sm:$0xff]  }
 0x29e   :  { %v6226_v59 = vpop.f32.mrf.mxu0  ;;  %v1049_v60 = vmul.f32 1.4142135, %v1033_v53  ;;  %v1038_v5 = vsel %vm1006_vm13, %v990_v40, %v1022_v54  ;;  %v1135_v20 = vpack.c.bf16 %v1123_v63, %v1122_v4  ;;  %6266 = vmatprep.subr.bf16.mxu0 %v6752_v52  ;;  %v6753_v53 = vld [vmem:[%s8756_s5 + $0x58] sm:$0xff]   ;;  %v6754_v54 = vld [vmem:[%s8756_s5 + $0x50] sm:$0xff]  }
 0x29f   :  { %vm1007_vm15 = vcmp.ge.f32.partialorder %v991_v56, 0.0  ;;  %v1023_v61 = vmul.f32 0.2, %v991_v56  ;;  %v972_v62 = vmul.f32 %v6226_v59, %v7167_v15  ;;  %v989_v0 = vadd.f32 %v7148_v45, %v967_v58  ;;  %6267 = vmatpush3.bf16.msra.mxu0 %v6752_v52  ;;  %v7217_v58 = vpop.f32.mrf.mxu1  ;;  %v7222_v59 = vld [vmem:[%s8761_s8] sm:$0xff]  }
 0x2a0   :  { %v910_v1 = vpop.f32.mrf.mxu0  ;;  %v1121_v3 = vmul.f32 %v7164_v12, %v1049_v60  ;;  %v1036_v6 = vsel %vm1004_vm14, %v988_v48, %v1020_v55  ;;  %v1054_v24 = vmul.f32 1.4142135, %v1038_v5  ;;  %6268 = vmatprep.subr.bf16.mxu0 %v6753_v53  ;;  %v6755_v55 = vld [vmem:[%s8756_s5 + $0x48] sm:$0xff]  }
 0x2a1   :  { %v1039_v7 = vsel %vm1007_vm15, %v991_v56, %v1023_v61  ;;  %v970_v10 = vmul.f32 %v7167_v15, %v910_v1  ;;  %vm1005_vm0 = vcmp.ge.f32.partialorder %v989_v0, 0.0  ;;  %v1021_v11 = vmul.f32 0.2, %v989_v0  ;;  %v6756_v56 = vld [vmem:[%s8756_s5 + $0x40] sm:$0xff]   ;;  %v7225_v60 = vpop.f32.mrf.mxu1 }
 0x2a2   :  { %v994_v13 = vadd.f32 %v7148_v45, %v972_v62  ;;  %v6227_v14 = vpop.f32.mrf.mxu0  ;;  %v1134_v16 = vpack.c.bf16 %v1121_v3, %v1120_v2  ;;  %v1055_v17 = vmul.f32 1.4142135, %v1039_v7  ;;  %v1052_v21 = vmul.f32 1.4142135, %v1036_v6 }
 0x2a3   :  { %v992_v18 = vadd.f32 %v7148_v45, %v970_v10  ;;  %v973_v19 = vmul.f32 %v6227_v14, %v7167_v15  ;;  %v1037_v22 = vsel %vm1005_vm0, %v989_v0, %v1021_v11  ;;  %v1126_v32 = vmul.f32 %v1113_v23, %v1054_v24  ;;  %6269 = vmatpush3.bf16.msra.mxu0 %v6753_v53  ;;  %v7227_v61 = vpop.f32.mrf.mxu1  ;;  %v5518_v7 = vld.sshfl [vmem:[%s8758_s1 + $0x6] sm:$0x11 pattern:$0x75316420] }
 0x2a4   :  { %6248 = vmatprep.mubr.bf16.mxu1 %v1134_v16  ;;  %v913_v12 = vpop.f32.mrf.mxu0  ;;  %v1026_v29 = vmul.f32 0.2, %v994_v13  ;;  %v1053_v26 = vmul.f32 1.4142135, %v1037_v22  ;;  %vm1010_vm2 = vcmp.ge.f32.partialorder %v994_v13, 0.0  ;;  %v1127_v27 = vmul.f32 %v1113_v23, %v1055_v17  ;;  %6270 = vmatprep.subr.bf16.mxu0 %v6754_v54 }
 0x2a5   :  { %vm1008_vm1 = vcmp.ge.f32.partialorder %v992_v18, 0.0  ;;  %v1024_v25 = vmul.f32 0.2, %v992_v18  ;;  %v995_v28 = vadd.f32 %v7148_v45, %v973_v19  ;;  %6249 = vmatmul.mubr.bf16.gmra.mxu1 %v1135_v20  ;;  %v971_v33 = vmul.f32 %v7167_v15, %v913_v12  ;;  %v7229_v62 = vpop.f32.mrf.mxu1  ;;  %v7261_v17 = vld [vmem:[%s8759_s4 + $0x2] ss:$0 sm:$0xff] }
 0x2a6   :  { %v1124_v37 = vmul.f32 %v1113_v23, %v1052_v21  ;;  %v1125_v30 = vmul.f32 %v1113_v23, %v1053_v26  ;;  %v1042_v38 = vsel %vm1010_vm2, %v994_v13, %v1026_v29  ;;  %v1137_v43 = vpack.c.bf16 %v1127_v27, %v1126_v32 }
 0x2a7   :  { %vm1011_vm3 = vcmp.ge.f32.partialorder %v995_v28, 0.0  ;;  %v1027_v34 = vmul.f32 0.2, %v995_v28  ;;  %v1040_v35 = vsel %vm1008_vm1, %v992_v18, %v1024_v25  ;;  %v993_v36 = vadd.f32 %v7148_v45, %v971_v33  ;;  %6271 = vmatpush3.bf16.msra.mxu0 %v6754_v54  ;;  %v7231_v63 = vpop.f32.mrf.mxu1 }
 0x2a8   :  { %v1136_v40 = vpack.c.bf16 %v1125_v30, %v1124_v37  ;;  %v1056_v41 = vmul.f32 1.4142135, %v1040_v35  ;;  %v1058_v44 = vmul.f32 1.4142135, %v1042_v38  ;;  %6272 = vmatprep.subr.bf16.mxu0 %v6755_v55  ;;  %v1300_v11 = vrot.slane %v5518_v7, %v6928_v8 }
 0x2a9   :  { %v1043_v31 = vsel %vm1011_vm3, %v995_v28, %v1027_v34  ;;  %vm1009_vm4 = vcmp.ge.f32.partialorder %v993_v36, 0.0  ;;  %v1025_v39 = vmul.f32 0.2, %v993_v36  ;;  %v7233_v0 = vpop.f32.mrf.mxu1  ;;  %v1293_v22 = vcombine.high %v5518_v7, %v5518_v7 }
 0x2aa   :  { %v1059_v42 = vmul.f32 1.4142135, %v1043_v31  ;;  %6252 = vmatprep.mubr.bf16.mxu1 %v1136_v40  ;;  %v1128_v47 = vmul.f32 %v1113_v23, %v1056_v41  ;;  %v1130_v50 = vmul.f32 %v1113_v23, %v1058_v44  ;;  %v1311_v14 = vrot.slane %v1300_v11, %v6930_v9  ;;  %v5538_v28 = vld.sshfl [vmem:[%s8754_s0 + $0x8] sm:$0x11 pattern:$0x75316420] }
 0x2ab   :  { %v1041_v15 = vsel %vm1009_vm4, %v993_v36, %v1025_v39  ;;  %6273 = vmatpush3.bf16.msra.mxu0 %v6755_v55  ;;  %v7235_v1 = vpop.f32.mrf.mxu1  ;;  %v1307_v27 = vrot.slane %v1293_v22, %v6928_v8  ;;  %v1456_v37 = vrot.slane %v5538_v28, %v6928_v8  ;;  %v1449_v32 = vcombine.high %v5538_v28, %v5538_v28 }
 0x2ac   :  { %v1057_v46 = vmul.f32 1.4142135, %v1041_v15  ;;  %v1131_v49 = vmul.f32 %v1113_v23, %v1059_v42  ;;  %6274 = vmatprep.subr.bf16.mxu0 %v6756_v56 }
 0x2ad   :  { %6253 = vmatmul.mubr.bf16.gmra.mxu1 %v1137_v43  ;;  %v7237_v2 = vpop.f32.mrf.mxu1  ;;  %v7274_v44 = vrot.slane %v1307_v27, %v6930_v9  ;;  %v1463_v11 = vrot.slane %v1449_v32, %v6928_v8 }
 0x2ae   :  { %v1129_v48 = vmul.f32 %v1113_v23, %v1057_v46  ;;  %v1139_v51 = vpack.c.bf16 %v1131_v49, %v1130_v50  ;;  %v1467_v49 = vrot.slane %v1456_v37, %v6930_v9 }
 0x2af   :  { %6275 = vmatpush3.bf16.msra.mxu0 %v6756_v56  ;;  %v7239_v3 = vpop.f32.mrf.mxu1 }
 0x2b0   :  { %v1138_v45 = vpack.c.bf16 %v1129_v48, %v1128_v47 }
 0x2b1   :  { %v7241_v4 = vpop.f32.mrf.mxu1 }
 0x2b2   :  { %6256 = vmatprep.mubr.bf16.mxu1 %v1138_v45 }
 0x2b3   :  { %v7243_v5 = vpop.f32.mrf.mxu1 }
 0x2b5   :  { %6257 = vmatmul.mubr.bf16.gmra.mxu1 %v1139_v51  ;;  %v7245_v6 = vpop.f32.mrf.mxu1 }
 0x2b6   :  { %6308 = vmatprep.mubr.bf16.mxu1 %v7222_v59 }
 0x2b7   :  { %v7250_v10 = vpop.f32.mrf.mxu1 }
 0x2b9   :  { %v7253_v13 = vpop.f32.mrf.mxu1 }
 0x2bb   :  { %v7256_v16 = vpop.f32.mrf.mxu1 }
 0x35d   :  { %v6246_v18 = vpop.f32.mrf.mxu1 }
 0x35e   :  { %v1320_v19 = vmul.f32 %v6246_v18, %v1311_v14 }
 0x35f   :  { %v1222_v20 = vpop.f32.mrf.mxu1 }
 0x360   :  { %v1342_v21 = vadd.f32 %v7261_v17, %v1320_v19  ;;  %v1318_v12 = vmul.f32 %v1311_v14, %v1222_v20 }
 0x361   :  { %v6247_v23 = vpop.f32.mrf.mxu1 }
 0x362   :  { %v1340_v24 = vadd.f32 %v7261_v17, %v1318_v12  ;;  %v1321_v25 = vmul.f32 %v6247_v23, %v1311_v14  ;;  %v1374_v29 = vmul.f32 0.2, %v1342_v21  ;;  %vm1358_vm5 = vcmp.ge.f32.partialorder %v1342_v21, 0.0 }
 0x363   :  { %v1225_v33 = vpop.f32.mrf.mxu1 }
 0x364   :  { %v1372_v26 = vmul.f32 0.2, %v1340_v24  ;;  %v1343_v34 = vadd.f32 %v7261_v17, %v1321_v25  ;;  %vm1356_vm6 = vcmp.ge.f32.partialorder %v1340_v24, 0.0  ;;  %v1319_v35 = vmul.f32 %v1311_v14, %v1225_v33 }
 0x365   :  { %v6250_v36 = vpop.f32.mrf.mxu1  ;;  %v1390_v38 = vsel %vm1358_vm5, %v1342_v21, %v1374_v29 }
 0x366   :  { %vm1359_vm7 = vcmp.ge.f32.partialorder %v1343_v34, 0.0  ;;  %v1375_v30 = vmul.f32 0.2, %v1343_v34  ;;  %v1324_v31 = vmul.f32 %v6250_v36, %v1311_v14  ;;  %v1341_v39 = vadd.f32 %v7261_v17, %v1319_v35 }
 0x367   :  { %v1238_v40 = vpop.f32.mrf.mxu1  ;;  %v1388_v41 = vsel %vm1356_vm6, %v1340_v24, %v1372_v26  ;;  %v7280_v52 = vmul.f32 1.4142135, %v1390_v38 }
 0x368   :  { %v1391_v42 = vsel %vm1359_vm7, %v1343_v34, %v1375_v30  ;;  %v1346_v43 = vadd.f32 %v7261_v17, %v1324_v31  ;;  %v1322_v15 = vmul.f32 %v1311_v14, %v1238_v40  ;;  %vm1357_vm8 = vcmp.ge.f32.partialorder %v1341_v39, 0.0 }
 0x369   :  { %v7276_v46 = vmul.f32 1.4142135, %v1391_v42  ;;  %v1373_v47 = vmul.f32 0.2, %v1341_v39  ;;  %v6251_v48 = vpop.f32.mrf.mxu1  ;;  %v7282_v53 = vmul.f32 1.4142135, %v1388_v41  ;;  %v1476_v24 = vmul.f32 %v1467_v49, %v7280_v52 }
 0x36a   :  { %v1378_v45 = vmul.f32 0.2, %v1346_v43  ;;  %v1344_v50 = vadd.f32 %v7261_v17, %v1322_v15  ;;  %v1325_v51 = vmul.f32 %v6251_v48, %v1311_v14  ;;  %vm1362_vm9 = vcmp.ge.f32.partialorder %v1346_v43, 0.0 }
 0x36b   :  { %v1241_v54 = vpop.f32.mrf.mxu1  ;;  %v1389_v55 = vsel %vm1357_vm8, %v1341_v39, %v1373_v47  ;;  %v1477_v18 = vmul.f32 %v1467_v49, %v7276_v46  ;;  %v1474_v29 = vmul.f32 %v1467_v49, %v7282_v53  ;;  %v7306_v48 = vrot.slane %v1463_v11, %v6930_v9 }
 0x36c   :  { %v1376_v56 = vmul.f32 0.2, %v1344_v50  ;;  %v1347_v7 = vadd.f32 %v7261_v17, %v1325_v51  ;;  %vm1360_vm10 = vcmp.ge.f32.partialorder %v1344_v50, 0.0  ;;  %v1323_v19 = vmul.f32 %v1311_v14, %v1241_v54 }
 0x36d   :  { %v6254_v20 = vpop.f32.mrf.mxu1  ;;  %v7287_v21 = vmul.f32 1.4142135, %v1389_v55  ;;  %v1394_v12 = vsel %vm1362_vm9, %v1346_v43, %v1378_v45  ;;  %v1491_v31 = vpack.c.bf16 %v1477_v18, %v1476_v24 }
 0x36e   :  { %vm1363_vm11 = vcmp.ge.f32.partialorder %v1347_v7, 0.0  ;;  %v1379_v22 = vmul.f32 0.2, %v1347_v7  ;;  %v1328_v23 = vmul.f32 %v6254_v20, %v7274_v44  ;;  %v1345_v25 = vadd.f32 %v7261_v17, %v1323_v19 }
 0x36f   :  { %v1254_v28 = vpop.f32.mrf.mxu1  ;;  %v1475_v33 = vmul.f32 %v1467_v49, %v7287_v21  ;;  %v1392_v26 = vsel %vm1360_vm10, %v1344_v50, %v1376_v56  ;;  %v7296_v35 = vmul.f32 1.4142135, %v1394_v12 }
 0x370   :  { %v1395_v34 = vsel %vm1363_vm11, %v1347_v7, %v1379_v22  ;;  %v1350_v14 = vadd.f32 %v7261_v17, %v1328_v23  ;;  %v1326_v27 = vmul.f32 %v7274_v44, %v1254_v28  ;;  %vm1361_vm12 = vcmp.ge.f32.partialorder %v1345_v25, 0.0 }
 0x371   :  { %v1377_v36 = vmul.f32 0.2, %v1345_v25  ;;  %v6255_v37 = vpop.f32.mrf.mxu1  ;;  %v1490_v30 = vpack.c.bf16 %v1475_v33, %v1474_v29  ;;  %v7298_v32 = vmul.f32 1.4142135, %v1395_v34  ;;  %v7302_v40 = vmul.f32 1.4142135, %v1392_v26 }
 0x372   :  { %v1348_v38 = vadd.f32 %v7261_v17, %v1326_v27  ;;  %v1329_v39 = vmul.f32 %v6255_v37, %v7274_v44  ;;  %v1382_v41 = vmul.f32 0.2, %v1350_v14  ;;  %vm1366_vm13 = vcmp.ge.f32.partialorder %v1350_v14, 0.0 }
 0x373   :  { %6276 = vmatprep.mubr.bf16.mxu0 %v1490_v30  ;;  %v1257_v42 = vpop.f32.mrf.mxu1  ;;  %v1393_v43 = vsel %vm1361_vm12, %v1345_v25, %v1377_v36  ;;  %v1480_v54 = vmul.f32 %v1467_v49, %v7296_v35  ;;  %v1481_v7 = vmul.f32 %v1467_v49, %v7298_v32  ;;  %v1478_v11 = vmul.f32 %v1467_v49, %v7302_v40 }
 0x374   :  { %v1380_v15 = vmul.f32 0.2, %v1348_v38  ;;  %v1351_v47 = vadd.f32 %v7261_v17, %v1329_v39  ;;  %6277 = vmatmul.mubr.bf16.vlgmr.msra.gmra.mxu0 %v1491_v31  ;;  %vm1364_vm14 = vcmp.ge.f32.partialorder %v1348_v38, 0.0  ;;  %v1327_v45 = vmul.f32 %v7274_v44, %v1257_v42 }
 0x375   :  { %v6258_v50 = vpop.f32.mrf.mxu1  ;;  %v7309_v51 = vmul.f32 1.4142135, %v1393_v43  ;;  %v1398_v18 = vsel %vm1366_vm13, %v1350_v14, %v1382_v41  ;;  %v1493_v36 = vpack.c.bf16 %v1481_v7, %v1480_v54 }
 0x376   :  { %vm1367_vm15 = vcmp.ge.f32.partialorder %v1351_v47, 0.0  ;;  %v1383_v55 = vmul.f32 0.2, %v1351_v47  ;;  %v1332_v56 = vmul.f32 %v6258_v50, %v7274_v44  ;;  %v1349_v19 = vadd.f32 %v7261_v17, %v1327_v45 }
 0x377   :  { %v1270_v20 = vpop.f32.mrf.mxu1  ;;  %v1479_v12 = vmul.f32 %v1467_v49, %v7309_v51  ;;  %v1396_v22 = vsel %vm1364_vm14, %v1348_v38, %v1380_v15  ;;  %v1414_v37 = vmul.f32 1.4142135, %v1398_v18 }
 0x378   :  { %v1399_v23 = vsel %vm1367_vm15, %v1351_v47, %v1383_v55  ;;  %v1354_v24 = vadd.f32 %v7261_v17, %v1332_v56  ;;  %v1330_v25 = vmul.f32 %v7274_v44, %v1270_v20  ;;  %vm1365_vm0 = vcmp.ge.f32.partialorder %v1349_v19, 0.0 }
 0x379   :  { %v1415_v28 = vmul.f32 1.4142135, %v1399_v23  ;;  %v1381_v29 = vmul.f32 0.2, %v1349_v19  ;;  %v6259_v33 = vpop.f32.mrf.mxu1  ;;  %v1492_v26 = vpack.c.bf16 %v1479_v12, %v1478_v11  ;;  %v1412_v30 = vmul.f32 1.4142135, %v1396_v22 }
 0x37a   :  { %v1386_v34 = vmul.f32 0.2, %v1354_v24  ;;  %v1352_v14 = vadd.f32 %v7261_v17, %v1330_v25  ;;  %v1333_v27 = vmul.f32 %v6259_v33, %v7274_v44  ;;  %vm1370_vm1 = vcmp.ge.f32.partialorder %v1354_v24, 0.0 }
 0x37b   :  { %6280 = vmatprep.mubr.bf16.mxu0 %v1492_v26  ;;  %v1273_v49 = vpop.f32.mrf.mxu1  ;;  %v1397_v31 = vsel %vm1365_vm0, %v1349_v19, %v1381_v29  ;;  %v1485_v43 = vmul.f32 %v7306_v48, %v1415_v28  ;;  %v1482_v50 = vmul.f32 %v7306_v48, %v1412_v30  ;;  %v1484_v7 = vmul.f32 %v7306_v48, %v1414_v37 }
 0x37c   :  { %vm1368_vm2 = vcmp.ge.f32.partialorder %v1352_v14, 0.0  ;;  %v1384_v38 = vmul.f32 0.2, %v1352_v14  ;;  %v1355_v39 = vadd.f32 %v7261_v17, %v1333_v27  ;;  %6281 = vmatmul.mubr.bf16.gmra.mxu0 %v1493_v36  ;;  %v1331_v41 = vmul.f32 %v7274_v44, %v1273_v49 }
 0x37d   :  { %v1413_v42 = vmul.f32 1.4142135, %v1397_v31  ;;  %v1402_v45 = vsel %vm1370_vm1, %v1354_v24, %v1386_v34  ;;  %v1495_v12 = vpack.c.bf16 %v1485_v43, %v1484_v7  ;;  %v1748_v49 = vpack.c.bf16 %v7298_v32, %v7296_v35  ;;  %v7344_v35 = vld [vmem:[%s8761_s8 + $0x8] sm:$0xff]   ;;  %v7349_v32 = vld [vmem:[%s8761_s8 + $0x10] sm:$0xff]  }
 0x37e   :  { %vm1371_vm3 = vcmp.ge.f32.partialorder %v1355_v39, 0.0  ;;  %v1387_v15 = vmul.f32 0.2, %v1355_v39  ;;  %v1353_v47 = vadd.f32 %v7261_v17, %v1331_v41  ;;  %v1400_v55 = vsel %vm1368_vm2, %v1352_v14, %v1384_v38  ;;  %v7407_v38 = vld [vmem:[%s8761_s8 + $0x58] sm:$0xff]   ;;  %v7419_v41 = vld [vmem:[%s8761_s8 + $0x68] sm:$0xff]   ;;  %v6790_v43 = vld [vmem:[%s8753_s3 + $0xf0] sm:$0xff]  }
 0x37f   :  { %v1483_v54 = vmul.f32 %v7306_v48, %v1413_v42  ;;  %v1418_v44 = vmul.f32 1.4142135, %v1402_v45  ;;  %v1416_v11 = vmul.f32 1.4142135, %v1400_v55  ;;  %v1750_v14 = vpack.c.bf16 %v1415_v28, %v1414_v37  ;;  %v7392_v28 = vld [vmem:[%s8761_s8 + $0x48] sm:$0xff]   ;;  %v7397_v37 = vld [vmem:[%s8761_s8 + $0x50] sm:$0xff]  }
 0x380   :  { %vm1369_vm4 = vcmp.ge.f32.partialorder %v1353_v47, 0.0  ;;  %v1385_v56 = vmul.f32 0.2, %v1353_v47  ;;  %v1403_v18 = vsel %vm1371_vm3, %v1355_v39, %v1387_v15  ;;  %v1749_v36 = vpack.c.bf16 %v1413_v42, %v1412_v30  ;;  %v6789_v30 = vld [vmem:[%s8753_s3 + $0xf8] sm:$0xff]   ;;  %v7412_v39 = vld [vmem:[%s8761_s8 + $0x60] sm:$0xff]   ;;  %v7424_v42 = vld [vmem:[%s8761_s8 + $0x70] sm:$0xff]  }
 0x381   :  { %v1494_v19 = vpack.c.bf16 %v1483_v54, %v1482_v50  ;;  %v1419_v20 = vmul.f32 1.4142135, %v1403_v18  ;;  %v1486_v25 = vmul.f32 %v7306_v48, %v1416_v11  ;;  %v1488_v34 = vmul.f32 %v7306_v48, %v1418_v44  ;;  %v7434_v15 = vld [vmem:[%s8761_s8 + $0x78] sm:$0xff]   ;;  %v7442_v45 = vld [vmem:[%s8761_s8 + $0x80] sm:$0xff]   ;;  %v7452_v54 = vld [vmem:[%s8761_s8 + $0x88] sm:$0xff]  }
 0x382   :  { %v1401_v22 = vsel %vm1369_vm4, %v1353_v47, %v1385_v56  ;;  %v1747_v31 = vpack.c.bf16 %v7309_v51, %v7302_v40  ;;  %v7380_v40 = vld [vmem:[%s8761_s8 + $0x38] sm:$0xff]   ;;  %v7385_v51 = vld [vmem:[%s8761_s8 + $0x40] sm:$0xff]   ;;  %v6791_v47 = vld [vmem:[%s8753_s3 + $0xe8] sm:$0xff]   ;;  %8779 = vst [vmem:[#allocation2_spill] sm:$0xff] %v7452_v54 }
 0x383   :  { %6284 = vmatprep.mubr.bf16.mxu0 %v1494_v19  ;;  %v1752_v23 = vpack.c.bf16 %v1419_v20, %v1418_v44  ;;  %v1417_v17 = vmul.f32 1.4142135, %v1401_v22  ;;  %v1489_v33 = vmul.f32 %v7306_v48, %v1419_v20  ;;  %v6792_v50 = vld [vmem:[%s8753_s3 + $0xe0] sm:$0xff]   ;;  %v6793_v55 = vld [vmem:[%s8753_s3 + $0xd8] sm:$0xff]   ;;  %v7460_v56 = vld [vmem:[%s8761_s8 + $0x90] sm:$0xff]  }
 0x384   :  { %6285 = vmatmul.mubr.bf16.gmra.mxu0 %v1495_v12  ;;  %8780 = vst [vmem:[#allocation3_spill] sm:$0xff] %v7460_v56  ;;  %v6794_v7 = vld [vmem:[%s8753_s3 + $0xd0] sm:$0xff]   ;;  %v7470_v18 = vld [vmem:[%s8761_s8 + $0x98] sm:$0xff]   ;;  %v7475_v19 = vld [vmem:[%s8761_s8 + $0xa0] sm:$0xff]  }
 0x385   :  { %6292 = vmatprep.subr.bf16.mxu1 %v1752_v23  ;;  %v1751_v24 = vpack.c.bf16 %v1417_v17, %v1416_v11  ;;  %v1487_v29 = vmul.f32 %v7306_v48, %v1417_v17  ;;  %v1497_v27 = vpack.c.bf16 %v1489_v33, %v1488_v34  ;;  %v1746_v48 = vpack.c.bf16 %v7276_v46, %v7280_v52  ;;  %v7356_v46 = vld [vmem:[%s8761_s8 + $0x18] sm:$0xff]   ;;  %v7361_v52 = vld [vmem:[%s8761_s8 + $0x20] sm:$0xff]   ;;  %v6795_v44 = vld [vmem:[%s8753_s3 + $0xc8] sm:$0xff]  }
 0x386   :  { %6293 = vmatpush3.bf16.msra.mxu1 %v1752_v23  ;;  %8781 = vst [vmem:[#allocation4_spill] sm:$0xff] %v7470_v18  ;;  %8782 = vst [vmem:[#allocation5_spill] sm:$0xff] %v7475_v19  ;;  %v6796_v20 = vld [vmem:[%s8753_s3 + $0xc0] sm:$0xff]   ;;  %v7488_v11 = vld [vmem:[%s8761_s8 + $0xa8] sm:$0xff]  }
 0x387   :  { %6294 = vmatprep.subr.bf16.mxu1 %v1751_v24  ;;  %v1496_v26 = vpack.c.bf16 %v1487_v29, %v1486_v25  ;;  %8783 = vst [vmem:[#allocation6_spill] sm:$0xff] %v7488_v11  ;;  %v7493_v12 = vld [vmem:[%s8761_s8 + $0xb0] sm:$0xff]   ;;  %v7500_v22 = vld [vmem:[%s8761_s8 + $0xb8] sm:$0xff]   ;;  %v7505_v23 = vld [vmem:[%s8761_s8 + $0xc0] sm:$0xff]  }
 0x388   :  { %8784 = vst [vmem:[#allocation7_spill] sm:$0xff] %v7493_v12  ;;  %8785 = vst [vmem:[#allocation8_spill] sm:$0xff] %v7500_v22  ;;  %v7512_v17 = vld [vmem:[%s8761_s8 + $0xc8] sm:$0xff]   ;;  %v7524_v25 = vld [vmem:[%s8761_s8 + $0xd8] sm:$0xff]  }
 0x389   :  { %6288 = vmatprep.mubr.bf16.mxu0 %v1496_v26  ;;  %8786 = vst [vmem:[#allocation9_spill] sm:$0xff] %v7505_v23  ;;  %8787 = vst [vmem:[#allocation10_spill] sm:$0xff] %v7512_v17  ;;  %v7529_v29 = vld [vmem:[%s8761_s8 + $0xe0] sm:$0xff]   ;;  %v7536_v33 = vld [vmem:[%s8761_s8 + $0xe8] sm:$0xff]  }
 0x38a   :  { %6295 = vmatpush3.bf16.msra.mxu1 %v1751_v24  ;;  %v7517_v24 = vld [vmem:[%s8761_s8 + $0xd0] sm:$0xff]   ;;  %8789 = vst [vmem:[#allocation12_spill] sm:$0xff] %v7524_v25  ;;  %8790 = vst [vmem:[#allocation13_spill] sm:$0xff] %v7529_v29  ;;  %v7548_v34 = vld [vmem:[%s8761_s8 + $0xf8] sm:$0xff]  }
 0x38b   :  { %6296 = vmatprep.subr.bf16.mxu1 %v1750_v14  ;;  %8788 = vst [vmem:[#allocation11_spill] sm:$0xff] %v7517_v24  ;;  %8791 = vst [vmem:[#allocation14_spill] sm:$0xff] %v7536_v33  ;;  %v7541_v26 = vld [vmem:[%s8761_s8 + $0xf0] sm:$0xff]  }
 0x38c   :  { %6289 = vmatmul.mubr.bf16.gmra.mxu0 %v1497_v27  ;;  %8792 = vst [vmem:[#allocation15_spill] sm:$0xff] %v7541_v26  ;;  %8793 = vst [vmem:[#allocation16_spill] sm:$0xff] %v7548_v34 }
 0x38d   :  { %6388 = vmatprep.mubr.bf16.mxu0 %v7222_v59  ;;  %v1745_v59 = vpack.c.bf16 %v7287_v21, %v7282_v53  ;;  %v7368_v53 = vld [vmem:[%s8761_s8 + $0x28] sm:$0xff]   ;;  %v7373_v21 = vld [vmem:[%s8761_s8 + $0x30] sm:$0xff]  }
 0x38e   :  { %6297 = vmatpush3.bf16.msra.mxu1 %v1750_v14 }
 0x38f   :  { %6298 = vmatprep.subr.bf16.mxu1 %v1749_v36 }
 0x392   :  { %6299 = vmatpush3.bf16.msra.mxu1 %v1749_v36 }
 0x393   :  { %6300 = vmatprep.subr.bf16.mxu1 %v1748_v49 }
 0x396   :  { %6301 = vmatpush3.bf16.msra.mxu1 %v1748_v49 }
 0x397   :  { %6302 = vmatprep.subr.bf16.mxu1 %v1747_v31 }
 0x39a   :  { %6303 = vmatpush3.bf16.msra.mxu1 %v1747_v31 }
 0x39b   :  { %6304 = vmatprep.subr.bf16.mxu1 %v1746_v48 }
 0x39e   :  { %6305 = vmatpush3.bf16.msra.mxu1 %v1746_v48 }
 0x39f   :  { %6306 = vmatprep.subr.bf16.mxu1 %v1745_v59 }
 0x3a2   :  { %6307 = vmatpush3.bf16.msra.mxu1 %v1745_v59 }
 0x3a3   :  { %6452 = vmatprep.subr.bf16.mxu1 %v6789_v30 }
 0x3a5   :  { %6309 = vmatmul.mubr.bf16.vlgmr.msra.gmra.mxu1 %v7344_v35 }
 0x3a6   :  { %6312 = vmatprep.mubr.bf16.mxu1 %v7349_v32  ;;  %6453 = vmatpush3.bf16.msra.mxu1 %v6789_v30 }
 0x3a7   :  { %6454 = vmatprep.subr.bf16.mxu1 %v6790_v43 }
 0x3aa   :  { %6455 = vmatpush3.bf16.msra.mxu1 %v6790_v43 }
 0x3ab   :  { %6456 = vmatprep.subr.bf16.mxu1 %v6791_v47 }
 0x3ad   :  { %6313 = vmatmul.mubr.bf16.gmra.mxu1 %v7356_v46 }
 0x3ae   :  { %6316 = vmatprep.mubr.bf16.mxu1 %v7361_v52  ;;  %6457 = vmatpush3.bf16.msra.mxu1 %v6791_v47 }
 0x3af   :  { %6458 = vmatprep.subr.bf16.mxu1 %v6792_v50 }
 0x3b2   :  { %6459 = vmatpush3.bf16.msra.mxu1 %v6792_v50 }
 0x3b3   :  { %6460 = vmatprep.subr.bf16.mxu1 %v6793_v55 }
 0x3b5   :  { %6317 = vmatmul.mubr.bf16.gmra.mxu1 %v7368_v53 }
 0x3b6   :  { %6320 = vmatprep.mubr.bf16.mxu1 %v7373_v21  ;;  %6461 = vmatpush3.bf16.msra.mxu1 %v6793_v55 }
 0x3b7   :  { %6462 = vmatprep.subr.bf16.mxu1 %v6794_v7 }
 0x3ba   :  { %6463 = vmatpush3.bf16.msra.mxu1 %v6794_v7 }
 0x3bb   :  { %6464 = vmatprep.subr.bf16.mxu1 %v6795_v44 }
 0x3bd   :  { %6321 = vmatmul.mubr.bf16.gmra.mxu1 %v7380_v40 }
 0x3be   :  { %6324 = vmatprep.mubr.bf16.mxu1 %v7385_v51  ;;  %6465 = vmatpush3.bf16.msra.mxu1 %v6795_v44  ;;  %v5547_v44 = vld [vmem:[%s8760_s6 + $0x1] ss:$0 sm:$0xff] }
 0x3bf   :  { %6466 = vmatprep.subr.bf16.mxu1 %v6796_v20 }
 0x3c2   :  { %6467 = vmatpush3.bf16.msra.mxu1 %v6796_v20 }
 0x3c5   :  { %6325 = vmatmul.mubr.bf16.gmra.mxu1 %v7392_v28 }
 0x3c6   :  { %6328 = vmatprep.mubr.bf16.mxu1 %v7397_v37 }
 0x3cd   :  { %6329 = vmatmul.mubr.bf16.gmra.mxu1 %v7407_v38 }
 0x3ce   :  { %6332 = vmatprep.mubr.bf16.mxu1 %v7412_v39 }
 0x3d5   :  { %6333 = vmatmul.mubr.bf16.gmra.mxu1 %v7419_v41 }
 0x3d6   :  { %6336 = vmatprep.mubr.bf16.mxu1 %v7424_v42 }
 0x3dd   :  { %6337 = vmatmul.mubr.bf16.gmra.mxu1 %v7434_v15 }
 0x3de   :  { %6340 = vmatprep.mubr.bf16.mxu1 %v7442_v45 }
 0x3e5   :  { %6341 = vmatmul.mubr.bf16.gmra.mxu1 %v7452_v54 }
 0x3e6   :  { %6344 = vmatprep.mubr.bf16.mxu1 %v7460_v56 }
 0x3ed   :  { %6345 = vmatmul.mubr.bf16.gmra.mxu1 %v7470_v18 }
 0x3ee   :  { %6348 = vmatprep.mubr.bf16.mxu1 %v7475_v19 }
 0x3f5   :  { %6349 = vmatmul.mubr.bf16.gmra.mxu1 %v7488_v11 }
 0x3f6   :  { %6352 = vmatprep.mubr.bf16.mxu1 %v7493_v12 }
 0x3fd   :  { %6353 = vmatmul.mubr.bf16.gmra.mxu1 %v7500_v22 }
 0x3fe   :  { %6356 = vmatprep.mubr.bf16.mxu1 %v7505_v23 }
 0x405   :  { %6357 = vmatmul.mubr.bf16.gmra.mxu1 %v7512_v17 }
 0x406   :  { %6360 = vmatprep.mubr.bf16.mxu1 %v7517_v24 }
 0x40d   :  { %6361 = vmatmul.mubr.bf16.gmra.mxu1 %v7524_v25 }
 0x40e   :  { %6364 = vmatprep.mubr.bf16.mxu1 %v7529_v29 }
 0x415   :  { %6365 = vmatmul.mubr.bf16.gmra.mxu1 %v7536_v33 }
 0x416   :  { %6368 = vmatprep.mubr.bf16.mxu1 %v7541_v26 }
 0x41d   :  { %6369 = vmatmul.mubr.bf16.gmra.mxu1 %v7548_v34 }
 0x434   :  { %v6278_v14 = vpop.f32.mrf.mxu0 }
 0x436   :  { %v7551_v27 = vpop.f32.mrf.mxu0 }
 0x438   :  { %v6279_v36 = vpop.f32.mrf.mxu0 }
 0x43a   :  { %v1583_v49 = vpop.f32.mrf.mxu0 }
 0x43c   :  { %v6282_v31 = vpop.f32.mrf.mxu0 }
 0x43e   :  { %v1596_v48 = vpop.f32.mrf.mxu0 }
 0x440   :  { %v6283_v59 = vpop.f32.mrf.mxu0 }
 0x442   :  { %v1599_v30 = vpop.f32.mrf.mxu0 }
 0x444   :  { %v6286_v43 = vpop.f32.mrf.mxu0 }
 0x445   :  { %v1659_v12 = vadd.f32 %v6286_v43, %v5547_v44 }
 0x446   :  { %v1612_v47 = vpop.f32.mrf.mxu0 }
 0x448   :  { %v6287_v50 = vpop.f32.mrf.mxu0 }
 0x449   :  { %v1660_v24 = vadd.f32 %v6287_v50, %v5547_v44  ;;  %v1657_v50 = vadd.f32 %v5547_v44, %v1612_v47 }
 0x44a   :  { %v1615_v55 = vpop.f32.mrf.mxu0 }
 0x44b   :  { %v1676_v56 = vadd.f32 %v7241_v4, %v1660_v24  ;;  %v1658_v54 = vadd.f32 %v5547_v44, %v1615_v55  ;;  %v1654_v4 = vadd.f32 %v5547_v44, %v1599_v30 }
 0x44c   :  { %v6290_v7 = vpop.f32.mrf.mxu0 }
 0x44d   :  { %v1663_v34 = vadd.f32 %v6290_v7, %v5547_v44 }
 0x44e   :  { %v1628_v20 = vpop.f32.mrf.mxu0 }
 0x44f   :  { %v1661_v33 = vadd.f32 %v5547_v44, %v1628_v20  ;;  %v1679_v17 = vadd.f32 %v7245_v6, %v1663_v34  ;;  %v1656_v6 = vadd.f32 %v6283_v59, %v5547_v44  ;;  %v1649_v34 = vadd.f32 %v5547_v44, %v7551_v27 }
 0x450   :  { %v6291_v26 = vpop.f32.mrf.mxu0 }
 0x451   :  { %v1664_v29 = vadd.f32 %v6291_v26, %v5547_v44  ;;  %v1677_v11 = vadd.f32 %v1661_v33, %v7250_v10  ;;  %v1675_v26 = vadd.f32 %v7237_v2, %v1659_v12  ;;  %v1673_v10 = vadd.f32 %v1657_v50, %v7239_v3  ;;  %v7569_v2 = vld.sshfl [vmem:[%s8754_s0 + $0xa] sm:$0x11 pattern:$0x75316420] }
 0x452   :  { %v1631_v25 = vpop.f32.mrf.mxu0  ;;  %v1651_v3 = vadd.f32 %v6278_v14, %v5547_v44  ;;  %v1665_v59 = vadd.f32 %v1649_v34, %v7217_v58 }
 0x453   :  { %v1680_v23 = vadd.f32 %v7253_v13, %v1664_v29  ;;  %v1662_v22 = vadd.f32 %v5547_v44, %v1631_v25  ;;  %v1674_v13 = vadd.f32 %v1658_v54, %v7243_v5  ;;  %v2239_v25 = vpack.c.bf16 %v1676_v56, %v1675_v26 }
 0x454   :  { %v1655_v29 = vadd.f32 %v6282_v31, %v5547_v44  ;;  %v1652_v5 = vadd.f32 %v6279_v36, %v5547_v44  ;;  %v1670_v54 = vadd.f32 %v1654_v4, %v7235_v1  ;;  %v1667_v1 = vadd.f32 %v7215_v57, %v1651_v3  ;;  %v6799_v4 = vld [vmem:[%s8753_s3 + $0x128] sm:$0xff]  }
 0x455   :  { %v1678_v19 = vadd.f32 %v1662_v22, %v7256_v16  ;;  %v2241_v18 = vpack.c.bf16 %v1680_v23, %v1679_v17  ;;  %v1672_v16 = vadd.f32 %v7233_v0, %v1656_v6  ;;  %v2238_v22 = vpack.c.bf16 %v1674_v13, %v1673_v10 }
 0x456   :  { %v2569_v0 = vrot.slane %v7569_v2, %v6928_v8  ;;  %v1668_v12 = vadd.f32 %v7225_v60, %v1652_v5  ;;  %v1650_v23 = vadd.f32 %v5547_v44, %v1583_v49 }
 0x457   :  { %6372 = vmatprep.subr.bf16.mxu0 %v2241_v18  ;;  %v2240_v7 = vpack.c.bf16 %v1678_v19, %v1677_v11  ;;  %v1653_v19 = vadd.f32 %v5547_v44, %v1596_v48  ;;  %v6797_v44 = vld [vmem:[%s8753_s3 + $0x138] sm:$0xff]  }
 0x458   :  { %6373 = vmatpush3.bf16.msra.mxu0 %v2241_v18  ;;  %v1671_v18 = vadd.f32 %v7229_v62, %v1655_v29  ;;  %v7577_v33 = vrot.slane %v2569_v0, %v6930_v9  ;;  %v1666_v14 = vadd.f32 %v1650_v23, %v7227_v61  ;;  %v2235_v48 = vpack.c.bf16 %v1668_v12, %v1667_v1 }
 0x459   :  { %6374 = vmatprep.subr.bf16.mxu0 %v2240_v7  ;;  %v1669_v11 = vadd.f32 %v1653_v19, %v7231_v63 }
 0x45a   :  { %v2237_v56 = vpack.c.bf16 %v1672_v16, %v1671_v18  ;;  %v2234_v55 = vpack.c.bf16 %v1666_v14, %v1665_v59 }
 0x45b   :  { %v2236_v24 = vpack.c.bf16 %v1670_v54, %v1669_v11 }
 0x45c   :  { %6375 = vmatpush3.bf16.msra.mxu0 %v2240_v7 }
 0x45d   :  { %6376 = vmatprep.subr.bf16.mxu0 %v2239_v25 }
 0x460   :  { %6377 = vmatpush3.bf16.msra.mxu0 %v2239_v25  ;;  %v6798_v25 = vld [vmem:[%s8753_s3 + $0x130] sm:$0xff]  }
 0x461   :  { %6378 = vmatprep.subr.bf16.mxu0 %v2238_v22 }
 0x464   :  { %6379 = vmatpush3.bf16.msra.mxu0 %v2238_v22 }
 0x465   :  { %6380 = vmatprep.subr.bf16.mxu0 %v2237_v56  ;;  %v6310_v62 = vpop.f32.mrf.mxu1 }
 0x466   :  { %v2589_v30 = vmul.f32 %v6310_v62, %v7577_v33 }
 0x467   :  { %v1979_v17 = vpop.f32.mrf.mxu1 }
 0x468   :  { %6381 = vmatpush3.bf16.msra.mxu0 %v2237_v56  ;;  %v2587_v60 = vmul.f32 %v7577_v33, %v1979_v17 }
 0x469   :  { %6382 = vmatprep.subr.bf16.mxu0 %v2236_v24  ;;  %v6311_v36 = vpop.f32.mrf.mxu1 }
 0x46a   :  { %v2590_v63 = vmul.f32 %v6311_v36, %v7577_v33 }
 0x46b   :  { %v1982_v31 = vpop.f32.mrf.mxu1 }
 0x46c   :  { %6383 = vmatpush3.bf16.msra.mxu0 %v2236_v24  ;;  %v2588_v49 = vmul.f32 %v7577_v33, %v1982_v31  ;;  %v2652_v43 = vpack.c.bf16 %v2590_v63, %v2589_v30 }
 0x46d   :  { %6384 = vmatprep.subr.bf16.mxu0 %v2235_v48  ;;  %v6314_v57 = vpop.f32.mrf.mxu1 }
 0x46e   :  { %v2651_v27 = vpack.c.bf16 %v2588_v49, %v2587_v60  ;;  %v2593_v50 = vmul.f32 %v6314_v57, %v7577_v33 }
 0x46f   :  { %v1995_v47 = vpop.f32.mrf.mxu1 }
 0x470   :  { %6385 = vmatpush3.bf16.msra.mxu0 %v2235_v48  ;;  %6468 = vmatprep.mubr.bf16.mxu1 %v2651_v27  ;;  %v2591_v7 = vmul.f32 %v7577_v33, %v1995_v47 }
 0x471   :  { %6386 = vmatprep.subr.bf16.mxu0 %v2234_v55  ;;  %v6315_v61 = vpop.f32.mrf.mxu1  ;;  %6469 = vmatmul.mubr.bf16.vlgmr.msra.gmra.mxu1 %v2652_v43 }
 0x472   :  { %v2594_v20 = vmul.f32 %v6315_v61, %v7577_v33 }
 0x473   :  { %v1998_v58 = vpop.f32.mrf.mxu1 }
 0x474   :  { %6387 = vmatpush3.bf16.msra.mxu0 %v2234_v55  ;;  %v2592_v26 = vmul.f32 %v7577_v33, %v1998_v58  ;;  %v2654_v29 = vpack.c.bf16 %v2594_v20, %v2593_v50 }
 0x475   :  { %v6318_v6 = vpop.f32.mrf.mxu1  ;;  %6532 = vmatprep.subr.bf16.mxu0 %v6797_v44 }
 0x476   :  { %v2653_v13 = vpack.c.bf16 %v2592_v26, %v2591_v7 }
 0x477   :  { %v2011_v10 = vpop.f32.mrf.mxu1  ;;  %6389 = vmatmul.mubr.bf16.vlgmr.msra.gmra.mxu0 %v7344_v35  ;;  %v2597_v35 = vmul.f32 %v6318_v6, %v7577_v33 }
 0x478   :  { %6472 = vmatprep.mubr.bf16.mxu1 %v2653_v13  ;;  %6392 = vmatprep.mubr.bf16.mxu0 %v7349_v32  ;;  %v2595_v19 = vmul.f32 %v7577_v33, %v2011_v10 }
 0x479   :  { %v6319_v16 = vpop.f32.mrf.mxu1  ;;  %6473 = vmatmul.mubr.bf16.gmra.mxu1 %v2654_v29  ;;  %6533 = vmatpush3.bf16.msra.mxu0 %v6797_v44 }
 0x47a   :  { %6534 = vmatprep.subr.bf16.mxu0 %v6798_v25  ;;  %v2598_v22 = vmul.f32 %v6319_v16, %v7577_v33 }
 0x47b   :  { %v2014_v18 = vpop.f32.mrf.mxu1 }
 0x47c   :  { %v2596_v5 = vmul.f32 %v7577_v33, %v2014_v18  ;;  %v2656_v56 = vpack.c.bf16 %v2598_v22, %v2597_v35 }
 0x47d   :  { %v6322_v54 = vpop.f32.mrf.mxu1  ;;  %6535 = vmatpush3.bf16.msra.mxu0 %v6798_v25 }
 0x47e   :  { %v2655_v32 = vpack.c.bf16 %v2596_v5, %v2595_v19  ;;  %6536 = vmatprep.subr.bf16.mxu0 %v6799_v4  ;;  %v2601_v17 = vmul.f32 %v6322_v54, %v7577_v33 }
 0x47f   :  { %v2027_v0 = vpop.f32.mrf.mxu1  ;;  %6393 = vmatmul.mubr.bf16.gmra.mxu0 %v7356_v46 }
 0x480   :  { %6476 = vmatprep.mubr.bf16.mxu1 %v2655_v32  ;;  %6396 = vmatprep.mubr.bf16.mxu0 %v7361_v52  ;;  %v2599_v12 = vmul.f32 %v7577_v33, %v2027_v0 }
 0x481   :  { %v6323_v3 = vpop.f32.mrf.mxu1  ;;  %6477 = vmatmul.mubr.bf16.gmra.mxu1 %v2656_v56  ;;  %6537 = vmatpush3.bf16.msra.mxu0 %v6799_v4 }
 0x482   :  { %v2602_v11 = vmul.f32 %v6323_v3, %v7577_v33 }
 0x483   :  { %v2030_v62 = vpop.f32.mrf.mxu1 }
 0x484   :  { %v2600_v23 = vmul.f32 %v7577_v33, %v2030_v62  ;;  %v2658_v34 = vpack.c.bf16 %v2602_v11, %v2601_v17 }
 0x485   :  { %v6326_v24 = vpop.f32.mrf.mxu1 }
 0x486   :  { %v2657_v1 = vpack.c.bf16 %v2600_v23, %v2599_v12  ;;  %v2605_v48 = vmul.f32 %v6326_v24, %v7577_v33  ;;  %v6800_v24 = vld [vmem:[%s8753_s3 + $0x120] sm:$0xff]  }
 0x487   :  { %v2043_v36 = vpop.f32.mrf.mxu1  ;;  %6397 = vmatmul.mubr.bf16.gmra.mxu0 %v7368_v53  ;;  %6538 = vmatprep.subr.bf16.mxu0 %v6800_v24 }
 0x488   :  { %6480 = vmatprep.mubr.bf16.mxu1 %v2657_v1  ;;  %6400 = vmatprep.mubr.bf16.mxu0 %v7373_v21  ;;  %v2603_v63 = vmul.f32 %v7577_v33, %v2043_v36 }
 0x489   :  { %v6327_v46 = vpop.f32.mrf.mxu1  ;;  %6481 = vmatmul.mubr.bf16.gmra.mxu1 %v2658_v34  ;;  %6539 = vmatpush3.bf16.msra.mxu0 %v6800_v24  ;;  %v8803_v24 = vld [vmem:[#allocation11_spill] sm:$0xff] }
 0x48a   :  { %v2606_v52 = vmul.f32 %v6327_v46, %v7577_v33 }
 0x48b   :  { %v2046_v14 = vpop.f32.mrf.mxu1 }
 0x48c   :  { %v2604_v31 = vmul.f32 %v7577_v33, %v2046_v14  ;;  %v2660_v59 = vpack.c.bf16 %v2606_v52, %v2605_v48  ;;  %v8794_v14 = vld [vmem:[#allocation2_spill] sm:$0xff] }
 0x48d   :  { %v6330_v60 = vpop.f32.mrf.mxu1 }
 0x48e   :  { %v2659_v49 = vpack.c.bf16 %v2604_v31, %v2603_v63  ;;  %v2609_v47 = vmul.f32 %v6330_v60, %v7577_v33  ;;  %v6801_v63 = vld [vmem:[%s8753_s3 + $0x118] sm:$0xff]   ;;  %v8795_v31 = vld [vmem:[#allocation3_spill] sm:$0xff] }
 0x48f   :  { %v2059_v30 = vpop.f32.mrf.mxu1  ;;  %6401 = vmatmul.mubr.bf16.gmra.mxu0 %v7380_v40  ;;  %6540 = vmatprep.subr.bf16.mxu0 %v6801_v63 }
 0x490   :  { %6484 = vmatprep.mubr.bf16.mxu1 %v2659_v49  ;;  %6404 = vmatprep.mubr.bf16.mxu0 %v7385_v51  ;;  %v2607_v27 = vmul.f32 %v7577_v33, %v2059_v30 }
 0x491   :  { %v6331_v53 = vpop.f32.mrf.mxu1  ;;  %6485 = vmatmul.mubr.bf16.gmra.mxu1 %v2660_v59  ;;  %6541 = vmatpush3.bf16.msra.mxu0 %v6801_v63  ;;  %v6802_v59 = vld [vmem:[%s8753_s3 + $0x110] sm:$0xff]  }
 0x492   :  { %v2610_v21 = vmul.f32 %v6331_v53, %v7577_v33  ;;  %6542 = vmatprep.subr.bf16.mxu0 %v6802_v59 }
 0x493   :  { %v2062_v57 = vpop.f32.mrf.mxu1 }
 0x494   :  { %v2608_v43 = vmul.f32 %v7577_v33, %v2062_v57  ;;  %v2662_v44 = vpack.c.bf16 %v2610_v21, %v2609_v47 }
 0x495   :  { %v6334_v55 = vpop.f32.mrf.mxu1  ;;  %6543 = vmatpush3.bf16.msra.mxu0 %v6802_v59 }
 0x496   :  { %v2661_v61 = vpack.c.bf16 %v2608_v43, %v2607_v27  ;;  %v2613_v50 = vmul.f32 %v6334_v55, %v7577_v33  ;;  %v8796_v55 = vld [vmem:[#allocation4_spill] sm:$0xff] }
 0x497   :  { %v2075_v20 = vpop.f32.mrf.mxu1  ;;  %6405 = vmatmul.mubr.bf16.gmra.mxu0 %v7392_v28  ;;  %v2562_v28 = vcombine.high %v7569_v2, %v7569_v2 }
 0x498   :  { %6488 = vmatprep.mubr.bf16.mxu1 %v2661_v61  ;;  %6408 = vmatprep.mubr.bf16.mxu0 %v7397_v37  ;;  %v2611_v7 = vmul.f32 %v7577_v33, %v2075_v20  ;;  %v6803_v61 = vld [vmem:[%s8753_s3 + $0x108] sm:$0xff]  }
 0x499   :  { %v6335_v40 = vpop.f32.mrf.mxu1  ;;  %6489 = vmatmul.mubr.bf16.gmra.mxu1 %v2662_v44  ;;  %v2576_v18 = vrot.slane %v2562_v28, %v6928_v8  ;;  %v8797_v44 = vld [vmem:[#allocation5_spill] sm:$0xff]  ;;  %6544 = vmatprep.subr.bf16.mxu0 %v6803_v61  ;;  %v8798_v28 = vld [vmem:[#allocation6_spill] sm:$0xff] }
 0x49a   :  { %v2614_v51 = vmul.f32 %v6335_v40, %v7577_v33  ;;  %6545 = vmatpush3.bf16.msra.mxu0 %v6803_v61  ;;  %v8808_v61 = vld [vmem:[#allocation16_spill] sm:$0xff] }
 0x49b   :  { %v2078_v58 = vpop.f32.mrf.mxu1  ;;  %v7642_v2 = vrot.slane %v2576_v18, %v6930_v9 }
 0x49c   :  { %v2612_v26 = vmul.f32 %v7577_v33, %v2078_v58  ;;  %v2664_v25 = vpack.c.bf16 %v2614_v51, %v2613_v50  ;;  %v6804_v58 = vld [vmem:[%s8753_s3 + $0x100] sm:$0xff]  }
 0x49d   :  { %v6338_v6 = vpop.f32.mrf.mxu1  ;;  %6546 = vmatprep.subr.bf16.mxu0 %v6804_v58 }
 0x49e   :  { %v2663_v13 = vpack.c.bf16 %v2612_v26, %v2611_v7  ;;  %v2617_v19 = vmul.f32 %v6338_v6, %v7577_v33  ;;  %6547 = vmatpush3.bf16.msra.mxu0 %v6804_v58 }
 0x49f   :  { %v2091_v29 = vpop.f32.mrf.mxu1  ;;  %6409 = vmatmul.mubr.bf16.gmra.mxu0 %v7407_v38 }
 0x4a0   :  { %6492 = vmatprep.mubr.bf16.mxu1 %v2663_v13  ;;  %6412 = vmatprep.mubr.bf16.mxu0 %v7412_v39  ;;  %v2615_v4 = vmul.f32 %v7577_v33, %v2091_v29 }
 0x4a1   :  { %v6339_v37 = vpop.f32.mrf.mxu1  ;;  %6493 = vmatmul.mubr.bf16.gmra.mxu1 %v2664_v25 }
 0x4a2   :  { %v2618_v10 = vmul.f32 %v6339_v37, %v7577_v33  ;;  %v8799_v37 = vld [vmem:[#allocation7_spill] sm:$0xff] }
 0x4a3   :  { %v2094_v16 = vpop.f32.mrf.mxu1 }
 0x4a4   :  { %v2616_v22 = vmul.f32 %v7577_v33, %v2094_v16  ;;  %v2666_v35 = vpack.c.bf16 %v2618_v10, %v2617_v19 }
 0x4a5   :  { %v6342_v38 = vpop.f32.mrf.mxu1 }
 0x4a6   :  { %v2665_v5 = vpack.c.bf16 %v2616_v22, %v2615_v4  ;;  %v2621_v3 = vmul.f32 %v6342_v38, %v7642_v2 }
 0x4a7   :  { %v2107_v39 = vpop.f32.mrf.mxu1  ;;  %6413 = vmatmul.mubr.bf16.gmra.mxu0 %v7419_v41 }
 0x4a8   :  { %6496 = vmatprep.mubr.bf16.mxu1 %v2665_v5  ;;  %6416 = vmatprep.mubr.bf16.mxu0 %v7424_v42  ;;  %v2619_v0 = vmul.f32 %v7642_v2, %v2107_v39 }
 0x4a9   :  { %v6343_v54 = vpop.f32.mrf.mxu1  ;;  %6497 = vmatmul.mubr.bf16.gmra.mxu1 %v2666_v35 }
 0x4aa   :  { %v2622_v32 = vmul.f32 %v6343_v54, %v7642_v2  ;;  %v8800_v54 = vld [vmem:[#allocation8_spill] sm:$0xff] }
 0x4ab   :  { %v2110_v56 = vpop.f32.mrf.mxu1 }
 0x4ac   :  { %v2620_v33 = vmul.f32 %v7642_v2, %v2110_v56  ;;  %v2668_v41 = vpack.c.bf16 %v2622_v32, %v2621_v3  ;;  %v8801_v32 = vld [vmem:[#allocation9_spill] sm:$0xff] }
 0x4ad   :  { %v6346_v11 = vpop.f32.mrf.mxu1 }
 0x4ae   :  { %v2667_v62 = vpack.c.bf16 %v2620_v33, %v2619_v0  ;;  %v2625_v36 = vmul.f32 %v6346_v11, %v7642_v2 }
 0x4af   :  { %v2123_v12 = vpop.f32.mrf.mxu1  ;;  %6417 = vmatmul.mubr.bf16.gmra.mxu0 %v7434_v15 }
 0x4b0   :  { %6500 = vmatprep.mubr.bf16.mxu1 %v2667_v62  ;;  %6420 = vmatprep.mubr.bf16.mxu0 %v7442_v45  ;;  %v2623_v1 = vmul.f32 %v7642_v2, %v2123_v12 }
 0x4b1   :  { %v6347_v42 = vpop.f32.mrf.mxu1  ;;  %6501 = vmatmul.mubr.bf16.gmra.mxu1 %v2668_v41 }
 0x4b2   :  { %v2626_v23 = vmul.f32 %v6347_v42, %v7642_v2 }
 0x4b3   :  { %v2126_v17 = vpop.f32.mrf.mxu1 }
 0x4b4   :  { %v2624_v34 = vmul.f32 %v7642_v2, %v2126_v17  ;;  %v2670_v45 = vpack.c.bf16 %v2626_v23, %v2625_v36  ;;  %v8802_v17 = vld [vmem:[#allocation10_spill] sm:$0xff] }
 0x4b5   :  { %v6350_v46 = vpop.f32.mrf.mxu1 }
 0x4b6   :  { %v2669_v15 = vpack.c.bf16 %v2624_v34, %v2623_v1  ;;  %v2629_v21 = vmul.f32 %v6350_v46, %v7642_v2 }
 0x4b7   :  { %v2139_v52 = vpop.f32.mrf.mxu1  ;;  %6421 = vmatmul.mubr.bf16.gmra.mxu0 %v8794_v14 }
 0x4b8   :  { %6504 = vmatprep.mubr.bf16.mxu1 %v2669_v15  ;;  %6424 = vmatprep.mubr.bf16.mxu0 %v8795_v31  ;;  %v2627_v30 = vmul.f32 %v7642_v2, %v2139_v52 }
 0x4b9   :  { %v6351_v48 = vpop.f32.mrf.mxu1  ;;  %6505 = vmatmul.mubr.bf16.gmra.mxu1 %v2670_v45 }
 0x4ba   :  { %v2630_v60 = vmul.f32 %v6351_v48, %v7642_v2  ;;  %v8804_v48 = vld [vmem:[#allocation12_spill] sm:$0xff] }
 0x4bb   :  { %v2142_v49 = vpop.f32.mrf.mxu1 }
 0x4bc   :  { %v2628_v53 = vmul.f32 %v7642_v2, %v2142_v49  ;;  %v2672_v43 = vpack.c.bf16 %v2630_v60, %v2629_v21  ;;  %v8805_v60 = vld [vmem:[#allocation13_spill] sm:$0xff] }
 0x4bd   :  { %v6354_v57 = vpop.f32.mrf.mxu1 }
 0x4be   :  { %v2671_v27 = vpack.c.bf16 %v2628_v53, %v2627_v30  ;;  %v2633_v50 = vmul.f32 %v6354_v57, %v7642_v2 }
 0x4bf   :  { %v2155_v47 = vpop.f32.mrf.mxu1  ;;  %6425 = vmatmul.mubr.bf16.gmra.mxu0 %v8796_v55  ;;  %v8807_v55 = vld [vmem:[#allocation15_spill] sm:$0xff] }
 0x4c0   :  { %6508 = vmatprep.mubr.bf16.mxu1 %v2671_v27  ;;  %6428 = vmatprep.mubr.bf16.mxu0 %v8797_v44  ;;  %v2631_v7 = vmul.f32 %v7642_v2, %v2155_v47  ;;  %v8806_v47 = vld [vmem:[#allocation14_spill] sm:$0xff]  ;;  %v7711_v44 = vld.sshfl [vmem:[%s8758_s1 + $0xa] sm:$0x11 pattern:$0x75316420] }
 0x4c1   :  { %v6355_v20 = vpop.f32.mrf.mxu1  ;;  %6509 = vmatmul.mubr.bf16.gmra.mxu1 %v2672_v43 }
 0x4c2   :  { %v2634_v40 = vmul.f32 %v6355_v20, %v7642_v2  ;;  %v3035_v20 = vrot.slane %v7711_v44, %v6928_v8 }
 0x4c3   :  { %v2158_v51 = vpop.f32.mrf.mxu1 }
 0x4c4   :  { %v2632_v26 = vmul.f32 %v7642_v2, %v2158_v51  ;;  %v2674_v25 = vpack.c.bf16 %v2634_v40, %v2633_v50  ;;  %v7721_v40 = vld [vmem:[%s8759_s4 + $0x3] ss:$0 sm:$0xff] }
 0x4c5   :  { %v6358_v6 = vpop.f32.mrf.mxu1 }
 0x4c6   :  { %v2673_v13 = vpack.c.bf16 %v2632_v26, %v2631_v7  ;;  %v2637_v19 = vmul.f32 %v6358_v6, %v7642_v2  ;;  %v7729_v6 = vld.sshfl [vmem:[%s8754_s0 + $0xc] sm:$0x11 pattern:$0x75316420] }
 0x4c7   :  { %v2171_v29 = vpop.f32.mrf.mxu1  ;;  %6429 = vmatmul.mubr.bf16.gmra.mxu0 %v8798_v28 }
 0x4c8   :  { %6512 = vmatprep.mubr.bf16.mxu1 %v2673_v13  ;;  %6432 = vmatprep.mubr.bf16.mxu0 %v8799_v37  ;;  %v2635_v22 = vmul.f32 %v7642_v2, %v2171_v29 }
 0x4c9   :  { %v6359_v10 = vpop.f32.mrf.mxu1  ;;  %6513 = vmatmul.mubr.bf16.gmra.mxu1 %v2674_v25 }
 0x4ca   :  { %v2638_v16 = vmul.f32 %v6359_v10, %v7642_v2 }
 0x4cb   :  { %v2174_v4 = vpop.f32.mrf.mxu1 }
 0x4cc   :  { %v2636_v18 = vmul.f32 %v7642_v2, %v2174_v4  ;;  %v2676_v35 = vpack.c.bf16 %v2638_v16, %v2637_v19 }
 0x4cd   :  { %v6362_v38 = vpop.f32.mrf.mxu1 }
 0x4ce   :  { %v2675_v5 = vpack.c.bf16 %v2636_v18, %v2635_v22  ;;  %v2641_v62 = vmul.f32 %v6362_v38, %v7642_v2  ;;  %v3481_v18 = vrot.slane %v7729_v6, %v6928_v8 }
 0x4cf   :  { %v2187_v39 = vpop.f32.mrf.mxu1  ;;  %6433 = vmatmul.mubr.bf16.gmra.mxu0 %v8800_v54 }
 0x4d0   :  { %6516 = vmatprep.mubr.bf16.mxu1 %v2675_v5  ;;  %6436 = vmatprep.mubr.bf16.mxu0 %v8801_v32  ;;  %v2639_v3 = vmul.f32 %v7642_v2, %v2187_v39 }
 0x4d1   :  { %v6363_v56 = vpop.f32.mrf.mxu1  ;;  %6517 = vmatmul.mubr.bf16.gmra.mxu1 %v2676_v35 }
 0x4d2   :  { %v2642_v0 = vmul.f32 %v6363_v56, %v7642_v2 }
 0x4d3   :  { %v2190_v33 = vpop.f32.mrf.mxu1 }
 0x4d4   :  { %v2640_v11 = vmul.f32 %v7642_v2, %v2190_v33  ;;  %v2678_v42 = vpack.c.bf16 %v2642_v0, %v2641_v62 }
 0x4d5   :  { %v6366_v41 = vpop.f32.mrf.mxu1 }
 0x4d6   :  { %v2677_v12 = vpack.c.bf16 %v2640_v11, %v2639_v3  ;;  %v2645_v45 = vmul.f32 %v6366_v41, %v7642_v2 }
 0x4d7   :  { %v2203_v23 = vpop.f32.mrf.mxu1  ;;  %6437 = vmatmul.mubr.bf16.gmra.mxu0 %v8802_v17 }
 0x4d8   :  { %6520 = vmatprep.mubr.bf16.mxu1 %v2677_v12  ;;  %6440 = vmatprep.mubr.bf16.mxu0 %v8803_v24  ;;  %v2643_v46 = vmul.f32 %v7642_v2, %v2203_v23  ;;  %v7748_v12 = vrot.slane %v3481_v18, %v6930_v9 }
 0x4d9   :  { %v6367_v1 = vpop.f32.mrf.mxu1  ;;  %6521 = vmatmul.mubr.bf16.gmra.mxu1 %v2678_v42 }
 0x4da   :  { %v2646_v34 = vmul.f32 %v6367_v1, %v7642_v2 }
 0x4db   :  { %v2206_v36 = vpop.f32.mrf.mxu1 }
 0x4dc   :  { %v2644_v15 = vmul.f32 %v7642_v2, %v2206_v36  ;;  %v2680_v63 = vpack.c.bf16 %v2646_v34, %v2645_v45 }
 0x4dd   :  { %v6370_v52 = vpop.f32.mrf.mxu1 }
 0x4de   :  { %v2679_v14 = vpack.c.bf16 %v2644_v15, %v2643_v46  ;;  %v2649_v57 = vmul.f32 %v6370_v52, %v7642_v2 }
 0x4df   :  { %v2219_v31 = vpop.f32.mrf.mxu1  ;;  %6441 = vmatmul.mubr.bf16.gmra.mxu0 %v8804_v48 }
 0x4e0   :  { %6524 = vmatprep.mubr.bf16.mxu1 %v2679_v14  ;;  %6444 = vmatprep.mubr.bf16.mxu0 %v8805_v60  ;;  %v2647_v53 = vmul.f32 %v7642_v2, %v2219_v31 }
 0x4e1   :  { %v6371_v49 = vpop.f32.mrf.mxu1  ;;  %6525 = vmatmul.mubr.bf16.gmra.mxu1 %v2680_v63 }
 0x4e2   :  { %v2650_v59 = vmul.f32 %v6371_v49, %v7642_v2 }
 0x4e3   :  { %v2222_v30 = vpop.f32.mrf.mxu1 }
 0x4e4   :  { %v2648_v21 = vmul.f32 %v7642_v2, %v2222_v30  ;;  %v2682_v43 = vpack.c.bf16 %v2650_v59, %v2649_v57  ;;  %v7716_v2 = vrot.slane %v3035_v20, %v6930_v9 }
 0x4e6   :  { %v2681_v27 = vpack.c.bf16 %v2648_v21, %v2647_v53 }
 0x4e7   :  { %6445 = vmatmul.mubr.bf16.gmra.mxu0 %v8806_v47  ;;  %v6806_v47 = vld [vmem:[%s8756_s5 + $0xb0] sm:$0xff]  }
 0x4e8   :  { %6528 = vmatprep.mubr.bf16.mxu1 %v2681_v27  ;;  %6448 = vmatprep.mubr.bf16.mxu0 %v8807_v55 }
 0x4e9   :  { %6529 = vmatmul.mubr.bf16.gmra.mxu1 %v2682_v43  ;;  %v6805_v43 = vld [vmem:[%s8756_s5 + $0xb8] sm:$0xff]  }
 0x4ea   :  { %6612 = vmatprep.subr.bf16.mxu1 %v6805_v43 }
 0x4eb   :  { %6613 = vmatpush3.bf16.msra.mxu1 %v6805_v43 }
 0x4ec   :  { %6614 = vmatprep.subr.bf16.mxu1 %v6806_v47 }
 0x4ef   :  { %6449 = vmatmul.mubr.bf16.gmra.mxu0 %v8808_v61  ;;  %6615 = vmatpush3.bf16.msra.mxu1 %v6806_v47 }
 0x531   :  { %v6470_v51 = vpop.f32.mrf.mxu1 }
 0x532   :  { %v3055_v58 = vmul.f32 %v6470_v51, %v7716_v2 }
 0x533   :  { %v2765_v7 = vpop.f32.mrf.mxu1 }
 0x534   :  { %v3125_v26 = vadd.f32 %v7721_v40, %v3055_v58  ;;  %v3053_v50 = vmul.f32 %v7716_v2, %v2765_v7 }
 0x535   :  { %v6471_v13 = vpop.f32.mrf.mxu1 }
 0x536   :  { %vm3189_vm5 = vcmp.ge.f32.partialorder %v3125_v26, 0.0  ;;  %v3253_v25 = vmul.f32 0.2, %v3125_v26  ;;  %v3123_v29 = vadd.f32 %v7721_v40, %v3053_v50  ;;  %v3056_v28 = vmul.f32 %v6471_v13, %v7716_v2 }
 0x537   :  { %v2768_v37 = vpop.f32.mrf.mxu1  ;;  %v7733_v10 = vpop.f32.mrf.mxu0 }
 0x538   :  { %v3317_v16 = vsel %vm3189_vm5, %v3125_v26, %v3253_v25  ;;  %vm3187_vm6 = vcmp.ge.f32.partialorder %v3123_v29, 0.0  ;;  %v3251_v4 = vmul.f32 0.2, %v3123_v29  ;;  %v3126_v22 = vadd.f32 %v7721_v40, %v3056_v28 }
 0x539   :  { %v3054_v19 = vmul.f32 %v7716_v2, %v2768_v37  ;;  %v6474_v38 = vpop.f32.mrf.mxu1  ;;  %v7739_v5 = vpop.f32.mrf.mxu0  ;;  %v3381_v32 = vmul.f32 1.4142135, %v3317_v16 }
 0x53a   :  { %v3315_v35 = vsel %vm3187_vm6, %v3123_v29, %v3251_v4  ;;  %vm3190_vm7 = vcmp.ge.f32.partialorder %v3126_v22, 0.0  ;;  %v3254_v39 = vmul.f32 0.2, %v3126_v22  ;;  %v3059_v54 = vmul.f32 %v6474_v38, %v7716_v2  ;;  %v6807_v38 = vld [vmem:[%s8756_s5 + $0xa8] sm:$0xff]  }
 0x53b   :  { %v3124_v56 = vadd.f32 %v7721_v40, %v3054_v19  ;;  %v2781_v0 = vpop.f32.mrf.mxu1  ;;  %v7743_v33 = vpop.f32.mrf.mxu0  ;;  %v3379_v3 = vmul.f32 1.4142135, %v3315_v35  ;;  %v3501_v48 = vmul.f32 %v7748_v12, %v3381_v32  ;;  %6616 = vmatprep.subr.bf16.mxu1 %v6807_v38 }
 0x53c   :  { %v3318_v11 = vsel %vm3190_vm7, %v3126_v22, %v3254_v39  ;;  %v3129_v62 = vadd.f32 %v7721_v40, %v3059_v54  ;;  %v3057_v41 = vmul.f32 %v7716_v2, %v2781_v0  ;;  %6617 = vmatpush3.bf16.msra.mxu1 %v6807_v38 }
 0x53d   :  { %v3382_v42 = vmul.f32 1.4142135, %v3318_v11  ;;  %vm3188_vm8 = vcmp.ge.f32.partialorder %v3124_v56, 0.0  ;;  %v3252_v23 = vmul.f32 0.2, %v3124_v56  ;;  %v6475_v17 = vpop.f32.mrf.mxu1  ;;  %v7750_v24 = vpop.f32.mrf.mxu0  ;;  %v3499_v30 = vmul.f32 %v7748_v12, %v3379_v3 }
 0x53e   :  { %vm3193_vm9 = vcmp.ge.f32.partialorder %v3129_v62, 0.0  ;;  %v3257_v1 = vmul.f32 0.2, %v3129_v62  ;;  %v3127_v34 = vadd.f32 %v7721_v40, %v3057_v41  ;;  %v3060_v36 = vmul.f32 %v6475_v17, %v7716_v2 }
 0x53f   :  { %v3502_v46 = vmul.f32 %v7748_v12, %v3382_v42  ;;  %v2784_v15 = vpop.f32.mrf.mxu1  ;;  %v3316_v45 = vsel %vm3188_vm8, %v3124_v56, %v3252_v23  ;;  %v7755_v52 = vpop.f32.mrf.mxu0 }
 0x540   :  { %v3321_v14 = vsel %vm3193_vm9, %v3129_v62, %v3257_v1  ;;  %vm3191_vm10 = vcmp.ge.f32.partialorder %v3127_v34, 0.0  ;;  %v3255_v63 = vmul.f32 0.2, %v3127_v34  ;;  %v3130_v31 = vadd.f32 %v7721_v40, %v3060_v36 }
 0x541   :  { %v3058_v60 = vmul.f32 %v7716_v2, %v2784_v15  ;;  %v6478_v49 = vpop.f32.mrf.mxu1  ;;  %v3380_v59 = vmul.f32 1.4142135, %v3316_v45  ;;  %v7761_v53 = vpop.f32.mrf.mxu0  ;;  %v3564_v55 = vpack.c.bf16 %v3502_v46, %v3501_v48  ;;  %v3385_v61 = vmul.f32 1.4142135, %v3321_v14 }
 0x542   :  { %v3319_v21 = vsel %vm3191_vm10, %v3127_v34, %v3255_v63  ;;  %vm3194_vm11 = vcmp.ge.f32.partialorder %v3130_v31, 0.0  ;;  %v3258_v57 = vmul.f32 0.2, %v3130_v31  ;;  %v3063_v27 = vmul.f32 %v6478_v49, %v7716_v2 }
 0x543   :  { %v3128_v20 = vadd.f32 %v7721_v40, %v3058_v60  ;;  %v2797_v51 = vpop.f32.mrf.mxu1  ;;  %v3500_v58 = vmul.f32 %v7748_v12, %v3380_v59  ;;  %v7772_v7 = vpop.f32.mrf.mxu0  ;;  %v3383_v26 = vmul.f32 1.4142135, %v3319_v21  ;;  %v3505_v11 = vmul.f32 %v7748_v12, %v3385_v61 }
 0x544   :  { %v3322_v50 = vsel %vm3194_vm11, %v3130_v31, %v3258_v57  ;;  %v3133_v13 = vadd.f32 %v7721_v40, %v3063_v27  ;;  %v3061_v25 = vmul.f32 %v7716_v2, %v2797_v51 }
 0x545   :  { %v3386_v29 = vmul.f32 1.4142135, %v3322_v50  ;;  %vm3192_vm12 = vcmp.ge.f32.partialorder %v3128_v20, 0.0  ;;  %v3256_v28 = vmul.f32 0.2, %v3128_v20  ;;  %v6479_v37 = vpop.f32.mrf.mxu1  ;;  %v3563_v16 = vpack.c.bf16 %v3500_v58, %v3499_v30  ;;  %v7776_v4 = vpop.f32.mrf.mxu0 }
 0x546   :  { %vm3197_vm13 = vcmp.ge.f32.partialorder %v3133_v13, 0.0  ;;  %v3261_v22 = vmul.f32 0.2, %v3133_v13  ;;  %v3131_v18 = vadd.f32 %v7721_v40, %v3061_v25  ;;  %v3064_v19 = vmul.f32 %v6479_v37, %v7716_v2 }
 0x547   :  { %v3506_v35 = vmul.f32 %v7748_v12, %v3386_v29  ;;  %6548 = vmatprep.mubr.bf16.mxu0 %v3563_v16  ;;  %v2800_v39 = vpop.f32.mrf.mxu1  ;;  %v3320_v54 = vsel %vm3192_vm12, %v3128_v20, %v3256_v28  ;;  %v7784_v32 = vpop.f32.mrf.mxu0  ;;  %v3503_v23 = vmul.f32 %v7748_v12, %v3383_v26 }
 0x548   :  { %v3325_v56 = vsel %vm3197_vm13, %v3133_v13, %v3261_v22  ;;  %vm3195_vm14 = vcmp.ge.f32.partialorder %v3131_v18, 0.0  ;;  %v3259_v0 = vmul.f32 0.2, %v3131_v18  ;;  %v3134_v3 = vadd.f32 %v7721_v40, %v3064_v19  ;;  %6549 = vmatmul.mubr.bf16.vlgmr.msra.gmra.mxu0 %v3564_v55 }
 0x549   :  { %v3062_v62 = vmul.f32 %v7716_v2, %v2800_v39  ;;  %v6482_v41 = vpop.f32.mrf.mxu1  ;;  %v3384_v42 = vmul.f32 1.4142135, %v3320_v54  ;;  %v7790_v17 = vpop.f32.mrf.mxu0  ;;  %v3389_v46 = vmul.f32 1.4142135, %v3325_v56  ;;  %v3566_v63 = vpack.c.bf16 %v3506_v35, %v3505_v11 }
 0x54a   :  { %v3323_v1 = vsel %vm3195_vm14, %v3131_v18, %v3259_v0  ;;  %vm3198_vm15 = vcmp.ge.f32.partialorder %v3134_v3, 0.0  ;;  %v3262_v34 = vmul.f32 0.2, %v3134_v3  ;;  %v3067_v36 = vmul.f32 %v6482_v41, %v7716_v2 }
 0x54b   :  { %v3132_v15 = vadd.f32 %v7721_v40, %v3062_v62  ;;  %v2813_v45 = vpop.f32.mrf.mxu1  ;;  %v3504_v14 = vmul.f32 %v7748_v12, %v3384_v42  ;;  %v7795_v31 = vpop.f32.mrf.mxu0  ;;  %v3387_v48 = vmul.f32 1.4142135, %v3323_v1  ;;  %v3509_v29 = vmul.f32 %v7748_v12, %v3389_v46 }
 0x54c   :  { %v3326_v60 = vsel %vm3198_vm15, %v3134_v3, %v3262_v34  ;;  %v3137_v49 = vadd.f32 %v7721_v40, %v3067_v36  ;;  %v3065_v59 = vmul.f32 %v7716_v2, %v2813_v45 }
 0x54d   :  { %v3390_v30 = vmul.f32 1.4142135, %v3326_v60  ;;  %vm3196_vm0 = vcmp.ge.f32.partialorder %v3132_v15, 0.0  ;;  %v3260_v21 = vmul.f32 0.2, %v3132_v15  ;;  %v6483_v57 = vpop.f32.mrf.mxu1  ;;  %v3565_v27 = vpack.c.bf16 %v3504_v14, %v3503_v23  ;;  %v7799_v43 = vpop.f32.mrf.mxu0 }
 0x54e   :  { %vm3201_vm1 = vcmp.ge.f32.partialorder %v3137_v49, 0.0  ;;  %v3265_v47 = vmul.f32 0.2, %v3137_v49  ;;  %v3135_v55 = vadd.f32 %v7721_v40, %v3065_v59  ;;  %v3068_v61 = vmul.f32 %v6483_v57, %v7716_v2 }
 0x54f   :  { %v3510_v20 = vmul.f32 %v7748_v12, %v3390_v30  ;;  %6552 = vmatprep.mubr.bf16.mxu0 %v3565_v27  ;;  %v2816_v51 = vpop.f32.mrf.mxu1  ;;  %v3324_v58 = vsel %vm3196_vm0, %v3132_v15, %v3260_v21  ;;  %v7804_v26 = vpop.f32.mrf.mxu0  ;;  %v3507_v22 = vmul.f32 %v7748_v12, %v3387_v48  ;;  %v3028_v48 = vcombine.high %v7711_v44, %v7711_v44 }
 0x550   :  { %v3329_v50 = vsel %vm3201_vm1, %v3137_v49, %v3265_v47  ;;  %vm3199_vm2 = vcmp.ge.f32.partialorder %v3135_v55, 0.0  ;;  %v3263_v13 = vmul.f32 0.2, %v3135_v55  ;;  %v3138_v25 = vadd.f32 %v7721_v40, %v3068_v61  ;;  %6553 = vmatmul.mubr.bf16.gmra.mxu0 %v3566_v63 }
 0x551   :  { %v3066_v28 = vmul.f32 %v7716_v2, %v2816_v51  ;;  %v6486_v37 = vpop.f32.mrf.mxu1  ;;  %v3388_v16 = vmul.f32 1.4142135, %v3324_v58  ;;  %v7810_v18 = vpop.f32.mrf.mxu0  ;;  %v3393_v39 = vmul.f32 1.4142135, %v3329_v50  ;;  %v3568_v3 = vpack.c.bf16 %v3510_v20, %v3509_v29 }
 0x552   :  { %v3327_v19 = vsel %vm3199_vm2, %v3135_v55, %v3263_v13  ;;  %vm3202_vm3 = vcmp.ge.f32.partialorder %v3138_v25, 0.0  ;;  %v3266_v38 = vmul.f32 0.2, %v3138_v25  ;;  %v3071_v35 = vmul.f32 %v6486_v37, %v7716_v2 }
 0x553   :  { %v3136_v54 = vadd.f32 %v7721_v40, %v3066_v28  ;;  %v2829_v56 = vpop.f32.mrf.mxu1  ;;  %v3508_v0 = vmul.f32 %v7748_v12, %v3388_v16  ;;  %v7815_v11 = vpop.f32.mrf.mxu0  ;;  %v3391_v62 = vmul.f32 1.4142135, %v3327_v19  ;;  %v3513_v47 = vmul.f32 %v7748_v12, %v3393_v39 }
 0x554   :  { %v3330_v41 = vsel %vm3202_vm3, %v3138_v25, %v3266_v38  ;;  %v3141_v42 = vadd.f32 %v7721_v40, %v3071_v35  ;;  %v3069_v23 = vmul.f32 %v7716_v2, %v2829_v56 }
 0x555   :  { %v3394_v1 = vmul.f32 1.4142135, %v3330_v41  ;;  %vm3200_vm4 = vcmp.ge.f32.partialorder %v3136_v54, 0.0  ;;  %v3264_v34 = vmul.f32 0.2, %v3136_v54  ;;  %v6487_v36 = vpop.f32.mrf.mxu1  ;;  %v3567_v46 = vpack.c.bf16 %v3508_v0, %v3507_v22  ;;  %v7819_v15 = vpop.f32.mrf.mxu0 }
 0x556   :  { %vm3205_vm5 = vcmp.ge.f32.partialorder %v3141_v42, 0.0  ;;  %v3269_v45 = vmul.f32 0.2, %v3141_v42  ;;  %v3139_v14 = vadd.f32 %v7721_v40, %v3069_v23  ;;  %v3072_v63 = vmul.f32 %v6487_v36, %v7716_v2 }
 0x557   :  { %v3514_v60 = vmul.f32 %v7748_v12, %v3394_v1  ;;  %6556 = vmatprep.mubr.bf16.mxu0 %v3567_v46  ;;  %v2832_v49 = vpop.f32.mrf.mxu1  ;;  %v3328_v59 = vsel %vm3200_vm4, %v3136_v54, %v3264_v34  ;;  %v7826_v30 = vpop.f32.mrf.mxu0  ;;  %v3511_v44 = vmul.f32 %v7748_v12, %v3391_v62  ;;  %v3042_v1 = vrot.slane %v3028_v48, %v6928_v8 }
 0x558   :  { %8809 = vst [vmem:[#allocation2_spill] sm:$0xff] %v7826_v30  ;;  %v3333_v21 = vsel %vm3205_vm5, %v3141_v42, %v3269_v45  ;;  %vm3203_vm6 = vcmp.ge.f32.partialorder %v3139_v14, 0.0  ;;  %v3267_v57 = vmul.f32 0.2, %v3139_v14  ;;  %v3142_v27 = vadd.f32 %v7721_v40, %v3072_v63  ;;  %6557 = vmatmul.mubr.bf16.gmra.mxu0 %v3568_v3 }
 0x559   :  { %v3070_v55 = vmul.f32 %v7716_v2, %v2832_v49  ;;  %v6490_v61 = vpop.f32.mrf.mxu1  ;;  %v3392_v20 = vmul.f32 1.4142135, %v3328_v59  ;;  %v7832_v51 = vpop.f32.mrf.mxu0  ;;  %v3397_v25 = vmul.f32 1.4142135, %v3333_v21  ;;  %v3570_v16 = vpack.c.bf16 %v3514_v60, %v3513_v47 }
 0x55a   :  { %8810 = vst [vmem:[#allocation3_spill] sm:$0xff] %v7832_v51  ;;  %v3331_v58 = vsel %vm3203_vm6, %v3139_v14, %v3267_v57  ;;  %vm3206_vm7 = vcmp.ge.f32.partialorder %v3142_v27, 0.0  ;;  %v3270_v50 = vmul.f32 0.2, %v3142_v27  ;;  %v3075_v13 = vmul.f32 %v6490_v61, %v7716_v2 }
 0x55b   :  { %v3140_v29 = vadd.f32 %v7721_v40, %v3070_v55  ;;  %v2845_v28 = vpop.f32.mrf.mxu1  ;;  %v3512_v37 = vmul.f32 %v7748_v12, %v3392_v20  ;;  %v7837_v22 = vpop.f32.mrf.mxu0  ;;  %v3395_v19 = vmul.f32 1.4142135, %v3331_v58  ;;  %v3517_v49 = vmul.f32 %v7748_v12, %v3397_v25 }
 0x55c   :  { %8811 = vst [vmem:[#allocation4_spill] sm:$0xff] %v7837_v22  ;;  %v3334_v38 = vsel %vm3206_vm7, %v3142_v27, %v3270_v50  ;;  %v3145_v35 = vadd.f32 %v7721_v40, %v3075_v13  ;;  %v3073_v39 = vmul.f32 %v7716_v2, %v2845_v28 }
 0x55d   :  { %v3398_v54 = vmul.f32 1.4142135, %v3334_v38  ;;  %vm3204_vm8 = vcmp.ge.f32.partialorder %v3140_v29, 0.0  ;;  %v3268_v56 = vmul.f32 0.2, %v3140_v29  ;;  %v6491_v0 = vpop.f32.mrf.mxu1  ;;  %v3569_v3 = vpack.c.bf16 %v3512_v37, %v3511_v44  ;;  %v7841_v62 = vpop.f32.mrf.mxu0 }
 0x55e   :  { %8812 = vst [vmem:[#allocation5_spill] sm:$0xff] %v7841_v62  ;;  %vm3209_vm9 = vcmp.ge.f32.partialorder %v3145_v35, 0.0  ;;  %v3273_v41 = vmul.f32 0.2, %v3145_v35  ;;  %v3143_v42 = vadd.f32 %v7721_v40, %v3073_v39  ;;  %v3076_v23 = vmul.f32 %v6491_v0, %v7716_v2 }
 0x55f   :  { %v3518_v34 = vmul.f32 %v7748_v12, %v3398_v54  ;;  %6560 = vmatprep.mubr.bf16.mxu0 %v3569_v3  ;;  %v2848_v36 = vpop.f32.mrf.mxu1  ;;  %v3332_v46 = vsel %vm3204_vm8, %v3140_v29, %v3268_v56  ;;  %v7847_v45 = vpop.f32.mrf.mxu0  ;;  %v3515_v48 = vmul.f32 %v7748_v12, %v3395_v19 }
 0x560   :  { %v3337_v14 = vsel %vm3209_vm9, %v3145_v35, %v3273_v41  ;;  %vm3207_vm10 = vcmp.ge.f32.partialorder %v3143_v42, 0.0  ;;  %v3271_v63 = vmul.f32 0.2, %v3143_v42  ;;  %v3146_v60 = vadd.f32 %v7721_v40, %v3076_v23  ;;  %6561 = vmatmul.mubr.bf16.gmra.mxu0 %v3570_v16 }
 0x561   :  { %v3074_v59 = vmul.f32 %v7716_v2, %v2848_v36  ;;  %v6494_v21 = vpop.f32.mrf.mxu1  ;;  %v3396_v57 = vmul.f32 1.4142135, %v3332_v46  ;;  %v7853_v27 = vpop.f32.mrf.mxu0  ;;  %v3401_v20 = vmul.f32 1.4142135, %v3337_v14  ;;  %v3572_v13 = vpack.c.bf16 %v3518_v34, %v3517_v49 }
 0x562   :  { %8813 = vst [vmem:[#allocation6_spill] sm:$0xff] %v7853_v27  ;;  %v3335_v47 = vsel %vm3207_vm10, %v3143_v42, %v3271_v63  ;;  %vm3210_vm11 = vcmp.ge.f32.partialorder %v3146_v60, 0.0  ;;  %v3274_v55 = vmul.f32 0.2, %v3146_v60  ;;  %v3079_v61 = vmul.f32 %v6494_v21, %v7716_v2 }
 0x563   :  { %v3144_v44 = vadd.f32 %v7721_v40, %v3074_v59  ;;  %v2861_v58 = vpop.f32.mrf.mxu1  ;;  %v3516_v50 = vmul.f32 %v7748_v12, %v3396_v57  ;;  %v7858_v25 = vpop.f32.mrf.mxu0  ;;  %v3399_v29 = vmul.f32 1.4142135, %v3335_v47  ;;  %v3474_v41 = vcombine.high %v7729_v6, %v7729_v6 }
 0x564   :  { %v3338_v28 = vsel %vm3210_vm11, %v3146_v60, %v3274_v55  ;;  %v3149_v37 = vadd.f32 %v7721_v40, %v3079_v61  ;;  %v3077_v16 = vmul.f32 %v7716_v2, %v2861_v58  ;;  %v7869_v42 = vrot.slane %v3042_v1, %v6930_v9 }
 0x565   :  { %v3402_v19 = vmul.f32 1.4142135, %v3338_v28  ;;  %vm3208_vm12 = vcmp.ge.f32.partialorder %v3144_v44, 0.0  ;;  %v3272_v38 = vmul.f32 0.2, %v3144_v44  ;;  %v6495_v35 = vpop.f32.mrf.mxu1  ;;  %v3571_v39 = vpack.c.bf16 %v3516_v50, %v3515_v48  ;;  %v7864_v3 = vpop.f32.mrf.mxu0 }
 0x566   :  { %vm3213_vm13 = vcmp.ge.f32.partialorder %v3149_v37, 0.0  ;;  %v3277_v54 = vmul.f32 0.2, %v3149_v37  ;;  %v3147_v56 = vadd.f32 %v7721_v40, %v3077_v16  ;;  %v3080_v0 = vmul.f32 %v6495_v35, %v7716_v2  ;;  %8814 = vst [vmem:[#allocation7_spill] sm:$0xff] %v7864_v3 }
 0x567   :  { %v3522_v23 = vmul.f32 %v7748_v12, %v3402_v19  ;;  %6564 = vmatprep.mubr.bf16.mxu0 %v3571_v39  ;;  %v2864_v34 = vpop.f32.mrf.mxu1  ;;  %v3336_v36 = vsel %vm3208_vm12, %v3144_v44, %v3272_v38  ;;  %v3521_v60 = vmul.f32 %v7748_v12, %v3401_v20  ;;  %v3519_v1 = vmul.f32 %v7748_v12, %v3399_v29  ;;  %v7877_v47 = vpop.f32.mrf.mxu0 }
 0x568   :  { %v3341_v46 = vsel %vm3213_vm13, %v3149_v37, %v3277_v54  ;;  %vm3211_vm14 = vcmp.ge.f32.partialorder %v3147_v56, 0.0  ;;  %v3275_v14 = vmul.f32 0.2, %v3147_v56  ;;  %v3150_v63 = vadd.f32 %v7721_v40, %v3080_v0  ;;  %6565 = vmatmul.mubr.bf16.gmra.mxu0 %v3572_v13 }
 0x569   :  { %v3078_v49 = vmul.f32 %v7716_v2, %v2864_v34  ;;  %v6498_v59 = vpop.f32.mrf.mxu1  ;;  %v3400_v6 = vmul.f32 1.4142135, %v3336_v36  ;;  %v3405_v55 = vmul.f32 1.4142135, %v3341_v46  ;;  %v3574_v20 = vpack.c.bf16 %v3522_v23, %v3521_v60 }
 0x56a   :  { %v3339_v21 = vsel %vm3211_vm14, %v3147_v56, %v3275_v14  ;;  %vm3214_vm15 = vcmp.ge.f32.partialorder %v3150_v63, 0.0  ;;  %v3278_v57 = vmul.f32 0.2, %v3150_v63  ;;  %v3083_v48 = vmul.f32 %v6498_v59, %v7716_v2  ;;  %v7885_v56 = vpop.f32.mrf.mxu0 }
 0x56b   :  { %v3148_v61 = vadd.f32 %v7721_v40, %v3078_v49  ;;  %v2877_v44 = vpop.f32.mrf.mxu1  ;;  %v3520_v58 = vmul.f32 %v7748_v12, %v3400_v6  ;;  %v3403_v50 = vmul.f32 1.4142135, %v3339_v21  ;;  %v3488_v14 = vrot.slane %v3474_v41, %v6928_v8 }
 0x56c   :  { %v3342_v13 = vsel %vm3214_vm15, %v3150_v63, %v3278_v57  ;;  %v3153_v28 = vadd.f32 %v7721_v40, %v3083_v48  ;;  %v3081_v29 = vmul.f32 %v7716_v2, %v2877_v44  ;;  %v3525_v6 = vmul.f32 %v7748_v12, %v3405_v55  ;;  %v7895_v48 = vpop.f32.mrf.mxu0 }
 0x56d   :  { %v3406_v37 = vmul.f32 1.4142135, %v3342_v13  ;;  %vm3212_vm0 = vcmp.ge.f32.partialorder %v3148_v61, 0.0  ;;  %v3276_v16 = vmul.f32 0.2, %v3148_v61  ;;  %v6499_v19 = vpop.f32.mrf.mxu1  ;;  %v3573_v38 = vpack.c.bf16 %v3520_v58, %v3519_v1 }
 0x56e   :  { %vm3217_vm1 = vcmp.ge.f32.partialorder %v3153_v28, 0.0  ;;  %v3281_v35 = vmul.f32 0.2, %v3153_v28  ;;  %v3151_v39 = vadd.f32 %v7721_v40, %v3081_v29  ;;  %v3084_v54 = vmul.f32 %v6499_v19, %v7716_v2 }
 0x56f   :  { %v3340_v0 = vsel %vm3212_vm0, %v3148_v61, %v3276_v16  ;;  %6568 = vmatprep.mubr.bf16.mxu0 %v3573_v38  ;;  %v2880_v23 = vpop.f32.mrf.mxu1  ;;  %v3526_v63 = vmul.f32 %v7748_v12, %v3406_v37  ;;  %v3523_v21 = vmul.f32 %v7748_v12, %v3403_v50  ;;  %v7903_v38 = vpop.f32.mrf.mxu0 }
 0x570   :  { %v3404_v34 = vmul.f32 1.4142135, %v3340_v0  ;;  %v3345_v36 = vsel %vm3217_vm1, %v3153_v28, %v3281_v35  ;;  %vm3215_vm2 = vcmp.ge.f32.partialorder %v3151_v39, 0.0  ;;  %v3279_v46 = vmul.f32 0.2, %v3151_v39  ;;  %6569 = vmatmul.mubr.bf16.gmra.mxu0 %v3574_v20 }
 0x571   :  { %v3154_v60 = vadd.f32 %v7721_v40, %v3084_v54  ;;  %v3082_v49 = vmul.f32 %v7716_v2, %v2880_v23  ;;  %v6502_v59 = vpop.f32.mrf.mxu1  ;;  %v3409_v61 = vmul.f32 1.4142135, %v3345_v36  ;;  %v7901_v28 = vrot.slane %v3488_v14, %v6930_v9 }
 0x572   :  { %v3087_v1 = vmul.f32 %v6502_v59, %v7869_v42  ;;  %v3524_v57 = vmul.f32 %v7748_v12, %v3404_v34  ;;  %v3343_v44 = vsel %vm3215_vm2, %v3151_v39, %v3279_v46  ;;  %v3576_v37 = vpack.c.bf16 %v3526_v63, %v3525_v6 }
 0x573   :  { %vm3218_vm3 = vcmp.ge.f32.partialorder %v3154_v60, 0.0  ;;  %v3282_v41 = vmul.f32 0.2, %v3154_v60  ;;  %v2893_v58 = vpop.f32.mrf.mxu1  ;;  %v3152_v20 = vadd.f32 %v7721_v40, %v3082_v49  ;;  %v3407_v35 = vmul.f32 1.4142135, %v3343_v44  ;;  %v7913_v44 = vpop.f32.mrf.mxu0 }
 0x574   :  { %v3157_v2 = vadd.f32 %v7721_v40, %v3087_v1  ;;  %v3085_v13 = vmul.f32 %v7869_v42, %v2893_v58  ;;  %v3575_v55 = vpack.c.bf16 %v3524_v57, %v3523_v21  ;;  %v3529_v34 = vmul.f32 %v7748_v12, %v3409_v61 }
 0x575   :  { %v3346_v50 = vsel %vm3218_vm3, %v3154_v60, %v3282_v41  ;;  %v6503_v29 = vpop.f32.mrf.mxu1  ;;  %vm3216_vm4 = vcmp.ge.f32.partialorder %v3152_v20, 0.0  ;;  %v3280_v19 = vmul.f32 0.2, %v3152_v20  ;;  %v3527_v58 = vmul.f32 %v7748_v12, %v3407_v35 }
 0x576   :  { %v3410_v16 = vmul.f32 1.4142135, %v3346_v50  ;;  %vm3221_vm5 = vcmp.ge.f32.partialorder %v3157_v2, 0.0  ;;  %6572 = vmatprep.mubr.bf16.mxu0 %v3575_v55  ;;  %v3285_v39 = vmul.f32 0.2, %v3157_v2  ;;  %v3155_v54 = vadd.f32 %v7721_v40, %v3085_v13 }
 0x577   :  { %v3088_v0 = vmul.f32 %v6503_v29, %v7869_v42  ;;  %v2896_v23 = vpop.f32.mrf.mxu1  ;;  %v3344_v46 = vsel %vm3216_vm4, %v3152_v20, %v3280_v19 }
 0x578   :  { %v3530_v36 = vmul.f32 %v7748_v12, %v3410_v16  ;;  %6573 = vmatmul.mubr.bf16.gmra.mxu0 %v3576_v37  ;;  %v3086_v14 = vmul.f32 %v7869_v42, %v2896_v23  ;;  %v3408_v63 = vmul.f32 1.4142135, %v3344_v46  ;;  %v3349_v60 = vsel %vm3221_vm5, %v3157_v2, %v3285_v39 }
 0x579   :  { %vm3219_vm6 = vcmp.ge.f32.partialorder %v3155_v54, 0.0  ;;  %v3283_v49 = vmul.f32 0.2, %v3155_v54  ;;  %v6506_v59 = vpop.f32.mrf.mxu1  ;;  %v3413_v6 = vmul.f32 1.4142135, %v3349_v60  ;;  %v3158_v1 = vadd.f32 %v7721_v40, %v3088_v0  ;;  %v7924_v0 = vpop.f32.mrf.mxu0 }
 0x57a   :  { %v3156_v21 = vadd.f32 %v7721_v40, %v3086_v14  ;;  %v3091_v57 = vmul.f32 %v6506_v59, %v7869_v42  ;;  %v3528_v20 = vmul.f32 %v7748_v12, %v3408_v63  ;;  %v3578_v13 = vpack.c.bf16 %v3530_v36, %v3529_v34 }
 0x57b   :  { %v3347_v61 = vsel %vm3219_vm6, %v3155_v54, %v3283_v49  ;;  %v2909_v41 = vpop.f32.mrf.mxu1  ;;  %v7918_v2 = vmul.f32 %v7901_v28, %v3413_v6  ;;  %vm3222_vm7 = vcmp.ge.f32.partialorder %v3158_v1, 0.0  ;;  %v3286_v50 = vmul.f32 0.2, %v3158_v1 }
 0x57c   :  { %v3411_v55 = vmul.f32 1.4142135, %v3347_v61  ;;  %vm3220_vm8 = vcmp.ge.f32.partialorder %v3156_v21, 0.0  ;;  %v3284_v29 = vmul.f32 0.2, %v3156_v21  ;;  %v3161_v37 = vadd.f32 %v7721_v40, %v3091_v57 }
 0x57d   :  { %v3089_v16 = vmul.f32 %v7869_v42, %v2909_v41  ;;  %v6507_v19 = vpop.f32.mrf.mxu1  ;;  %v3350_v39 = vsel %vm3222_vm7, %v3158_v1, %v3286_v50  ;;  %v3577_v35 = vpack.c.bf16 %v3528_v20, %v3527_v58 }
 0x57e   :  { %v3092_v54 = vmul.f32 %v6507_v19, %v7869_v42  ;;  %v3531_v12 = vmul.f32 %v7901_v28, %v3411_v55  ;;  %v3414_v23 = vmul.f32 1.4142135, %v3350_v39  ;;  %v3348_v34 = vsel %vm3220_vm8, %v3156_v21, %v3284_v29  ;;  %v7930_v21 = vpop.f32.mrf.mxu0 }
 0x57f   :  { %vm3225_vm9 = vcmp.ge.f32.partialorder %v3161_v37, 0.0  ;;  %v3289_v36 = vmul.f32 0.2, %v3161_v37  ;;  %v2912_v46 = vpop.f32.mrf.mxu1  ;;  %v3412_v14 = vmul.f32 1.4142135, %v3348_v34  ;;  %v3159_v63 = vadd.f32 %v7721_v40, %v3089_v16  ;;  %6576 = vmatprep.mubr.bf16.mxu0 %v3577_v35 }
 0x580   :  { %v3162_v60 = vadd.f32 %v7721_v40, %v3092_v54  ;;  %v3090_v49 = vmul.f32 %v7869_v42, %v2912_v46  ;;  %v3534_v59 = vmul.f32 %v7901_v28, %v3414_v23  ;;  %6577 = vmatmul.mubr.bf16.gmra.mxu0 %v3578_v13 }
 0x581   :  { %v3353_v6 = vsel %vm3225_vm9, %v3161_v37, %v3289_v36  ;;  %v6510_v1 = vpop.f32.mrf.mxu1  ;;  %vm3223_vm10 = vcmp.ge.f32.partialorder %v3159_v63, 0.0  ;;  %v3287_v61 = vmul.f32 0.2, %v3159_v63  ;;  %v3532_v50 = vmul.f32 %v7901_v28, %v3412_v14  ;;  %v7943_v14 = vpop.f32.mrf.mxu0 }
 0x582   :  { %v3417_v57 = vmul.f32 1.4142135, %v3353_v6  ;;  %vm3226_vm11 = vcmp.ge.f32.partialorder %v3162_v60, 0.0  ;;  %v3290_v41 = vmul.f32 0.2, %v3162_v60  ;;  %v3160_v58 = vadd.f32 %v7721_v40, %v3090_v49 }
 0x583   :  { %v3095_v20 = vmul.f32 %v6510_v1, %v7869_v42  ;;  %v2925_v55 = vpop.f32.mrf.mxu1  ;;  %v3351_v37 = vsel %vm3223_vm10, %v3159_v63, %v3287_v61  ;;  %v3580_v16 = vpack.c.bf16 %v3534_v59, %v7918_v2  ;;  %v3579_v63 = vpack.c.bf16 %v3532_v50, %v3531_v12  ;;  %v6808_v12 = vld [vmem:[%s8756_s5 + $0xa0] sm:$0xff]  }
 0x584   :  { %v7936_v29 = vmul.f32 %v7901_v28, %v3417_v57  ;;  %v3093_v13 = vmul.f32 %v7869_v42, %v2925_v55  ;;  %v3415_v19 = vmul.f32 1.4142135, %v3351_v37  ;;  %v3354_v39 = vsel %vm3226_vm11, %v3162_v60, %v3290_v41  ;;  %6618 = vmatprep.subr.bf16.mxu1 %v6808_v12 }
 0x585   :  { %vm3224_vm12 = vcmp.ge.f32.partialorder %v3160_v58, 0.0  ;;  %v3288_v54 = vmul.f32 0.2, %v3160_v58  ;;  %v6511_v35 = vpop.f32.mrf.mxu1  ;;  %v3418_v23 = vmul.f32 1.4142135, %v3354_v39  ;;  %v3165_v34 = vadd.f32 %v7721_v40, %v3095_v20  ;;  %6580 = vmatprep.mubr.bf16.mxu0 %v3579_v63  ;;  %6619 = vmatpush3.bf16.msra.mxu1 %v6808_v12 }
 0x586   :  { %v3163_v36 = vadd.f32 %v7721_v40, %v3093_v13  ;;  %v3096_v46 = vmul.f32 %v6511_v35, %v7869_v42  ;;  %v3535_v1 = vmul.f32 %v7901_v28, %v3415_v19  ;;  %v7955_v13 = vpop.f32.mrf.mxu0 }
 0x587   :  { %v3352_v49 = vsel %vm3224_vm12, %v3160_v58, %v3288_v54  ;;  %v2928_v6 = vpop.f32.mrf.mxu1  ;;  %v3538_v2 = vmul.f32 %v7901_v28, %v3418_v23  ;;  %vm3229_vm13 = vcmp.ge.f32.partialorder %v3165_v34, 0.0  ;;  %v3293_v59 = vmul.f32 0.2, %v3165_v34 }
 0x588   :  { %v3416_v60 = vmul.f32 1.4142135, %v3352_v49  ;;  %vm3227_vm14 = vcmp.ge.f32.partialorder %v3163_v36, 0.0  ;;  %v3291_v57 = vmul.f32 0.2, %v3163_v36  ;;  %v3166_v61 = vadd.f32 %v7721_v40, %v3096_v46  ;;  %6581 = vmatmul.mubr.bf16.gmra.mxu0 %v3580_v16 }
 0x589   :  { %v3094_v41 = vmul.f32 %v7869_v42, %v2928_v6  ;;  %v6514_v20 = vpop.f32.mrf.mxu1  ;;  %v3357_v58 = vsel %vm3229_vm13, %v3165_v34, %v3293_v59  ;;  %v3582_v37 = vpack.c.bf16 %v3538_v2, %v7936_v29  ;;  %v7966_v59 = vpop.f32.mrf.mxu0 }
 0x58a   :  { %v3099_v55 = vmul.f32 %v6514_v20, %v7869_v42  ;;  %v3536_v50 = vmul.f32 %v7901_v28, %v3416_v60  ;;  %v3421_v19 = vmul.f32 1.4142135, %v3357_v58  ;;  %v3355_v39 = vsel %vm3227_vm14, %v3163_v36, %v3291_v57  ;;  %v6809_v36 = vld [vmem:[%s8756_s5 + $0x98] sm:$0xff]  }
 0x58b   :  { %vm3230_vm15 = vcmp.ge.f32.partialorder %v3166_v61, 0.0  ;;  %v3294_v54 = vmul.f32 0.2, %v3166_v61  ;;  %v2941_v35 = vpop.f32.mrf.mxu1  ;;  %v3419_v23 = vmul.f32 1.4142135, %v3355_v39  ;;  %v3164_v46 = vadd.f32 %v7721_v40, %v3094_v41  ;;  %6620 = vmatprep.subr.bf16.mxu1 %v6809_v36 }
 0x58c   :  { %v3169_v34 = vadd.f32 %v7721_v40, %v3099_v55  ;;  %v3097_v16 = vmul.f32 %v7869_v42, %v2941_v35  ;;  %v7961_v49 = vmul.f32 %v7901_v28, %v3421_v19  ;;  %v3581_v6 = vpack.c.bf16 %v3536_v50, %v3535_v1  ;;  %6621 = vmatpush3.bf16.msra.mxu1 %v6809_v36  ;;  %v6810_v35 = vld [vmem:[%s8756_s5 + $0x90] sm:$0xff]  }
 0x58d   :  { %v3358_v29 = vsel %vm3230_vm15, %v3166_v61, %v3294_v54  ;;  %v6515_v63 = vpop.f32.mrf.mxu1  ;;  %vm3228_vm0 = vcmp.ge.f32.partialorder %v3164_v46, 0.0  ;;  %v3292_v60 = vmul.f32 0.2, %v3164_v46  ;;  %v3539_v61 = vmul.f32 %v7901_v28, %v3419_v23  ;;  %6622 = vmatprep.subr.bf16.mxu1 %v6810_v35 }
 0x58e   :  { %v3422_v2 = vmul.f32 1.4142135, %v3358_v29  ;;  %vm3233_vm1 = vcmp.ge.f32.partialorder %v3169_v34, 0.0  ;;  %v3297_v57 = vmul.f32 0.2, %v3169_v34  ;;  %v3167_v41 = vadd.f32 %v7721_v40, %v3097_v16  ;;  %6584 = vmatprep.mubr.bf16.mxu0 %v3581_v6 }
 0x58f   :  { %v3100_v20 = vmul.f32 %v6515_v63, %v7869_v42  ;;  %v2944_v12 = vpop.f32.mrf.mxu1  ;;  %v3356_v58 = vsel %vm3228_vm0, %v3164_v46, %v3292_v60  ;;  %v7979_v63 = vpop.f32.mrf.mxu0 }
 0x590   :  { %v3542_v1 = vmul.f32 %v7901_v28, %v3422_v2  ;;  %v3098_v55 = vmul.f32 %v7869_v42, %v2944_v12  ;;  %v3420_v50 = vmul.f32 1.4142135, %v3356_v58  ;;  %v3361_v19 = vsel %vm3233_vm1, %v3169_v34, %v3297_v57  ;;  %6585 = vmatmul.mubr.bf16.gmra.mxu0 %v3582_v37  ;;  %6623 = vmatpush3.bf16.msra.mxu1 %v6810_v35 }
 0x591   :  { %vm3231_vm2 = vcmp.ge.f32.partialorder %v3167_v41, 0.0  ;;  %v3295_v39 = vmul.f32 0.2, %v3167_v41  ;;  %v6518_v54 = vpop.f32.mrf.mxu1  ;;  %v3425_v16 = vmul.f32 1.4142135, %v3361_v19  ;;  %v3170_v29 = vadd.f32 %v7721_v40, %v3100_v20 }
 0x592   :  { %v3168_v23 = vadd.f32 %v7721_v40, %v3098_v55  ;;  %v3103_v46 = vmul.f32 %v6518_v54, %v7869_v42  ;;  %v3540_v34 = vmul.f32 %v7901_v28, %v3420_v50  ;;  %v3584_v2 = vpack.c.bf16 %v3542_v1, %v7961_v49  ;;  %v6811_v55 = vld [vmem:[%s8756_s5 + $0x88] sm:$0xff]  }
 0x593   :  { %v3359_v6 = vsel %vm3231_vm2, %v3167_v41, %v3295_v39  ;;  %v2957_v36 = vpop.f32.mrf.mxu1  ;;  %v7984_v60 = vmul.f32 %v7901_v28, %v3425_v16  ;;  %vm3234_vm3 = vcmp.ge.f32.partialorder %v3170_v29, 0.0  ;;  %v3298_v20 = vmul.f32 0.2, %v3170_v29  ;;  %v7993_v39 = vpop.f32.mrf.mxu0  ;;  %6624 = vmatprep.subr.bf16.mxu1 %v6811_v55 }
 0x594   :  { %v3423_v57 = vmul.f32 1.4142135, %v3359_v6  ;;  %vm3232_vm4 = vcmp.ge.f32.partialorder %v3168_v23, 0.0  ;;  %v3296_v37 = vmul.f32 0.2, %v3168_v23  ;;  %v3173_v12 = vadd.f32 %v7721_v40, %v3103_v46  ;;  %6625 = vmatpush3.bf16.msra.mxu1 %v6811_v55 }
 0x595   :  { %v3101_v58 = vmul.f32 %v7869_v42, %v2957_v36  ;;  %v6519_v41 = vpop.f32.mrf.mxu1  ;;  %v3362_v49 = vsel %vm3234_vm3, %v3170_v29, %v3298_v20  ;;  %v3583_v50 = vpack.c.bf16 %v3540_v34, %v3539_v61 }
 0x596   :  { %v3104_v1 = vmul.f32 %v6519_v41, %v7869_v42  ;;  %v3543_v19 = vmul.f32 %v7901_v28, %v3423_v57  ;;  %v3426_v54 = vmul.f32 1.4142135, %v3362_v49  ;;  %v3360_v35 = vsel %vm3232_vm4, %v3168_v23, %v3296_v37  ;;  %v6812_v23 = vld [vmem:[%s8756_s5 + $0x80] sm:$0xff]  }
 0x597   :  { %vm3237_vm5 = vcmp.ge.f32.partialorder %v3173_v12, 0.0  ;;  %v3301_v16 = vmul.f32 0.2, %v3173_v12  ;;  %v2960_v46 = vpop.f32.mrf.mxu1  ;;  %v3424_v6 = vmul.f32 1.4142135, %v3360_v35  ;;  %v3171_v36 = vadd.f32 %v7721_v40, %v3101_v58  ;;  %6588 = vmatprep.mubr.bf16.mxu0 %v3583_v50  ;;  %v8002_v58 = vpop.f32.mrf.mxu0  ;;  %6626 = vmatprep.subr.bf16.mxu1 %v6812_v23 }
 0x598   :  { %v3174_v51 = vadd.f32 %v7721_v40, %v3104_v1  ;;  %v3102_v29 = vmul.f32 %v7869_v42, %v2960_v46  ;;  %v3546_v61 = vmul.f32 %v7901_v28, %v3426_v54  ;;  %6589 = vmatmul.mubr.bf16.gmra.mxu0 %v3584_v2  ;;  %8815 = vst [vmem:[#allocation8_spill] sm:$0xff] %v8002_v58  ;;  %v8007_v41 = vld [vmem:[%s8759_s4 + $0x3] ss:$0 sm:$0xff] }
 0x599   :  { %v3365_v34 = vsel %vm3237_vm5, %v3173_v12, %v3301_v16  ;;  %v6522_v57 = vpop.f32.mrf.mxu1  ;;  %vm3235_vm6 = vcmp.ge.f32.partialorder %v3171_v36, 0.0  ;;  %v3299_v37 = vmul.f32 0.2, %v3171_v36  ;;  %v3544_v1 = vmul.f32 %v7901_v28, %v3424_v6  ;;  %6627 = vmatpush3.bf16.msra.mxu1 %v6812_v23  ;;  %v8021_v30 = vpop.f32.mrf.mxu0 }
 0x59a   :  { %v3429_v20 = vmul.f32 1.4142135, %v3365_v34  ;;  %vm3238_vm7 = vcmp.ge.f32.partialorder %v3174_v51, 0.0  ;;  %v3302_v40 = vmul.f32 0.2, %v3174_v51  ;;  %v3172_v12 = vadd.f32 %v8007_v41, %v3102_v29  ;;  %8816 = vst [vmem:[#allocation9_spill] sm:$0xff] %v8021_v30 }
 0x59b   :  { %v3107_v55 = vmul.f32 %v6522_v57, %v7869_v42  ;;  %v2973_v49 = vpop.f32.mrf.mxu1  ;;  %v3363_v2 = vsel %vm3235_vm6, %v3171_v36, %v3299_v37  ;;  %v3586_v35 = vpack.c.bf16 %v3546_v61, %v7984_v60  ;;  %v3585_v37 = vpack.c.bf16 %v3544_v1, %v3543_v19 }
 0x59c   :  { %v8013_v50 = vmul.f32 %v7901_v28, %v3429_v20  ;;  %v3105_v54 = vmul.f32 %v7869_v42, %v2973_v49  ;;  %v3427_v16 = vmul.f32 1.4142135, %v3363_v2  ;;  %v3366_v46 = vsel %vm3238_vm7, %v3174_v51, %v3302_v40 }
 0x59d   :  { %vm3236_vm8 = vcmp.ge.f32.partialorder %v3172_v12, 0.0  ;;  %v3300_v29 = vmul.f32 0.2, %v3172_v12  ;;  %v6523_v34 = vpop.f32.mrf.mxu1  ;;  %v3430_v57 = vmul.f32 1.4142135, %v3366_v46  ;;  %v3177_v62 = vadd.f32 %v8007_v41, %v3107_v55  ;;  %6592 = vmatprep.mubr.bf16.mxu0 %v3585_v37 }
 0x59e   :  { %v3175_v6 = vadd.f32 %v8007_v41, %v3105_v54  ;;  %v3108_v20 = vmul.f32 %v6523_v34, %v7869_v42  ;;  %v3547_v60 = vmul.f32 %v7901_v28, %v3427_v16  ;;  %v8030_v16 = vpop.f32.mrf.mxu0 }
 0x59f   :  { %v3364_v36 = vsel %vm3236_vm8, %v3172_v12, %v3300_v29  ;;  %v2976_v49 = vpop.f32.mrf.mxu1  ;;  %v3550_v61 = vmul.f32 %v7901_v28, %v3430_v57  ;;  %vm3241_vm9 = vcmp.ge.f32.partialorder %v3177_v62, 0.0  ;;  %v3305_v23 = vmul.f32 0.2, %v3177_v62  ;;  %8817 = vst [vmem:[#allocation10_spill] sm:$0xff] %v8030_v16 }
 0x5a0   :  { %v3428_v51 = vmul.f32 1.4142135, %v3364_v36  ;;  %vm3239_vm10 = vcmp.ge.f32.partialorder %v3175_v6, 0.0  ;;  %v3303_v40 = vmul.f32 0.2, %v3175_v6  ;;  %v3178_v55 = vadd.f32 %v8007_v41, %v3108_v20  ;;  %6593 = vmatmul.mubr.bf16.gmra.mxu0 %v3586_v35 }
 0x5a1   :  { %v3106_v2 = vmul.f32 %v7869_v42, %v2976_v49  ;;  %v6526_v54 = vpop.f32.mrf.mxu1  ;;  %v3369_v46 = vsel %vm3241_vm9, %v3177_v62, %v3305_v23  ;;  %v3588_v1 = vpack.c.bf16 %v3550_v61, %v8013_v50 }
 0x5a2   :  { %v3111_v19 = vmul.f32 %v6526_v54, %v7869_v42  ;;  %v3548_v12 = vmul.f32 %v7901_v28, %v3428_v51  ;;  %v3433_v29 = vmul.f32 1.4142135, %v3369_v46  ;;  %v3367_v34 = vsel %vm3239_vm10, %v3175_v6, %v3303_v40  ;;  %v8038_v6 = vpop.f32.mrf.mxu0 }
 0x5a3   :  { %vm3242_vm11 = vcmp.ge.f32.partialorder %v3178_v55, 0.0  ;;  %v3306_v57 = vmul.f32 0.2, %v3178_v55  ;;  %v2989_v36 = vpop.f32.mrf.mxu1  ;;  %v3431_v20 = vmul.f32 1.4142135, %v3367_v34  ;;  %v3176_v37 = vadd.f32 %v8007_v41, %v3106_v2  ;;  %8818 = vst [vmem:[#allocation11_spill] sm:$0xff] %v8038_v6 }
 0x5a4   :  { %v3181_v49 = vadd.f32 %v8007_v41, %v3111_v19  ;;  %v3109_v62 = vmul.f32 %v7869_v42, %v2989_v36  ;;  %v8036_v35 = vmul.f32 %v7901_v28, %v3433_v29  ;;  %v3587_v50 = vpack.c.bf16 %v3548_v12, %v3547_v60 }
 0x5a5   :  { %v3370_v51 = vsel %vm3242_vm11, %v3178_v55, %v3306_v57  ;;  %v6527_v23 = vpop.f32.mrf.mxu1  ;;  %vm3240_vm12 = vcmp.ge.f32.partialorder %v3176_v37, 0.0  ;;  %v3304_v54 = vmul.f32 0.2, %v3176_v37  ;;  %v3551_v34 = vmul.f32 %v7901_v28, %v3431_v20 }
 0x5a6   :  { %v3434_v61 = vmul.f32 1.4142135, %v3370_v51  ;;  %vm3245_vm13 = vcmp.ge.f32.partialorder %v3181_v49, 0.0  ;;  %v3309_v40 = vmul.f32 0.2, %v3181_v49  ;;  %v3179_v46 = vadd.f32 %v8007_v41, %v3109_v62  ;;  %6596 = vmatprep.mubr.bf16.mxu0 %v3587_v50  ;;  %v8048_v50 = vpop.f32.mrf.mxu0 }
 0x5a7   :  { %v3112_v2 = vmul.f32 %v6527_v23, %v7869_v42  ;;  %v2992_v19 = vpop.f32.mrf.mxu1  ;;  %v3368_v55 = vsel %vm3240_vm12, %v3176_v37, %v3304_v54  ;;  %8819 = vst [vmem:[#allocation12_spill] sm:$0xff] %v8048_v50 }
 0x5a8   :  { %v3554_v29 = vmul.f32 %v7901_v28, %v3434_v61  ;;  %v3110_v60 = vmul.f32 %v7869_v42, %v2992_v19  ;;  %v3432_v12 = vmul.f32 1.4142135, %v3368_v55  ;;  %v3373_v57 = vsel %vm3245_vm13, %v3181_v49, %v3309_v40  ;;  %6597 = vmatmul.mubr.bf16.gmra.mxu0 %v3588_v1 }
 0x5a9   :  { %vm3243_vm14 = vcmp.ge.f32.partialorder %v3179_v46, 0.0  ;;  %v3307_v36 = vmul.f32 0.2, %v3179_v46  ;;  %v6530_v51 = vpop.f32.mrf.mxu1  ;;  %v3437_v22 = vmul.f32 1.4142135, %v3373_v57  ;;  %v3182_v6 = vadd.f32 %v8007_v41, %v3112_v2 }
 0x5aa   :  { %v3180_v62 = vadd.f32 %v8007_v41, %v3110_v60  ;;  %v3115_v23 = vmul.f32 %v6530_v51, %v7869_v42  ;;  %v3552_v37 = vmul.f32 %v7901_v28, %v3432_v12  ;;  %v3590_v54 = vpack.c.bf16 %v3554_v29, %v8036_v35  ;;  %v8057_v51 = vpop.f32.mrf.mxu0 }
 0x5ab   :  { %v3371_v20 = vsel %vm3243_vm14, %v3179_v46, %v3307_v36  ;;  %v3005_v61 = vpop.f32.mrf.mxu1  ;;  %v3557_v49 = vmul.f32 %v7901_v28, %v3437_v22  ;;  %vm3246_vm15 = vcmp.ge.f32.partialorder %v3182_v6, 0.0  ;;  %v3310_v19 = vmul.f32 0.2, %v3182_v6  ;;  %8820 = vst [vmem:[#allocation13_spill] sm:$0xff] %v8057_v51 }
 0x5ac   :  { %v3435_v40 = vmul.f32 1.4142135, %v3371_v20  ;;  %vm3244_vm0 = vcmp.ge.f32.partialorder %v3180_v62, 0.0  ;;  %v3308_v2 = vmul.f32 0.2, %v3180_v62  ;;  %v3185_v1 = vadd.f32 %v8007_v41, %v3115_v23 }
 0x5ad   :  { %v3113_v55 = vmul.f32 %v7869_v42, %v3005_v61  ;;  %v6531_v60 = vpop.f32.mrf.mxu1  ;;  %v3374_v57 = vsel %vm3246_vm15, %v3182_v6, %v3310_v19  ;;  %v3589_v36 = vpack.c.bf16 %v3552_v37, %v3551_v34 }
 0x5ae   :  { %v3116_v46 = vmul.f32 %v6531_v60, %v7869_v42  ;;  %v3555_v12 = vmul.f32 %v7901_v28, %v3435_v40  ;;  %v3438_v35 = vmul.f32 1.4142135, %v3374_v57  ;;  %v3372_v22 = vsel %vm3244_vm0, %v3180_v62, %v3308_v2  ;;  %v8063_v62 = vpop.f32.mrf.mxu0 }
 0x5af   :  { %vm3249_vm1 = vcmp.ge.f32.partialorder %v3185_v1, 0.0  ;;  %v3313_v29 = vmul.f32 0.2, %v3185_v1  ;;  %v3008_v20 = vpop.f32.mrf.mxu1  ;;  %v3436_v50 = vmul.f32 1.4142135, %v3372_v22  ;;  %v3183_v30 = vadd.f32 %v8007_v41, %v3113_v55  ;;  %6600 = vmatprep.mubr.bf16.mxu0 %v3589_v36  ;;  %8821 = vst [vmem:[#allocation14_spill] sm:$0xff] %v8063_v62 }
 0x5b0   :  { %v3186_v23 = vadd.f32 %v8007_v41, %v3116_v46  ;;  %v3114_v6 = vmul.f32 %v7869_v42, %v3008_v20  ;;  %v3558_v61 = vmul.f32 %v7901_v28, %v3438_v35  ;;  %6601 = vmatmul.mubr.bf16.gmra.mxu0 %v3590_v54 }
 0x5b1   :  { %v3377_v34 = vsel %vm3249_vm1, %v3185_v1, %v3313_v29  ;;  %vm3247_vm2 = vcmp.ge.f32.partialorder %v3183_v30, 0.0  ;;  %v3311_v40 = vmul.f32 0.2, %v3183_v30  ;;  %v3556_v55 = vmul.f32 %v7901_v28, %v3436_v50  ;;  %v8068_v29 = vpop.f32.mrf.mxu0 }
 0x5b2   :  { %v3441_v37 = vmul.f32 1.4142135, %v3377_v34  ;;  %vm3250_vm3 = vcmp.ge.f32.partialorder %v3186_v23, 0.0  ;;  %v3314_v19 = vmul.f32 0.2, %v3186_v23  ;;  %v3184_v2 = vadd.f32 %v8007_v41, %v3114_v6  ;;  %8822 = vst [vmem:[#allocation15_spill] sm:$0xff] %v8068_v29 }
 0x5b3   :  { %v3592_v60 = vpack.c.bf16 %v3558_v61, %v3557_v49  ;;  %v3375_v46 = vsel %vm3247_vm2, %v3183_v30, %v3311_v40  ;;  %v3591_v22 = vpack.c.bf16 %v3556_v55, %v3555_v12  ;;  %v8073_v30 = vpop.f32.mrf.mxu0 }
 0x5b4   :  { %v3561_v57 = vmul.f32 %v7901_v28, %v3441_v37  ;;  %v3439_v42 = vmul.f32 1.4142135, %v3375_v46  ;;  %v3378_v36 = vsel %vm3250_vm3, %v3186_v23, %v3314_v19  ;;  %vm3248_vm4 = vcmp.ge.f32.partialorder %v3184_v2, 0.0  ;;  %8823 = vst [vmem:[#allocation16_spill] sm:$0xff] %v8073_v30 }
 0x5b5   :  { %v3312_v1 = vmul.f32 0.2, %v3184_v2  ;;  %v3442_v35 = vmul.f32 1.4142135, %v3378_v36  ;;  %6604 = vmatprep.mubr.bf16.mxu0 %v3591_v22  ;;  %v8075_v6 = vpop.f32.mrf.mxu0 }
 0x5b6   :  { %v3559_v20 = vmul.f32 %v7901_v28, %v3439_v42  ;;  %8824 = vst [vmem:[#allocation17_spill] sm:$0xff] %v8075_v6  ;;  %v8110_v22 = vld.sshfl [vmem:[%s8758_s1 + $0xc] sm:$0x11 pattern:$0x75316420] }
 0x5b7   :  { %v3376_v54 = vsel %vm3248_vm4, %v3184_v2, %v3312_v1  ;;  %v3562_v34 = vmul.f32 %v7901_v28, %v3442_v35  ;;  %v8077_v12 = vpop.f32.mrf.mxu0 }
 0x5b8   :  { %v3440_v41 = vmul.f32 1.4142135, %v3376_v54  ;;  %6605 = vmatmul.mubr.bf16.gmra.mxu0 %v3592_v60  ;;  %8825 = vst [vmem:[#allocation18_spill] sm:$0xff] %v8077_v12 }
 0x5b9   :  { %v3594_v49 = vpack.c.bf16 %v3562_v34, %v3561_v57  ;;  %v8079_v61 = vpop.f32.mrf.mxu0 }
 0x5ba   :  { %v3560_v50 = vmul.f32 %v7901_v28, %v3440_v41  ;;  %8826 = vst [vmem:[#allocation19_spill] sm:$0xff] %v8079_v61 }
 0x5bb   :  { %v8081_v37 = vpop.f32.mrf.mxu0 }
 0x5bc   :  { %v3593_v23 = vpack.c.bf16 %v3560_v50, %v3559_v20  ;;  %8827 = vst [vmem:[#allocation20_spill] sm:$0xff] %v8081_v37  ;;  %v3947_v20 = vrot.slane %v8110_v22, %v6928_v8 }
 0x5bd   :  { %v8083_v40 = vpop.f32.mrf.mxu0 }
 0x5be   :  { %6608 = vmatprep.mubr.bf16.mxu0 %v3593_v23  ;;  %8828 = vst [vmem:[#allocation21_spill] sm:$0xff] %v8083_v40  ;;  %v8119_v41 = vrot.slane %v3947_v20, %v6930_v9  ;;  %v8134_v20 = vld.sshfl [vmem:[%s8754_s0 + $0xe] sm:$0x11 pattern:$0x75316420] }
 0x5bf   :  { %v8085_v19 = vpop.f32.mrf.mxu0 }
 0x5c0   :  { %6609 = vmatmul.mubr.bf16.gmra.mxu0 %v3594_v49  ;;  %8829 = vst [vmem:[#allocation22_spill] sm:$0xff] %v8085_v19  ;;  %v8126_v49 = vld [vmem:[%s8759_s4 + $0x4] ss:$0 sm:$0xff] }
 0x5c1   :  { %v8087_v2 = vpop.f32.mrf.mxu0 }
 0x5c2   :  { %8830 = vst [vmem:[#allocation23_spill] sm:$0xff] %v8087_v2 }
 0x5c3   :  { %v8089_v28 = vpop.f32.mrf.mxu0 }
 0x5c4   :  { %8831 = vst [vmem:[#allocation24_spill] sm:$0xff] %v8089_v28 }
 0x5c5   :  { %v8091_v55 = vpop.f32.mrf.mxu0 }
 0x5c6   :  { %8832 = vst [vmem:[#allocation25_spill] sm:$0xff] %v8091_v55 }
 0x5c7   :  { %v8093_v60 = vpop.f32.mrf.mxu0 }
 0x5c8   :  { %8833 = vst [vmem:[#allocation26_spill] sm:$0xff] %v8093_v60 }
 0x5c9   :  { %v8095_v57 = vpop.f32.mrf.mxu0 }
 0x5ca   :  { %8834 = vst [vmem:[#allocation27_spill] sm:$0xff] %v8095_v57 }
 0x5cb   :  { %v8097_v46 = vpop.f32.mrf.mxu0 }
 0x5cc   :  { %8835 = vst [vmem:[#allocation28_spill] sm:$0xff] %v8097_v46 }
 0x5cd   :  { %v8099_v42 = vpop.f32.mrf.mxu0 }
 0x5ce   :  { %8836 = vst [vmem:[#allocation29_spill] sm:$0xff] %v8099_v42 }
 0x5cf   :  { %v8101_v36 = vpop.f32.mrf.mxu0 }
 0x5d0   :  { %8837 = vst [vmem:[#allocation30_spill] sm:$0xff] %v8101_v36 }
 0x5d1   :  { %v8103_v1 = vpop.f32.mrf.mxu0 }
 0x5d2   :  { %8838 = vst [vmem:[#allocation31_spill] sm:$0xff] %v8103_v1 }
 0x5d3   :  { %v8105_v35 = vpop.f32.mrf.mxu0 }
 0x5d4   :  { %8839 = vst [vmem:[#allocation32_spill] sm:$0xff] %v8105_v35 }
 0x5d5   :  { %v8112_v54 = vpop.f32.mrf.mxu0 }
 0x5d6   :  { %8840 = vst [vmem:[#allocation33_spill] sm:$0xff] %v8112_v54 }
 0x5d7   :  { %v8116_v34 = vpop.f32.mrf.mxu0 }
 0x5d8   :  { %8841 = vst [vmem:[#allocation34_spill] sm:$0xff] %v8116_v34 }
 0x5d9   :  { %v8121_v50 = vpop.f32.mrf.mxu0 }
 0x5da   :  { %8842 = vst [vmem:[#allocation35_spill] sm:$0xff] %v8121_v50 }
 0x608   :  { %v6550_v23 = vpop.f32.mrf.mxu0 }
 0x609   :  { %v3967_v40 = vmul.f32 %v6550_v23, %v8119_v41 }
 0x60a   :  { %v3677_v2 = vpop.f32.mrf.mxu0 }
 0x60b   :  { %v4037_v37 = vadd.f32 %v8126_v49, %v3967_v40  ;;  %v3965_v19 = vmul.f32 %v8119_v41, %v3677_v2  ;;  %v4391_v40 = vrot.slane %v8134_v20, %v6928_v8 }
 0x60c   :  { %v6551_v55 = vpop.f32.mrf.mxu0 }
 0x60d   :  { %vm4101_vm5 = vcmp.ge.f32.partialorder %v4037_v37, 0.0  ;;  %v4165_v57 = vmul.f32 0.2, %v4037_v37  ;;  %v4035_v28 = vadd.f32 %v8126_v49, %v3965_v19  ;;  %v3968_v51 = vmul.f32 %v6551_v55, %v8119_v41 }
 0x60e   :  { %v3680_v60 = vpop.f32.mrf.mxu0  ;;  %v8147_v61 = vrot.slane %v4391_v40, %v6930_v9 }
 0x60f   :  { %v4229_v29 = vsel %vm4101_vm5, %v4037_v37, %v4165_v57  ;;  %v4163_v23 = vmul.f32 0.2, %v4035_v28  ;;  %v4038_v42 = vadd.f32 %v8126_v49, %v3968_v51  ;;  %vm4099_vm6 = vcmp.ge.f32.partialorder %v4035_v28, 0.0 }
 0x610   :  { %v3966_v2 = vmul.f32 %v8119_v41, %v3680_v60  ;;  %v6554_v1 = vpop.f32.mrf.mxu0  ;;  %v4293_v6 = vmul.f32 1.4142135, %v4229_v29 }
 0x611   :  { %vm4102_vm7 = vcmp.ge.f32.partialorder %v4038_v42, 0.0  ;;  %v4166_v62 = vmul.f32 0.2, %v4038_v42  ;;  %v3971_v46 = vmul.f32 %v6554_v1, %v8119_v41  ;;  %v4227_v36 = vsel %vm4099_vm6, %v4035_v28, %v4163_v23 }
 0x612   :  { %v4036_v19 = vadd.f32 %v8126_v49, %v3966_v2  ;;  %v3693_v55 = vpop.f32.mrf.mxu0  ;;  %v4291_v2 = vmul.f32 1.4142135, %v4227_v36  ;;  %v4411_v23 = vmul.f32 %v8147_v61, %v4293_v6 }
 0x613   :  { %v4230_v37 = vsel %vm4102_vm7, %v4038_v42, %v4166_v62  ;;  %v4041_v57 = vadd.f32 %v8126_v49, %v3971_v46  ;;  %v3969_v51 = vmul.f32 %v8119_v41, %v3693_v55 }
 0x614   :  { %v4294_v50 = vmul.f32 1.4142135, %v4230_v37  ;;  %vm4100_vm8 = vcmp.ge.f32.partialorder %v4036_v19, 0.0  ;;  %v4164_v60 = vmul.f32 0.2, %v4036_v19  ;;  %v6555_v54 = vpop.f32.mrf.mxu0  ;;  %v4409_v12 = vmul.f32 %v8147_v61, %v4291_v2 }
 0x615   :  { %vm4105_vm9 = vcmp.ge.f32.partialorder %v4041_v57, 0.0  ;;  %v4169_v30 = vmul.f32 0.2, %v4041_v57  ;;  %v4039_v29 = vadd.f32 %v8126_v49, %v3969_v51  ;;  %v3972_v1 = vmul.f32 %v6555_v54, %v8119_v41 }
 0x616   :  { %v3696_v28 = vpop.f32.mrf.mxu0  ;;  %v4228_v62 = vsel %vm4100_vm8, %v4036_v19, %v4164_v60  ;;  %v4412_v35 = vmul.f32 %v8147_v61, %v4294_v50 }
 0x617   :  { %vm4103_vm10 = vcmp.ge.f32.partialorder %v4039_v29, 0.0  ;;  %v4167_v46 = vmul.f32 0.2, %v4039_v29  ;;  %v4042_v42 = vadd.f32 %v8126_v49, %v3972_v1  ;;  %v4233_v40 = vsel %vm4105_vm9, %v4041_v57, %v4169_v30 }
 0x618   :  { %v3970_v55 = vmul.f32 %v8119_v41, %v3696_v28  ;;  %v6558_v37 = vpop.f32.mrf.mxu0  ;;  %v4292_v34 = vmul.f32 1.4142135, %v4228_v62  ;;  %v4297_v6 = vmul.f32 1.4142135, %v4233_v40 }
 0x619   :  { %vm4106_vm11 = vcmp.ge.f32.partialorder %v4042_v42, 0.0  ;;  %v4170_v51 = vmul.f32 0.2, %v4042_v42  ;;  %v3975_v54 = vmul.f32 %v6558_v37, %v8119_v41  ;;  %v4231_v36 = vsel %vm4103_vm10, %v4039_v29, %v4167_v46 }
 0x61a   :  { %v4040_v19 = vadd.f32 %v8126_v49, %v3970_v55  ;;  %v3709_v60 = vpop.f32.mrf.mxu0  ;;  %v4410_v1 = vmul.f32 %v8147_v61, %v4292_v34  ;;  %v4474_v37 = vpack.c.bf16 %v4412_v35, %v4411_v23  ;;  %v4295_v29 = vmul.f32 1.4142135, %v4231_v36 }
 0x61b   :  { %v4234_v30 = vsel %vm4106_vm11, %v4042_v42, %v4170_v51  ;;  %v4045_v57 = vadd.f32 %v8126_v49, %v3975_v54  ;;  %v3973_v28 = vmul.f32 %v8119_v41, %v3709_v60 }
 0x61c   :  { %v4298_v62 = vmul.f32 1.4142135, %v4234_v30  ;;  %vm4104_vm12 = vcmp.ge.f32.partialorder %v4040_v19, 0.0  ;;  %v4168_v50 = vmul.f32 0.2, %v4040_v19  ;;  %v6559_v27 = vpop.f32.mrf.mxu0  ;;  %v4473_v16 = vpack.c.bf16 %v4410_v1, %v4409_v12 }
 0x61d   :  { %v4043_v46 = vadd.f32 %v8126_v49, %v3973_v28  ;;  %v3976_v55 = vmul.f32 %v6559_v27, %v8119_v41  ;;  %vm4109_vm13 = vcmp.ge.f32.partialorder %v4045_v57, 0.0  ;;  %v4173_v2 = vmul.f32 0.2, %v4045_v57 }
 0x61e   :  { %6628 = vmatprep.mubr.bf16.mxu1 %v4473_v16  ;;  %v3712_v34 = vpop.f32.mrf.mxu0  ;;  %v4232_v42 = vsel %vm4104_vm12, %v4040_v19, %v4168_v50  ;;  %v4416_v40 = vmul.f32 %v8147_v61, %v4298_v62  ;;  %v4415_v12 = vmul.f32 %v8147_v61, %v4297_v6  ;;  %v4413_v16 = vmul.f32 %v8147_v61, %v4295_v29 }
 0x61f   :  { %vm4107_vm14 = vcmp.ge.f32.partialorder %v4043_v46, 0.0  ;;  %v4171_v51 = vmul.f32 0.2, %v4043_v46  ;;  %v4046_v54 = vadd.f32 %v8126_v49, %v3976_v55  ;;  %6629 = vmatmul.mubr.bf16.vlgmr.msra.gmra.mxu1 %v4474_v37  ;;  %v3974_v35 = vmul.f32 %v8119_v41, %v3712_v34 }
 0x620   :  { %v6562_v23 = vpop.f32.mrf.mxu0  ;;  %v4296_v36 = vmul.f32 1.4142135, %v4232_v42  ;;  %v4237_v19 = vsel %vm4109_vm13, %v4045_v57, %v4173_v2  ;;  %v4476_v55 = vpack.c.bf16 %v4416_v40, %v4415_v12 }
 0x621   :  { %vm4110_vm15 = vcmp.ge.f32.partialorder %v4046_v54, 0.0  ;;  %v4174_v27 = vmul.f32 0.2, %v4046_v54  ;;  %v3979_v60 = vmul.f32 %v6562_v23, %v8119_v41  ;;  %v4235_v1 = vsel %vm4107_vm14, %v4043_v46, %v4171_v51 }
 0x622   :  { %v4044_v30 = vadd.f32 %v8126_v49, %v3974_v35  ;;  %v3725_v28 = vpop.f32.mrf.mxu0  ;;  %v4414_v62 = vmul.f32 %v8147_v61, %v4296_v36  ;;  %v4299_v29 = vmul.f32 1.4142135, %v4235_v1  ;;  %v4301_v2 = vmul.f32 1.4142135, %v4237_v19 }
 0x623   :  { %v4238_v50 = vsel %vm4110_vm15, %v4046_v54, %v4174_v27  ;;  %v4049_v6 = vadd.f32 %v8126_v49, %v3979_v60  ;;  %v3977_v37 = vmul.f32 %v8119_v41, %v3725_v28 }
 0x624   :  { %v4302_v34 = vmul.f32 1.4142135, %v4238_v50  ;;  %vm4108_vm0 = vcmp.ge.f32.partialorder %v4044_v30, 0.0  ;;  %v4172_v42 = vmul.f32 0.2, %v4044_v30  ;;  %v6563_v23 = vpop.f32.mrf.mxu0  ;;  %v4475_v58 = vpack.c.bf16 %v4414_v62, %v4413_v16 }
 0x625   :  { %v4177_v3 = vmul.f32 0.2, %v4049_v6  ;;  %v4047_v57 = vadd.f32 %v8126_v49, %v3977_v37  ;;  %v3980_v46 = vmul.f32 %v6563_v23, %v8119_v41  ;;  %vm4113_vm1 = vcmp.ge.f32.partialorder %v4049_v6, 0.0 }
 0x626   :  { %v4236_v51 = vsel %vm4108_vm0, %v4044_v30, %v4172_v42  ;;  %6632 = vmatprep.mubr.bf16.mxu1 %v4475_v58  ;;  %v3728_v54 = vpop.f32.mrf.mxu0  ;;  %v4420_v40 = vmul.f32 %v8147_v61, %v4302_v34  ;;  %v4417_v19 = vmul.f32 %v8147_v61, %v4299_v29  ;;  %v4419_v58 = vmul.f32 %v8147_v61, %v4301_v2 }
 0x627   :  { %v4300_v35 = vmul.f32 1.4142135, %v4236_v51  ;;  %vm4111_vm2 = vcmp.ge.f32.partialorder %v4047_v57, 0.0  ;;  %v4175_v36 = vmul.f32 0.2, %v4047_v57  ;;  %6633 = vmatmul.mubr.bf16.gmra.mxu1 %v4476_v55  ;;  %v4050_v12 = vadd.f32 %v8126_v49, %v3980_v46 }
 0x628   :  { %v3978_v27 = vmul.f32 %v8119_v41, %v3728_v54  ;;  %v6566_v60 = vpop.f32.mrf.mxu0  ;;  %v4241_v16 = vsel %vm4113_vm1, %v4049_v6, %v4177_v3  ;;  %v4478_v46 = vpack.c.bf16 %v4420_v40, %v4419_v58 }
 0x629   :  { %v3983_v1 = vmul.f32 %v6566_v60, %v8119_v41  ;;  %v4418_v30 = vmul.f32 %v8147_v61, %v4300_v35  ;;  %v4239_v28 = vsel %vm4111_vm2, %v4047_v57, %v4175_v36  ;;  %vm4114_vm3 = vcmp.ge.f32.partialorder %v4050_v12, 0.0 }
 0x62a   :  { %v4178_v62 = vmul.f32 0.2, %v4050_v12  ;;  %v3741_v50 = vpop.f32.mrf.mxu0  ;;  %v4048_v37 = vadd.f32 %v8126_v49, %v3978_v27  ;;  %v4305_v3 = vmul.f32 1.4142135, %v4241_v16  ;;  %v4303_v29 = vmul.f32 1.4142135, %v4239_v28 }
 0x62b   :  { %v4053_v55 = vadd.f32 %v8126_v49, %v3983_v1  ;;  %v3981_v34 = vmul.f32 %v8119_v41, %v3741_v50  ;;  %v4477_v42 = vpack.c.bf16 %v4418_v30, %v4417_v19 }
 0x62c   :  { %v4242_v6 = vsel %vm4114_vm3, %v4050_v12, %v4178_v62  ;;  %v6567_v23 = vpop.f32.mrf.mxu0  ;;  %vm4112_vm4 = vcmp.ge.f32.partialorder %v4048_v37, 0.0  ;;  %v4176_v51 = vmul.f32 0.2, %v4048_v37  ;;  %v4423_v28 = vmul.f32 %v8147_v61, %v4305_v3 }
 0x62d   :  { %vm4117_vm5 = vcmp.ge.f32.partialorder %v4053_v55, 0.0  ;;  %6636 = vmatprep.mubr.bf16.mxu1 %v4477_v42  ;;  %v4306_v57 = vmul.f32 1.4142135, %v4242_v6  ;;  %v4181_v2 = vmul.f32 0.2, %v4053_v55  ;;  %v4051_v54 = vadd.f32 %v8126_v49, %v3981_v34 }
 0x62e   :  { %v3984_v35 = vmul.f32 %v6567_v23, %v8119_v41  ;;  %v3744_v36 = vpop.f32.mrf.mxu0  ;;  %v4240_v27 = vsel %vm4112_vm4, %v4048_v37, %v4176_v51  ;;  %v4421_v37 = vmul.f32 %v8147_v61, %v4303_v29 }
 0x62f   :  { %6637 = vmatmul.mubr.bf16.gmra.mxu1 %v4478_v46  ;;  %v3982_v60 = vmul.f32 %v8119_v41, %v3744_v36  ;;  %v4304_v16 = vmul.f32 1.4142135, %v4240_v27  ;;  %v4245_v12 = vsel %vm4117_vm5, %v4053_v55, %v4181_v2  ;;  %vm4115_vm6 = vcmp.ge.f32.partialorder %v4051_v54, 0.0 }
 0x630   :  { %v4179_v40 = vmul.f32 0.2, %v4051_v54  ;;  %v6570_v1 = vpop.f32.mrf.mxu0  ;;  %v4054_v19 = vadd.f32 %v8126_v49, %v3984_v35  ;;  %v4424_v62 = vmul.f32 %v8147_v61, %v4306_v57  ;;  %v4309_v42 = vmul.f32 1.4142135, %v4245_v12 }
 0x631   :  { %v4052_v30 = vadd.f32 %v8126_v49, %v3982_v60  ;;  %v3987_v58 = vmul.f32 %v6570_v1, %v8119_v41  ;;  %v4422_v34 = vmul.f32 %v8147_v61, %v4304_v16 }
 0x632   :  { %v3757_v50 = vpop.f32.mrf.mxu0  ;;  %v4243_v55 = vsel %vm4115_vm6, %v4051_v54, %v4179_v40  ;;  %vm4118_vm7 = vcmp.ge.f32.partialorder %v4054_v19, 0.0  ;;  %v4182_v6 = vmul.f32 0.2, %v4054_v19  ;;  %v4480_v60 = vpack.c.bf16 %v4424_v62, %v4423_v28 }
 0x633   :  { %vm4116_vm8 = vcmp.ge.f32.partialorder %v4052_v30, 0.0  ;;  %v4180_v23 = vmul.f32 0.2, %v4052_v30  ;;  %v4057_v46 = vadd.f32 %v8126_v49, %v3987_v58  ;;  %v3985_v51 = vmul.f32 %v8119_v41, %v3757_v50 }
 0x634   :  { %v6571_v2 = vpop.f32.mrf.mxu0  ;;  %v4246_v35 = vsel %vm4118_vm7, %v4054_v19, %v4182_v6  ;;  %v4479_v57 = vpack.c.bf16 %v4422_v34, %v4421_v37  ;;  %v4307_v36 = vmul.f32 1.4142135, %v4243_v55  ;;  %v3940_v58 = vcombine.high %v8110_v22, %v8110_v22 }
 0x635   :  { %v3988_v3 = vmul.f32 %v6571_v2, %v8119_v41  ;;  %v4310_v27 = vmul.f32 1.4142135, %v4246_v35  ;;  %v4244_v29 = vsel %vm4116_vm8, %v4052_v30, %v4180_v23  ;;  %v4055_v54 = vadd.f32 %v8126_v49, %v3985_v51 }
 0x636   :  { %v3760_v16 = vpop.f32.mrf.mxu0  ;;  %v4308_v12 = vmul.f32 1.4142135, %v4244_v29  ;;  %6640 = vmatprep.mubr.bf16.mxu1 %v4479_v57  ;;  %v4427_v19 = vmul.f32 %v8147_v61, %v4309_v42  ;;  %v4185_v50 = vmul.f32 0.2, %v4057_v46  ;;  %vm4121_vm9 = vcmp.ge.f32.partialorder %v4057_v46, 0.0 }
 0x637   :  { %v4058_v40 = vadd.f32 %v8126_v49, %v3988_v3  ;;  %v3986_v1 = vmul.f32 %v8119_v41, %v3760_v16  ;;  %6641 = vmatmul.mubr.bf16.gmra.mxu1 %v4480_v60  ;;  %vm4119_vm10 = vcmp.ge.f32.partialorder %v4055_v54, 0.0  ;;  %v4183_v30 = vmul.f32 0.2, %v4055_v54 }
 0x638   :  { %v6574_v37 = vpop.f32.mrf.mxu0  ;;  %v4426_v6 = vmul.f32 %v8147_v61, %v4308_v12  ;;  %v4428_v23 = vmul.f32 %v8147_v61, %v4310_v27  ;;  %v4425_v51 = vmul.f32 %v8147_v61, %v4307_v36  ;;  %v4249_v2 = vsel %vm4121_vm9, %v4057_v46, %v4185_v50 }
 0x639   :  { %vm4122_vm11 = vcmp.ge.f32.partialorder %v4058_v40, 0.0  ;;  %v4186_v28 = vmul.f32 0.2, %v4058_v40  ;;  %v4056_v62 = vadd.f32 %v8126_v49, %v3986_v1  ;;  %v3991_v34 = vmul.f32 %v6574_v37, %v8119_v41 }
 0x63a   :  { %v3773_v55 = vpop.f32.mrf.mxu0  ;;  %v4247_v22 = vsel %vm4119_vm10, %v4055_v54, %v4183_v30  ;;  %v4481_v27 = vpack.c.bf16 %v4426_v6, %v4425_v51  ;;  %v4384_v30 = vcombine.high %v8134_v20, %v8134_v20  ;;  %v3954_v46 = vrot.slane %v3940_v58, %v6928_v8 }
 0x63b   :  { %v3989_v42 = vmul.f32 %v8119_v41, %v3773_v55  ;;  %v4250_v35 = vsel %vm4122_vm11, %v4058_v40, %v4186_v28  ;;  %vm4120_vm12 = vcmp.ge.f32.partialorder %v4056_v62, 0.0  ;;  %v4184_v3 = vmul.f32 0.2, %v4056_v62 }
 0x63c   :  { %v6575_v57 = vpop.f32.mrf.mxu0  ;;  %v4311_v29 = vmul.f32 1.4142135, %v4247_v22  ;;  %v4061_v60 = vadd.f32 %v8126_v49, %v3991_v34  ;;  %v4314_v12 = vmul.f32 1.4142135, %v4250_v35  ;;  %v4482_v40 = vpack.c.bf16 %v4428_v23, %v4427_v19  ;;  %6644 = vmatprep.mubr.bf16.mxu1 %v4481_v27 }
 0x63d   :  { %v4059_v16 = vadd.f32 %v8126_v49, %v3989_v42  ;;  %v3992_v1 = vmul.f32 %v6575_v57, %v8119_v41  ;;  %v4248_v37 = vsel %vm4120_vm12, %v4056_v62, %v4184_v3  ;;  %v4313_v50 = vmul.f32 1.4142135, %v4249_v2 }
 0x63e   :  { %v3776_v54 = vpop.f32.mrf.mxu0  ;;  %v4312_v36 = vmul.f32 1.4142135, %v4248_v37  ;;  %v4189_v28 = vmul.f32 0.2, %v4061_v60  ;;  %vm4125_vm13 = vcmp.ge.f32.partialorder %v4061_v60, 0.0  ;;  %v4429_v6 = vmul.f32 %v8147_v61, %v4311_v29 }
 0x63f   :  { %v4062_v55 = vadd.f32 %v8126_v49, %v3992_v1  ;;  %v3990_v34 = vmul.f32 %v8119_v41, %v3776_v54  ;;  %v4187_v22 = vmul.f32 0.2, %v4059_v16  ;;  %6645 = vmatmul.mubr.bf16.gmra.mxu1 %v4482_v40  ;;  %v4432_v20 = vmul.f32 %v8147_v61, %v4314_v12 }
 0x640   :  { %v6578_v62 = vpop.f32.mrf.mxu0  ;;  %v4430_v42 = vmul.f32 %v8147_v61, %v4312_v36  ;;  %vm4123_vm14 = vcmp.ge.f32.partialorder %v4059_v16, 0.0  ;;  %v8223_v19 = vrot.slane %v3954_v46, %v6930_v9  ;;  %v4431_v3 = vmul.f32 %v8147_v61, %v4313_v50 }
 0x641   :  { %vm4126_vm15 = vcmp.ge.f32.partialorder %v4062_v55, 0.0  ;;  %v4190_v58 = vmul.f32 0.2, %v4062_v55  ;;  %v4060_v23 = vadd.f32 %v8126_v49, %v3990_v34  ;;  %v3995_v51 = vmul.f32 %v6578_v62, %v8119_v41 }
 0x642   :  { %v3789_v2 = vpop.f32.mrf.mxu0  ;;  %v4483_v35 = vpack.c.bf16 %v4430_v42, %v4429_v6  ;;  %v4253_v57 = vsel %vm4125_vm13, %v4061_v60, %v4189_v28  ;;  %v4251_v12 = vsel %vm4123_vm14, %v4059_v16, %v4187_v22  ;;  %v4484_v34 = vpack.c.bf16 %v4432_v20, %v4431_v3 }
 0x643   :  { %v4254_v29 = vsel %vm4126_vm15, %v4062_v55, %v4190_v58  ;;  %v3993_v1 = vmul.f32 %v8119_v41, %v3789_v2  ;;  %vm4124_vm0 = vcmp.ge.f32.partialorder %v4060_v23, 0.0  ;;  %v4188_v37 = vmul.f32 0.2, %v4060_v23 }
 0x644   :  { %v4065_v27 = vadd.f32 %v8126_v49, %v3995_v51  ;;  %v6579_v54 = vpop.f32.mrf.mxu0  ;;  %6648 = vmatprep.mubr.bf16.mxu1 %v4483_v35  ;;  %v4318_v46 = vmul.f32 1.4142135, %v4254_v29  ;;  %v4317_v62 = vmul.f32 1.4142135, %v4253_v57  ;;  %v4315_v55 = vmul.f32 1.4142135, %v4251_v12 }
 0x645   :  { %v4063_v36 = vadd.f32 %v8126_v49, %v3993_v1  ;;  %v3996_v40 = vmul.f32 %v6579_v54, %v8119_v41  ;;  %v4252_v50 = vsel %vm4124_vm0, %v4060_v23, %v4188_v37  ;;  %v4398_v51 = vrot.slane %v4384_v30, %v6928_v8 }
 0x646   :  { %vm4129_vm1 = vcmp.ge.f32.partialorder %v4065_v27, 0.0  ;;  %v4193_v60 = vmul.f32 0.2, %v4065_v27  ;;  %v3792_v28 = vpop.f32.mrf.mxu0  ;;  %v4316_v6 = vmul.f32 1.4142135, %v4252_v50  ;;  %v4436_v2 = vmul.f32 %v8147_v61, %v4318_v46 }
 0x647   :  { %v4191_v16 = vmul.f32 0.2, %v4063_v36  ;;  %v4066_v22 = vadd.f32 %v8126_v49, %v3996_v40  ;;  %vm4127_vm2 = vcmp.ge.f32.partialorder %v4063_v36, 0.0  ;;  %6649 = vmatmul.mubr.bf16.gmra.mxu1 %v4484_v34  ;;  %v3994_v58 = vmul.f32 %v8119_v41, %v3792_v28 }
 0x648   :  { %v4257_v42 = vsel %vm4129_vm1, %v4065_v27, %v4193_v60  ;;  %v6582_v23 = vpop.f32.mrf.mxu0  ;;  %v4435_v35 = vmul.f32 %v8147_v61, %v4317_v62  ;;  %v4434_v29 = vmul.f32 %v8147_v61, %v4316_v6  ;;  %v4433_v41 = vmul.f32 %v8147_v61, %v4315_v55 }
 0x649   :  { %vm4130_vm3 = vcmp.ge.f32.partialorder %v4066_v22, 0.0  ;;  %v4194_v20 = vmul.f32 0.2, %v4066_v22  ;;  %v4064_v3 = vadd.f32 %v8126_v49, %v3994_v58  ;;  %v3999_v57 = vmul.f32 %v6582_v23, %v8223_v19 }
 0x64a   :  { %v4321_v1 = vmul.f32 1.4142135, %v4257_v42  ;;  %v4255_v12 = vsel %vm4127_vm2, %v4063_v36, %v4191_v16  ;;  %v3805_v27 = vpop.f32.mrf.mxu0  ;;  %v4485_v34 = vpack.c.bf16 %v4434_v29, %v4433_v41  ;;  %v4486_v62 = vpack.c.bf16 %v4436_v2, %v4435_v35 }
 0x64b   :  { %v4258_v37 = vsel %vm4130_vm3, %v4066_v22, %v4194_v20  ;;  %vm4128_vm4 = vcmp.ge.f32.partialorder %v4064_v3, 0.0  ;;  %v4192_v30 = vmul.f32 0.2, %v4064_v3  ;;  %v4069_v54 = vadd.f32 %v8126_v49, %v3999_v57 }
 0x64c   :  { %v4322_v8 = vmul.f32 1.4142135, %v4258_v37  ;;  %v3997_v46 = vmul.f32 %v8223_v19, %v3805_v27  ;;  %v6583_v40 = vpop.f32.mrf.mxu0  ;;  %v4319_v50 = vmul.f32 1.4142135, %v4255_v12  ;;  %v8245_v36 = vrot.slane %v4398_v51, %v6930_v9  ;;  %6652 = vmatprep.mubr.bf16.mxu1 %v4485_v34 }
 0x64d   :  { %v4256_v60 = vsel %vm4128_vm4, %v4064_v3, %v4192_v30  ;;  %vm4133_vm5 = vcmp.ge.f32.partialorder %v4069_v54, 0.0  ;;  %v4197_v28 = vmul.f32 0.2, %v4069_v54  ;;  %v4000_v16 = vmul.f32 %v6583_v40, %v8223_v19 }
 0x64e   :  { %v4320_v6 = vmul.f32 1.4142135, %v4256_v60  ;;  %v4067_v55 = vadd.f32 %v8126_v49, %v3997_v46  ;;  %v3808_v22 = vpop.f32.mrf.mxu0  ;;  %v4439_v42 = vmul.f32 %v8147_v61, %v4321_v1  ;;  %v4440_v58 = vmul.f32 %v8147_v61, %v4322_v8 }
 0x64f   :  { %v4261_v20 = vsel %vm4133_vm5, %v4069_v54, %v4197_v28  ;;  %6653 = vmatmul.mubr.bf16.gmra.mxu1 %v4486_v62  ;;  %v3998_v2 = vmul.f32 %v8223_v19, %v3808_v22  ;;  %v4070_v9 = vadd.f32 %v8126_v49, %v4000_v16  ;;  %v4437_v29 = vmul.f32 %v8147_v61, %v4319_v50 }
 0x650   :  { %v4325_v23 = vmul.f32 1.4142135, %v4261_v20  ;;  %vm4131_vm6 = vcmp.ge.f32.partialorder %v4067_v55, 0.0  ;;  %v4195_v35 = vmul.f32 0.2, %v4067_v55  ;;  %v6586_v51 = vpop.f32.mrf.mxu0  ;;  %v4438_v1 = vmul.f32 %v8147_v61, %v4320_v6 }
 0x651   :  { %v4068_v3 = vadd.f32 %v8126_v49, %v3998_v2  ;;  %v4003_v57 = vmul.f32 %v6586_v51, %v8223_v19  ;;  %vm4134_vm7 = vcmp.ge.f32.partialorder %v4070_v9, 0.0  ;;  %v4198_v27 = vmul.f32 0.2, %v4070_v9 }
 0x652   :  { %v8258_v12 = vmul.f32 %v8245_v36, %v4325_v23  ;;  %v4259_v37 = vsel %vm4131_vm6, %v4067_v55, %v4195_v35  ;;  %v3821_v41 = vpop.f32.mrf.mxu0  ;;  %v4487_v62 = vpack.c.bf16 %v4438_v1, %v4437_v29  ;;  %v4488_v50 = vpack.c.bf16 %v4440_v58, %v4439_v42 }
 0x653   :  { %v4323_v8 = vmul.f32 1.4142135, %v4259_v37  ;;  %vm4132_vm8 = vcmp.ge.f32.partialorder %v4068_v3, 0.0  ;;  %v4196_v30 = vmul.f32 0.2, %v4068_v3  ;;  %v4073_v54 = vadd.f32 %v8126_v49, %v4003_v57 }
 0x654   :  { %v4262_v46 = vsel %vm4134_vm7, %v4070_v9, %v4198_v27  ;;  %v4001_v40 = vmul.f32 %v8223_v19, %v3821_v41  ;;  %v6587_v34 = vpop.f32.mrf.mxu0  ;;  %6656 = vmatprep.mubr.bf16.mxu1 %v4487_v62 }
 0x655   :  { %v4326_v60 = vmul.f32 1.4142135, %v4262_v46  ;;  %v4260_v61 = vsel %vm4132_vm8, %v4068_v3, %v4196_v30  ;;  %vm4137_vm9 = vcmp.ge.f32.partialorder %v4073_v54, 0.0  ;;  %v4201_v28 = vmul.f32 0.2, %v4073_v54 }
 0x656   :  { %v4324_v6 = vmul.f32 1.4142135, %v4260_v61  ;;  %v4071_v55 = vadd.f32 %v8126_v49, %v4001_v40  ;;  %v4004_v16 = vmul.f32 %v6587_v34, %v8223_v19  ;;  %v3824_v22 = vpop.f32.mrf.mxu0  ;;  %v4441_v20 = vmul.f32 %v8245_v36, %v4323_v8 }
 0x657   :  { %v4444_v2 = vmul.f32 %v8245_v36, %v4326_v60  ;;  %v4265_v23 = vsel %vm4137_vm9, %v4073_v54, %v4201_v28  ;;  %6657 = vmatmul.mubr.bf16.gmra.mxu1 %v4488_v50  ;;  %v4002_v35 = vmul.f32 %v8223_v19, %v3824_v22 }
 0x658   :  { %v4329_v42 = vmul.f32 1.4142135, %v4265_v23  ;;  %vm4135_vm10 = vcmp.ge.f32.partialorder %v4071_v55, 0.0  ;;  %v4199_v58 = vmul.f32 0.2, %v4071_v55  ;;  %v4074_v9 = vadd.f32 %v8126_v49, %v4004_v16  ;;  %v6590_v51 = vpop.f32.mrf.mxu0 }
 0x659   :  { %v4072_v3 = vadd.f32 %v8126_v49, %v4002_v35  ;;  %v4007_v57 = vmul.f32 %v6590_v51, %v8223_v19  ;;  %v4442_v29 = vmul.f32 %v8245_v36, %v4324_v6  ;;  %v4490_v1 = vpack.c.bf16 %v4444_v2, %v8258_v12 }
 0x65a   :  { %v4447_v37 = vmul.f32 %v8245_v36, %v4329_v42  ;;  %v4263_v27 = vsel %vm4135_vm10, %v4071_v55, %v4199_v58  ;;  %vm4138_vm11 = vcmp.ge.f32.partialorder %v4074_v9, 0.0  ;;  %v4202_v41 = vmul.f32 0.2, %v4074_v9  ;;  %v3837_v8 = vpop.f32.mrf.mxu0 }
 0x65b   :  { %v4327_v30 = vmul.f32 1.4142135, %v4263_v27  ;;  %vm4136_vm12 = vcmp.ge.f32.partialorder %v4072_v3, 0.0  ;;  %v4200_v54 = vmul.f32 0.2, %v4072_v3  ;;  %v4077_v46 = vadd.f32 %v8126_v49, %v4007_v57 }
 0x65c   :  { %v4266_v40 = vsel %vm4138_vm11, %v4074_v9, %v4202_v41  ;;  %v4005_v34 = vmul.f32 %v8223_v19, %v3837_v8  ;;  %v6591_v62 = vpop.f32.mrf.mxu0  ;;  %v4489_v50 = vpack.c.bf16 %v4442_v29, %v4441_v20 }
 0x65d   :  { %v4330_v60 = vmul.f32 1.4142135, %v4266_v40  ;;  %v4264_v61 = vsel %vm4136_vm12, %v4072_v3, %v4200_v54  ;;  %vm4141_vm13 = vcmp.ge.f32.partialorder %v4077_v46, 0.0  ;;  %v4205_v12 = vmul.f32 0.2, %v4077_v46 }
 0x65e   :  { %v4328_v28 = vmul.f32 1.4142135, %v4264_v61  ;;  %v4075_v6 = vadd.f32 %v8126_v49, %v4005_v34  ;;  %v4008_v55 = vmul.f32 %v6591_v62, %v8223_v19  ;;  %6660 = vmatprep.mubr.bf16.mxu1 %v4489_v50  ;;  %v3840_v16 = vpop.f32.mrf.mxu0  ;;  %v4445_v22 = vmul.f32 %v8245_v36, %v4327_v30 }
 0x65f   :  { %v4448_v2 = vmul.f32 %v8245_v36, %v4330_v60  ;;  %v4269_v23 = vsel %vm4141_vm13, %v4077_v46, %v4205_v12  ;;  %6661 = vmatmul.mubr.bf16.gmra.mxu1 %v4490_v1  ;;  %v4006_v35 = vmul.f32 %v8223_v19, %v3840_v16 }
 0x660   :  { %v4333_v20 = vmul.f32 1.4142135, %v4269_v23  ;;  %vm4139_vm14 = vcmp.ge.f32.partialorder %v4075_v6, 0.0  ;;  %v4203_v42 = vmul.f32 0.2, %v4075_v6  ;;  %v4078_v58 = vadd.f32 %v8126_v49, %v4008_v55  ;;  %v6594_v9 = vpop.f32.mrf.mxu0 }
 0x661   :  { %v4076_v51 = vadd.f32 %v8126_v49, %v4006_v35  ;;  %v4011_v3 = vmul.f32 %v6594_v9, %v8223_v19  ;;  %v4446_v57 = vmul.f32 %v8245_v36, %v4328_v28  ;;  %v4492_v29 = vpack.c.bf16 %v4448_v2, %v4447_v37 }
 0x662   :  { %v4451_v27 = vmul.f32 %v8245_v36, %v4333_v20  ;;  %v4267_v41 = vsel %vm4139_vm14, %v4075_v6, %v4203_v42  ;;  %vm4142_vm15 = vcmp.ge.f32.partialorder %v4078_v58, 0.0  ;;  %v4206_v1 = vmul.f32 0.2, %v4078_v58  ;;  %v3853_v8 = vpop.f32.mrf.mxu0 }
 0x663   :  { %v4331_v30 = vmul.f32 1.4142135, %v4267_v41  ;;  %vm4140_vm0 = vcmp.ge.f32.partialorder %v4076_v51, 0.0  ;;  %v4204_v54 = vmul.f32 0.2, %v4076_v51  ;;  %v4081_v46 = vadd.f32 %v8126_v49, %v4011_v3 }
 0x664   :  { %v4270_v40 = vsel %vm4142_vm15, %v4078_v58, %v4206_v1  ;;  %v4009_v34 = vmul.f32 %v8223_v19, %v3853_v8  ;;  %v6595_v62 = vpop.f32.mrf.mxu0  ;;  %v4491_v50 = vpack.c.bf16 %v4446_v57, %v4445_v22 }
 0x665   :  { %v4334_v60 = vmul.f32 1.4142135, %v4270_v40  ;;  %v4268_v61 = vsel %vm4140_vm0, %v4076_v51, %v4204_v54  ;;  %vm4145_vm1 = vcmp.ge.f32.partialorder %v4081_v46, 0.0  ;;  %v4209_v37 = vmul.f32 0.2, %v4081_v46 }
 0x666   :  { %v4332_v12 = vmul.f32 1.4142135, %v4268_v61  ;;  %v4079_v28 = vadd.f32 %v8126_v49, %v4009_v34  ;;  %v4012_v6 = vmul.f32 %v6595_v62, %v8223_v19  ;;  %6664 = vmatprep.mubr.bf16.mxu1 %v4491_v50  ;;  %v3856_v55 = vpop.f32.mrf.mxu0  ;;  %v4449_v16 = vmul.f32 %v8245_v36, %v4331_v30 }
 0x667   :  { %v4452_v2 = vmul.f32 %v8245_v36, %v4334_v60  ;;  %v4273_v23 = vsel %vm4145_vm1, %v4081_v46, %v4209_v37  ;;  %6665 = vmatmul.mubr.bf16.gmra.mxu1 %v4492_v29  ;;  %v4010_v35 = vmul.f32 %v8223_v19, %v3856_v55 }
 0x668   :  { %v4337_v22 = vmul.f32 1.4142135, %v4273_v23  ;;  %vm4143_vm2 = vcmp.ge.f32.partialorder %v4079_v28, 0.0  ;;  %v4207_v20 = vmul.f32 0.2, %v4079_v28  ;;  %v4082_v42 = vadd.f32 %v8126_v49, %v4012_v6  ;;  %v6598_v58 = vpop.f32.mrf.mxu0 }
 0x669   :  { %v4080_v9 = vadd.f32 %v8126_v49, %v4010_v35  ;;  %v4015_v51 = vmul.f32 %v6598_v58, %v8223_v19  ;;  %v4450_v3 = vmul.f32 %v8245_v36, %v4332_v12  ;;  %v4494_v57 = vpack.c.bf16 %v4452_v2, %v4451_v27 }
 0x66a   :  { %v4455_v41 = vmul.f32 %v8245_v36, %v4337_v22  ;;  %v4271_v1 = vsel %vm4143_vm2, %v4079_v28, %v4207_v20  ;;  %vm4146_vm3 = vcmp.ge.f32.partialorder %v4082_v42, 0.0  ;;  %v4210_v29 = vmul.f32 0.2, %v4082_v42  ;;  %v3869_v8 = vpop.f32.mrf.mxu0 }
 0x66b   :  { %v4335_v30 = vmul.f32 1.4142135, %v4271_v1  ;;  %vm4144_vm4 = vcmp.ge.f32.partialorder %v4080_v9, 0.0  ;;  %v4208_v54 = vmul.f32 0.2, %v4080_v9  ;;  %v4085_v46 = vadd.f32 %v8126_v49, %v4015_v51 }
 0x66c   :  { %v4274_v40 = vsel %vm4146_vm3, %v4082_v42, %v4210_v29  ;;  %v4013_v34 = vmul.f32 %v8223_v19, %v3869_v8  ;;  %v6599_v62 = vpop.f32.mrf.mxu0  ;;  %v4493_v50 = vpack.c.bf16 %v4450_v3, %v4449_v16 }
 0x66d   :  { %v4338_v60 = vmul.f32 1.4142135, %v4274_v40  ;;  %v4272_v61 = vsel %vm4144_vm4, %v4080_v9, %v4208_v54  ;;  %vm4149_vm5 = vcmp.ge.f32.partialorder %v4085_v46, 0.0  ;;  %v4213_v27 = vmul.f32 0.2, %v4085_v46 }
 0x66e   :  { %v4336_v37 = vmul.f32 1.4142135, %v4272_v61  ;;  %v4083_v12 = vadd.f32 %v8126_v49, %v4013_v34  ;;  %v4016_v28 = vmul.f32 %v6599_v62, %v8223_v19  ;;  %6668 = vmatprep.mubr.bf16.mxu1 %v4493_v50  ;;  %v3872_v6 = vpop.f32.mrf.mxu0  ;;  %v4453_v55 = vmul.f32 %v8245_v36, %v4335_v30 }
 0x66f   :  { %v4456_v2 = vmul.f32 %v8245_v36, %v4338_v60  ;;  %v4277_v23 = vsel %vm4149_vm5, %v4085_v46, %v4213_v27  ;;  %6669 = vmatmul.mubr.bf16.gmra.mxu1 %v4494_v57  ;;  %v4014_v35 = vmul.f32 %v8223_v19, %v3872_v6 }
 0x670   :  { %v4341_v16 = vmul.f32 1.4142135, %v4277_v23  ;;  %vm4147_vm6 = vcmp.ge.f32.partialorder %v4083_v12, 0.0  ;;  %v4211_v22 = vmul.f32 0.2, %v4083_v12  ;;  %v4086_v20 = vadd.f32 %v8126_v49, %v4016_v28  ;;  %v6602_v42 = vpop.f32.mrf.mxu0 }
 0x671   :  { %v4084_v58 = vadd.f32 %v8126_v49, %v4014_v35  ;;  %v4019_v9 = vmul.f32 %v6602_v42, %v8223_v19  ;;  %v4454_v51 = vmul.f32 %v8245_v36, %v4336_v37  ;;  %v4496_v3 = vpack.c.bf16 %v4456_v2, %v4455_v41 }
 0x672   :  { %v8309_v1 = vmul.f32 %v8245_v36, %v4341_v16  ;;  %v4275_v29 = vsel %vm4147_vm6, %v4083_v12, %v4211_v22  ;;  %vm4150_vm7 = vcmp.ge.f32.partialorder %v4086_v20, 0.0  ;;  %v4214_v57 = vmul.f32 0.2, %v4086_v20  ;;  %v3885_v8 = vpop.f32.mrf.mxu0 }
 0x673   :  { %v4339_v30 = vmul.f32 1.4142135, %v4275_v29  ;;  %vm4148_vm8 = vcmp.ge.f32.partialorder %v4084_v58, 0.0  ;;  %v4212_v54 = vmul.f32 0.2, %v4084_v58  ;;  %v4089_v46 = vadd.f32 %v8126_v49, %v4019_v9 }
 0x674   :  { %v4278_v40 = vsel %vm4150_vm7, %v4086_v20, %v4214_v57  ;;  %v4017_v34 = vmul.f32 %v8223_v19, %v3885_v8  ;;  %v6603_v62 = vpop.f32.mrf.mxu0  ;;  %v4495_v50 = vpack.c.bf16 %v4454_v51, %v4453_v55 }
 0x675   :  { %v4342_v60 = vmul.f32 1.4142135, %v4278_v40  ;;  %v4276_v61 = vsel %vm4148_vm8, %v4084_v58, %v4212_v54  ;;  %vm4153_vm9 = vcmp.ge.f32.partialorder %v4089_v46, 0.0  ;;  %v4217_v41 = vmul.f32 0.2, %v4089_v46 }
 0x676   :  { %v4340_v27 = vmul.f32 1.4142135, %v4276_v61  ;;  %v4087_v37 = vadd.f32 %v8126_v49, %v4017_v34  ;;  %v4020_v12 = vmul.f32 %v6603_v62, %v8223_v19  ;;  %6672 = vmatprep.mubr.bf16.mxu1 %v4495_v50  ;;  %v3888_v28 = vpop.f32.mrf.mxu0  ;;  %v4457_v6 = vmul.f32 %v8245_v36, %v4339_v30 }
 0x677   :  { %v4460_v2 = vmul.f32 %v8245_v36, %v4342_v60  ;;  %v4281_v23 = vsel %vm4153_vm9, %v4089_v46, %v4217_v41  ;;  %6673 = vmatmul.mubr.bf16.gmra.mxu1 %v4496_v3  ;;  %v4018_v35 = vmul.f32 %v8223_v19, %v3888_v28 }
 0x678   :  { %v4345_v55 = vmul.f32 1.4142135, %v4281_v23  ;;  %vm4151_vm10 = vcmp.ge.f32.partialorder %v4087_v37, 0.0  ;;  %v4215_v16 = vmul.f32 0.2, %v4087_v37  ;;  %v4090_v22 = vadd.f32 %v8126_v49, %v4020_v12  ;;  %v6606_v20 = vpop.f32.mrf.mxu0 }
 0x679   :  { %v4088_v42 = vadd.f32 %v8126_v49, %v4018_v35  ;;  %v4023_v58 = vmul.f32 %v6606_v20, %v8223_v19  ;;  %v4458_v9 = vmul.f32 %v8245_v36, %v4340_v27  ;;  %v4498_v51 = vpack.c.bf16 %v4460_v2, %v8309_v1  ;;  %v6862_v27 = vld [vmem:[%s8759_s4 + $0x4] ss:$0 sm:$0xff] }
 0x67a   :  { %v8324_v29 = vmul.f32 %v8245_v36, %v4345_v55  ;;  %v4279_v3 = vsel %vm4151_vm10, %v4087_v37, %v4215_v16  ;;  %vm4154_vm11 = vcmp.ge.f32.partialorder %v4090_v22, 0.0  ;;  %v4218_v57 = vmul.f32 0.2, %v4090_v22  ;;  %v3901_v8 = vpop.f32.mrf.mxu0 }
 0x67b   :  { %v4343_v30 = vmul.f32 1.4142135, %v4279_v3  ;;  %vm4152_vm12 = vcmp.ge.f32.partialorder %v4088_v42, 0.0  ;;  %v4216_v54 = vmul.f32 0.2, %v4088_v42  ;;  %v4093_v46 = vadd.f32 %v8126_v49, %v4023_v58 }
 0x67c   :  { %v4282_v40 = vsel %vm4154_vm11, %v4090_v22, %v4218_v57  ;;  %v4021_v34 = vmul.f32 %v8223_v19, %v3901_v8  ;;  %v6607_v62 = vpop.f32.mrf.mxu0  ;;  %v4497_v50 = vpack.c.bf16 %v4458_v9, %v4457_v6 }
 0x67d   :  { %v4346_v60 = vmul.f32 1.4142135, %v4282_v40  ;;  %v4280_v61 = vsel %vm4152_vm12, %v4088_v42, %v4216_v54  ;;  %vm4157_vm13 = vcmp.ge.f32.partialorder %v4093_v46, 0.0  ;;  %v4221_v1 = vmul.f32 0.2, %v4093_v46 }
 0x67e   :  { %v4344_v41 = vmul.f32 1.4142135, %v4280_v61  ;;  %v4091_v37 = vadd.f32 %v6862_v27, %v4021_v34  ;;  %v4024_v12 = vmul.f32 %v6607_v62, %v8223_v19  ;;  %6676 = vmatprep.mubr.bf16.mxu1 %v4497_v50  ;;  %v3904_v28 = vpop.f32.mrf.mxu0  ;;  %v4461_v49 = vmul.f32 %v8245_v36, %v4343_v30 }
 0x67f   :  { %v4464_v2 = vmul.f32 %v8245_v36, %v4346_v60  ;;  %v4285_v23 = vsel %vm4157_vm13, %v4093_v46, %v4221_v1  ;;  %6677 = vmatmul.mubr.bf16.gmra.mxu1 %v4498_v51  ;;  %v4022_v6 = vmul.f32 %v8223_v19, %v3904_v28 }
 0x680   :  { %v4349_v35 = vmul.f32 1.4142135, %v4285_v23  ;;  %vm4155_vm14 = vcmp.ge.f32.partialorder %v4091_v37, 0.0  ;;  %v4219_v55 = vmul.f32 0.2, %v4091_v37  ;;  %v4094_v16 = vadd.f32 %v6862_v27, %v4024_v12  ;;  %v6610_v22 = vpop.f32.mrf.mxu0 }
 0x681   :  { %v4092_v20 = vadd.f32 %v6862_v27, %v4022_v6  ;;  %v4027_v42 = vmul.f32 %v6610_v22, %v8223_v19  ;;  %v4462_v58 = vmul.f32 %v8245_v36, %v4344_v41  ;;  %v4500_v9 = vpack.c.bf16 %v4464_v2, %v8324_v29 }
 0x682   :  { %v4467_v3 = vmul.f32 %v8245_v36, %v4349_v35  ;;  %v4283_v57 = vsel %vm4155_vm14, %v4091_v37, %v4219_v55  ;;  %vm4158_vm15 = vcmp.ge.f32.partialorder %v4094_v16, 0.0  ;;  %v4222_v8 = vmul.f32 0.2, %v4094_v16  ;;  %v3917_v51 = vpop.f32.mrf.mxu0 }
 0x683   :  { %v4347_v30 = vmul.f32 1.4142135, %v4283_v57  ;;  %vm4156_vm0 = vcmp.ge.f32.partialorder %v4092_v20, 0.0  ;;  %v4220_v54 = vmul.f32 0.2, %v4092_v20  ;;  %v4097_v46 = vadd.f32 %v6862_v27, %v4027_v42 }
 0x684   :  { %v4286_v40 = vsel %vm4158_vm15, %v4094_v16, %v4222_v8  ;;  %v4025_v34 = vmul.f32 %v8223_v19, %v3917_v51  ;;  %v6611_v62 = vpop.f32.mrf.mxu0  ;;  %v4499_v50 = vpack.c.bf16 %v4462_v58, %v4461_v49 }
 0x685   :  { %v4350_v60 = vmul.f32 1.4142135, %v4286_v40  ;;  %v4284_v61 = vsel %vm4156_vm0, %v4092_v20, %v4220_v54  ;;  %vm4161_vm1 = vcmp.ge.f32.partialorder %v4097_v46, 0.0  ;;  %v4225_v1 = vmul.f32 0.2, %v4097_v46 }
 0x686   :  { %v4348_v29 = vmul.f32 1.4142135, %v4284_v61  ;;  %v4095_v41 = vadd.f32 %v6862_v27, %v4025_v34  ;;  %v4028_v37 = vmul.f32 %v6611_v62, %v8223_v19  ;;  %6680 = vmatprep.mubr.bf16.mxu1 %v4499_v50  ;;  %v3920_v12 = vpop.f32.mrf.mxu0  ;;  %v4465_v28 = vmul.f32 %v8245_v36, %v4347_v30  ;;  %v6815_v50 = vld [vmem:[%s8762_s9 + $0x4] ss:$16 sps:$4 sm:$0xff]  }
 0x687   :  { %v4468_v2 = vmul.f32 %v8245_v36, %v4350_v60  ;;  %v4289_v23 = vsel %vm4161_vm1, %v4097_v46, %v4225_v1  ;;  %6681 = vmatmul.mubr.bf16.gmra.mxu1 %v4500_v9  ;;  %v4026_v6 = vmul.f32 %v8223_v19, %v3920_v12  ;;  %5232 = vmatprep.mubr.bf16.mxu0 %v6815_v50  ;;  %v8355_v60 = vld [vmem:[%s8760_s6 + $0x2] ss:$0 sm:$0xff] }
 0x688   :  { %v4353_v35 = vmul.f32 1.4142135, %v4289_v23  ;;  %vm4159_vm2 = vcmp.ge.f32.partialorder %v4095_v41, 0.0  ;;  %v4223_v49 = vmul.f32 0.2, %v4095_v41  ;;  %v4098_v55 = vadd.f32 %v6862_v27, %v4028_v37 }
 0x689   :  { %v4096_v16 = vadd.f32 %v6862_v27, %v4026_v6  ;;  %v4466_v22 = vmul.f32 %v8245_v36, %v4348_v29  ;;  %v4502_v20 = vpack.c.bf16 %v4468_v2, %v4467_v3 }
 0x68a   :  { %v4471_v42 = vmul.f32 %v8245_v36, %v4353_v35  ;;  %v4287_v58 = vsel %vm4159_vm2, %v4095_v41, %v4223_v49  ;;  %vm4162_vm3 = vcmp.ge.f32.partialorder %v4098_v55, 0.0  ;;  %v4226_v57 = vmul.f32 0.2, %v4098_v55 }
 0x68b   :  { %v4351_v8 = vmul.f32 1.4142135, %v4287_v58  ;;  %vm4160_vm4 = vcmp.ge.f32.partialorder %v4096_v16, 0.0  ;;  %v4224_v51 = vmul.f32 0.2, %v4096_v16  ;;  %v4501_v30 = vpack.c.bf16 %v4466_v22, %v4465_v28 }
 0x68c   :  { %v4290_v9 = vsel %vm4162_vm3, %v4098_v55, %v4226_v57 }
 0x68d   :  { %v4354_v54 = vmul.f32 1.4142135, %v4290_v9  ;;  %v4288_v19 = vsel %vm4160_vm4, %v4096_v16, %v4224_v51  ;;  %6684 = vmatprep.mubr.bf16.mxu1 %v4501_v30  ;;  %v4469_v46 = vmul.f32 %v8245_v36, %v4351_v8 }
 0x68e   :  { %v4352_v40 = vmul.f32 1.4142135, %v4288_v19 }
 0x68f   :  { %v4472_v27 = vmul.f32 %v8245_v36, %v4354_v54  ;;  %6685 = vmatmul.mubr.bf16.gmra.mxu1 %v4502_v20 }
 0x690   :  { %v4470_v3 = vmul.f32 %v8245_v36, %v4352_v40 }
 0x691   :  { %v4504_v34 = vpack.c.bf16 %v4472_v27, %v4471_v42 }
 0x692   :  { %v4503_v62 = vpack.c.bf16 %v4470_v3, %v4469_v46 }
 0x694   :  { %6688 = vmatprep.mubr.bf16.mxu1 %v4503_v62 }
 0x697   :  { %6689 = vmatmul.mubr.bf16.gmra.mxu1 %v4504_v34 }
 0x6df   :  { %v6630_v61 = vpop.f32.mrf.mxu1 }
 0x6e0   :  { %v4850_v29 = vadd.f32 %v6630_v61, %v8355_v60 }
 0x6e1   :  { %v4587_v1 = vpop.f32.mrf.mxu1 }
 0x6e2   :  { %v4848_v36 = vadd.f32 %v8355_v60, %v4587_v1  ;;  %v4914_v28 = vadd.f32 %v7733_v10, %v4850_v29 }
 0x6e3   :  { %v6631_v41 = vpop.f32.mrf.mxu1 }
 0x6e4   :  { %v4851_v37 = vadd.f32 %v6631_v41, %v8355_v60  ;;  %v4912_v35 = vadd.f32 %v4848_v36, %v7739_v5 }
 0x6e5   :  { %v4590_v12 = vpop.f32.mrf.mxu1 }
 0x6e6   :  { %v4915_v2 = vadd.f32 %v7743_v33, %v4851_v37  ;;  %v4849_v23 = vadd.f32 %v8355_v60, %v4590_v12 }
 0x6e7   :  { %v6634_v6 = vpop.f32.mrf.mxu1 }
 0x6e8   :  { %v8364_v49 = vpack.c.bf16 %v4915_v2, %v4914_v28  ;;  %v4913_v55 = vadd.f32 %v4849_v23, %v7750_v24  ;;  %v4854_v20 = vadd.f32 %v6634_v6, %v8355_v60 }
 0x6e9   :  { %v4603_v16 = vpop.f32.mrf.mxu1 }
 0x6ea   :  { %v8367_v22 = vpack.c.bf16 %v4913_v55, %v4912_v35  ;;  %v4852_v58 = vadd.f32 %v8355_v60, %v4603_v16  ;;  %v4918_v57 = vadd.f32 %v7755_v52, %v4854_v20 }
 0x6eb   :  { %v6635_v42 = vpop.f32.mrf.mxu1 }
 0x6ec   :  { %v4855_v10 = vadd.f32 %v6635_v42, %v8355_v60  ;;  %v4916_v24 = vadd.f32 %v4852_v58, %v7761_v53 }
 0x6ed   :  { %v4606_v33 = vpop.f32.mrf.mxu1 }
 0x6ee   :  { %v4919_v8 = vadd.f32 %v7772_v7, %v4855_v10  ;;  %v4853_v5 = vadd.f32 %v8355_v60, %v4606_v33 }
 0x6ef   :  { %v6638_v51 = vpop.f32.mrf.mxu1 }
 0x6f0   :  { %v8376_v30 = vpack.c.bf16 %v4919_v8, %v4918_v57  ;;  %v4917_v9 = vadd.f32 %v4853_v5, %v7776_v4  ;;  %v4858_v42 = vadd.f32 %v6638_v51, %v8355_v60 }
 0x6f1   :  { %v8379_v54 = vpop.f32.mrf.mxu1 }
 0x6f2   :  { %v8381_v19 = vpack.c.bf16 %v4917_v9, %v4916_v24 }
 0x6f3   :  { %v6639_v46 = vpop.f32.mrf.mxu1 }
 0x6f4   :  { %v4859_v9 = vadd.f32 %v6639_v46, %v8355_v60 }
 0x6f5   :  { %v4622_v40 = vpop.f32.mrf.mxu1 }
 0x6f7   :  { %v6642_v27 = vpop.f32.mrf.mxu1 }
 0x6f8   :  { %v4862_v35 = vadd.f32 %v6642_v27, %v8355_v60 }
 0x6f9   :  { %v4635_v3 = vpop.f32.mrf.mxu1 }
 0x6fa   :  { %v4926_v27 = vadd.f32 %v7804_v26, %v4862_v35  ;;  %v4857_v35 = vadd.f32 %v8355_v60, %v4622_v40 }
 0x6fb   :  { %v6643_v52 = vpop.f32.mrf.mxu1 }
 0x6fc   :  { %v4863_v2 = vadd.f32 %v6643_v52, %v8355_v60  ;;  %v4860_v52 = vadd.f32 %v8355_v60, %v4635_v3 }
 0x6fd   :  { %v4638_v34 = vpop.f32.mrf.mxu1 }
 0x6fe   :  { %v4927_v58 = vadd.f32 %v7815_v11, %v4863_v2  ;;  %v4861_v10 = vadd.f32 %v8355_v60, %v4638_v34 }
 0x6ff   :  { %v8383_v7 = vpop.f32.mrf.mxu1 }
 0x700   :  { %v5015_v2 = vpack.c.bf16 %v4927_v58, %v4926_v27  ;;  %v4856_v58 = vadd.f32 %v8355_v60, %v8379_v54 }
 0x701   :  { %v8385_v62 = vpop.f32.mrf.mxu1 }
 0x703   :  { %v8387_v50 = vpop.f32.mrf.mxu1 }
 0x705   :  { %v8389_v53 = vpop.f32.mrf.mxu1 }
 0x707   :  { %v8391_v61 = vpop.f32.mrf.mxu1 }
 0x708   :  { %v4870_v40 = vadd.f32 %v8391_v61, %v8355_v60 }
 0x709   :  { %v8393_v4 = vpop.f32.mrf.mxu1 }
 0x70b   :  { %v6651_v1 = vpop.f32.mrf.mxu1 }
 0x70d   :  { %v8395_v29 = vpop.f32.mrf.mxu1 }
 0x70f   :  { %v6654_v41 = vpop.f32.mrf.mxu1 }
 0x710   :  { %v4874_v11 = vadd.f32 %v6654_v41, %v8355_v60 }
 0x711   :  { %v4683_v36 = vpop.f32.mrf.mxu1 }
 0x713   :  { %v6655_v37 = vpop.f32.mrf.mxu1 }
 0x714   :  { %v4875_v57 = vadd.f32 %v6655_v37, %v8355_v60 }
 0x715   :  { %v4686_v12 = vpop.f32.mrf.mxu1 }
 0x716   :  { %v4939_v26 = vadd.f32 %v7895_v48, %v4875_v57 }
 0x717   :  { %v6658_v28 = vpop.f32.mrf.mxu1 }
 0x718   :  { %v4878_v6 = vadd.f32 %v6658_v28, %v8355_v60 }
 0x719   :  { %v4699_v23 = vpop.f32.mrf.mxu1 }
 0x71a   :  { %v4876_v16 = vadd.f32 %v8355_v60, %v4699_v23  ;;  %v4942_v8 = vadd.f32 %v7913_v44, %v4878_v6  ;;  %v4922_v44 = vadd.f32 %v7784_v32, %v4858_v42  ;;  %v4873_v23 = vadd.f32 %v8355_v60, %v4686_v12 }
 0x71b   :  { %v6659_v55 = vpop.f32.mrf.mxu1  ;;  %v4872_v6 = vadd.f32 %v8355_v60, %v4683_v36 }
 0x71c   :  { %v4879_v20 = vadd.f32 %v6659_v55, %v8355_v60  ;;  %v4940_v34 = vadd.f32 %v4876_v16, %v7924_v0  ;;  %v4923_v0 = vadd.f32 %v7795_v31, %v4859_v9  ;;  %v4871_v31 = vadd.f32 %v6651_v1, %v8355_v60 }
 0x71d   :  { %v4702_v33 = vpop.f32.mrf.mxu1  ;;  %v4936_v1 = vadd.f32 %v4872_v6, %v7885_v56  ;;  %v4869_v56 = vadd.f32 %v8355_v60, %v8395_v29  ;;  %v4934_v29 = vadd.f32 %v7847_v45, %v4870_v40  ;;  %v8852_v40 = vld [vmem:[#allocation3_spill] sm:$0xff] }
 0x71e   :  { %v4943_v5 = vadd.f32 %v7930_v21, %v4879_v20  ;;  %v4877_v24 = vadd.f32 %v8355_v60, %v4702_v33  ;;  %v4925_v21 = vadd.f32 %v4861_v10, %v7819_v15  ;;  %v4938_v15 = vadd.f32 %v7877_v47, %v4874_v11  ;;  %v8843_v11 = vld [vmem:[#allocation7_spill] sm:$0xff] }
 0x71f   :  { %v6662_v51 = vpop.f32.mrf.mxu1  ;;  %v5013_v54 = vpack.c.bf16 %v4923_v0, %v4922_v44  ;;  %v4921_v33 = vadd.f32 %v4857_v35, %v7799_v43  ;;  %v4935_v57 = vadd.f32 %v7858_v25, %v4871_v31  ;;  %v4868_v43 = vadd.f32 %v8355_v60, %v8393_v4  ;;  %v8844_v4 = vld [vmem:[#allocation8_spill] sm:$0xff]  ;;  %v8848_v0 = vld [vmem:[#allocation11_spill] sm:$0xff] }
 0x720   :  { %v4941_v28 = vadd.f32 %v4877_v24, %v7943_v14  ;;  %v5023_v37 = vpack.c.bf16 %v4943_v5, %v4942_v8  ;;  %v4882_v3 = vadd.f32 %v6662_v51, %v8355_v60  ;;  %v4924_v14 = vadd.f32 %v4860_v52, %v7810_v18 }
 0x721   :  { %v4715_v46 = vpop.f32.mrf.mxu1  ;;  %v4937_v18 = vadd.f32 %v4873_v23, %v7903_v38  ;;  %v5021_v42 = vpack.c.bf16 %v4939_v26, %v4938_v15  ;;  %v4920_v24 = vadd.f32 %v4856_v58, %v7790_v17  ;;  %v4867_v51 = vadd.f32 %v8387_v50, %v8355_v60  ;;  %v8846_v23 = vld [vmem:[#allocation6_spill] sm:$0xff]  ;;  %v8847_v50 = vld [vmem:[#allocation9_spill] sm:$0xff] }
 0x722   :  { %5988 = vmatprep.subr.bf16.mxu0 %v5023_v37  ;;  %6692 = vmatprep.subr.bf16.mxu1 %v5023_v37  ;;  %v5022_v41 = vpack.c.bf16 %v4941_v28, %v4940_v34  ;;  %v4880_v12 = vadd.f32 %v8355_v60, %v4715_v46  ;;  %v5014_v55 = vpack.c.bf16 %v4925_v21, %v4924_v14  ;;  %v8845_v37 = vld [vmem:[#allocation10_spill] sm:$0xff] }
 0x723   :  { %v6663_v32 = vpop.f32.mrf.mxu1  ;;  %5989 = vmatpush3.bf16.msra.mxu0 %v5015_v2  ;;  %6700 = vmatpush3.bf16.msra.mxu1 %v5015_v2  ;;  %v8430_v36 = vadd.f32 %v7955_v13, %v4882_v3  ;;  %v5020_v5 = vpack.c.bf16 %v4937_v18, %v4936_v1  ;;  %v5012_v52 = vpack.c.bf16 %v4921_v33, %v4920_v24  ;;  %v6813_v33 = vld [vmem:[%s8762_s9] ss:$16 sps:$4 sm:$0xff]  }
 0x724   :  { %v4883_v48 = vadd.f32 %v6663_v32, %v8355_v60  ;;  %5990 = vmatprep.subr.bf16.mxu0 %v5022_v41  ;;  %6693 = vmatprep.subr.bf16.mxu1 %v5022_v41  ;;  %v8442_v38 = vadd.f32 %v4880_v12, %v7966_v59  ;;  %v6851_v59 = vld [vmem:[%s8762_s9 + $0xc4] ss:$16 sps:$4 sm:$0xff]   ;;  %v4933_v17 = vadd.f32 %v4869_v56, %v8843_v11 }
 0x725   :  { %v4718_v16 = vpop.f32.mrf.mxu1  ;;  %5280 = vmatprep.mubr.bf16.mxu1 %v6851_v59  ;;  %v5019_v2 = vpack.c.bf16 %v4935_v57, %v4934_v29  ;;  %v4866_v21 = vadd.f32 %v8383_v7, %v8355_v60  ;;  %v4932_v46 = vadd.f32 %v4868_v43, %v8846_v23  ;;  %v8849_v7 = vld [vmem:[#allocation4_spill] sm:$0xff]  ;;  %v4865_v15 = vadd.f32 %v8355_v60, %v8389_v53  ;;  %v8851_v53 = vld [vmem:[#allocation5_spill] sm:$0xff] }
 0x726   :  { %v8433_v20 = vadd.f32 %v7979_v63, %v4883_v48  ;;  %v4881_v47 = vadd.f32 %v8355_v60, %v4718_v16  ;;  %v4931_v32 = vadd.f32 %v8849_v7, %v4867_v51  ;;  %v4864_v18 = vadd.f32 %v8355_v60, %v8385_v62  ;;  %v6821_v43 = vld [vmem:[%s8762_s9 + $0x44] ss:$16 sps:$4 sm:$0xff]  }
 0x727   :  { %v6666_v10 = vpop.f32.mrf.mxu1  ;;  %5991 = vmatpush3.bf16.msra.mxu0 %v5014_v55  ;;  %6701 = vmatpush3.bf16.msra.mxu1 %v5014_v55  ;;  %v5018_v48 = vpack.c.bf16 %v4933_v17, %v4932_v46  ;;  %v8850_v55 = vld [vmem:[#allocation2_spill] sm:$0xff] }
 0x728   :  { %v5025_v13 = vpack.c.bf16 %v8433_v20, %v8430_v36  ;;  %v8447_v63 = vadd.f32 %v4881_v47, %v7993_v39  ;;  %5992 = vmatprep.subr.bf16.mxu0 %v5021_v42  ;;  %6694 = vmatprep.subr.bf16.mxu1 %v5021_v42  ;;  %v4886_v39 = vadd.f32 %v6666_v10, %v8355_v60  ;;  %v6824_v51 = vld [vmem:[%s8762_s9 + $0x64] ss:$16 sps:$4 sm:$0xff]   ;;  %v6834_v36 = vld [vmem:[%s8762_s9 + $0x28] ss:$16 sps:$4 sm:$0xff]   ;;  %v6839_v20 = vld [vmem:[%s8762_s9 + $0x4c] ss:$16 sps:$4 sm:$0xff]  }
 0x729   :  { %v4731_v61 = vpop.f32.mrf.mxu1  ;;  %v4930_v31 = vadd.f32 %v8850_v55, %v4866_v21  ;;  %v4929_v47 = vadd.f32 %v4865_v15, %v8851_v53  ;;  %v4928_v1 = vadd.f32 %v4864_v18, %v8852_v40  ;;  %v8854_v18 = vld [vmem:[#allocation32_spill] sm:$0xff] }
 0x72a   :  { %v5024_v8 = vpack.c.bf16 %v8447_v63, %v8442_v38  ;;  %v4884_v27 = vadd.f32 %v8355_v60, %v4731_v61  ;;  %v8469_v28 = vadd.f32 %v8844_v4, %v4886_v39  ;;  %v6857_v61 = vld [vmem:[%s8762_s9 + $0xe4] ss:$16 sps:$4 sm:$0xff]   ;;  %v6822_v4 = vld [vmem:[%s8762_s9 + $0x60] ss:$16 sps:$4 sm:$0xff]   ;;  %v6837_v38 = vld [vmem:[%s8762_s9 + $0x48] ss:$16 sps:$4 sm:$0xff]  }
 0x72b   :  { %v6667_v9 = vpop.f32.mrf.mxu1  ;;  %5993 = vmatpush3.bf16.msra.mxu0 %v5013_v54  ;;  %6702 = vmatpush3.bf16.msra.mxu1 %v5013_v54  ;;  %v5017_v42 = vpack.c.bf16 %v4931_v32, %v4930_v31  ;;  %v5016_v10 = vpack.c.bf16 %v4929_v47, %v4928_v1  ;;  %v8853_v32 = vld [vmem:[#allocation18_spill] sm:$0xff]  ;;  %v8856_v1 = vld [vmem:[#allocation16_spill] sm:$0xff]  ;;  %v6840_v63 = vld [vmem:[%s8762_s9 + $0x68] ss:$16 sps:$4 sm:$0xff]  }
 0x72c   :  { %v4887_v25 = vadd.f32 %v6667_v9, %v8355_v60  ;;  %5994 = vmatprep.subr.bf16.mxu0 %v5020_v5  ;;  %6695 = vmatprep.subr.bf16.mxu1 %v5020_v5  ;;  %v8481_v3 = vadd.f32 %v4884_v27, %v8847_v50  ;;  %v6855_v5 = vld [vmem:[%s8762_s9 + $0xe0] ss:$16 sps:$4 sm:$0xff]  }
 0x72d   :  { %v4734_v34 = vpop.f32.mrf.mxu1  ;;  %v8855_v47 = vld [vmem:[#allocation34_spill] sm:$0xff] }
 0x72e   :  { %v8472_v44 = vadd.f32 %v8845_v37, %v4887_v25  ;;  %v4885_v45 = vadd.f32 %v8355_v60, %v4734_v34  ;;  %v6819_v25 = vld [vmem:[%s8762_s9 + $0x40] ss:$16 sps:$4 sm:$0xff]  }
 0x72f   :  { %v8478_v26 = vpop.f32.mrf.mxu1  ;;  %5995 = vmatpush3.bf16.msra.mxu0 %v5012_v52  ;;  %6703 = vmatpush3.bf16.msra.mxu1 %v5012_v52 }
 0x730   :  { %v5027_v41 = vpack.c.bf16 %v8472_v44, %v8469_v28  ;;  %v8486_v14 = vadd.f32 %v4885_v45, %v8848_v0  ;;  %5996 = vmatprep.subr.bf16.mxu0 %v5019_v2  ;;  %6696 = vmatprep.subr.bf16.mxu1 %v5019_v2  ;;  %v6827_v45 = vld [vmem:[%s8762_s9 + $0x84] ss:$16 sps:$4 sm:$0xff]   ;;  %v6836_v28 = vld [vmem:[%s8762_s9 + $0x2c] ss:$16 sps:$4 sm:$0xff]   ;;  %v6843_v44 = vld [vmem:[%s8762_s9 + $0x88] ss:$16 sps:$4 sm:$0xff]  }
 0x731   :  { %v8488_v6 = vpop.f32.mrf.mxu1 }
 0x732   :  { %v5026_v12 = vpack.c.bf16 %v8486_v14, %v8481_v3  ;;  %v6848_v3 = vld [vmem:[%s8762_s9 + $0xac] ss:$16 sps:$4 sm:$0xff]  }
 0x733   :  { %v8495_v35 = vpop.f32.mrf.mxu1  ;;  %5997 = vmatpush3.bf16.msra.mxu0 %v8376_v30  ;;  %6704 = vmatpush3.bf16.msra.mxu1 %v8376_v30  ;;  %v6854_v14 = vld [vmem:[%s8762_s9 + $0xcc] ss:$16 sps:$4 sm:$0xff]  }
 0x734   :  { %5998 = vmatprep.subr.bf16.mxu0 %v5018_v48  ;;  %6697 = vmatprep.subr.bf16.mxu1 %v5018_v48 }
 0x735   :  { %v8502_v16 = vpop.f32.mrf.mxu1 }
 0x737   :  { %v6674_v58 = vpop.f32.mrf.mxu1  ;;  %5999 = vmatpush3.bf16.msra.mxu0 %v8381_v19  ;;  %6705 = vmatpush3.bf16.msra.mxu1 %v8381_v19  ;;  %v6849_v19 = vld [vmem:[%s8762_s9 + $0xc0] ss:$16 sps:$4 sm:$0xff]  }
 0x738   :  { %6000 = vmatprep.subr.bf16.mxu0 %v5017_v42  ;;  %6698 = vmatprep.subr.bf16.mxu1 %v5017_v42  ;;  %v4894_v46 = vadd.f32 %v6674_v58, %v8355_v60  ;;  %v6825_v58 = vld [vmem:[%s8762_s9 + $0x80] ss:$16 sps:$4 sm:$0xff]  }
 0x739   :  { %v4763_v30 = vpop.f32.mrf.mxu1 }
 0x73b   :  { %v6675_v54 = vpop.f32.mrf.mxu1  ;;  %6001 = vmatpush3.bf16.msra.mxu0 %v8364_v49  ;;  %6706 = vmatpush3.bf16.msra.mxu1 %v8364_v49  ;;  %v6818_v49 = vld [vmem:[%s8762_s9 + $0x24] ss:$16 sps:$4 sm:$0xff]  }
 0x73c   :  { %6002 = vmatprep.subr.bf16.mxu0 %v5016_v10  ;;  %6699 = vmatprep.subr.bf16.mxu1 %v5016_v10  ;;  %v4895_v2 = vadd.f32 %v6675_v54, %v8355_v60  ;;  %v4958_v10 = vadd.f32 %v8856_v1, %v4894_v46  ;;  %v4892_v54 = vadd.f32 %v8355_v60, %v4763_v30  ;;  %v8868_v1 = vld [vmem:[#allocation26_spill] sm:$0xff] }
 0x73d   :  { %v4766_v62 = vpop.f32.mrf.mxu1 }
 0x73e   :  { %v4959_v15 = vadd.f32 %v8853_v32, %v4895_v2  ;;  %v4893_v48 = vadd.f32 %v8355_v60, %v4766_v62  ;;  %v6830_v62 = vld [vmem:[%s8762_s9 + $0xa4] ss:$16 sps:$4 sm:$0xff]   ;;  %v8861_v2 = vld [vmem:[#allocation17_spill] sm:$0xff] }
 0x73f   :  { %v8516_v56 = vpop.f32.mrf.mxu1  ;;  %6003 = vmatpush3.bf16.msra.mxu0 %v8367_v22  ;;  %6707 = vmatpush3.bf16.msra.mxu1 %v8367_v22  ;;  %v6816_v22 = vld [vmem:[%s8762_s9 + $0x20] ss:$16 sps:$4 sm:$0xff]  }
 0x741   :  { %v8526_v59 = vpop.f32.mrf.mxu1 }
 0x742   :  { %5233 = vmatmul.mubr.bf16.vlgmr.msra.gmra.mxu0 %v6813_v33  ;;  %5281 = vmatmul.mubr.bf16.vlgmr.msra.gmra.mxu1 %v6849_v19  ;;  %v8857_v19 = vld [vmem:[#allocation33_spill] sm:$0xff] }
 0x743   :  { %v8528_v57 = vpop.f32.mrf.mxu1  ;;  %5240 = vmatprep.mubr.bf16.mxu0 %v6818_v49  ;;  %5288 = vmatprep.mubr.bf16.mxu1 %v6857_v61  ;;  %v8858_v61 = vld [vmem:[#allocation35_spill] sm:$0xff] }
 0x745   :  { %v8530_v39 = vpop.f32.mrf.mxu1 }
 0x747   :  { %v8538_v24 = vpop.f32.mrf.mxu1 }
 0x749   :  { %v8543_v9 = vpop.f32.mrf.mxu1 }
 0x74a   :  { %5241 = vmatmul.mubr.bf16.gmra.mxu0 %v6816_v22  ;;  %5289 = vmatmul.mubr.bf16.gmra.mxu1 %v6855_v5 }
 0x74b   :  { %v6683_v29 = vpop.f32.mrf.mxu1  ;;  %5248 = vmatprep.mubr.bf16.mxu0 %v6821_v43  ;;  %v4891_v43 = vadd.f32 %v8495_v35, %v8355_v60 }
 0x74c   :  { %v4903_v32 = vadd.f32 %v6683_v29, %v8355_v60  ;;  %v4902_v29 = vadd.f32 %v8538_v24, %v8355_v60  ;;  %v4900_v24 = vadd.f32 %v8355_v60, %v8543_v9  ;;  %v4897_v9 = vadd.f32 %v8355_v60, %v8530_v39 }
 0x74d   :  { %v8545_v27 = vpop.f32.mrf.mxu1 }
 0x74f   :  { %v6686_v52 = vpop.f32.mrf.mxu1 }
 0x750   :  { %v4906_v33 = vadd.f32 %v6686_v52, %v8355_v60  ;;  %v4890_v52 = vadd.f32 %v8478_v26, %v8355_v60 }
 0x751   :  { %v4811_v11 = vpop.f32.mrf.mxu1 }
 0x752   :  { %5249 = vmatmul.mubr.bf16.gmra.mxu0 %v6819_v25  ;;  %v5031_v25 = vpack.c.bf16 %v4959_v15, %v4958_v10  ;;  %v4904_v35 = vadd.f32 %v8355_v60, %v4811_v11  ;;  %v8864_v15 = vld [vmem:[#allocation31_spill] sm:$0xff]  ;;  %v4888_v11 = vadd.f32 %v8355_v60, %v8488_v6  ;;  %v4967_v10 = vadd.f32 %v8868_v1, %v4903_v32 }
 0x753   :  { %v6687_v17 = vpop.f32.mrf.mxu1  ;;  %5256 = vmatprep.mubr.bf16.mxu0 %v6824_v51  ;;  %v8859_v51 = vld [vmem:[#allocation19_spill] sm:$0xff] }
 0x754   :  { %v4907_v31 = vadd.f32 %v6687_v17, %v8355_v60  ;;  %v4957_v17 = vadd.f32 %v4893_v48, %v8859_v51  ;;  %v8872_v51 = vld [vmem:[#allocation25_spill] sm:$0xff] }
 0x755   :  { %v4814_v34 = vpop.f32.mrf.mxu1 }
 0x756   :  { %v4905_v30 = vadd.f32 %v8355_v60, %v4814_v34  ;;  %v4889_v34 = vadd.f32 %v8355_v60, %v8502_v16  ;;  %v6833_v16 = vld [vmem:[%s8762_s9 + $0xc] ss:$16 sps:$4 sm:$0xff]  }
 0x757   :  { %v6690_v37 = vpop.f32.mrf.mxu1 }
 0x758   :  { %v4910_v23 = vadd.f32 %v6690_v37, %v8355_v60  ;;  %v4969_v48 = vadd.f32 %v4905_v30, %v8864_v15 }
 0x759   :  { %v4827_v21 = vpop.f32.mrf.mxu1 }
 0x75a   :  { %5257 = vmatmul.mubr.bf16.gmra.mxu0 %v6822_v4  ;;  %v4908_v0 = vadd.f32 %v8355_v60, %v4827_v21  ;;  %v4974_v53 = vadd.f32 %v8854_v18, %v4910_v23  ;;  %v8860_v4 = vld [vmem:[#allocation30_spill] sm:$0xff]  ;;  %v4956_v21 = vadd.f32 %v4892_v54, %v8861_v2  ;;  %v8862_v23 = vld [vmem:[#allocation28_spill] sm:$0xff]  ;;  %v4901_v54 = vadd.f32 %v8355_v60, %v8545_v27 }
 0x75b   :  { %v6691_v50 = vpop.f32.mrf.mxu1  ;;  %5264 = vmatprep.mubr.bf16.mxu0 %v6827_v45  ;;  %v4971_v37 = vadd.f32 %v8860_v4, %v4907_v31  ;;  %v4970_v46 = vadd.f32 %v8862_v23, %v4906_v33  ;;  %v8865_v31 = vld [vmem:[#allocation12_spill] sm:$0xff]  ;;  %v4898_v27 = vadd.f32 %v8516_v56, %v8355_v60  ;;  %v8873_v4 = vld [vmem:[#allocation22_spill] sm:$0xff]  ;;  %v8875_v56 = vld [vmem:[#allocation23_spill] sm:$0xff] }
 0x75c   :  { %v4911_v7 = vadd.f32 %v6691_v50, %v8355_v60  ;;  %v4972_v49 = vadd.f32 %v4908_v0, %v8857_v19  ;;  %v8863_v50 = vld [vmem:[#allocation14_spill] sm:$0xff]  ;;  %v4954_v18 = vadd.f32 %v8865_v31, %v4890_v52  ;;  %v8870_v19 = vld [vmem:[#allocation24_spill] sm:$0xff]  ;;  %v4896_v52 = vadd.f32 %v8355_v60, %v8526_v59  ;;  %v8876_v23 = vld [vmem:[#allocation21_spill] sm:$0xff] }
 0x75d   :  { %v4830_v55 = vpop.f32.mrf.mxu1  ;;  %v4955_v0 = vadd.f32 %v8863_v50, %v4891_v43  ;;  %v5037_v26 = vpack.c.bf16 %v4971_v37, %v4970_v46  ;;  %v4961_v2 = vadd.f32 %v4897_v9, %v8875_v56  ;;  %v6860_v59 = vld [vmem:[%s8762_s9 + $0xec] ss:$16 sps:$4 sm:$0xff]  }
 0x75e   :  { %v4975_v42 = vadd.f32 %v8855_v47, %v4911_v7  ;;  %v4909_v40 = vadd.f32 %v8355_v60, %v4830_v55  ;;  %v5030_v7 = vpack.c.bf16 %v4957_v17, %v4956_v21  ;;  %v6828_v55 = vld [vmem:[%s8762_s9 + $0xa0] ss:$16 sps:$4 sm:$0xff]   ;;  %v4964_v17 = vadd.f32 %v4900_v24, %v8872_v51 }
 0x75f   :  { %v4960_v39 = vadd.f32 %v4896_v52, %v8876_v23 }
 0x760   :  { %v4973_v22 = vadd.f32 %v4909_v40, %v8858_v61  ;;  %v5039_v5 = vpack.c.bf16 %v4975_v42, %v4974_v53  ;;  %v8866_v53 = vld [vmem:[#allocation29_spill] sm:$0xff]  ;;  %v5029_v42 = vpack.c.bf16 %v4955_v0, %v4954_v18  ;;  %v8867_v40 = vld [vmem:[#allocation15_spill] sm:$0xff] }
 0x761   :  { %v4968_v47 = vadd.f32 %v4904_v35, %v8866_v53  ;;  %v5032_v46 = vpack.c.bf16 %v4961_v2, %v4960_v39  ;;  %v6858_v35 = vld [vmem:[%s8762_s9 + $0xe8] ss:$16 sps:$4 sm:$0xff]  }
 0x762   :  { %6052 = vmatprep.subr.bf16.mxu0 %v5039_v5  ;;  %v5038_v45 = vpack.c.bf16 %v4973_v22, %v4972_v49  ;;  %5265 = vmatmul.mubr.bf16.gmra.mxu0 %v6825_v58  ;;  %v4953_v58 = vadd.f32 %v4889_v34, %v8867_v40  ;;  %v4966_v49 = vadd.f32 %v8870_v19, %v4902_v29  ;;  %v8871_v5 = vld [vmem:[#allocation27_spill] sm:$0xff] }
 0x763   :  { %6053 = vmatpush3.bf16.msra.mxu0 %v5031_v25  ;;  %5272 = vmatprep.mubr.bf16.mxu0 %v6830_v62  ;;  %v5036_v6 = vpack.c.bf16 %v4969_v48, %v4968_v47  ;;  %v8869_v62 = vld [vmem:[#allocation13_spill] sm:$0xff]  ;;  %v4899_v22 = vadd.f32 %v8528_v57, %v8355_v60  ;;  %v4965_v43 = vadd.f32 %v4901_v54, %v8871_v5  ;;  %v8874_v57 = vld [vmem:[#allocation20_spill] sm:$0xff] }
 0x764   :  { %6054 = vmatprep.subr.bf16.mxu0 %v5038_v45  ;;  %v4952_v33 = vadd.f32 %v4888_v11, %v8869_v62  ;;  %v5035_v25 = vpack.c.bf16 %v4967_v10, %v4966_v49  ;;  %v4962_v45 = vadd.f32 %v8874_v57, %v4898_v27  ;;  %v6831_v60 = vld [vmem:[%s8762_s9 + $0x8] ss:$16 sps:$4 sm:$0xff]  }
 0x765   :  { %v4963_v37 = vadd.f32 %v8873_v4, %v4899_v22  ;;  %v5034_v30 = vpack.c.bf16 %v4965_v43, %v4964_v17 }
 0x766   :  { %v5028_v61 = vpack.c.bf16 %v4953_v58, %v4952_v33 }
 0x767   :  { %6055 = vmatpush3.bf16.msra.mxu0 %v5030_v7  ;;  %v5033_v21 = vpack.c.bf16 %v4963_v37, %v4962_v45 }
 0x768   :  { %6056 = vmatprep.subr.bf16.mxu0 %v5037_v26 }
 0x76a   :  { %5273 = vmatmul.mubr.bf16.gmra.mxu0 %v6828_v55 }
 0x76b   :  { %6057 = vmatpush3.bf16.msra.mxu0 %v5029_v42  ;;  %5329 = vmatprep.mubr.bf16.mxu0 %v6833_v16 }
 0x76c   :  { %6058 = vmatprep.subr.bf16.mxu0 %v5036_v6 }
 0x76f   :  { %6059 = vmatpush3.bf16.msra.mxu0 %v5028_v61 }
 0x770   :  { %6060 = vmatprep.subr.bf16.mxu0 %v5035_v25 }
 0x773   :  { %6061 = vmatpush3.bf16.msra.mxu0 %v5027_v41  ;;  %v6846_v41 = vld [vmem:[%s8762_s9 + $0xa8] ss:$16 sps:$4 sm:$0xff]  }
 0x774   :  { %6062 = vmatprep.subr.bf16.mxu0 %v5034_v30 }
 0x777   :  { %6063 = vmatpush3.bf16.msra.mxu0 %v5026_v12  ;;  %v6852_v12 = vld [vmem:[%s8762_s9 + $0xc8] ss:$16 sps:$4 sm:$0xff]  }
 0x778   :  { %6064 = vmatprep.subr.bf16.mxu0 %v5033_v21 }
 0x77b   :  { %6065 = vmatpush3.bf16.msra.mxu0 %v5025_v13  ;;  %v6842_v13 = vld [vmem:[%s8762_s9 + $0x6c] ss:$16 sps:$4 sm:$0xff]  }
 0x77c   :  { %6066 = vmatprep.subr.bf16.mxu0 %v5032_v46 }
 0x77f   :  { %6067 = vmatpush3.bf16.msra.mxu0 %v5024_v8  ;;  %v6845_v8 = vld [vmem:[%s8762_s9 + $0x8c] ss:$16 sps:$4 sm:$0xff]  }
 0x782   :  { %5330 = vmatmul.mubr.bf16.vlgmr.msra.gmra.mxu0 %v6831_v60 }
 0x783   :  { %5337 = vmatprep.mubr.bf16.mxu0 %v6836_v28 }
 0x78a   :  { %5338 = vmatmul.mubr.bf16.gmra.mxu0 %v6834_v36 }
 0x78b   :  { %5345 = vmatprep.mubr.bf16.mxu0 %v6839_v20 }
 0x792   :  { %5346 = vmatmul.mubr.bf16.gmra.mxu0 %v6837_v38 }
 0x793   :  { %5353 = vmatprep.mubr.bf16.mxu0 %v6842_v13 }
 0x79a   :  { %5354 = vmatmul.mubr.bf16.gmra.mxu0 %v6840_v63 }
 0x79b   :  { %5361 = vmatprep.mubr.bf16.mxu0 %v6845_v8 }
 0x7a2   :  { %5362 = vmatmul.mubr.bf16.gmra.mxu0 %v6843_v44 }
 0x7a3   :  { %5369 = vmatprep.mubr.bf16.mxu0 %v6848_v3 }
 0x7aa   :  { %5370 = vmatmul.mubr.bf16.gmra.mxu0 %v6846_v41 }
 0x7ab   :  { %5377 = vmatprep.mubr.bf16.mxu0 %v6854_v14 }
 0x7b2   :  { %5378 = vmatmul.mubr.bf16.gmra.mxu0 %v6852_v12 }
 0x7b3   :  { %5385 = vmatprep.mubr.bf16.mxu0 %v6860_v59 }
 0x7ba   :  { %5386 = vmatmul.mubr.bf16.gmra.mxu0 %v6858_v35 }
 0x802   :  { %v6004_v50 = vpop.f32.mrf.mxu0 }
 0x804   :  { %v6005_v0 = vpop.f32.mrf.mxu0 }
 0x805   :  { %v6006_v49 = vadd.f32 %v6005_v0, %v6004_v50  ;;  %v6040_v50 = vpop.f32.mrf.mxu1 }
 0x806   :  { %v6007_v34 = vpop.f32.mrf.mxu0 }
 0x808   :  { %v6008_v7 = vpop.f32.mrf.mxu0 }
 0x809   :  { %v6009_v43 = vadd.f32 %v6008_v7, %v6007_v34 }
 0x80a   :  { %v6010_v32 = vpop.f32.mrf.mxu0 }
 0x80c   :  { %v6011_v15 = vpop.f32.mrf.mxu0 }
 0x80d   :  { %v6012_v4 = vadd.f32 %v6011_v15, %v6010_v32 }
 0x80e   :  { %v6013_v48 = vpop.f32.mrf.mxu0 }
 0x810   :  { %v6014_v26 = vpop.f32.mrf.mxu0 }
 0x811   :  { %v6015_v45 = vadd.f32 %v6014_v26, %v6013_v48  ;;  %v6041_v48 = vpop.f32.mrf.mxu1 }
 0x812   :  { %v6016_v55 = vpop.f32.mrf.mxu0 }
 0x814   :  { %v6017_v31 = vpop.f32.mrf.mxu0 }
 0x815   :  { %v6018_v23 = vadd.f32 %v6017_v31, %v6016_v55 }
 0x816   :  { %v6019_v18 = vpop.f32.mrf.mxu0 }
 0x818   :  { %v6020_v11 = vpop.f32.mrf.mxu0 }
 0x819   :  { %v6021_v36 = vadd.f32 %v6020_v11, %v6019_v18 }
 0x81a   :  { %v6022_v16 = vpop.f32.mrf.mxu0 }
 0x81c   :  { %v6023_v29 = vpop.f32.mrf.mxu0 }
 0x81d   :  { %v6024_v8 = vadd.f32 %v6023_v29, %v6022_v16  ;;  %v6043_v16 = vpop.f32.mrf.mxu1 }
 0x81e   :  { %v6025_v53 = vpop.f32.mrf.mxu0 }
 0x820   :  { %v6026_v47 = vpop.f32.mrf.mxu0 }
 0x821   :  { %v6027_v12 = vadd.f32 %v6026_v47, %v6025_v53 }
 0x822   :  { %v6028_v42 = vpop.f32.mrf.mxu0 }
 0x824   :  { %v6029_v40 = vpop.f32.mrf.mxu0 }
 0x825   :  { %v6030_v7 = vadd.f32 %v6029_v40, %v6028_v42 }
 0x826   :  { %v8687_v58 = vpop.f32.mrf.mxu0 }
 0x828   :  { %v8689_v1 = vpop.f32.mrf.mxu0 }
 0x829   :  { %v6033_v31 = vadd.f32 %v8689_v1, %v8687_v58 }
 0x82a   :  { %v8691_v10 = vpop.f32.mrf.mxu0 }
 0x82c   :  { %v8693_v54 = vpop.f32.mrf.mxu0 }
 0x82d   :  { %v6036_v47 = vadd.f32 %v8693_v54, %v8691_v10 }
 0x82e   :  { %v8695_v6 = vpop.f32.mrf.mxu0 }
 0x830   :  { %v8697_v62 = vpop.f32.mrf.mxu0 }
 0x842   :  { %v6068_v33 = vpop.f32.mrf.mxu0 }
 0x844   :  { %v6069_v19 = vpop.f32.mrf.mxu0 }
 0x845   :  { %v6070_v24 = vadd.f32 %v6069_v19, %v6068_v33  ;;  %v6044_v33 = vpop.f32.mrf.mxu1  ;;  %v6039_v19 = vadd.f32 %v8697_v62, %v8695_v6 }
 0x846   :  { %v6071_v61 = vpop.f32.mrf.mxu0  ;;  %v6045_v6 = vadd.f32 %v6044_v33, %v6043_v16 }
 0x847   :  { %v5332_v22 = vadd.f32 %v6070_v24, %v6006_v49 }
 0x848   :  { %v6072_v5 = vpop.f32.mrf.mxu0 }
 0x849   :  { %5394 = vst [vmem:[%s8763_s10] sm:$0xff] %v5332_v22  ;;  %v6073_v25 = vadd.f32 %v6072_v5, %v6071_v61  ;;  %v6046_v61 = vpop.f32.mrf.mxu1  ;;  %v6042_v22 = vadd.f32 %v6041_v48, %v6040_v50 }
 0x84a   :  { %v6074_v27 = vpop.f32.mrf.mxu0 }
 0x84b   :  { %v5335_v51 = vadd.f32 %v6073_v25, %v6009_v43  ;;  %v6047_v25 = vpop.f32.mrf.mxu1 }
 0x84c   :  { %v6075_v17 = vpop.f32.mrf.mxu0 }
 0x84d   :  { %5395 = vst [vmem:[%s8763_s10 + $0x8] sm:$0xff] %v5335_v51  ;;  %v6076_v37 = vadd.f32 %v6075_v17, %v6074_v27 }
 0x84e   :  { %v6077_v9 = vpop.f32.mrf.mxu0 }
 0x84f   :  { %v5340_v30 = vadd.f32 %v6076_v37, %v6012_v4  ;;  %v6049_v4 = vpop.f32.mrf.mxu1 }
 0x850   :  { %v6078_v57 = vpop.f32.mrf.mxu0 }
 0x851   :  { %5396 = vst [vmem:[%s8763_s10 + $0x10] sm:$0xff] %v5340_v30  ;;  %v6079_v52 = vadd.f32 %v6078_v57, %v6077_v9  ;;  %v6048_v30 = vadd.f32 %v6047_v25, %v6046_v61 }
 0x852   :  { %v6080_v56 = vpop.f32.mrf.mxu0 }
 0x853   :  { %v5343_v2 = vadd.f32 %v6079_v52, %v6015_v45  ;;  %v6050_v52 = vpop.f32.mrf.mxu1 }
 0x854   :  { %v6081_v21 = vpop.f32.mrf.mxu0 }
 0x855   :  { %5397 = vst [vmem:[%s8763_s10 + $0x18] sm:$0xff] %v5343_v2  ;;  %v6082_v39 = vadd.f32 %v6081_v21, %v6080_v56  ;;  %v6051_v21 = vadd.f32 %v6050_v52, %v6049_v4 }
 0x856   :  { %v6083_v46 = vpop.f32.mrf.mxu0 }
 0x857   :  { %v5348_v60 = vadd.f32 %v6082_v39, %v6018_v23 }
 0x858   :  { %v6084_v28 = vpop.f32.mrf.mxu0 }
 0x859   :  { %5398 = vst [vmem:[%s8763_s10 + $0x20] sm:$0xff] %v5348_v60  ;;  %v6085_v20 = vadd.f32 %v6084_v28, %v6083_v46 }
 0x85a   :  { %v6086_v38 = vpop.f32.mrf.mxu0 }
 0x85b   :  { %v5351_v13 = vadd.f32 %v6085_v20, %v6021_v36 }
 0x85c   :  { %v6087_v63 = vpop.f32.mrf.mxu0 }
 0x85d   :  { %5399 = vst [vmem:[%s8763_s10 + $0x28] sm:$0xff] %v5351_v13  ;;  %v6088_v44 = vadd.f32 %v6087_v63, %v6086_v38 }
 0x85e   :  { %v6089_v3 = vpop.f32.mrf.mxu0 }
 0x85f   :  { %v5356_v41 = vadd.f32 %v6088_v44, %v6024_v8 }
 0x860   :  { %v6090_v14 = vpop.f32.mrf.mxu0 }
 0x861   :  { %5400 = vst [vmem:[%s8763_s10 + $0x30] sm:$0xff] %v5356_v41  ;;  %v6091_v59 = vadd.f32 %v6090_v14, %v6089_v3 }
 0x862   :  { %v6092_v35 = vpop.f32.mrf.mxu0 }
 0x863   :  { %v5359_v0 = vadd.f32 %v6091_v59, %v6027_v12 }
 0x864   :  { %v6093_v34 = vpop.f32.mrf.mxu0 }
 0x865   :  { %5401 = vst [vmem:[%s8763_s10 + $0x38] sm:$0xff] %v5359_v0  ;;  %v6094_v32 = vadd.f32 %v6093_v34, %v6092_v35 }
 0x866   :  { %v6095_v15 = vpop.f32.mrf.mxu0 }
 0x867   :  { %v5364_v26 = vadd.f32 %v6094_v32, %v6030_v7 }
 0x868   :  { %v6096_v55 = vpop.f32.mrf.mxu0 }
 0x869   :  { %5402 = vst [vmem:[%s8763_s10 + $0x40] sm:$0xff] %v5364_v26  ;;  %v6097_v18 = vadd.f32 %v6096_v55, %v6095_v15 }
 0x86a   :  { %v6098_v11 = vpop.f32.mrf.mxu0 }
 0x86b   :  { %v5367_v29 = vadd.f32 %v6097_v18, %v6033_v31 }
 0x86c   :  { %v6099_v53 = vpop.f32.mrf.mxu0 }
 0x86d   :  { %5403 = vst [vmem:[%s8763_s10 + $0x48] sm:$0xff] %v5367_v29  ;;  %v6100_v42 = vadd.f32 %v6099_v53, %v6098_v11 }
 0x86e   :  { %v6101_v40 = vpop.f32.mrf.mxu0 }
 0x86f   :  { %v5372_v58 = vadd.f32 %v6100_v42, %v6036_v47 }
 0x870   :  { %v6102_v1 = vpop.f32.mrf.mxu0 }
 0x871   :  { %5404 = vst [vmem:[%s8763_s10 + $0x50] sm:$0xff] %v5372_v58  ;;  %v6103_v49 = vadd.f32 %v6102_v1, %v6101_v40 }
 0x872   :  { %v6104_v24 = vpop.f32.mrf.mxu0 }
 0x873   :  { %v5375_v10 = vadd.f32 %v6103_v49, %v6039_v19 }
 0x874   :  { %v6105_v54 = vpop.f32.mrf.mxu0 }
 0x875   :  { %5405 = vst [vmem:[%s8763_s10 + $0x58] sm:$0xff] %v5375_v10  ;;  %v6106_v5 = vadd.f32 %v6105_v54, %v6104_v24 }
 0x876   :  { %v6107_v43 = vpop.f32.mrf.mxu0 }
 0x877   :  { %v5380_v27 = vadd.f32 %v6106_v5, %v6042_v22 }
 0x878   :  { %v6108_v51 = vpop.f32.mrf.mxu0 }
 0x879   :  { %5406 = vst [vmem:[%s8763_s10 + $0x60] sm:$0xff] %v5380_v27  ;;  %v6109_v62 = vadd.f32 %v6108_v51, %v6107_v43 }
 0x87a   :  { %v6110_v17 = vpop.f32.mrf.mxu0 }
 0x87b   :  { %v5383_v37 = vadd.f32 %v6109_v62, %v6045_v6 }
 0x87c   :  { %v6111_v9 = vpop.f32.mrf.mxu0 }
 0x87d   :  { %5407 = vst [vmem:[%s8763_s10 + $0x68] sm:$0xff] %v5383_v37  ;;  %v6112_v57 = vadd.f32 %v6111_v9, %v6110_v17 }
 0x87e   :  { %v6113_v45 = vpop.f32.mrf.mxu0 }
 0x87f   :  { %v5388_v56 = vadd.f32 %v6112_v57, %v6048_v30 }
 0x880   :  { %v6114_v2 = vpop.f32.mrf.mxu0 }
 0x881   :  { %5408 = vst [vmem:[%s8763_s10 + $0x70] sm:$0xff] %v5388_v56  ;;  %v6115_v23 = vadd.f32 %v6114_v2, %v6113_v45 }
 0x883   :  { %v5391_v39 = vadd.f32 %v6115_v23, %v6051_v21 }
 0x885   :  { %5409 = vst [vmem:[%s8763_s10 + $0x78] sm:$0xff] %v5391_v39 }

// kernel: e4e_forward.2
= control target key start
LH: loop header
LB: loop body
LE: loop exit
PB: predicated region body
PF: predicated region fallthrough
CT: control target
= control target key end

     0   :  { %16 = vsyncpa [#allocation3], 0  ;;  %s9281_s0 = inlined_call_operand.vmem [shape: f32[512,8], index: 0, kind: input, shape index: {}]   ;;  %s9282_s1 = inlined_call_operand.vmem [shape: bf16[8,128], index: 1, kind: input, shape index: {}]   ;;  %s9283_s2 = inlined_call_operand.vmem [shape: f32[1,128], index: 2, kind: input, shape index: {}]   ;;  %s9284_s3 = inlined_call_operand.vmem [shape: bf16[128,3072], index: 3, kind: input, shape index: {}]   ;;  %s9285_s4 = inlined_call_operand.vmem [shape: f32[1,3072], index: 4, kind: input, shape index: {}]   ;;  %s9286_s5 = inlined_call_operand.vmem [shape: f32[1,3072], index: 5, kind: input, shape index: {}]   ;;  %s9287_s6 = inlined_call_operand.hbm [shape: bf16[8,512,128], index: 6, kind: input, shape index: {}]   ;;  %s9288_s7 = inlined_call_operand.vmem [shape: f32[8,1,128], index: 7, kind: input, shape index: {}]   ;;  %s9289_s8 = inlined_call_operand.hbm [shape: bf16[8,128,128], index: 8, kind: input, shape index: {}]   ;;  %s9290_s9 = inlined_call_operand.vmem [shape: f32[8,2,128], index: 9, kind: output, shape index: {0}]   ;;  %s9291_s10 = inlined_call_operand.vmem [shape: f32[8,2,128], index: 10, kind: output, shape index: {1}]  }
   0x1   :  { %17 = vsyncpa [#allocation5], 0  ;;  %s7902_s13 = smov [#allocation2]  }
   0x2   :  { %s35_s14 = sshll.u32 %s7902_s13, 4  ;;  %s36_s14 = int_to_ptr.vmem [resolvable:$true] %s35_s14 }
   0x3   :  { %s7866_s15 = scalar_lea.vmem %s36_s14, 32768  ;;  %p7871_p1 = scmp.lt.s32.totalorder %s36_s14, %s36_s14 }
   0x4   :  { %p7867_p0 = scmp.ne.s32.totalorder %s36_s14, %s7866_s15  ;;  %p7872_p2 = scmp.lt.s32.totalorder %s7866_s15, %s7866_s15 }
   0x6   :  { %p7873_p3 = por %p7872_p2, %p7871_p1 }
   0x8   :  { %p7874_p4 = pnand %p7873_p3, %p7867_p0 }
   0xa   :  { %7877 = shalt.err (!%p7874_p4)
}
   0xb   :  { %s7903_s16 = smov 64   ;;  %s7904_s17 = smov 4  }
   0xc   :  { %41 = dma.hbm_to_vmem [thread:$0]  %s9287_s6, 32768, %s36_s14, [#allocation3], %s7903_s16, %s7903_s16, %s7904_s17  }
   0xd   :  { %s7905_s20 = smov [#allocation4]  }
   0xe   :  { %s49_s21 = sshll.u32 %s7905_s20, 4  ;;  %s50_s21 = int_to_ptr.vmem [resolvable:$true] %s49_s21 }
   0xf   :  { %s7886_s22 = scalar_lea.vmem %s50_s21, 8192  ;;  %p7891_p6 = scmp.lt.s32.totalorder %s50_s21, %s50_s21 }
  0x10   :  { %p7887_p5 = scmp.ne.s32.totalorder %s50_s21, %s7886_s22  ;;  %p7892_p7 = scmp.lt.s32.totalorder %s7886_s22, %s7886_s22 }
  0x12   :  { %p7893_p8 = por %p7892_p7, %p7891_p6 }
  0x14   :  { %p7894_p9 = pnand %p7893_p8, %p7887_p5 }
  0x16   :  { %7897 = shalt.err (!%p7894_p9)
}
  0x17   :  { %55 = dma.hbm_to_vmem [thread:$0]  %s9289_s8, 8192, %s50_s21, [#allocation5], %s7903_s16, %s7903_s16, %s7904_s17  }
  0x18   :  { %7898 = dma.done.wait [#allocation3], 32768  }
  0x19   :  { %7899 = vsyncadd [#allocation3], 4294934528 }
  0x1a   :  { %7900 = dma.done.wait [#allocation5], 8192  }
  0x1b   :  { %7901 = vsyncadd [#allocation5], 4294959104  ;;  %vm264_vm0 = vcmask 1043456   ;;  %v159_v0 = vld [vmem:[%s9282_s1] sm:$0xf]  ;;  %v64_v2 = vld [vmem:[%s9281_s0 + $0x8] sm:$0xff] }
  0x1c   :  { %v63_v1 = vld [vmem:[%s9281_s0] sm:$0xff]  ;;  %vm167_vm1 = vcmask 64512   ;;  %7514 = vmatprep.subr.msk.bf16.mxu0 %vm264_vm0, %v159_v0  ;;  %v266_v3 = vsel %vm264_vm0, %v159_v0, 0  ;;  %v65_v5 = vld [vmem:[%s9281_s0 + $0x10] sm:$0xff]  ;;  %v66_v6 = vld [vmem:[%s9281_s0 + $0x18] sm:$0xff]  ;;  %vm1022_vm2 = vcmask 1041409  }
  0x1d   :  { %v127_v4 = vpack.c.bf16 %v64_v2, %v63_v1  ;;  %v67_v7 = vld [vmem:[%s9281_s0 + $0x20] sm:$0xff]  ;;  %7289 = vmatpush3.bf16.msra.mxu0 %v266_v3  ;;  %v128_v8 = vpack.c.bf16 %v66_v6, %v65_v5  ;;  %v68_v9 = vld [vmem:[%s9281_s0 + $0x28] sm:$0xff]  ;;  %v69_v11 = vld [vmem:[%s9281_s0 + $0x30] sm:$0xff]  ;;  %vm7908_vm3 = vmmov 0  }
  0x1e   :  { %v129_v10 = vpack.c.bf16 %v68_v9, %v67_v7  ;;  %v70_v12 = vld [vmem:[%s9281_s0 + $0x38] sm:$0xff]  ;;  %v71_v13 = vld [vmem:[%s9281_s0 + $0x40] sm:$0xff]  ;;  %v72_v14 = vld [vmem:[%s9281_s0 + $0x48] sm:$0xff] }
  0x1f   :  { %7290 = vmatprep.mubr.msk.bf16.mxu0 %vm167_vm1, %v127_v4  ;;  %v130_v15 = vpack.c.bf16 %v70_v12, %v69_v11  ;;  %v131_v16 = vpack.c.bf16 %v72_v14, %v71_v13  ;;  %v73_v17 = vld [vmem:[%s9281_s0 + $0x50] sm:$0xff]  ;;  %v74_v18 = vld [vmem:[%s9281_s0 + $0x58] sm:$0xff]  ;;  %v75_v19 = vld [vmem:[%s9281_s0 + $0x60] sm:$0xff] }
  0x20   :  { %7291 = vmatmul.mubr.msk.bf16.vlgmr.msra.gmra.mxu0 %vm167_vm1, %v128_v8  ;;  %v76_v20 = vld [vmem:[%s9281_s0 + $0x68] sm:$0xff]  ;;  %v132_v21 = vpack.c.bf16 %v74_v18, %v73_v17  ;;  %v77_v23 = vld [vmem:[%s9281_s0 + $0x70] sm:$0xff]  ;;  %v78_v24 = vld [vmem:[%s9281_s0 + $0x78] sm:$0xff] }
  0x21   :  { %7294 = vmatprep.mubr.msk.bf16.mxu0 %vm167_vm1, %v129_v10  ;;  %v133_v22 = vpack.c.bf16 %v76_v20, %v75_v19  ;;  %v79_v25 = vld [vmem:[%s9281_s0 + $0x80] sm:$0xff]  ;;  %v80_v26 = vld [vmem:[%s9281_s0 + $0x88] sm:$0xff]  ;;  %v134_v27 = vpack.c.bf16 %v78_v24, %v77_v23  ;;  %v81_v29 = vld [vmem:[%s9281_s0 + $0x90] sm:$0xff] }
  0x22   :  { %v135_v28 = vpack.c.bf16 %v80_v26, %v79_v25  ;;  %v82_v30 = vld [vmem:[%s9281_s0 + $0x98] sm:$0xff]  ;;  %v83_v31 = vld [vmem:[%s9281_s0 + $0xa0] sm:$0xff]  ;;  %v84_v32 = vld [vmem:[%s9281_s0 + $0xa8] sm:$0xff] }
  0x23   :  { %v136_v33 = vpack.c.bf16 %v82_v30, %v81_v29  ;;  %v137_v34 = vpack.c.bf16 %v84_v32, %v83_v31  ;;  %v85_v35 = vld [vmem:[%s9281_s0 + $0xb0] sm:$0xff]  ;;  %v86_v36 = vld [vmem:[%s9281_s0 + $0xb8] sm:$0xff]  ;;  %v87_v37 = vld [vmem:[%s9281_s0 + $0xc0] sm:$0xff] }
  0x24   :  { %v88_v38 = vld [vmem:[%s9281_s0 + $0xc8] sm:$0xff]  ;;  %v138_v39 = vpack.c.bf16 %v86_v36, %v85_v35  ;;  %v89_v41 = vld [vmem:[%s9281_s0 + $0xd0] sm:$0xff]  ;;  %v90_v42 = vld [vmem:[%s9281_s0 + $0xd8] sm:$0xff] }
  0x25   :  { %v139_v40 = vpack.c.bf16 %v88_v38, %v87_v37  ;;  %v91_v43 = vld [vmem:[%s9281_s0 + $0xe0] sm:$0xff]  ;;  %v92_v44 = vld [vmem:[%s9281_s0 + $0xe8] sm:$0xff]  ;;  %v140_v45 = vpack.c.bf16 %v90_v42, %v89_v41  ;;  %v93_v47 = vld [vmem:[%s9281_s0 + $0xf0] sm:$0xff] }
  0x26   :  { %v141_v46 = vpack.c.bf16 %v92_v44, %v91_v43  ;;  %v94_v48 = vld [vmem:[%s9281_s0 + $0xf8] sm:$0xff]  ;;  %v95_v49 = vld [vmem:[%s9281_s0 + $0x100] sm:$0xff]  ;;  %v96_v50 = vld [vmem:[%s9281_s0 + $0x108] sm:$0xff] }
  0x27   :  { %v142_v51 = vpack.c.bf16 %v94_v48, %v93_v47  ;;  %v143_v52 = vpack.c.bf16 %v96_v50, %v95_v49  ;;  %v97_v53 = vld [vmem:[%s9281_s0 + $0x110] sm:$0xff]  ;;  %v98_v54 = vld [vmem:[%s9281_s0 + $0x118] sm:$0xff]  ;;  %v99_v55 = vld [vmem:[%s9281_s0 + $0x120] sm:$0xff] }
  0x28   :  { %7295 = vmatmul.mubr.msk.bf16.gmra.mxu0 %vm167_vm1, %v130_v15  ;;  %v100_v56 = vld [vmem:[%s9281_s0 + $0x128] sm:$0xff]  ;;  %v144_v57 = vpack.c.bf16 %v98_v54, %v97_v53  ;;  %v101_v59 = vld [vmem:[%s9281_s0 + $0x130] sm:$0xff]  ;;  %v102_v60 = vld [vmem:[%s9281_s0 + $0x138] sm:$0xff] }
  0x29   :  { %7298 = vmatprep.mubr.msk.bf16.mxu0 %vm167_vm1, %v131_v16  ;;  %v145_v58 = vpack.c.bf16 %v100_v56, %v99_v55  ;;  %v103_v61 = vld [vmem:[%s9281_s0 + $0x140] sm:$0xff]  ;;  %v104_v62 = vld [vmem:[%s9281_s0 + $0x148] sm:$0xff]  ;;  %v146_v63 = vpack.c.bf16 %v102_v60, %v101_v59  ;;  %v105_v1 = vld [vmem:[%s9281_s0 + $0x150] sm:$0xff] }
  0x2a   :  { %v147_v0 = vpack.c.bf16 %v104_v62, %v103_v61  ;;  %v106_v2 = vld [vmem:[%s9281_s0 + $0x158] sm:$0xff]  ;;  %v107_v3 = vld [vmem:[%s9281_s0 + $0x160] sm:$0xff]  ;;  %v108_v4 = vld [vmem:[%s9281_s0 + $0x168] sm:$0xff] }
  0x2b   :  { %v148_v5 = vpack.c.bf16 %v106_v2, %v105_v1  ;;  %v149_v6 = vpack.c.bf16 %v108_v4, %v107_v3  ;;  %v109_v7 = vld [vmem:[%s9281_s0 + $0x170] sm:$0xff]  ;;  %v110_v8 = vld [vmem:[%s9281_s0 + $0x178] sm:$0xff]  ;;  %v111_v9 = vld [vmem:[%s9281_s0 + $0x180] sm:$0xff] }
  0x2c   :  { %v112_v10 = vld [vmem:[%s9281_s0 + $0x188] sm:$0xff]  ;;  %v150_v11 = vpack.c.bf16 %v110_v8, %v109_v7  ;;  %v113_v13 = vld [vmem:[%s9281_s0 + $0x190] sm:$0xff]  ;;  %v114_v14 = vld [vmem:[%s9281_s0 + $0x198] sm:$0xff] }
  0x2d   :  { %v151_v12 = vpack.c.bf16 %v112_v10, %v111_v9  ;;  %v115_v15 = vld [vmem:[%s9281_s0 + $0x1a0] sm:$0xff]  ;;  %v116_v16 = vld [vmem:[%s9281_s0 + $0x1a8] sm:$0xff]  ;;  %v152_v17 = vpack.c.bf16 %v114_v14, %v113_v13  ;;  %v117_v19 = vld [vmem:[%s9281_s0 + $0x1b0] sm:$0xff] }
  0x2e   :  { %v153_v18 = vpack.c.bf16 %v116_v16, %v115_v15  ;;  %v118_v20 = vld [vmem:[%s9281_s0 + $0x1b8] sm:$0xff]  ;;  %v121_v25 = vld [vmem:[%s9281_s0 + $0x1d0] sm:$0xff]  ;;  %v880_v35 = vld [vmem:[%s9284_s3 + $0x5a0] sm:$0xff] }
  0x2f   :  { %v154_v23 = vpack.c.bf16 %v118_v20, %v117_v19  ;;  %v122_v26 = vld [vmem:[%s9281_s0 + $0x1d8] sm:$0xff]  ;;  %v125_v31 = vld [vmem:[%s9281_s0 + $0x1f0] sm:$0xff]  ;;  %v872_v36 = vld [vmem:[%s9284_s3 + $0x560] sm:$0xff] }
  0x30   :  { %7299 = vmatmul.mubr.msk.bf16.gmra.mxu0 %vm167_vm1, %v132_v21  ;;  %v119_v21 = vld [vmem:[%s9281_s0 + $0x1c0] sm:$0xff]  ;;  %v156_v29 = vpack.c.bf16 %v122_v26, %v121_v25  ;;  %v126_v32 = vld [vmem:[%s9281_s0 + $0x1f8] sm:$0xff] }
  0x31   :  { %7302 = vmatprep.mubr.msk.bf16.mxu0 %vm167_vm1, %v133_v22  ;;  %v120_v22 = vld [vmem:[%s9281_s0 + $0x1c8] sm:$0xff]  ;;  %v884_v38 = vld [vmem:[%s9284_s3 + $0x5c0] sm:$0xff] }
  0x32   :  { %v155_v24 = vpack.c.bf16 %v120_v22, %v119_v21  ;;  %v844_v42 = vld [vmem:[%s9284_s3 + $0x480] sm:$0xff] }
  0x33   :  { %v856_v43 = vld [vmem:[%s9284_s3 + $0x4e0] sm:$0xff] }
  0x34   :  { %v848_v44 = vld [vmem:[%s9284_s3 + $0x4a0] sm:$0xff]  ;;  %v6455_v50 = vcombine.low %v844_v42, %v856_v43 }
  0x35   :  { %v820_v53 = vld [vmem:[%s9284_s3 + $0x3c0] sm:$0xff] }
  0x36   :  { %v832_v54 = vld [vmem:[%s9284_s3 + $0x420] sm:$0xff] }
  0x37   :  { %v824_v55 = vld [vmem:[%s9284_s3 + $0x3e0] sm:$0xff]  ;;  %v6432_v56 = vcombine.high %v820_v53, %v832_v54  ;;  %v6431_v61 = vcombine.low %v820_v53, %v832_v54 }
  0x38   :  { %7303 = vmatmul.mubr.msk.bf16.gmra.mxu0 %vm167_vm1, %v134_v27  ;;  %v123_v27 = vld [vmem:[%s9281_s0 + $0x1e0] sm:$0xff] }
  0x39   :  { %7306 = vmatprep.mubr.msk.bf16.mxu0 %vm167_vm1, %v135_v28  ;;  %v124_v28 = vld [vmem:[%s9281_s0 + $0x1e8] sm:$0xff]  ;;  %v808_v1 = vld [vmem:[%s9284_s3 + $0x360] sm:$0xff] }
  0x3a   :  { %v157_v30 = vpack.c.bf16 %v124_v28, %v123_v27  ;;  %v800_v2 = vld [vmem:[%s9284_s3 + $0x320] sm:$0xff] }
  0x3b   :  { %v772_v15 = vld [vmem:[%s9284_s3 + $0x240] sm:$0xff] }
  0x3c   :  { %v784_v16 = vld [vmem:[%s9284_s3 + $0x2a0] sm:$0xff] }
  0x3d   :  { %v6384_v21 = vcombine.high %v772_v15, %v784_v16  ;;  %v788_v22 = vld [vmem:[%s9284_s3 + $0x2c0] sm:$0xff]  ;;  %v6383_v26 = vcombine.low %v772_v15, %v784_v16  ;;  %v8313_v16 = vld [vmem:[%s9284_s3 + $0x548] sm:$0xff] }
  0x40   :  { %7307 = vmatmul.mubr.msk.bf16.gmra.mxu0 %vm167_vm1, %v136_v33  ;;  %v158_v33 = vpack.c.bf16 %v126_v32, %v125_v31  ;;  %v748_v31 = vld [vmem:[%s9284_s3 + $0x180] sm:$0xff] }
  0x41   :  { %7310 = vmatprep.mubr.msk.bf16.mxu0 %vm167_vm1, %v137_v34  ;;  %v868_v34 = vld [vmem:[%s9284_s3 + $0x540] sm:$0xff] }
  0x42   :  { %v6480_v37 = vcombine.high %v868_v34, %v880_v35  ;;  %v6479_v41 = vcombine.low %v868_v34, %v880_v35  ;;  %v760_v32 = vld [vmem:[%s9284_s3 + $0x1e0] sm:$0xff] }
  0x44   :  { %1986 = vmatprep.subr.bf16.mxu1 %v6480_v37  ;;  %v6360_v37 = vcombine.high %v748_v31, %v760_v32 }
  0x45   :  { %1987 = vmatpush1.bf16.msra.mxu1 %v6479_v41 }
  0x48   :  { %7311 = vmatmul.mubr.msk.bf16.gmra.mxu0 %vm167_vm1, %v138_v39  ;;  %v6487_v39 = vcombine.low %v872_v36, %v884_v38 }
  0x49   :  { %7314 = vmatprep.mubr.msk.bf16.mxu0 %vm167_vm1, %v139_v40  ;;  %v6488_v40 = vcombine.high %v872_v36, %v884_v38  ;;  %v764_v38 = vld [vmem:[%s9284_s3 + $0x200] sm:$0xff] }
  0x4b   :  { %2150 = vmatprep.subr.bf16.mxu0 %v6488_v40 }
  0x4c   :  { %2151 = vmatpush1.bf16.msra.mxu0 %v6487_v39 }
  0x50   :  { %7315 = vmatmul.mubr.msk.bf16.gmra.mxu0 %vm167_vm1, %v140_v45  ;;  %v6456_v45 = vcombine.high %v844_v42, %v856_v43  ;;  %v6359_v42 = vcombine.low %v748_v31, %v760_v32 }
  0x51   :  { %7318 = vmatprep.mubr.msk.bf16.mxu0 %vm167_vm1, %v141_v46  ;;  %v860_v46 = vld [vmem:[%s9284_s3 + $0x500] sm:$0xff] }
  0x52   :  { %v6463_v48 = vcombine.low %v848_v44, %v860_v46  ;;  %v6464_v49 = vcombine.high %v848_v44, %v860_v46  ;;  %1988 = vmatprep.subr.bf16.mxu1 %v6456_v45 }
  0x53   :  { %1989 = vmatpush1.bf16.msra.mxu1 %v6455_v50 }
  0x54   :  { %2152 = vmatprep.subr.bf16.mxu0 %v6464_v49  ;;  %1990 = vmatprep.subr.bf16.mxu1 %v6432_v56  ;;  %v728_v49 = vld [vmem:[%s9284_s3 + $0xe0] sm:$0xff] }
  0x55   :  { %2153 = vmatpush1.bf16.msra.mxu0 %v6463_v48  ;;  %v736_v48 = vld [vmem:[%s9284_s3 + $0x120] sm:$0xff] }
  0x57   :  { %1991 = vmatpush1.bf16.msra.mxu1 %v6431_v61 }
  0x58   :  { %7319 = vmatmul.mubr.msk.bf16.gmra.mxu0 %vm167_vm1, %v142_v51  ;;  %v8224_v51 = vld [vmem:[%s9283_s2] ss:$0 sm:$0xff] }
  0x59   :  { %7322 = vmatprep.mubr.msk.bf16.mxu0 %vm167_vm1, %v143_v52 }
  0x60   :  { %7323 = vmatmul.mubr.msk.bf16.gmra.mxu0 %vm167_vm1, %v144_v57  ;;  %v836_v57 = vld [vmem:[%s9284_s3 + $0x440] sm:$0xff] }
  0x61   :  { %7326 = vmatprep.mubr.msk.bf16.mxu0 %vm167_vm1, %v145_v58  ;;  %v6439_v59 = vcombine.low %v824_v55, %v836_v57  ;;  %v6440_v60 = vcombine.high %v824_v55, %v836_v57  ;;  %v740_v55 = vld [vmem:[%s9284_s3 + $0x140] sm:$0xff] }
  0x62   :  { %v6343_v57 = vcombine.low %v728_v49, %v740_v55 }
  0x63   :  { %2154 = vmatprep.subr.bf16.mxu0 %v6440_v60 }
  0x64   :  { %2155 = vmatpush1.bf16.msra.mxu0 %v6439_v59 }
  0x68   :  { %7327 = vmatmul.mubr.msk.bf16.gmra.mxu0 %vm167_vm1, %v146_v63 }
  0x69   :  { %7330 = vmatprep.mubr.msk.bf16.mxu0 %vm167_vm1, %v147_v0  ;;  %v796_v0 = vld [vmem:[%s9284_s3 + $0x300] sm:$0xff] }
  0x6a   :  { %v6407_v10 = vcombine.low %v796_v0, %v808_v1 }
  0x70   :  { %7331 = vmatmul.mubr.msk.bf16.gmra.mxu0 %vm167_vm1, %v148_v5  ;;  %v6408_v5 = vcombine.high %v796_v0, %v808_v1  ;;  %v700_v0 = vld [vmem:[%s9284_s3] sm:$0xff] }
  0x71   :  { %7334 = vmatprep.mubr.msk.bf16.mxu0 %vm167_vm1, %v149_v6  ;;  %v812_v6 = vld [vmem:[%s9284_s3 + $0x380] sm:$0xff] }
  0x72   :  { %v6415_v8 = vcombine.low %v800_v2, %v812_v6  ;;  %v6416_v9 = vcombine.high %v800_v2, %v812_v6  ;;  %1992 = vmatprep.subr.bf16.mxu1 %v6408_v5  ;;  %v712_v1 = vld [vmem:[%s9284_s3 + $0x60] sm:$0xff] }
  0x73   :  { %1993 = vmatpush1.bf16.msra.mxu1 %v6407_v10  ;;  %v704_v2 = vld [vmem:[%s9284_s3 + $0x20] sm:$0xff]  ;;  %v6312_v6 = vcombine.high %v700_v0, %v712_v1 }
  0x74   :  { %2156 = vmatprep.subr.bf16.mxu0 %v6416_v9  ;;  %1994 = vmatprep.subr.bf16.mxu1 %v6384_v21 }
  0x75   :  { %2157 = vmatpush1.bf16.msra.mxu0 %v6415_v8 }
  0x77   :  { %1995 = vmatpush1.bf16.msra.mxu1 %v6383_v26 }
  0x78   :  { %7335 = vmatmul.mubr.msk.bf16.gmra.mxu0 %vm167_vm1, %v150_v11  ;;  %1996 = vmatprep.subr.bf16.mxu1 %v6360_v37 }
  0x79   :  { %7338 = vmatprep.mubr.msk.bf16.mxu0 %vm167_vm1, %v151_v12 }
  0x7b   :  { %1997 = vmatpush1.bf16.msra.mxu1 %v6359_v42 }
  0x80   :  { %7339 = vmatmul.mubr.msk.bf16.gmra.mxu0 %vm167_vm1, %v152_v17  ;;  %v776_v17 = vld [vmem:[%s9284_s3 + $0x260] sm:$0xff] }
  0x81   :  { %7342 = vmatprep.mubr.msk.bf16.mxu0 %vm167_vm1, %v153_v18  ;;  %v6392_v25 = vcombine.high %v776_v17, %v788_v22 }
  0x83   :  { %2158 = vmatprep.subr.bf16.mxu0 %v6392_v25 }
  0x88   :  { %7343 = vmatmul.mubr.msk.bf16.gmra.mxu0 %vm167_vm1, %v154_v23 }
  0x89   :  { %7346 = vmatprep.mubr.msk.bf16.mxu0 %vm167_vm1, %v155_v24  ;;  %v6391_v24 = vcombine.low %v776_v17, %v788_v22  ;;  %v8318_v17 = vld [vmem:[%s9284_s3 + $0x5a8] sm:$0xff] }
  0x8a   :  { %v6482_v22 = vcombine.high %v8313_v16, %v8318_v17  ;;  %v6481_v25 = vcombine.low %v8313_v16, %v8318_v17  ;;  %v802_v16 = vld [vmem:[%s9284_s3 + $0x330] sm:$0xff] }
  0x8b   :  { %2159 = vmatpush1.bf16.msra.mxu0 %v6391_v24  ;;  %v814_v17 = vld [vmem:[%s9284_s3 + $0x390] sm:$0xff] }
  0x90   :  { %7347 = vmatmul.mubr.msk.bf16.gmra.mxu0 %vm167_vm1, %v156_v29 }
  0x91   :  { %7350 = vmatprep.mubr.msk.bf16.mxu0 %vm167_vm1, %v157_v30 }
  0x98   :  { %7351 = vmatmul.mubr.msk.bf16.gmra.mxu0 %vm167_vm1, %v158_v33  ;;  %v752_v33 = vld [vmem:[%s9284_s3 + $0x1a0] sm:$0xff] }
  0x99   :  { %v6367_v40 = vcombine.low %v752_v33, %v764_v38  ;;  %v6368_v41 = vcombine.high %v752_v33, %v764_v38 }
  0x9b   :  { %2160 = vmatprep.subr.bf16.mxu0 %v6368_v41 }
  0x9c   :  { %2161 = vmatpush1.bf16.msra.mxu0 %v6367_v40 }
  0xe0   :  { %v7292_v47 = vpop.f32.mrf.mxu0 }
  0xe1   :  { %v311_v3 = vadd.f32 %v7292_v47, %v8224_v51  ;;  %v724_v47 = vld [vmem:[%s9284_s3 + $0xc0] sm:$0xff] }
  0xe2   :  { %v302_v52 = vpop.f32.mrf.mxu0  ;;  %v6336_v54 = vcombine.high %v724_v47, %v736_v48  ;;  %v6335_v59 = vcombine.low %v724_v47, %v736_v48 }
  0xe3   :  { %v303_v62 = vadd.f32 %v8224_v51, %v302_v52  ;;  %v559_v18 = vmax.f32 %v311_v3, 0.0 }
  0xe4   :  { %v7293_v58 = vpop.f32.mrf.mxu0  ;;  %1998 = vmatprep.subr.bf16.mxu1 %v6336_v54 }
  0xe5   :  { %v557_v11 = vmax.f32 %v303_v62, 0.0  ;;  %v314_v12 = vadd.f32 %v7293_v58, %v8224_v51  ;;  %v6344_v58 = vcombine.high %v728_v49, %v740_v55  ;;  %1999 = vmatpush1.bf16.msra.mxu1 %v6335_v59 }
  0xe6   :  { %v305_v63 = vpop.f32.mrf.mxu0  ;;  %2000 = vmatprep.subr.bf16.mxu1 %v6312_v6 }
  0xe7   :  { %v306_v4 = vadd.f32 %v8224_v51, %v305_v63  ;;  %v560_v27 = vmax.f32 %v314_v12, 0.0  ;;  %2162 = vmatprep.subr.bf16.mxu0 %v6344_v58 }
  0xe8   :  { %v7296_v7 = vpop.f32.mrf.mxu0  ;;  %2163 = vmatpush1.bf16.msra.mxu0 %v6343_v57 }
  0xe9   :  { %v558_v13 = vmax.f32 %v306_v4, 0.0  ;;  %v327_v29 = vadd.f32 %v7296_v7, %v8224_v51  ;;  %v716_v7 = vld [vmem:[%s9284_s3 + $0x80] sm:$0xff] }
  0xea   :  { %v318_v14 = vpop.f32.mrf.mxu0  ;;  %v6319_v9 = vcombine.low %v704_v2, %v716_v7  ;;  %v6320_v10 = vcombine.high %v704_v2, %v716_v7 }
  0xeb   :  { %v621_v19 = vadd.f32 %v558_v13, %v557_v11  ;;  %v319_v20 = vadd.f32 %v8224_v51, %v318_v14  ;;  %v563_v50 = vmax.f32 %v327_v29, 0.0  ;;  %v6311_v11 = vcombine.low %v700_v0, %v712_v1 }
  0xec   :  { %v7297_v23 = vpop.f32.mrf.mxu0  ;;  %2164 = vmatprep.subr.bf16.mxu0 %v6320_v10 }
  0xed   :  { %v622_v28 = vadd.f32 %v621_v19, %v559_v18  ;;  %v561_v34 = vmax.f32 %v319_v20, 0.0  ;;  %v330_v44 = vadd.f32 %v7297_v23, %v8224_v51  ;;  %2001 = vmatpush1.bf16.msra.mxu1 %v6311_v11  ;;  %v8323_v18 = vld [vmem:[%s9284_s3 + $0x570] sm:$0xff]  ;;  %2165 = vmatpush1.bf16.msra.mxu0 %v6319_v9 }
  0xee   :  { %v321_v30 = vpop.f32.mrf.mxu0  ;;  %v8331_v23 = vld [vmem:[%s9284_s3 + $0x5d0] sm:$0xff]  ;;  %2027 = vmatprep.subr.bf16.mxu1 %v6482_v22 }
  0xef   :  { %v623_v35 = vadd.f32 %v622_v28, %v560_v27  ;;  %v322_v36 = vadd.f32 %v8224_v51, %v321_v30  ;;  %v564_v60 = vmax.f32 %v330_v44, 0.0  ;;  %v6491_v26 = vcombine.low %v8323_v18, %v8331_v23 }
  0xf0   :  { %v7300_v39 = vpop.f32.mrf.mxu0  ;;  %v6492_v27 = vcombine.high %v8323_v18, %v8331_v23  ;;  %v7906_v30 = vmov 0  }
  0xf1   :  { %v624_v43 = vadd.f32 %v623_v35, %v561_v34  ;;  %v562_v45 = vmax.f32 %v322_v36, 0.0  ;;  %v343_v62 = vadd.f32 %v7300_v39, %v8224_v51  ;;  %2018 = vmatprep.mubr.bf16.mxu1 %v7906_v30  ;;  %2182 = vmatprep.mubr.bf16.mxu0 %v7906_v30 }
  0xf2   :  { %v334_v46 = vpop.f32.mrf.mxu0  ;;  %2232 = vmatprep.subr.bf16.mxu0 %v6492_v27 }
  0xf3   :  { %v625_v52 = vadd.f32 %v624_v43, %v562_v45  ;;  %v335_v53 = vadd.f32 %v8224_v51, %v334_v46  ;;  %v567_v19 = vmax.f32 %v343_v62, 0.0 }
  0xf4   :  { %v7301_v56 = vpop.f32.mrf.mxu0 }
  0xf5   :  { %v626_v61 = vadd.f32 %v625_v52, %v563_v50  ;;  %v565_v3 = vmax.f32 %v335_v53, 0.0  ;;  %v346_v13 = vadd.f32 %v7301_v56, %v8224_v51 }
  0xf6   :  { %v337_v63 = vpop.f32.mrf.mxu0 }
  0xf7   :  { %v627_v4 = vadd.f32 %v626_v61, %v564_v60  ;;  %v338_v5 = vadd.f32 %v8224_v51, %v337_v63  ;;  %v568_v28 = vmax.f32 %v346_v13, 0.0 }
  0xf8   :  { %v7304_v8 = vpop.f32.mrf.mxu0 }
  0xf9   :  { %v628_v12 = vadd.f32 %v627_v4, %v565_v3  ;;  %v566_v14 = vmax.f32 %v338_v5, 0.0  ;;  %v359_v32 = vadd.f32 %v7304_v8, %v8224_v51 }
  0xfa   :  { %v350_v15 = vpop.f32.mrf.mxu0 }
  0xfb   :  { %v629_v20 = vadd.f32 %v628_v12, %v566_v14  ;;  %v351_v21 = vadd.f32 %v8224_v51, %v350_v15  ;;  %v571_v41 = vmax.f32 %v359_v32, 0.0 }
  0xfc   :  { %v7305_v24 = vpop.f32.mrf.mxu0 }
  0xfd   :  { %v630_v29 = vadd.f32 %v629_v20, %v567_v19  ;;  %v569_v33 = vmax.f32 %v351_v21, 0.0  ;;  %v362_v38 = vadd.f32 %v7305_v24, %v8224_v51 }
  0xfe   :  { %v353_v31 = vpop.f32.mrf.mxu0 }
  0xff   :  { %v631_v34 = vadd.f32 %v630_v29, %v568_v28  ;;  %v354_v35 = vadd.f32 %v8224_v51, %v353_v31  ;;  %v572_v45 = vmax.f32 %v362_v38, 0.0 }
 0x100   :  { %v7308_v36 = vpop.f32.mrf.mxu0 }
 0x101   :  { %v632_v37 = vadd.f32 %v631_v34, %v569_v33  ;;  %v570_v39 = vmax.f32 %v354_v35, 0.0  ;;  %v375_v48 = vadd.f32 %v7308_v36, %v8224_v51 }
 0x102   :  { %v366_v40 = vpop.f32.mrf.mxu0 }
 0x103   :  { %v633_v42 = vadd.f32 %v632_v37, %v570_v39  ;;  %v367_v43 = vadd.f32 %v8224_v51, %v366_v40  ;;  %v575_v58 = vmax.f32 %v375_v48, 0.0 }
 0x104   :  { %v7309_v44 = vpop.f32.mrf.mxu0 }
 0x105   :  { %v634_v46 = vadd.f32 %v633_v42, %v571_v41  ;;  %v573_v49 = vmax.f32 %v367_v43, 0.0  ;;  %v378_v55 = vadd.f32 %v7309_v44, %v8224_v51 }
 0x106   :  { %v369_v47 = vpop.f32.mrf.mxu0 }
 0x107   :  { %v635_v50 = vadd.f32 %v634_v46, %v572_v45  ;;  %v370_v52 = vadd.f32 %v8224_v51, %v369_v47  ;;  %v576_v62 = vmax.f32 %v378_v55, 0.0 }
 0x108   :  { %v7312_v53 = vpop.f32.mrf.mxu0 }
 0x109   :  { %v636_v54 = vadd.f32 %v635_v50, %v573_v49  ;;  %v574_v56 = vmax.f32 %v370_v52, 0.0  ;;  %v391_v1 = vadd.f32 %v7312_v53, %v8224_v51 }
 0x10a   :  { %v382_v57 = vpop.f32.mrf.mxu0 }
 0x10b   :  { %v637_v59 = vadd.f32 %v636_v54, %v574_v56  ;;  %v383_v60 = vadd.f32 %v8224_v51, %v382_v57  ;;  %v579_v10 = vmax.f32 %v391_v1, 0.0 }
 0x10c   :  { %v7313_v61 = vpop.f32.mrf.mxu0 }
 0x10d   :  { %v638_v63 = vadd.f32 %v637_v59, %v575_v58  ;;  %v577_v2 = vmax.f32 %v383_v60, 0.0  ;;  %v394_v7 = vadd.f32 %v7313_v61, %v8224_v51 }
 0x10e   :  { %v385_v0 = vpop.f32.mrf.mxu0 }
 0x10f   :  { %v639_v3 = vadd.f32 %v638_v63, %v576_v62  ;;  %v386_v4 = vadd.f32 %v8224_v51, %v385_v0  ;;  %v580_v14 = vmax.f32 %v394_v7, 0.0 }
 0x110   :  { %v7316_v5 = vpop.f32.mrf.mxu0 }
 0x111   :  { %v640_v6 = vadd.f32 %v639_v3, %v577_v2  ;;  %v578_v8 = vmax.f32 %v386_v4, 0.0  ;;  %v407_v20 = vadd.f32 %v7316_v5, %v8224_v51 }
 0x112   :  { %v398_v9 = vpop.f32.mrf.mxu0 }
 0x113   :  { %v641_v11 = vadd.f32 %v640_v6, %v578_v8  ;;  %v399_v12 = vadd.f32 %v8224_v51, %v398_v9  ;;  %v583_v33 = vmax.f32 %v407_v20, 0.0 }
 0x114   :  { %v7317_v13 = vpop.f32.mrf.mxu0 }
 0x115   :  { %v642_v15 = vadd.f32 %v641_v11, %v579_v10  ;;  %v581_v21 = vmax.f32 %v399_v12, 0.0  ;;  %v410_v29 = vadd.f32 %v7317_v13, %v8224_v51 }
 0x116   :  { %v401_v19 = vpop.f32.mrf.mxu0 }
 0x117   :  { %v643_v22 = vadd.f32 %v642_v15, %v580_v14  ;;  %v402_v24 = vadd.f32 %v8224_v51, %v401_v19  ;;  %v584_v37 = vmax.f32 %v410_v29, 0.0 }
 0x118   :  { %v7320_v27 = vpop.f32.mrf.mxu0 }
 0x119   :  { %v644_v28 = vadd.f32 %v643_v22, %v581_v21  ;;  %v582_v31 = vmax.f32 %v402_v24, 0.0  ;;  %v423_v40 = vadd.f32 %v7320_v27, %v8224_v51 }
 0x11a   :  { %v414_v32 = vpop.f32.mrf.mxu0 }
 0x11b   :  { %v645_v34 = vadd.f32 %v644_v28, %v582_v31  ;;  %v415_v35 = vadd.f32 %v8224_v51, %v414_v32  ;;  %v587_v49 = vmax.f32 %v423_v40, 0.0 }
 0x11c   :  { %v7321_v36 = vpop.f32.mrf.mxu0 }
 0x11d   :  { %v646_v38 = vadd.f32 %v645_v34, %v583_v33  ;;  %v585_v41 = vmax.f32 %v415_v35, 0.0  ;;  %v426_v46 = vadd.f32 %v7321_v36, %v8224_v51 }
 0x11e   :  { %v417_v39 = vpop.f32.mrf.mxu0 }
 0x11f   :  { %v647_v42 = vadd.f32 %v646_v38, %v584_v37  ;;  %v418_v43 = vadd.f32 %v8224_v51, %v417_v39  ;;  %v588_v53 = vmax.f32 %v426_v46, 0.0 }
 0x120   :  { %v7324_v44 = vpop.f32.mrf.mxu0 }
 0x121   :  { %v648_v45 = vadd.f32 %v647_v42, %v585_v41  ;;  %v586_v47 = vmax.f32 %v418_v43, 0.0  ;;  %v439_v58 = vadd.f32 %v7324_v44, %v8224_v51 }
 0x122   :  { %v430_v48 = vpop.f32.mrf.mxu0 }
 0x123   :  { %v649_v50 = vadd.f32 %v648_v45, %v586_v47  ;;  %v431_v55 = vadd.f32 %v8224_v51, %v430_v48  ;;  %v591_v1 = vmax.f32 %v439_v58, 0.0 }
 0x124   :  { %v7325_v52 = vpop.f32.mrf.mxu0 }
 0x125   :  { %v650_v54 = vadd.f32 %v649_v50, %v587_v49  ;;  %v589_v61 = vmax.f32 %v431_v55, 0.0  ;;  %v442_v62 = vadd.f32 %v7325_v52, %v8224_v51 }
 0x126   :  { %v433_v56 = vpop.f32.mrf.mxu0 }
 0x127   :  { %v8361_v57 = vadd.f32 %v650_v54, %v588_v53  ;;  %v434_v59 = vadd.f32 %v8224_v51, %v433_v56  ;;  %v592_v5 = vmax.f32 %v442_v62, 0.0 }
 0x128   :  { %v7328_v60 = vpop.f32.mrf.mxu0 }
 0x129   :  { %v590_v63 = vmax.f32 %v434_v59, 0.0  ;;  %v455_v8 = vadd.f32 %v7328_v60, %v8224_v51 }
 0x12a   :  { %v446_v0 = vpop.f32.mrf.mxu0 }
 0x12b   :  { %v658_v2 = vadd.f32 %v590_v63, %v589_v61  ;;  %v447_v3 = vadd.f32 %v8224_v51, %v446_v0  ;;  %v595_v20 = vmax.f32 %v455_v8, 0.0 }
 0x12c   :  { %v7329_v4 = vpop.f32.mrf.mxu0 }
 0x12d   :  { %v659_v6 = vadd.f32 %v658_v2, %v591_v1  ;;  %v593_v9 = vmax.f32 %v447_v3, 0.0  ;;  %v458_v14 = vadd.f32 %v7329_v4, %v8224_v51 }
 0x12e   :  { %v449_v7 = vpop.f32.mrf.mxu0 }
 0x12f   :  { %v660_v10 = vadd.f32 %v659_v6, %v592_v5  ;;  %v450_v11 = vadd.f32 %v8224_v51, %v449_v7  ;;  %v596_v27 = vmax.f32 %v458_v14, 0.0 }
 0x130   :  { %v7332_v12 = vpop.f32.mrf.mxu0 }
 0x131   :  { %v661_v13 = vadd.f32 %v660_v10, %v593_v9  ;;  %v594_v15 = vmax.f32 %v450_v11, 0.0  ;;  %v471_v31 = vadd.f32 %v7332_v12, %v8224_v51 }
 0x132   :  { %v462_v19 = vpop.f32.mrf.mxu0 }
 0x133   :  { %v662_v21 = vadd.f32 %v661_v13, %v594_v15  ;;  %v463_v22 = vadd.f32 %v8224_v51, %v462_v19  ;;  %v599_v40 = vmax.f32 %v471_v31, 0.0 }
 0x134   :  { %v7333_v24 = vpop.f32.mrf.mxu0 }
 0x135   :  { %v663_v28 = vadd.f32 %v662_v21, %v595_v20  ;;  %v597_v32 = vmax.f32 %v463_v22, 0.0  ;;  %v474_v37 = vadd.f32 %v7333_v24, %v8224_v51 }
 0x136   :  { %v465_v29 = vpop.f32.mrf.mxu0 }
 0x137   :  { %v664_v33 = vadd.f32 %v663_v28, %v596_v27  ;;  %v466_v34 = vadd.f32 %v8224_v51, %v465_v29  ;;  %v600_v44 = vmax.f32 %v474_v37, 0.0 }
 0x138   :  { %v7336_v35 = vpop.f32.mrf.mxu0 }
 0x139   :  { %v665_v36 = vadd.f32 %v664_v33, %v597_v32  ;;  %v598_v38 = vmax.f32 %v466_v34, 0.0  ;;  %v487_v47 = vadd.f32 %v7336_v35, %v8224_v51 }
 0x13a   :  { %v478_v39 = vpop.f32.mrf.mxu0 }
 0x13b   :  { %v666_v41 = vadd.f32 %v665_v36, %v598_v38  ;;  %v479_v42 = vadd.f32 %v8224_v51, %v478_v39  ;;  %v603_v58 = vmax.f32 %v487_v47, 0.0 }
 0x13c   :  { %v7337_v43 = vpop.f32.mrf.mxu0 }
 0x13d   :  { %v667_v45 = vadd.f32 %v666_v41, %v599_v40  ;;  %v601_v48 = vmax.f32 %v479_v42, 0.0  ;;  %v490_v54 = vadd.f32 %v7337_v43, %v8224_v51 }
 0x13e   :  { %v481_v46 = vpop.f32.mrf.mxu0 }
 0x13f   :  { %v668_v49 = vadd.f32 %v667_v45, %v600_v44  ;;  %v482_v50 = vadd.f32 %v8224_v51, %v481_v46  ;;  %v604_v62 = vmax.f32 %v490_v54, 0.0  ;;  %v652_v45 = vrot.slane %v8361_v57, 4 }
 0x140   :  { %v7340_v52 = vpop.f32.mrf.mxu0 }
 0x141   :  { %v669_v53 = vadd.f32 %v668_v49, %v601_v48  ;;  %v602_v55 = vmax.f32 %v482_v50, 0.0  ;;  %v503_v1 = vadd.f32 %v7340_v52, %v8224_v51 }
 0x142   :  { %v494_v56 = vpop.f32.mrf.mxu0 }
 0x143   :  { %v670_v59 = vadd.f32 %v669_v53, %v602_v55  ;;  %v495_v60 = vadd.f32 %v8224_v51, %v494_v56  ;;  %v607_v10 = vmax.f32 %v503_v1, 0.0  ;;  %v653_v55 = vadd.f32 %v652_v45, %v8361_v57  ;;  %v797_v45 = vld [vmem:[%s9284_s3 + $0x308] sm:$0xff] }
 0x144   :  { %v7341_v61 = vpop.f32.mrf.mxu0 }
 0x145   :  { %v671_v63 = vadd.f32 %v670_v59, %v603_v58  ;;  %v605_v2 = vmax.f32 %v495_v60, 0.0  ;;  %v506_v7 = vadd.f32 %v7341_v61, %v8224_v51 }
 0x146   :  { %v497_v0 = vpop.f32.mrf.mxu0 }
 0x147   :  { %v672_v3 = vadd.f32 %v671_v63, %v604_v62  ;;  %v498_v4 = vadd.f32 %v8224_v51, %v497_v0  ;;  %v608_v14 = vmax.f32 %v506_v7, 0.0  ;;  %v654_v0 = vrot.slane %v653_v55, 2 }
 0x148   :  { %v7344_v5 = vpop.f32.mrf.mxu0 }
 0x149   :  { %v673_v6 = vadd.f32 %v672_v3, %v605_v2  ;;  %v606_v8 = vmax.f32 %v498_v4, 0.0  ;;  %v519_v20 = vadd.f32 %v7344_v5, %v8224_v51 }
 0x14a   :  { %v510_v9 = vpop.f32.mrf.mxu0 }
 0x14b   :  { %v674_v11 = vadd.f32 %v673_v6, %v606_v8  ;;  %v511_v12 = vadd.f32 %v8224_v51, %v510_v9  ;;  %v611_v33 = vmax.f32 %v519_v20, 0.0  ;;  %v655_v6 = vadd.f32 %v654_v0, %v653_v55 }
 0x14c   :  { %v7345_v13 = vpop.f32.mrf.mxu0 }
 0x14d   :  { %v675_v15 = vadd.f32 %v674_v11, %v607_v10  ;;  %v609_v21 = vmax.f32 %v511_v12, 0.0  ;;  %v522_v29 = vadd.f32 %v7345_v13, %v8224_v51  ;;  %v656_v9 = vrot.slane %v655_v6, 1 }
 0x14e   :  { %v513_v19 = vpop.f32.mrf.mxu0 }
 0x14f   :  { %v676_v22 = vadd.f32 %v675_v15, %v608_v14  ;;  %v514_v24 = vadd.f32 %v8224_v51, %v513_v19  ;;  %v612_v37 = vmax.f32 %v522_v29, 0.0  ;;  %v657_v12 = vadd.f32 %v656_v9, %v655_v6  ;;  %v857_v29 = vld [vmem:[%s9284_s3 + $0x4e8] sm:$0xff] }
 0x150   :  { %v7348_v27 = vpop.f32.mrf.mxu0  ;;  %v713_v9 = vld [vmem:[%s9284_s3 + $0x68] sm:$0xff] }
 0x151   :  { %v677_v28 = vadd.f32 %v676_v22, %v609_v21  ;;  %v610_v31 = vmax.f32 %v514_v24, 0.0  ;;  %v535_v40 = vadd.f32 %v7348_v27, %v8224_v51  ;;  %v696_v15 = vmul.f32 0.00390625, %v657_v12 }
 0x152   :  { %v526_v32 = vpop.f32.mrf.mxu0 }
 0x153   :  { %v678_v34 = vadd.f32 %v677_v28, %v610_v31  ;;  %v527_v35 = vadd.f32 %v8224_v51, %v526_v32  ;;  %v615_v50 = vmax.f32 %v535_v40, 0.0  ;;  %v698_v21 = vpack.c.bf16 %v696_v15, %v696_v15  ;;  %v850_v31 = vld [vmem:[%s9284_s3 + $0x4b0] sm:$0xff] }
 0x154   :  { %v7349_v36 = vpop.f32.mrf.mxu0  ;;  %v862_v32 = vld [vmem:[%s9284_s3 + $0x510] sm:$0xff] }
 0x155   :  { %v679_v38 = vadd.f32 %v678_v34, %v611_v33  ;;  %v613_v41 = vmax.f32 %v527_v35, 0.0  ;;  %v538_v47 = vadd.f32 %v7349_v36, %v8224_v51  ;;  %v1020_v27 = vunpack.c.l.b16 %v698_v21  ;;  %v838_v40 = vld [vmem:[%s9284_s3 + $0x450] sm:$0xff]  ;;  %v876_v21 = vld [vmem:[%s9284_s3 + $0x580] sm:$0xff] }
 0x156   :  { %v529_v39 = vpop.f32.mrf.mxu0  ;;  %v6468_v36 = vcombine.high %v850_v31, %v862_v32 }
 0x157   :  { %v680_v42 = vadd.f32 %v679_v38, %v612_v37  ;;  %v530_v43 = vadd.f32 %v8224_v51, %v529_v39  ;;  %v616_v56 = vmax.f32 %v538_v47, 0.0  ;;  %v821_v37 = vld [vmem:[%s9284_s3 + $0x3c8] sm:$0xff]  ;;  %v826_v39 = vld [vmem:[%s9284_s3 + $0x3f0] sm:$0xff] }
 0x158   :  { %v7352_v44 = vpop.f32.mrf.mxu0  ;;  %v833_v38 = vld [vmem:[%s9284_s3 + $0x428] sm:$0xff]  ;;  %v6443_v23 = vcombine.low %v826_v39, %v838_v40 }
 0x159   :  { %v681_v46 = vadd.f32 %v680_v42, %v613_v41  ;;  %v614_v48 = vmax.f32 %v530_v43, 0.0  ;;  %v551_v60 = vadd.f32 %v7352_v44, %v8224_v51  ;;  %v6467_v42 = vcombine.low %v850_v31, %v862_v32  ;;  %v773_v47 = vld [vmem:[%s9284_s3 + $0x248] sm:$0xff]  ;;  %v858_v31 = vld [vmem:[%s9284_s3 + $0x4f0] sm:$0xff]  ;;  %v852_v32 = vld [vmem:[%s9284_s3 + $0x4c0] sm:$0xff] }
 0x15a   :  { %v542_v49 = vpop.f32.mrf.mxu0  ;;  %v6434_v43 = vcombine.high %v821_v37, %v833_v38  ;;  %v6444_v44 = vcombine.high %v826_v39, %v838_v40  ;;  %v6433_v18 = vcombine.low %v821_v37, %v833_v38  ;;  %v822_v39 = vld [vmem:[%s9284_s3 + $0x3d0] sm:$0xff] }
 0x15b   :  { %v682_v52 = vadd.f32 %v681_v46, %v614_v48  ;;  %v543_v53 = vadd.f32 %v8224_v51, %v542_v49  ;;  %v619_v4 = vmax.f32 %v551_v60, 0.0  ;;  %v809_v46 = vld [vmem:[%s9284_s3 + $0x368] sm:$0xff]  ;;  %v778_v49 = vld [vmem:[%s9284_s3 + $0x270] sm:$0xff] }
 0x15c   :  { %v7353_v54 = vpop.f32.mrf.mxu0  ;;  %v785_v48 = vld [vmem:[%s9284_s3 + $0x2a8] sm:$0xff]  ;;  %v766_v60 = vld [vmem:[%s9284_s3 + $0x210] sm:$0xff] }
 0x15d   :  { %v683_v58 = vadd.f32 %v682_v52, %v615_v50  ;;  %v617_v61 = vmax.f32 %v543_v53, 0.0  ;;  %v554_v2 = vadd.f32 %v7353_v54, %v8224_v51  ;;  %v790_v50 = vld [vmem:[%s9284_s3 + $0x2d0] sm:$0xff]  ;;  %v6409_v52 = vcombine.low %v797_v45, %v809_v46 }
 0x15e   :  { %v545_v59 = vpop.f32.mrf.mxu0  ;;  %v6419_v53 = vcombine.low %v802_v16, %v814_v17  ;;  %v6386_v54 = vcombine.high %v773_v47, %v785_v48  ;;  %v6396_v55 = vcombine.high %v778_v49, %v790_v50  ;;  %v834_v40 = vld [vmem:[%s9284_s3 + $0x430] sm:$0xff] }
 0x15f   :  { %v684_v62 = vadd.f32 %v683_v58, %v616_v56  ;;  %v546_v63 = vadd.f32 %v8224_v51, %v545_v59  ;;  %v620_v7 = vmax.f32 %v554_v2, 0.0  ;;  %v845_v51 = vld [vmem:[%s9284_s3 + $0x488] sm:$0xff]  ;;  %v754_v59 = vld [vmem:[%s9284_s3 + $0x1b0] sm:$0xff] }
 0x160   :  { %v6458_v35 = vcombine.high %v845_v51, %v857_v29  ;;  %v6457_v41 = vcombine.low %v845_v51, %v857_v29  ;;  %v749_v56 = vld [vmem:[%s9284_s3 + $0x188] sm:$0xff]  ;;  %v6372_v0 = vcombine.high %v754_v59, %v766_v60  ;;  %v6371_v6 = vcombine.low %v754_v59, %v766_v60  ;;  %v846_v29 = vld [vmem:[%s9284_s3 + $0x490] sm:$0xff] }
 0x161   :  { %v685_v1 = vadd.f32 %v684_v62, %v617_v61  ;;  %v618_v3 = vmax.f32 %v546_v63, 0.0  ;;  %v761_v58 = vld [vmem:[%s9284_s3 + $0x1e8] sm:$0xff]  ;;  %v6385_v61 = vcombine.low %v773_v47, %v785_v48  ;;  %v6395_v62 = vcombine.low %v778_v49, %v790_v50  ;;  %v774_v49 = vld [vmem:[%s9284_s3 + $0x250] sm:$0xff] }
 0x162   :  { %v6362_v63 = vcombine.high %v749_v56, %v761_v58  ;;  %v737_v2 = vld [vmem:[%s9284_s3 + $0x128] sm:$0xff]  ;;  %v6460_v37 = vcombine.high %v846_v29, %v858_v31  ;;  %v786_v50 = vld [vmem:[%s9284_s3 + $0x2b0] sm:$0xff] }
 0x163   :  { %v686_v5 = vadd.f32 %v685_v1, %v618_v3  ;;  %v725_v1 = vld [vmem:[%s9284_s3 + $0xc8] sm:$0xff]  ;;  %v730_v3 = vld [vmem:[%s9284_s3 + $0xf0] sm:$0xff] }
 0x164   :  { %v6337_v12 = vcombine.low %v725_v1, %v737_v2  ;;  %v750_v59 = vld [vmem:[%s9284_s3 + $0x190] sm:$0xff] }
 0x165   :  { %v687_v8 = vadd.f32 %v686_v5, %v619_v4  ;;  %v742_v4 = vld [vmem:[%s9284_s3 + $0x150] sm:$0xff]  ;;  %v6361_v5 = vcombine.low %v749_v56, %v761_v58  ;;  %v6388_v56 = vcombine.high %v774_v49, %v786_v50 }
 0x166   :  { %v762_v60 = vld [vmem:[%s9284_s3 + $0x1f0] sm:$0xff] }
 0x167   :  { %v688_v57 = vadd.f32 %v687_v8, %v620_v7  ;;  %v6338_v7 = vcombine.high %v725_v1, %v737_v2  ;;  %v6348_v8 = vcombine.high %v730_v3, %v742_v4  ;;  %v6364_v1 = vcombine.high %v750_v59, %v762_v60 }
 0x169   :  { %v689_v10 = vrot.slane %v688_v57, 4 }
 0x16b   :  { %v690_v11 = vadd.f32 %v689_v10, %v688_v57  ;;  %v701_v57 = vld [vmem:[%s9284_s3 + $0x8] sm:$0xff]  ;;  %v706_v10 = vld [vmem:[%s9284_s3 + $0x30] sm:$0xff] }
 0x16d   :  { %v691_v13 = vrot.slane %v690_v11, 2 }
 0x16f   :  { %v692_v14 = vadd.f32 %v691_v13, %v690_v11  ;;  %v718_v11 = vld [vmem:[%s9284_s3 + $0x90] sm:$0xff]  ;;  %v6347_v13 = vcombine.low %v730_v3, %v742_v4 }
 0x170   :  { %v6324_v15 = vcombine.high %v706_v10, %v718_v11  ;;  %v6323_v51 = vcombine.low %v706_v10, %v718_v11  ;;  %v726_v3 = vld [vmem:[%s9284_s3 + $0xd0] sm:$0xff] }
 0x171   :  { %v693_v19 = vrot.slane %v692_v14, 1  ;;  %v738_v4 = vld [vmem:[%s9284_s3 + $0x130] sm:$0xff] }
 0x172   :  { %v702_v10 = vld [vmem:[%s9284_s3 + $0x10] sm:$0xff] }
 0x173   :  { %v694_v20 = vadd.f32 %v693_v19, %v692_v14  ;;  %v6314_v14 = vcombine.high %v701_v57, %v713_v9  ;;  %v870_v19 = vld [vmem:[%s9284_s3 + $0x550] sm:$0xff] }
 0x174   :  { %v714_v11 = vld [vmem:[%s9284_s3 + $0x70] sm:$0xff] }
 0x175   :  { %v697_v22 = vmul.f32 0.00390625, %v694_v20  ;;  %v882_v20 = vld [vmem:[%s9284_s3 + $0x5b0] sm:$0xff] }
 0x177   :  { %v699_v24 = vpack.c.bf16 %v697_v22, %v697_v22  ;;  %v888_v22 = vld [vmem:[%s9284_s3 + $0x5e0] sm:$0xff] }
 0x179   :  { %v1021_v28 = vunpack.c.l.b16 %v699_v24  ;;  %v6313_v24 = vcombine.low %v701_v57, %v713_v9  ;;  %v6340_v57 = vcombine.high %v726_v3, %v738_v4 }
 0x17b   :  { %v1023_v33 = vsel %vm1022_vm2, %v1021_v28, %v1020_v27  ;;  %v6484_v27 = vcombine.high %v870_v19, %v882_v20  ;;  %v6496_v28 = vcombine.high %v876_v21, %v888_v22 }
 0x17c   :  { %v8408_v34 = vpack.c.b16 %v1023_v33, %v1023_v33  ;;  %v864_v33 = vld [vmem:[%s9284_s3 + $0x520] sm:$0xff] }
 0x17d   :  { %v6472_v38 = vcombine.high %v852_v32, %v864_v33 }
 0x17e   :  { %2019 = vmatmul.mubr.bf16.vlgmr.msra.gmra.mxu1 %v8408_v34  ;;  %2183 = vmatmul.mubr.bf16.vlgmr.msra.gmra.mxu0 %v8408_v34 }
 0x17f   :  { %2028 = vmatpush1.bf16.msra.mxu1 %v6481_v25  ;;  %2233 = vmatpush1.bf16.msra.mxu0 %v6491_v26  ;;  %v6410_v25 = vcombine.high %v797_v45, %v809_v46  ;;  %v6420_v26 = vcombine.high %v802_v16, %v814_v17  ;;  %v6436_v45 = vcombine.high %v822_v39, %v834_v40  ;;  %v798_v16 = vld [vmem:[%s9284_s3 + $0x310] sm:$0xff] }
 0x180   :  { %2029 = vmatprep.subr.bf16.mxu1 %v6458_v35  ;;  %2234 = vmatprep.subr.bf16.mxu0 %v6468_v36  ;;  %v6483_v35 = vcombine.low %v870_v19, %v882_v20  ;;  %v6495_v36 = vcombine.low %v876_v21, %v888_v22  ;;  %v810_v17 = vld [vmem:[%s9284_s3 + $0x370] sm:$0xff]  ;;  %v6316_v19 = vcombine.high %v702_v10, %v714_v11  ;;  %v871_v21 = vld [vmem:[%s9284_s3 + $0x558] sm:$0xff] }
 0x181   :  { %2059 = vmatprep.mubr.bf16.mxu1 %v7906_v30  ;;  %2264 = vmatprep.mubr.bf16.mxu0 %v7906_v30  ;;  %v6412_v47 = vcombine.high %v798_v16, %v810_v17  ;;  %v883_v22 = vld [vmem:[%s9284_s3 + $0x5b8] sm:$0xff] }
 0x183   :  { %2030 = vmatpush1.bf16.msra.mxu1 %v6457_v41  ;;  %2235 = vmatpush1.bf16.msra.mxu0 %v6467_v42  ;;  %v828_v41 = vld [vmem:[%s9284_s3 + $0x400] sm:$0xff] }
 0x184   :  { %2031 = vmatprep.subr.bf16.mxu1 %v6434_v43  ;;  %2236 = vmatprep.subr.bf16.mxu0 %v6444_v44  ;;  %v840_v42 = vld [vmem:[%s9284_s3 + $0x460] sm:$0xff]  ;;  %v6459_v43 = vcombine.low %v846_v29, %v858_v31  ;;  %v6471_v44 = vcombine.low %v852_v32, %v864_v33  ;;  %v6486_v29 = vcombine.high %v871_v21, %v883_v22  ;;  %v847_v32 = vld [vmem:[%s9284_s3 + $0x498] sm:$0xff] }
 0x185   :  { %v6448_v46 = vcombine.high %v828_v41, %v840_v42  ;;  %v859_v33 = vld [vmem:[%s9284_s3 + $0x4f8] sm:$0xff] }
 0x187   :  { %2032 = vmatpush1.bf16.msra.mxu1 %v6433_v18  ;;  %2237 = vmatpush1.bf16.msra.mxu0 %v6443_v23  ;;  %v804_v18 = vld [vmem:[%s9284_s3 + $0x340] sm:$0xff] }
 0x188   :  { %2033 = vmatprep.subr.bf16.mxu1 %v6410_v25  ;;  %2238 = vmatprep.subr.bf16.mxu0 %v6420_v26  ;;  %v816_v23 = vld [vmem:[%s9284_s3 + $0x3a0] sm:$0xff]  ;;  %v6435_v25 = vcombine.low %v822_v39, %v834_v40  ;;  %v6447_v26 = vcombine.low %v828_v41, %v840_v42  ;;  %v6462_v39 = vcombine.high %v847_v32, %v859_v33  ;;  %v823_v41 = vld [vmem:[%s9284_s3 + $0x3d8] sm:$0xff] }
 0x189   :  { %v6424_v48 = vcombine.high %v804_v18, %v816_v23  ;;  %v835_v42 = vld [vmem:[%s9284_s3 + $0x438] sm:$0xff] }
 0x18b   :  { %2034 = vmatpush1.bf16.msra.mxu1 %v6409_v52  ;;  %2239 = vmatpush1.bf16.msra.mxu0 %v6419_v53  ;;  %v780_v52 = vld [vmem:[%s9284_s3 + $0x280] sm:$0xff] }
 0x18c   :  { %2035 = vmatprep.subr.bf16.mxu1 %v6386_v54  ;;  %2240 = vmatprep.subr.bf16.mxu0 %v6396_v55  ;;  %v792_v53 = vld [vmem:[%s9284_s3 + $0x2e0] sm:$0xff]  ;;  %v6411_v54 = vcombine.low %v798_v16, %v810_v17  ;;  %v6423_v55 = vcombine.low %v804_v18, %v816_v23  ;;  %v6438_v16 = vcombine.high %v823_v41, %v835_v42  ;;  %v799_v18 = vld [vmem:[%s9284_s3 + $0x318] sm:$0xff] }
 0x18d   :  { %v6400_v58 = vcombine.high %v780_v52, %v792_v53  ;;  %v811_v23 = vld [vmem:[%s9284_s3 + $0x378] sm:$0xff] }
 0x18f   :  { %2036 = vmatpush1.bf16.msra.mxu1 %v6385_v61  ;;  %2241 = vmatpush1.bf16.msra.mxu0 %v6395_v62  ;;  %v756_v61 = vld [vmem:[%s9284_s3 + $0x1c0] sm:$0xff] }
 0x190   :  { %2037 = vmatprep.subr.bf16.mxu1 %v6362_v63  ;;  %2242 = vmatprep.subr.bf16.mxu0 %v6372_v0  ;;  %v768_v62 = vld [vmem:[%s9284_s3 + $0x220] sm:$0xff]  ;;  %v6387_v63 = vcombine.low %v774_v49, %v786_v50  ;;  %v6399_v0 = vcombine.low %v780_v52, %v792_v53  ;;  %v6414_v49 = vcombine.high %v799_v18, %v811_v23  ;;  %v775_v52 = vld [vmem:[%s9284_s3 + $0x258] sm:$0xff] }
 0x191   :  { %v6376_v2 = vcombine.high %v756_v61, %v768_v62  ;;  %v787_v53 = vld [vmem:[%s9284_s3 + $0x2b8] sm:$0xff] }
 0x193   :  { %2038 = vmatpush1.bf16.msra.mxu1 %v6361_v5  ;;  %2243 = vmatpush1.bf16.msra.mxu0 %v6371_v6  ;;  %v732_v5 = vld [vmem:[%s9284_s3 + $0x100] sm:$0xff] }
 0x194   :  { %2039 = vmatprep.subr.bf16.mxu1 %v6338_v7  ;;  %2244 = vmatprep.subr.bf16.mxu0 %v6348_v8  ;;  %v744_v6 = vld [vmem:[%s9284_s3 + $0x160] sm:$0xff]  ;;  %v6363_v7 = vcombine.low %v750_v59, %v762_v60  ;;  %v6375_v8 = vcombine.low %v756_v61, %v768_v62  ;;  %v6390_v59 = vcombine.high %v775_v52, %v787_v53  ;;  %v751_v61 = vld [vmem:[%s9284_s3 + $0x198] sm:$0xff] }
 0x195   :  { %v6352_v9 = vcombine.high %v732_v5, %v744_v6  ;;  %v763_v62 = vld [vmem:[%s9284_s3 + $0x1f8] sm:$0xff] }
 0x197   :  { %2040 = vmatpush1.bf16.msra.mxu1 %v6337_v12  ;;  %2245 = vmatpush1.bf16.msra.mxu0 %v6347_v13  ;;  %v708_v12 = vld [vmem:[%s9284_s3 + $0x40] sm:$0xff] }
 0x198   :  { %2041 = vmatprep.subr.bf16.mxu1 %v6314_v14  ;;  %2246 = vmatprep.subr.bf16.mxu0 %v6324_v15  ;;  %v720_v13 = vld [vmem:[%s9284_s3 + $0xa0] sm:$0xff]  ;;  %v6339_v14 = vcombine.low %v726_v3, %v738_v4  ;;  %v6351_v15 = vcombine.low %v732_v5, %v744_v6  ;;  %v6366_v3 = vcombine.high %v751_v61, %v763_v62  ;;  %v727_v5 = vld [vmem:[%s9284_s3 + $0xd8] sm:$0xff] }
 0x199   :  { %v6328_v20 = vcombine.high %v708_v12, %v720_v13  ;;  %v739_v6 = vld [vmem:[%s9284_s3 + $0x138] sm:$0xff] }
 0x19b   :  { %2042 = vmatpush1.bf16.msra.mxu1 %v6313_v24  ;;  %2247 = vmatpush1.bf16.msra.mxu0 %v6323_v51  ;;  %v878_v24 = vld [vmem:[%s9284_s3 + $0x590] sm:$0xff] }
 0x19c   :  { %2068 = vmatprep.subr.bf16.mxu1 %v6484_v27  ;;  %2314 = vmatprep.subr.bf16.mxu0 %v6496_v28  ;;  %v890_v51 = vld [vmem:[%s9284_s3 + $0x5f0] sm:$0xff]  ;;  %v6315_v27 = vcombine.low %v702_v10, %v714_v11  ;;  %v6327_v28 = vcombine.low %v708_v12, %v720_v13  ;;  %v6342_v10 = vcombine.high %v727_v5, %v739_v6  ;;  %v703_v12 = vld [vmem:[%s9284_s3 + $0x18] sm:$0xff] }
 0x19d   :  { %v6500_v31 = vcombine.high %v878_v24, %v890_v51  ;;  %v715_v13 = vld [vmem:[%s9284_s3 + $0x78] sm:$0xff] }
 0x19e   :  { %2060 = vmatmul.mubr.bf16.vlgmr.msra.gmra.mxu1 %v8408_v34  ;;  %2265 = vmatmul.mubr.bf16.vlgmr.msra.gmra.mxu0 %v8408_v34 }
 0x19f   :  { %2069 = vmatpush1.bf16.msra.mxu1 %v6483_v35  ;;  %2315 = vmatpush1.bf16.msra.mxu0 %v6495_v36  ;;  %v854_v35 = vld [vmem:[%s9284_s3 + $0x4d0] sm:$0xff] }
 0x1a0   :  { %2070 = vmatprep.subr.bf16.mxu1 %v6460_v37  ;;  %2316 = vmatprep.subr.bf16.mxu0 %v6472_v38  ;;  %v866_v36 = vld [vmem:[%s9284_s3 + $0x530] sm:$0xff]  ;;  %v6485_v37 = vcombine.low %v871_v21, %v883_v22  ;;  %v6499_v38 = vcombine.low %v878_v24, %v890_v51  ;;  %v6318_v21 = vcombine.high %v703_v12, %v715_v13  ;;  %v873_v24 = vld [vmem:[%s9284_s3 + $0x568] sm:$0xff] }
 0x1a1   :  { %2100 = vmatprep.mubr.bf16.mxu1 %v7906_v30  ;;  %2346 = vmatprep.mubr.bf16.mxu0 %v7906_v30  ;;  %v6476_v40 = vcombine.high %v854_v35, %v866_v36  ;;  %v885_v51 = vld [vmem:[%s9284_s3 + $0x5c8] sm:$0xff] }
 0x1a3   :  { %2071 = vmatpush1.bf16.msra.mxu1 %v6459_v43  ;;  %2317 = vmatpush1.bf16.msra.mxu0 %v6471_v44  ;;  %v830_v43 = vld [vmem:[%s9284_s3 + $0x410] sm:$0xff] }
 0x1a4   :  { %2072 = vmatprep.subr.bf16.mxu1 %v6436_v45  ;;  %2318 = vmatprep.subr.bf16.mxu0 %v6448_v46  ;;  %v842_v44 = vld [vmem:[%s9284_s3 + $0x470] sm:$0xff]  ;;  %v6461_v45 = vcombine.low %v847_v32, %v859_v33  ;;  %v6475_v46 = vcombine.low %v854_v35, %v866_v36  ;;  %v849_v32 = vld [vmem:[%s9284_s3 + $0x4a8] sm:$0xff]  ;;  %v6489_v35 = vcombine.low %v873_v24, %v885_v51 }
 0x1a5   :  { %v6452_v17 = vcombine.high %v830_v43, %v842_v44  ;;  %v861_v33 = vld [vmem:[%s9284_s3 + $0x508] sm:$0xff] }
 0x1a6   :  { %v6466_v36 = vcombine.high %v849_v32, %v861_v33 }
 0x1a7   :  { %2073 = vmatpush1.bf16.msra.mxu1 %v6435_v25  ;;  %2319 = vmatpush1.bf16.msra.mxu0 %v6447_v26  ;;  %v806_v25 = vld [vmem:[%s9284_s3 + $0x350] sm:$0xff] }
 0x1a8   :  { %2074 = vmatprep.subr.bf16.mxu1 %v6412_v47  ;;  %2320 = vmatprep.subr.bf16.mxu0 %v6424_v48  ;;  %v818_v26 = vld [vmem:[%s9284_s3 + $0x3b0] sm:$0xff]  ;;  %v6437_v47 = vcombine.low %v823_v41, %v835_v42  ;;  %v6451_v48 = vcombine.low %v830_v43, %v842_v44  ;;  %v6465_v41 = vcombine.low %v849_v32, %v861_v33  ;;  %v801_v44 = vld [vmem:[%s9284_s3 + $0x328] sm:$0xff] }
 0x1a9   :  { %v6428_v50 = vcombine.high %v806_v25, %v818_v26  ;;  %v7525_v43 = vld [vmem:[#allocation2 + $0x30] sm:$0xff]  }
 0x1ab   :  { %2075 = vmatpush1.bf16.msra.mxu1 %v6411_v54  ;;  %2321 = vmatpush1.bf16.msra.mxu0 %v6423_v55  ;;  %v782_v54 = vld [vmem:[%s9284_s3 + $0x290] sm:$0xff] }
 0x1ac   :  { %2076 = vmatprep.subr.bf16.mxu1 %v6388_v56  ;;  %2322 = vmatprep.subr.bf16.mxu0 %v6400_v58  ;;  %v794_v55 = vld [vmem:[%s9284_s3 + $0x2f0] sm:$0xff]  ;;  %v6413_v56 = vcombine.low %v799_v18, %v811_v23  ;;  %v6427_v58 = vcombine.low %v806_v25, %v818_v26  ;;  %v7527_v18 = vld [vmem:[#allocation2 + $0x28] sm:$0xff]   ;;  %v7528_v26 = vld [vmem:[#allocation2 + $0x60] sm:$0xff]  }
 0x1ad   :  { %v6404_v60 = vcombine.high %v782_v54, %v794_v55  ;;  %v777_v23 = vld [vmem:[%s9284_s3 + $0x268] sm:$0xff] }
 0x1ae   :  { %v789_v25 = vld [vmem:[%s9284_s3 + $0x2c8] sm:$0xff] }
 0x1af   :  { %2077 = vmatpush1.bf16.msra.mxu1 %v6387_v63  ;;  %2323 = vmatpush1.bf16.msra.mxu0 %v6399_v0  ;;  %v758_v63 = vld [vmem:[%s9284_s3 + $0x1d0] sm:$0xff] }
 0x1b0   :  { %2078 = vmatprep.subr.bf16.mxu1 %v6364_v1  ;;  %2324 = vmatprep.subr.bf16.mxu0 %v6376_v2  ;;  %v770_v0 = vld [vmem:[%s9284_s3 + $0x230] sm:$0xff]  ;;  %v6389_v1 = vcombine.low %v775_v52, %v787_v53  ;;  %v6403_v2 = vcombine.low %v782_v54, %v794_v55  ;;  %v765_v52 = vld [vmem:[%s9284_s3 + $0x208] sm:$0xff]  ;;  %v7530_v53 = vld [vmem:[#allocation2 + $0x58] sm:$0xff]   ;;  %v6393_v54 = vcombine.low %v777_v23, %v789_v25 }
 0x1b1   :  { %v6380_v4 = vcombine.high %v758_v63, %v770_v0 }
 0x1b3   :  { %2079 = vmatpush1.bf16.msra.mxu1 %v6363_v7  ;;  %2325 = vmatpush1.bf16.msra.mxu0 %v6375_v8  ;;  %v734_v7 = vld [vmem:[%s9284_s3 + $0x110] sm:$0xff] }
 0x1b4   :  { %2080 = vmatprep.subr.bf16.mxu1 %v6340_v57  ;;  %2326 = vmatprep.subr.bf16.mxu0 %v6352_v9  ;;  %v746_v8 = vld [vmem:[%s9284_s3 + $0x170] sm:$0xff]  ;;  %v6365_v57 = vcombine.low %v751_v61, %v763_v62  ;;  %v6379_v9 = vcombine.low %v758_v63, %v770_v0  ;;  %v705_v0 = vld [vmem:[%s9284_s3 + $0x28] sm:$0xff] }
 0x1b5   :  { %v6356_v11 = vcombine.high %v734_v7, %v746_v8  ;;  %v7533_v63 = vld [vmem:[#allocation2 + $0x10] sm:$0xff]  }
 0x1b7   :  { %2081 = vmatpush1.bf16.msra.mxu1 %v6339_v14  ;;  %2327 = vmatpush1.bf16.msra.mxu0 %v6351_v15  ;;  %v710_v14 = vld [vmem:[%s9284_s3 + $0x50] sm:$0xff] }
 0x1b8   :  { %2082 = vmatprep.subr.bf16.mxu1 %v6316_v19  ;;  %2328 = vmatprep.subr.bf16.mxu0 %v6328_v20  ;;  %v722_v15 = vld [vmem:[%s9284_s3 + $0xb0] sm:$0xff]  ;;  %v6341_v19 = vcombine.low %v727_v5, %v739_v6  ;;  %v6355_v20 = vcombine.low %v734_v7, %v746_v8  ;;  %v7535_v5 = vld [vmem:[#allocation2 + $0x8] sm:$0xff]   ;;  %v875_v6 = vld [vmem:[%s9284_s3 + $0x578] sm:$0xff] }
 0x1b9   :  { %v6332_v22 = vcombine.high %v710_v14, %v722_v15  ;;  %v887_v7 = vld [vmem:[%s9284_s3 + $0x5d8] sm:$0xff]  ;;  %v7536_v8 = vld [vmem:[#allocation2 + $0x40] sm:$0xff]  }
 0x1bb   :  { %2083 = vmatpush1.bf16.msra.mxu1 %v6315_v27  ;;  %2329 = vmatpush1.bf16.msra.mxu0 %v6327_v28  ;;  %v6317_v27 = vcombine.low %v703_v12, %v715_v13  ;;  %v6331_v28 = vcombine.low %v710_v14, %v722_v15  ;;  %v863_v12 = vld [vmem:[%s9284_s3 + $0x518] sm:$0xff]  ;;  %v6493_v14 = vcombine.low %v875_v6, %v887_v7 }
 0x1bc   :  { %2109 = vmatprep.subr.bf16.mxu1 %v6486_v29  ;;  %2396 = vmatprep.subr.bf16.mxu0 %v6500_v31  ;;  %v6490_v29 = vcombine.high %v873_v24, %v885_v51  ;;  %v7522_v31 = vld [vmem:[#allocation2 + $0x78] sm:$0xff]  }
 0x1bd   :  { %v7544_v13 = vld [vmem:[#allocation2 + $0x178] sm:$0xff]  }
 0x1be   :  { %2101 = vmatmul.mubr.bf16.vlgmr.msra.gmra.mxu1 %v8408_v34  ;;  %2347 = vmatmul.mubr.bf16.vlgmr.msra.gmra.mxu0 %v8408_v34  ;;  %v803_v24 = vld [vmem:[%s9284_s3 + $0x338] sm:$0xff] }
 0x1bf   :  { %2110 = vmatpush1.bf16.msra.mxu1 %v6485_v37  ;;  %2397 = vmatpush1.bf16.msra.mxu0 %v6499_v38  ;;  %v7523_v37 = vld [vmem:[#allocation2 + $0x38] sm:$0xff]   ;;  %v825_v38 = vld [vmem:[%s9284_s3 + $0x3e8] sm:$0xff] }
 0x1c0   :  { %2111 = vmatprep.subr.bf16.mxu1 %v6462_v39  ;;  %2398 = vmatprep.subr.bf16.mxu0 %v6476_v40  ;;  %v837_v39 = vld [vmem:[%s9284_s3 + $0x448] sm:$0xff]  ;;  %v7524_v40 = vld [vmem:[#allocation2 + $0x70] sm:$0xff]   ;;  %v815_v51 = vld [vmem:[%s9284_s3 + $0x398] sm:$0xff] }
 0x1c1   :  { %2141 = vmatprep.mubr.bf16.mxu1 %v7906_v30  ;;  %2428 = vmatprep.mubr.bf16.mxu0 %v7906_v30  ;;  %v6442_v42 = vcombine.high %v825_v38, %v837_v39  ;;  %v6421_v32 = vcombine.low %v803_v24, %v815_v51 }
 0x1c3   :  { %2112 = vmatpush1.bf16.msra.mxu1 %v6461_v45  ;;  %2399 = vmatpush1.bf16.msra.mxu0 %v6475_v46  ;;  %v813_v45 = vld [vmem:[%s9284_s3 + $0x388] sm:$0xff] }
 0x1c4   :  { %2113 = vmatprep.subr.bf16.mxu1 %v6438_v16  ;;  %2400 = vmatprep.subr.bf16.mxu0 %v6452_v17  ;;  %v7526_v46 = vld [vmem:[#allocation2 + $0x68] sm:$0xff]   ;;  %v6441_v16 = vcombine.low %v825_v38, %v837_v39  ;;  %v6418_v17 = vcombine.high %v801_v44, %v813_v45  ;;  %v731_v39 = vld [vmem:[%s9284_s3 + $0xf8] sm:$0xff] }
 0x1c7   :  { %2114 = vmatpush1.bf16.msra.mxu1 %v6437_v47  ;;  %2401 = vmatpush1.bf16.msra.mxu0 %v6451_v48  ;;  %v6417_v47 = vcombine.low %v801_v44, %v813_v45  ;;  %v6394_v48 = vcombine.high %v777_v23, %v789_v25  ;;  %v719_v44 = vld [vmem:[%s9284_s3 + $0x98] sm:$0xff]  ;;  %v853_v25 = vld [vmem:[%s9284_s3 + $0x4c8] sm:$0xff] }
 0x1c8   :  { %2115 = vmatprep.subr.bf16.mxu1 %v6414_v49  ;;  %2402 = vmatprep.subr.bf16.mxu0 %v6428_v50  ;;  %v7529_v49 = vld [vmem:[#allocation2 + $0x20] sm:$0xff]   ;;  %v753_v50 = vld [vmem:[%s9284_s3 + $0x1a8] sm:$0xff] }
 0x1c9   :  { %v6370_v55 = vcombine.high %v753_v50, %v765_v52  ;;  %v6369_v61 = vcombine.low %v753_v50, %v765_v52  ;;  %v841_v50 = vld [vmem:[%s9284_s3 + $0x468] sm:$0xff] }
 0x1cb   :  { %2116 = vmatpush1.bf16.msra.mxu1 %v6413_v56  ;;  %2403 = vmatpush1.bf16.msra.mxu0 %v6427_v58  ;;  %v7531_v56 = vld [vmem:[#allocation2 + $0x18] sm:$0xff]   ;;  %v729_v58 = vld [vmem:[%s9284_s3 + $0xe8] sm:$0xff] }
 0x1cc   :  { %2117 = vmatprep.subr.bf16.mxu1 %v6390_v59  ;;  %2404 = vmatprep.subr.bf16.mxu0 %v6404_v60  ;;  %v741_v59 = vld [vmem:[%s9284_s3 + $0x148] sm:$0xff]  ;;  %v7532_v60 = vld [vmem:[#allocation2 + $0x50] sm:$0xff]  }
 0x1cd   :  { %v6346_v62 = vcombine.high %v729_v58, %v741_v59 }
 0x1cf   :  { %2118 = vmatpush1.bf16.msra.mxu1 %v6389_v1  ;;  %2405 = vmatpush1.bf16.msra.mxu0 %v6403_v2  ;;  %v717_v1 = vld [vmem:[%s9284_s3 + $0x88] sm:$0xff] }
 0x1d0   :  { %2119 = vmatprep.subr.bf16.mxu1 %v6366_v3  ;;  %2406 = vmatprep.subr.bf16.mxu0 %v6380_v4  ;;  %v7534_v2 = vld [vmem:[#allocation2 + $0x48] sm:$0xff]   ;;  %v6345_v3 = vcombine.low %v729_v58, %v741_v59  ;;  %v6322_v4 = vcombine.high %v705_v0, %v717_v1 }
 0x1d1   :  { %v781_v59 = vld [vmem:[%s9284_s3 + $0x288] sm:$0xff] }
 0x1d3   :  { %2120 = vmatpush1.bf16.msra.mxu1 %v6365_v57  ;;  %2407 = vmatpush1.bf16.msra.mxu0 %v6379_v9  ;;  %v6321_v57 = vcombine.low %v705_v0, %v717_v1  ;;  %v6494_v9 = vcombine.high %v875_v6, %v887_v7  ;;  %v769_v0 = vld [vmem:[%s9284_s3 + $0x228] sm:$0xff]  ;;  %v898_v6 = vlaneseq }
 0x1d4   :  { %2121 = vmatprep.subr.bf16.mxu1 %v6342_v10  ;;  %2408 = vmatprep.subr.bf16.mxu0 %v6356_v11  ;;  %v7537_v10 = vld [vmem:[#allocation2] sm:$0xff]   ;;  %v851_v11 = vld [vmem:[%s9284_s3 + $0x4b8] sm:$0xff] }
 0x1d5   :  { %v6470_v15 = vcombine.high %v851_v11, %v863_v12 }
 0x1d7   :  { %2122 = vmatpush1.bf16.msra.mxu1 %v6341_v19  ;;  %2409 = vmatpush1.bf16.msra.mxu0 %v6355_v20  ;;  %v827_v19 = vld [vmem:[%s9284_s3 + $0x3f8] sm:$0xff] }
 0x1d8   :  { %2123 = vmatprep.subr.bf16.mxu1 %v6318_v21  ;;  %2410 = vmatprep.subr.bf16.mxu0 %v6332_v22  ;;  %v839_v20 = vld [vmem:[%s9284_s3 + $0x458] sm:$0xff]  ;;  %v6469_v21 = vcombine.low %v851_v11, %v863_v12 }
 0x1d9   :  { %v6446_v22 = vcombine.high %v827_v19, %v839_v20  ;;  %v879_v12 = vld [vmem:[%s9284_s3 + $0x598] sm:$0xff] }
 0x1db   :  { %2124 = vmatpush1.bf16.msra.mxu1 %v6317_v27  ;;  %2411 = vmatpush1.bf16.msra.mxu0 %v6331_v28  ;;  %v6445_v27 = vcombine.low %v827_v19, %v839_v20  ;;  %v6422_v28 = vcombine.high %v803_v24, %v815_v51  ;;  %v8857_v20 = vld [vmem:[%s9285_s4] sm:$0xff]  ;;  %v867_v24 = vld [vmem:[%s9284_s3 + $0x538] sm:$0xff] }
 0x1dc   :  { %2191 = vmatprep.subr.bf16.mxu1 %v6490_v29  ;;  %6864 = vmatprep.subr.bf16.mxu0 %v7522_v31  ;;  %v779_v29 = vld [vmem:[%s9284_s3 + $0x278] sm:$0xff] }
 0x1dd   :  { %v791_v31 = vld [vmem:[%s9284_s3 + $0x2d8] sm:$0xff] }
 0x1de   :  { %2142 = vmatmul.mubr.bf16.vlgmr.msra.gmra.mxu1 %v8408_v34  ;;  %2429 = vmatmul.mubr.bf16.vlgmr.msra.gmra.mxu0 %v8408_v34  ;;  %v6398_v33 = vcombine.high %v779_v29, %v791_v31 }
 0x1df   :  { %2192 = vmatpush1.bf16.msra.mxu1 %v6489_v35  ;;  %2223 = vmatprep.mubr.bf16.mxu1 %v7906_v30  ;;  %v755_v35 = vld [vmem:[%s9284_s3 + $0x1b8] sm:$0xff] }
 0x1e0   :  { %2193 = vmatprep.subr.bf16.mxu1 %v6466_v36  ;;  %6865 = vmatpush3.bf16.msra.mxu0 %v7523_v37  ;;  %v767_v36 = vld [vmem:[%s9284_s3 + $0x218] sm:$0xff]  ;;  %v6397_v37 = vcombine.low %v779_v29, %v791_v31 }
 0x1e1   :  { %6866 = vmatprep.subr.bf16.mxu0 %v7524_v40  ;;  %v6374_v38 = vcombine.high %v755_v35, %v767_v36  ;;  %v743_v40 = vld [vmem:[%s9284_s3 + $0x158] sm:$0xff] }
 0x1e2   :  { %v6349_v45 = vcombine.low %v731_v39, %v743_v40 }
 0x1e3   :  { %2194 = vmatpush1.bf16.msra.mxu1 %v6465_v41  ;;  %v6373_v41 = vcombine.low %v755_v35, %v767_v36 }
 0x1e4   :  { %2195 = vmatprep.subr.bf16.mxu1 %v6442_v42  ;;  %6867 = vmatpush3.bf16.msra.mxu0 %v7525_v43  ;;  %v6350_v42 = vcombine.high %v731_v39, %v743_v40  ;;  %v707_v43 = vld [vmem:[%s9284_s3 + $0x38] sm:$0xff] }
 0x1e5   :  { %6868 = vmatprep.subr.bf16.mxu0 %v7526_v46  ;;  %v6326_v46 = vcombine.high %v707_v43, %v719_v44 }
 0x1e7   :  { %2196 = vmatpush1.bf16.msra.mxu1 %v6441_v16  ;;  %v877_v16 = vld [vmem:[%s9284_s3 + $0x588] sm:$0xff] }
 0x1e8   :  { %2197 = vmatprep.subr.bf16.mxu1 %v6418_v17  ;;  %6869 = vmatpush3.bf16.msra.mxu0 %v7527_v18  ;;  %v889_v17 = vld [vmem:[%s9284_s3 + $0x5e8] sm:$0xff]  ;;  %v6325_v18 = vcombine.low %v707_v43, %v719_v44 }
 0x1e9   :  { %6870 = vmatprep.subr.bf16.mxu0 %v7528_v26  ;;  %v6498_v23 = vcombine.high %v877_v16, %v889_v17  ;;  %v865_v26 = vld [vmem:[%s9284_s3 + $0x528] sm:$0xff] }
 0x1ea   :  { %v6473_v52 = vcombine.low %v853_v25, %v865_v26 }
 0x1eb   :  { %2198 = vmatpush1.bf16.msra.mxu1 %v6417_v47  ;;  %v6497_v47 = vcombine.low %v877_v16, %v889_v17 }
 0x1ec   :  { %2199 = vmatprep.subr.bf16.mxu1 %v6394_v48  ;;  %6871 = vmatpush3.bf16.msra.mxu0 %v7529_v49  ;;  %v6474_v48 = vcombine.high %v853_v25, %v865_v26  ;;  %v829_v49 = vld [vmem:[%s9284_s3 + $0x408] sm:$0xff] }
 0x1ed   :  { %6872 = vmatprep.subr.bf16.mxu0 %v7530_v53  ;;  %v6450_v53 = vcombine.high %v829_v49, %v841_v50 }
 0x1ef   :  { %2200 = vmatpush1.bf16.msra.mxu1 %v6393_v54  ;;  %v805_v54 = vld [vmem:[%s9284_s3 + $0x348] sm:$0xff] }
 0x1f0   :  { %2201 = vmatprep.subr.bf16.mxu1 %v6370_v55  ;;  %6873 = vmatpush3.bf16.msra.mxu0 %v7531_v56  ;;  %v817_v55 = vld [vmem:[%s9284_s3 + $0x3a8] sm:$0xff]  ;;  %v6449_v56 = vcombine.low %v829_v49, %v841_v50  ;;  %v783_v49 = vld [vmem:[%s9284_s3 + $0x298] sm:$0xff] }
 0x1f1   :  { %6874 = vmatprep.subr.bf16.mxu0 %v7532_v60  ;;  %v6426_v58 = vcombine.high %v805_v54, %v817_v55  ;;  %v793_v60 = vld [vmem:[%s9284_s3 + $0x2e8] sm:$0xff]  ;;  %v795_v50 = vld [vmem:[%s9284_s3 + $0x2f8] sm:$0xff] }
 0x1f2   :  { %v6401_v1 = vcombine.low %v781_v59, %v793_v60 }
 0x1f3   :  { %2202 = vmatpush1.bf16.msra.mxu1 %v6369_v61  ;;  %v6425_v61 = vcombine.low %v805_v54, %v817_v55  ;;  %v7548_v54 = vld [vmem:[#allocation2 + $0x170] sm:$0xff]  }
 0x1f4   :  { %2203 = vmatprep.subr.bf16.mxu1 %v6346_v62  ;;  %6875 = vmatpush3.bf16.msra.mxu0 %v7533_v63  ;;  %v6402_v62 = vcombine.high %v781_v59, %v793_v60  ;;  %v757_v63 = vld [vmem:[%s9284_s3 + $0x1c8] sm:$0xff]  ;;  %v771_v59 = vld [vmem:[%s9284_s3 + $0x238] sm:$0xff]  ;;  %v7549_v60 = vld [vmem:[#allocation2 + $0x130] sm:$0xff]  }
 0x1f5   :  { %6876 = vmatprep.subr.bf16.mxu0 %v7534_v2  ;;  %v6378_v2 = vcombine.high %v757_v63, %v769_v0 }
 0x1f7   :  { %2204 = vmatpush1.bf16.msra.mxu1 %v6345_v3  ;;  %v733_v3 = vld [vmem:[%s9284_s3 + $0x108] sm:$0xff] }
 0x1f8   :  { %2205 = vmatprep.subr.bf16.mxu1 %v6322_v4  ;;  %6877 = vmatpush3.bf16.msra.mxu0 %v7535_v5  ;;  %v745_v4 = vld [vmem:[%s9284_s3 + $0x168] sm:$0xff]  ;;  %v6377_v5 = vcombine.low %v757_v63, %v769_v0  ;;  %v735_v0 = vld [vmem:[%s9284_s3 + $0x118] sm:$0xff] }
 0x1f9   :  { %6878 = vmatprep.subr.bf16.mxu0 %v7536_v8  ;;  %v6354_v7 = vcombine.high %v733_v3, %v745_v4  ;;  %v709_v8 = vld [vmem:[%s9284_s3 + $0x48] sm:$0xff] }
 0x1fb   :  { %2206 = vmatpush1.bf16.msra.mxu1 %v6321_v57  ;;  %v721_v57 = vld [vmem:[%s9284_s3 + $0xa8] sm:$0xff] }
 0x1fc   :  { %2273 = vmatprep.subr.bf16.mxu1 %v6494_v9  ;;  %6879 = vmatpush3.bf16.msra.mxu0 %v7537_v10  ;;  %v6353_v9 = vcombine.low %v733_v3, %v745_v4  ;;  %v8843_v10 = vshrl.u32 %v898_v6, 7  ;;  %v6330_v11 = vcombine.high %v709_v8, %v721_v57  ;;  %v7556_v3 = vld [vmem:[#allocation2 + $0x160] sm:$0xff]   ;;  %v711_v6 = vld [vmem:[%s9284_s3 + $0x58] sm:$0xff] }
 0x1fd   :  { %6908 = vmatprep.subr.bf16.mxu0 %v7544_v13  ;;  %v891_v13 = vld [vmem:[%s9284_s3 + $0x5f8] sm:$0xff] }
 0x1fe   :  { %2224 = vmatmul.mubr.bf16.vlgmr.msra.gmra.mxu1 %v8408_v34  ;;  %v6502_v19 = vcombine.high %v879_v12, %v891_v13  ;;  %v6501_v51 = vcombine.low %v879_v12, %v891_v13  ;;  %v7561_v12 = vld [vmem:[#allocation2 + $0x118] sm:$0xff]   ;;  %v7564_v13 = vld [vmem:[#allocation2 + $0x150] sm:$0xff]  }
 0x1ff   :  { %2274 = vmatpush1.bf16.msra.mxu1 %v6493_v14  ;;  %2305 = vmatprep.mubr.bf16.mxu1 %v7906_v30  ;;  %v6329_v14 = vcombine.low %v709_v8, %v721_v57  ;;  %v7557_v8 = vld [vmem:[#allocation2 + $0x120] sm:$0xff]   ;;  %v7560_v57 = vld [vmem:[#allocation2 + $0x158] sm:$0xff]  }
 0x200   :  { %2275 = vmatprep.subr.bf16.mxu1 %v6470_v15  ;;  %v8852_v15 = vsub.s32 0, %v8843_v10 }
 0x203   :  { %2276 = vmatpush1.bf16.msra.mxu1 %v6469_v21  ;;  %v8860_v21 = vsub.s32 1, %v8843_v10 }
 0x204   :  { %2277 = vmatprep.subr.bf16.mxu1 %v6446_v22  ;;  %v855_v22 = vld [vmem:[%s9284_s3 + $0x4d8] sm:$0xff] }
 0x205   :  { %v6478_v29 = vcombine.high %v855_v22, %v867_v24  ;;  %v905_v31 = vrot.slane %v8857_v20, %v8860_v21  ;;  %v6477_v40 = vcombine.low %v855_v22, %v867_v24  ;;  %v8924_v22 = vsub.s32 3, %v8843_v10  ;;  %v7565_v24 = vld [vmem:[#allocation2 + $0x110] sm:$0xff]  }
 0x207   :  { %2278 = vmatpush1.bf16.msra.mxu1 %v6445_v27  ;;  %v901_v27 = vrot.slane %v8857_v20, %v8852_v15 }
 0x208   :  { %2279 = vmatprep.subr.bf16.mxu1 %v6422_v28  ;;  %v8873_v28 = vld [vmem:[%s9286_s5] sm:$0xff] }
 0x209   :  { %v2487_v36 = vrot.slane %v8873_v28, %v8852_v15  ;;  %v2491_v39 = vrot.slane %v8873_v28, %v8860_v21 }
 0x20b   :  { %2280 = vmatpush1.bf16.msra.mxu1 %v6421_v32  ;;  %v831_v32 = vld [vmem:[%s9284_s3 + $0x418] sm:$0xff] }
 0x20c   :  { %2281 = vmatprep.subr.bf16.mxu1 %v6398_v33  ;;  %v843_v33 = vld [vmem:[%s9284_s3 + $0x478] sm:$0xff] }
 0x20d   :  { %v6454_v43 = vcombine.high %v831_v32, %v843_v33 }
 0x20f   :  { %2282 = vmatpush1.bf16.msra.mxu1 %v6397_v37 }
 0x210   :  { %2283 = vmatprep.subr.bf16.mxu1 %v6374_v38 }
 0x213   :  { %2284 = vmatpush1.bf16.msra.mxu1 %v6373_v41 }
 0x214   :  { %2285 = vmatprep.subr.bf16.mxu1 %v6350_v42 }
 0x217   :  { %2286 = vmatpush1.bf16.msra.mxu1 %v6349_v45  ;;  %v807_v45 = vld [vmem:[%s9284_s3 + $0x358] sm:$0xff] }
 0x218   :  { %2287 = vmatprep.subr.bf16.mxu1 %v6326_v46  ;;  %v819_v46 = vld [vmem:[%s9284_s3 + $0x3b8] sm:$0xff] }
 0x219   :  { %v6429_v55 = vcombine.low %v807_v45, %v819_v46 }
 0x21b   :  { %2288 = vmatpush1.bf16.msra.mxu1 %v6325_v18 }
 0x21c   :  { %2355 = vmatprep.subr.bf16.mxu1 %v6498_v23 }
 0x21e   :  { %2306 = vmatmul.mubr.bf16.vlgmr.msra.gmra.mxu1 %v8408_v34 }
 0x21f   :  { %2356 = vmatpush1.bf16.msra.mxu1 %v6497_v47  ;;  %2387 = vmatprep.mubr.bf16.mxu1 %v7906_v30  ;;  %v6430_v47 = vcombine.high %v807_v45, %v819_v46  ;;  %v7569_v45 = vld [vmem:[#allocation2 + $0x100] sm:$0xff]  }
 0x220   :  { %2357 = vmatprep.subr.bf16.mxu1 %v6474_v48 }
 0x223   :  { %2358 = vmatpush1.bf16.msra.mxu1 %v6473_v52  ;;  %v7545_v52 = vld [vmem:[#allocation2 + $0x138] sm:$0xff]  }
 0x224   :  { %2359 = vmatprep.subr.bf16.mxu1 %v6450_v53 }
 0x227   :  { %2360 = vmatpush1.bf16.msra.mxu1 %v6449_v56  ;;  %v6406_v56 = vcombine.high %v783_v49, %v795_v50 }
 0x228   :  { %2361 = vmatprep.subr.bf16.mxu1 %v6426_v58  ;;  %v759_v58 = vld [vmem:[%s9284_s3 + $0x1d8] sm:$0xff] }
 0x229   :  { %v6382_v63 = vcombine.high %v759_v58, %v771_v59  ;;  %v6381_v4 = vcombine.low %v759_v58, %v771_v59 }
 0x22b   :  { %2362 = vmatpush1.bf16.msra.mxu1 %v6425_v61  ;;  %v7552_v61 = vld [vmem:[#allocation2 + $0x168] sm:$0xff]  }
 0x22c   :  { %2363 = vmatprep.subr.bf16.mxu1 %v6402_v62  ;;  %v6405_v62 = vcombine.low %v783_v49, %v795_v50  ;;  %v7551_v49 = vld [vmem:[#allocation2 + $0x98] sm:$0xff]   ;;  %v8936_v50 = vsub.s32 2, %v8843_v10 }
 0x22e   :  { %v2495_v59 = vrot.slane %v8873_v28, %v8936_v50 }
 0x22f   :  { %2364 = vmatpush1.bf16.msra.mxu1 %v6401_v1  ;;  %v747_v1 = vld [vmem:[%s9284_s3 + $0x178] sm:$0xff] }
 0x230   :  { %2365 = vmatprep.subr.bf16.mxu1 %v6378_v2  ;;  %v7553_v2 = vld [vmem:[#allocation2 + $0x128] sm:$0xff]  }
 0x233   :  { %2366 = vmatpush1.bf16.msra.mxu1 %v6377_v5  ;;  %v6358_v5 = vcombine.high %v735_v0, %v747_v1 }
 0x234   :  { %2367 = vmatprep.subr.bf16.mxu1 %v6354_v7  ;;  %v723_v7 = vld [vmem:[%s9284_s3 + $0xb8] sm:$0xff] }
 0x237   :  { %2368 = vmatpush1.bf16.msra.mxu1 %v6353_v9  ;;  %v6357_v9 = vcombine.low %v735_v0, %v747_v1  ;;  %v8943_v0 = vsub.s32 4, %v8843_v10  ;;  %v8946_v1 = vsub.s32 5, %v8843_v10 }
 0x238   :  { %2369 = vmatprep.subr.bf16.mxu1 %v6330_v11  ;;  %v6334_v11 = vcombine.high %v711_v6, %v723_v7 }
 0x23b   :  { %2370 = vmatpush1.bf16.msra.mxu1 %v6329_v14  ;;  %v6333_v14 = vcombine.low %v711_v6, %v723_v7  ;;  %v921_v6 = vrot.slane %v8857_v20, %v8946_v1 }
 0x23c   :  { %2437 = vmatprep.subr.bf16.mxu1 %v6502_v19  ;;  %v7538_v19 = vld [vmem:[#allocation2 + $0xf8] sm:$0xff]  }
 0x23e   :  { %2388 = vmatmul.mubr.bf16.vlgmr.msra.gmra.mxu1 %v8408_v34  ;;  %v2020_v35 = vpop.f32.mrf.mxu1  ;;  %v8886_v37 = vpop.f32.mrf.mxu0 }
 0x23f   :  { %v2021_v38 = vadd.f32 %v2020_v35, %v901_v27  ;;  %2438 = vmatpush1.bf16.msra.mxu1 %v6501_v51  ;;  %2469 = vmatprep.mubr.bf16.mxu1 %v7906_v30  ;;  %v6453_v30 = vcombine.low %v831_v32, %v843_v33  ;;  %v7566_v51 = vld [vmem:[#allocation2 + $0x148] sm:$0xff]   ;;  %v7539_v27 = vld [vmem:[#allocation2 + $0xb8] sm:$0xff]  }
 0x240   :  { %v2022_v41 = vpop.f32.mrf.mxu1  ;;  %v8891_v42 = vpop.f32.mrf.mxu0  ;;  %2439 = vmatprep.subr.bf16.mxu1 %v6478_v29  ;;  %v7540_v29 = vld [vmem:[#allocation2 + $0xf0] sm:$0xff]   ;;  %v7567_v32 = vld [vmem:[#allocation2 + $0x108] sm:$0xff]  }
 0x241   :  { %v2023_v44 = vadd.f32 %v2022_v41, %v905_v31  ;;  %v2604_v16 = vadd.f32 %v2487_v36, %v2021_v38  ;;  %v913_v31 = vrot.slane %v8857_v20, %v8924_v22  ;;  %v7568_v36 = vld [vmem:[#allocation2 + $0x140] sm:$0xff]   ;;  %v2499_v38 = vrot.slane %v8873_v28, %v8924_v22 }
 0x242   :  { %v2024_v17 = vpop.f32.mrf.mxu1  ;;  %v2188_v18 = vpop.f32.mrf.mxu0 }
 0x243   :  { %v2605_v23 = vadd.f32 %v2491_v39, %v2023_v44  ;;  %2440 = vmatpush1.bf16.msra.mxu1 %v6477_v40  ;;  %v2628_v53 = vpack.c.bf16 %v2604_v16, %v2604_v16  ;;  %v7541_v39 = vld [vmem:[#allocation2 + $0xb0] sm:$0xff]   ;;  %v7571_v17 = vld [vmem:[#allocation2 + $0x278] sm:$0xff]   ;;  %v7543_v18 = vld [vmem:[#allocation2 + $0xa8] sm:$0xff]  }
 0x244   :  { %v2025_v25 = vpop.f32.mrf.mxu1  ;;  %v2189_v26 = vpop.f32.mrf.mxu0  ;;  %2441 = vmatprep.subr.bf16.mxu1 %v6454_v43  ;;  %v7542_v43 = vld [vmem:[#allocation2 + $0xe8] sm:$0xff]  }
 0x245   :  { %v2629_v48 = vpack.c.bf16 %v2605_v23, %v2605_v23  ;;  %v7546_v25 = vld [vmem:[#allocation2 + $0xe0] sm:$0xff]  }
 0x247   :  { %2442 = vmatpush1.bf16.msra.mxu1 %v6453_v30  ;;  %3444 = vmatprep.mubr.bf16.mxu0 %v2629_v48  ;;  %v7550_v48 = vld [vmem:[#allocation2 + $0xd8] sm:$0xff]  }
 0x248   :  { %3445 = vmatmul.mubr.bf16.vlgmr.msra.gmra.mxu0 %v2628_v53  ;;  %2443 = vmatprep.subr.bf16.mxu1 %v6430_v47  ;;  %v7547_v47 = vld [vmem:[#allocation2 + $0xa0] sm:$0xff]   ;;  %v7555_v53 = vld [vmem:[#allocation2 + $0x90] sm:$0xff]  }
 0x249   :  { %6909 = vmatpush3.bf16.msra.mxu0 %v7545_v52  ;;  %v7554_v52 = vld [vmem:[#allocation2 + $0xd0] sm:$0xff]  }
 0x24a   :  { %6910 = vmatprep.subr.bf16.mxu0 %v7548_v54  ;;  %v909_v54 = vrot.slane %v8857_v20, %v8936_v50 }
 0x24b   :  { %2444 = vmatpush1.bf16.msra.mxu1 %v6429_v55  ;;  %v7558_v55 = vld [vmem:[#allocation2 + $0xc8] sm:$0xff]  }
 0x24c   :  { %2445 = vmatprep.subr.bf16.mxu1 %v6406_v56  ;;  %v7559_v56 = vld [vmem:[#allocation2 + $0x88] sm:$0xff]  }
 0x24d   :  { %6911 = vmatpush3.bf16.msra.mxu0 %v7549_v60  ;;  %v7562_v60 = vld [vmem:[#allocation2 + $0xc0] sm:$0xff]  }
 0x24e   :  { %6912 = vmatprep.subr.bf16.mxu0 %v7552_v61  ;;  %v7563_v61 = vld [vmem:[#allocation2 + $0x80] sm:$0xff]  }
 0x24f   :  { %2446 = vmatpush1.bf16.msra.mxu1 %v6405_v62 }
 0x250   :  { %2447 = vmatprep.subr.bf16.mxu1 %v6382_v63  ;;  %v7570_v63 = vld [vmem:[#allocation2 + $0x1f8] sm:$0xff]  }
 0x251   :  { %6913 = vmatpush3.bf16.msra.mxu0 %v7553_v2  ;;  %v917_v2 = vrot.slane %v8857_v20, %v8943_v0 }
 0x252   :  { %6914 = vmatprep.subr.bf16.mxu0 %v7556_v3  ;;  %v7572_v3 = vld [vmem:[#allocation2 + $0x1b8] sm:$0xff]  }
 0x253   :  { %2448 = vmatpush1.bf16.msra.mxu1 %v6381_v4 }
 0x254   :  { %2449 = vmatprep.subr.bf16.mxu1 %v6358_v5  ;;  %v7574_v5 = vld [vmem:[#allocation2 + $0x1f0] sm:$0xff]  }
 0x255   :  { %6915 = vmatpush3.bf16.msra.mxu0 %v7557_v8  ;;  %v2503_v8 = vrot.slane %v8873_v28, %v8943_v0 }
 0x256   :  { %6916 = vmatprep.subr.bf16.mxu0 %v7560_v57 }
 0x257   :  { %2450 = vmatpush1.bf16.msra.mxu1 %v6357_v9 }
 0x258   :  { %2451 = vmatprep.subr.bf16.mxu1 %v6334_v11  ;;  %v2507_v11 = vrot.slane %v8873_v28, %v8946_v1 }
 0x259   :  { %6917 = vmatpush3.bf16.msra.mxu0 %v7561_v12  ;;  %v7576_v12 = vld [vmem:[#allocation2 + $0x1b0] sm:$0xff]  }
 0x25a   :  { %6918 = vmatprep.subr.bf16.mxu0 %v7564_v13 }
 0x25b   :  { %2452 = vmatpush1.bf16.msra.mxu1 %v6333_v14 }
 0x25c   :  { %6886 = vmatprep.subr.bf16.mxu1 %v7538_v19  ;;  %v7578_v19 = vld [vmem:[#allocation2 + $0x1e8] sm:$0xff]  }
 0x25d   :  { %6919 = vmatpush3.bf16.msra.mxu0 %v7565_v24 }
 0x25e   :  { %v2061_v33 = vpop.f32.mrf.mxu1  ;;  %v8928_v35 = vpop.f32.mrf.mxu0  ;;  %2470 = vmatmul.mubr.bf16.vlgmr.msra.gmra.mxu1 %v8408_v34  ;;  %6920 = vmatprep.subr.bf16.mxu0 %v7566_v51 }
 0x25f   :  { %6887 = vmatpush3.bf16.msra.mxu1 %v7539_v27  ;;  %v2062_v58 = vadd.f32 %v2061_v33, %v909_v54  ;;  %v7591_v54 = vld [vmem:[#allocation2 + $0x250] sm:$0xff]  }
 0x260   :  { %v2063_v40 = vpop.f32.mrf.mxu1  ;;  %v8933_v41 = vpop.f32.mrf.mxu0  ;;  %6888 = vmatprep.subr.bf16.mxu1 %v7540_v29 }
 0x261   :  { %v2064_v44 = vadd.f32 %v2063_v40, %v913_v31  ;;  %6921 = vmatpush3.bf16.msra.mxu0 %v7567_v32  ;;  %v2606_v62 = vadd.f32 %v2495_v59, %v2062_v58  ;;  %v7580_v32 = vld [vmem:[#allocation2 + $0x1a8] sm:$0xff]   ;;  %v7573_v40 = vld [vmem:[#allocation2 + $0x238] sm:$0xff]   ;;  %v7593_v59 = vld [vmem:[#allocation2 + $0x210] sm:$0xff]  }
 0x262   :  { %v2065_v46 = vpop.f32.mrf.mxu1  ;;  %v2270_v16 = vpop.f32.mrf.mxu0  ;;  %6922 = vmatprep.subr.bf16.mxu0 %v7568_v36  ;;  %v7602_v58 = vld [vmem:[#allocation2 + $0x2f8] sm:$0xff]  }
 0x263   :  { %v2607_v34 = vadd.f32 %v2499_v38, %v2064_v44  ;;  %6889 = vmatpush3.bf16.msra.mxu1 %v7541_v39  ;;  %v2630_v4 = vpack.c.bf16 %v2606_v62, %v2606_v62  ;;  %v7582_v38 = vld [vmem:[#allocation2 + $0x1e0] sm:$0xff]   ;;  %v7575_v44 = vld [vmem:[#allocation2 + $0x270] sm:$0xff]   ;;  %v7586_v46 = vld [vmem:[#allocation2 + $0x1d8] sm:$0xff]  }
 0x264   :  { %v2066_v23 = vpop.f32.mrf.mxu1  ;;  %v2271_v30 = vpop.f32.mrf.mxu0  ;;  %6890 = vmatprep.subr.bf16.mxu1 %v7542_v43  ;;  %v7577_v16 = vld [vmem:[#allocation2 + $0x230] sm:$0xff]   ;;  %v8972_v62 = vld [vmem:[%s9285_s4 + $0x8] sm:$0xff] }
 0x265   :  { %v2631_v26 = vpack.c.bf16 %v2607_v34, %v2607_v34  ;;  %6923 = vmatpush3.bf16.msra.mxu0 %v7569_v45  ;;  %v7584_v45 = vld [vmem:[#allocation2 + $0x1a0] sm:$0xff]   ;;  %v7588_v34 = vld [vmem:[#allocation2 + $0x198] sm:$0xff]   ;;  %v7581_v23 = vld [vmem:[#allocation2 + $0x228] sm:$0xff]  }
 0x266   :  { %6952 = vmatprep.subr.bf16.mxu0 %v7571_v17  ;;  %v7579_v17 = vld [vmem:[#allocation2 + $0x268] sm:$0xff]   ;;  %v7583_v30 = vld [vmem:[#allocation2 + $0x260] sm:$0xff]  }
 0x267   :  { %6891 = vmatpush3.bf16.msra.mxu1 %v7543_v18  ;;  %3484 = vmatprep.mubr.bf16.mxu1 %v2631_v26  ;;  %v7590_v18 = vld [vmem:[#allocation2 + $0x1d0] sm:$0xff]   ;;  %v7594_v26 = vld [vmem:[#allocation2 + $0x1c8] sm:$0xff]  }
 0x268   :  { %6892 = vmatprep.subr.bf16.mxu1 %v7546_v25  ;;  %v7592_v25 = vld [vmem:[#allocation2 + $0x190] sm:$0xff]  }
 0x26b   :  { %6893 = vmatpush3.bf16.msra.mxu1 %v7547_v47  ;;  %v7585_v47 = vld [vmem:[#allocation2 + $0x220] sm:$0xff]  }
 0x26c   :  { %6894 = vmatprep.subr.bf16.mxu1 %v7550_v48  ;;  %v7587_v48 = vld [vmem:[#allocation2 + $0x258] sm:$0xff]  }
 0x26f   :  { %6895 = vmatpush3.bf16.msra.mxu1 %v7551_v49  ;;  %v7596_v49 = vld [vmem:[#allocation2 + $0x188] sm:$0xff]  }
 0x270   :  { %6896 = vmatprep.subr.bf16.mxu1 %v7554_v52  ;;  %v7598_v52 = vld [vmem:[#allocation2 + $0x1c0] sm:$0xff]  }
 0x273   :  { %6897 = vmatpush3.bf16.msra.mxu1 %v7555_v53  ;;  %v7589_v53 = vld [vmem:[#allocation2 + $0x218] sm:$0xff]  }
 0x274   :  { %6898 = vmatprep.subr.bf16.mxu1 %v7558_v55  ;;  %v8964_v55 = vsub.s32 6, %v8843_v10 }
 0x277   :  { %6899 = vmatpush3.bf16.msra.mxu1 %v7559_v56  ;;  %v7600_v56 = vld [vmem:[#allocation2 + $0x180] sm:$0xff]  }
 0x278   :  { %6900 = vmatprep.subr.bf16.mxu1 %v7562_v60  ;;  %v8967_v60 = vsub.s32 7, %v8843_v10 }
 0x27a   :  { %v929_v10 = vrot.slane %v8857_v20, %v8967_v60 }
 0x27b   :  { %6901 = vmatpush3.bf16.msra.mxu1 %v7563_v61  ;;  %v7595_v61 = vld [vmem:[#allocation2 + $0x248] sm:$0xff]  }
 0x27c   :  { %6930 = vmatprep.subr.bf16.mxu1 %v7570_v63  ;;  %v925_v63 = vrot.slane %v8857_v20, %v8964_v55 }
 0x27e   :  { %v2102_v7 = vpop.f32.mrf.mxu1  ;;  %v8954_v57 = vpop.f32.mrf.mxu0  ;;  %3485 = vmatmul.mubr.bf16.vlgmr.msra.gmra.mxu1 %v2630_v4 }
 0x27f   :  { %v2103_v9 = vadd.f32 %v2102_v7, %v917_v2  ;;  %6931 = vmatpush3.bf16.msra.mxu1 %v7572_v3  ;;  %v937_v2 = vrot.slane %v8972_v62, %v8860_v21  ;;  %v7597_v3 = vld [vmem:[#allocation2 + $0x208] sm:$0xff]   ;;  %v7599_v7 = vld [vmem:[#allocation2 + $0x240] sm:$0xff]  }
 0x280   :  { %v2104_v13 = vpop.f32.mrf.mxu1  ;;  %v8958_v14 = vpop.f32.mrf.mxu0  ;;  %6932 = vmatprep.subr.bf16.mxu1 %v7574_v5  ;;  %v2511_v5 = vrot.slane %v8873_v28, %v8964_v55 }
 0x281   :  { %v2105_v24 = vadd.f32 %v2104_v13, %v921_v6  ;;  %v2608_v51 = vadd.f32 %v2503_v8, %v2103_v9  ;;  %v8987_v8 = vld [vmem:[%s9286_s5 + $0x8] sm:$0xff]  ;;  %v2187_v20 = vadd.f32 %v8891_v42, %v937_v2  ;;  %v7604_v42 = vld [vmem:[#allocation2 + $0x2b8] sm:$0xff]  }
 0x282   :  { %v2106_v27 = vpop.f32.mrf.mxu1  ;;  %v2352_v29 = vpop.f32.mrf.mxu0  ;;  %v7626_v2 = vld [vmem:[#allocation2 + $0x2c8] sm:$0xff]  }
 0x283   :  { %v2609_v31 = vadd.f32 %v2507_v11, %v2105_v24  ;;  %6933 = vmatpush3.bf16.msra.mxu1 %v7576_v12  ;;  %v8960_v43 = vpack.c.bf16 %v2608_v51, %v2608_v51  ;;  %v2515_v11 = vrot.slane %v8873_v28, %v8967_v60  ;;  %v2523_v12 = vrot.slane %v8987_v8, %v8860_v21  ;;  %v7601_v51 = vld [vmem:[#allocation2 + $0x200] sm:$0xff]  }
 0x284   :  { %v2107_v33 = vpop.f32.mrf.mxu1  ;;  %v2353_v36 = vpop.f32.mrf.mxu0  ;;  %6934 = vmatprep.subr.bf16.mxu1 %v7578_v19 }
 0x285   :  { %v2633_v39 = vpack.c.bf16 %v2609_v31, %v2609_v31  ;;  %v2613_v36 = vadd.f32 %v2523_v12, %v2187_v20  ;;  %v7630_v12 = vld [vmem:[#allocation2 + $0x2c0] sm:$0xff]  }
 0x287   :  { %3716 = vmatprep.mubr.bf16.mxu0 %v2633_v39  ;;  %6935 = vmatpush3.bf16.msra.mxu1 %v7580_v32  ;;  %v7603_v32 = vld [vmem:[#allocation2 + $0x378] sm:$0xff]  }
 0x288   :  { %3717 = vmatmul.mubr.bf16.vlgmr.msra.gmra.mxu0 %v8960_v43  ;;  %6936 = vmatprep.subr.bf16.mxu1 %v7582_v38 }
 0x289   :  { %6953 = vmatpush3.bf16.msra.mxu0 %v7573_v40  ;;  %3988 = vmatprep.mubr.bf16.mxu0 %v2633_v39  ;;  %v7605_v40 = vld [vmem:[#allocation2 + $0x338] sm:$0xff]  }
 0x28a   :  { %6954 = vmatprep.subr.bf16.mxu0 %v7575_v44 }
 0x28b   :  { %6937 = vmatpush3.bf16.msra.mxu1 %v7584_v45  ;;  %v7606_v45 = vld [vmem:[#allocation2 + $0x2f0] sm:$0xff]  }
 0x28c   :  { %6938 = vmatprep.subr.bf16.mxu1 %v7586_v46  ;;  %v7607_v46 = vld [vmem:[#allocation2 + $0x370] sm:$0xff]  }
 0x28d   :  { %6955 = vmatpush3.bf16.msra.mxu0 %v7577_v16  ;;  %v2637_v16 = vpack.c.bf16 %v2613_v36, %v2613_v36 }
 0x28e   :  { %6956 = vmatprep.subr.bf16.mxu0 %v7579_v17  ;;  %v7608_v17 = vld [vmem:[#allocation2 + $0x2b0] sm:$0xff]  }
 0x28f   :  { %6939 = vmatpush3.bf16.msra.mxu1 %v7588_v34  ;;  %v7609_v34 = vld [vmem:[#allocation2 + $0x330] sm:$0xff]  }
 0x290   :  { %6940 = vmatprep.subr.bf16.mxu1 %v7590_v18  ;;  %v7610_v18 = vld [vmem:[#allocation2 + $0x2e8] sm:$0xff]  }
 0x291   :  { %6957 = vmatpush3.bf16.msra.mxu0 %v7581_v23  ;;  %v7611_v23 = vld [vmem:[#allocation2 + $0x368] sm:$0xff]  }
 0x292   :  { %6958 = vmatprep.subr.bf16.mxu0 %v7583_v30  ;;  %v7612_v30 = vld [vmem:[#allocation2 + $0x2a8] sm:$0xff]  }
 0x293   :  { %6941 = vmatpush3.bf16.msra.mxu1 %v7592_v25  ;;  %v7613_v25 = vld [vmem:[#allocation2 + $0x328] sm:$0xff]  }
 0x294   :  { %6942 = vmatprep.subr.bf16.mxu1 %v7594_v26  ;;  %v7614_v26 = vld [vmem:[#allocation2 + $0x2e0] sm:$0xff]  }
 0x295   :  { %6959 = vmatpush3.bf16.msra.mxu0 %v7585_v47  ;;  %v7616_v47 = vld [vmem:[#allocation2 + $0x2a0] sm:$0xff]  }
 0x296   :  { %6960 = vmatprep.subr.bf16.mxu0 %v7587_v48  ;;  %v7617_v48 = vld [vmem:[#allocation2 + $0x320] sm:$0xff]  }
 0x297   :  { %6943 = vmatpush3.bf16.msra.mxu1 %v7596_v49  ;;  %v7618_v49 = vld [vmem:[#allocation2 + $0x2d8] sm:$0xff]  }
 0x298   :  { %6944 = vmatprep.subr.bf16.mxu1 %v7598_v52  ;;  %v7619_v52 = vld [vmem:[#allocation2 + $0x358] sm:$0xff]  }
 0x299   :  { %6961 = vmatpush3.bf16.msra.mxu0 %v7589_v53  ;;  %v7620_v53 = vld [vmem:[#allocation2 + $0x298] sm:$0xff]  }
 0x29a   :  { %6962 = vmatprep.subr.bf16.mxu0 %v7591_v54  ;;  %v7621_v54 = vld [vmem:[#allocation2 + $0x318] sm:$0xff]  }
 0x29b   :  { %6945 = vmatpush3.bf16.msra.mxu1 %v7600_v56  ;;  %v7622_v56 = vld [vmem:[#allocation2 + $0x2d0] sm:$0xff]  }
 0x29c   :  { %6974 = vmatprep.subr.bf16.mxu1 %v7602_v58  ;;  %v7623_v58 = vld [vmem:[#allocation2 + $0x350] sm:$0xff]  }
 0x29d   :  { %6963 = vmatpush3.bf16.msra.mxu0 %v7593_v59  ;;  %v7624_v59 = vld [vmem:[#allocation2 + $0x290] sm:$0xff]  }
 0x29e   :  { %v2143_v4 = vpop.f32.mrf.mxu1  ;;  %v8982_v6 = vpop.f32.mrf.mxu0  ;;  %6964 = vmatprep.subr.bf16.mxu0 %v7595_v61  ;;  %v7625_v61 = vld [vmem:[#allocation2 + $0x310] sm:$0xff]  }
 0x29f   :  { %v2144_v9 = vadd.f32 %v2143_v4, %v925_v63  ;;  %v933_v63 = vrot.slane %v8972_v62, %v8852_v15  ;;  %v945_v4 = vrot.slane %v8972_v62, %v8924_v22 }
 0x2a0   :  { %v2145_v13 = vpop.f32.mrf.mxu1  ;;  %v8994_v19 = vpop.f32.mrf.mxu0 }
 0x2a1   :  { %v2146_v24 = vadd.f32 %v2145_v13, %v929_v10  ;;  %6965 = vmatpush3.bf16.msra.mxu0 %v7597_v3  ;;  %v2610_v27 = vadd.f32 %v2511_v5, %v2144_v9  ;;  %v7627_v10 = vld [vmem:[#allocation2 + $0x348] sm:$0xff]   ;;  %v953_v3 = vrot.slane %v8972_v62, %v8946_v1  ;;  %v2185_v9 = vadd.f32 %v8886_v37, %v933_v63  ;;  %v7631_v13 = vld [vmem:[#allocation2 + $0x340] sm:$0xff]   ;;  %v7656_v63 = vld [vmem:[#allocation2 + $0x390] sm:$0xff]  }
 0x2a2   :  { %v2147_v29 = vpop.f32.mrf.mxu1  ;;  %v2434_v31 = vpop.f32.mrf.mxu0  ;;  %6966 = vmatprep.subr.bf16.mxu0 %v7599_v7  ;;  %v7628_v5 = vld [vmem:[#allocation2 + $0x288] sm:$0xff]   ;;  %v7632_v37 = vld [vmem:[#allocation2 + $0x280] sm:$0xff]  }
 0x2a3   :  { %v2611_v33 = vadd.f32 %v2515_v11, %v2146_v24  ;;  %v8996_v44 = vpack.c.bf16 %v2610_v27, %v2610_v27  ;;  %v7629_v7 = vld [vmem:[#allocation2 + $0x308] sm:$0xff]   ;;  %v2519_v11 = vrot.slane %v8987_v8, %v8852_v15  ;;  %v2531_v24 = vrot.slane %v8987_v8, %v8924_v22 }
 0x2a4   :  { %v2148_v38 = vpop.f32.mrf.mxu1  ;;  %v2435_v28 = vpop.f32.mrf.mxu0  ;;  %v2539_v27 = vrot.slane %v8987_v8, %v8946_v1 }
 0x2a5   :  { %v2635_v39 = vpack.c.bf16 %v2611_v33, %v2611_v33  ;;  %6967 = vmatpush3.bf16.msra.mxu0 %v7601_v51  ;;  %v2269_v51 = vadd.f32 %v8933_v41, %v953_v3  ;;  %v2612_v33 = vadd.f32 %v2519_v11, %v2185_v9  ;;  %v7634_v38 = vld [vmem:[#allocation2 + $0x3f8] sm:$0xff]   ;;  %v7658_v3 = vld [vmem:[#allocation2 + $0x3c8] sm:$0xff]  }
 0x2a6   :  { %6996 = vmatprep.subr.bf16.mxu0 %v7603_v32  ;;  %v7633_v32 = vld [vmem:[#allocation2 + $0x300] sm:$0xff]   ;;  %v7635_v28 = vld [vmem:[#allocation2 + $0x478] sm:$0xff]   ;;  %v7660_v9 = vld [vmem:[#allocation2 + $0x388] sm:$0xff]  }
 0x2a7   :  { %3756 = vmatprep.mubr.bf16.mxu1 %v2635_v39  ;;  %v7636_v41 = vld [vmem:[#allocation2 + $0x3b8] sm:$0xff]  }
 0x2a8   :  { %3989 = vmatmul.mubr.bf16.vlgmr.msra.gmra.mxu0 %v8960_v43  ;;  %3757 = vmatmul.mubr.bf16.vlgmr.msra.gmra.mxu1 %v8996_v44  ;;  %v7615_v43 = vld [vmem:[#allocation2 + $0x360] sm:$0xff]  }
 0x2a9   :  { %6975 = vmatpush3.bf16.msra.mxu1 %v7604_v42  ;;  %6997 = vmatpush3.bf16.msra.mxu0 %v7605_v40  ;;  %v2617_v42 = vadd.f32 %v2539_v27, %v2269_v51  ;;  %v7662_v51 = vld [vmem:[#allocation2 + $0x3c0] sm:$0xff]  }
 0x2aa   :  { %4260 = vmatprep.mubr.bf16.mxu0 %v2637_v16  ;;  %4028 = vmatprep.mubr.bf16.mxu1 %v2635_v39  ;;  %v7637_v16 = vld [vmem:[#allocation2 + $0x438] sm:$0xff]  }
 0x2ab   :  { %6976 = vmatprep.subr.bf16.mxu1 %v7606_v45  ;;  %6998 = vmatprep.subr.bf16.mxu0 %v7607_v46  ;;  %v2636_v46 = vpack.c.bf16 %v2612_v33, %v2612_v33  ;;  %v7664_v33 = vld [vmem:[#allocation2 + $0x380] sm:$0xff]  }
 0x2ad   :  { %6977 = vmatpush3.bf16.msra.mxu1 %v7608_v17  ;;  %6999 = vmatpush3.bf16.msra.mxu0 %v7609_v34  ;;  %v7638_v17 = vld [vmem:[#allocation2 + $0x3f0] sm:$0xff]  }
 0x2ae   :  { %6978 = vmatprep.subr.bf16.mxu1 %v7610_v18  ;;  %7000 = vmatprep.subr.bf16.mxu0 %v7611_v23  ;;  %v7639_v34 = vld [vmem:[#allocation2 + $0x470] sm:$0xff]   ;;  %v9016_v18 = vpack.c.bf16 %v2617_v42, %v2617_v42 }
 0x2af   :  { %v7640_v23 = vld [vmem:[#allocation2 + $0x3b0] sm:$0xff]  }
 0x2b1   :  { %6979 = vmatpush3.bf16.msra.mxu1 %v7612_v30  ;;  %7001 = vmatpush3.bf16.msra.mxu0 %v7613_v25  ;;  %v7641_v30 = vld [vmem:[#allocation2 + $0x430] sm:$0xff]   ;;  %v7642_v25 = vld [vmem:[#allocation2 + $0x3e8] sm:$0xff]  }
 0x2b2   :  { %6980 = vmatprep.subr.bf16.mxu1 %v7614_v26  ;;  %7002 = vmatprep.subr.bf16.mxu0 %v7615_v43  ;;  %v7643_v26 = vld [vmem:[#allocation2 + $0x468] sm:$0xff]  }
 0x2b3   :  { %v7644_v43 = vld [vmem:[#allocation2 + $0x3a8] sm:$0xff]  }
 0x2b5   :  { %6981 = vmatpush3.bf16.msra.mxu1 %v7616_v47  ;;  %7003 = vmatpush3.bf16.msra.mxu0 %v7617_v48  ;;  %v7645_v47 = vld [vmem:[#allocation2 + $0x428] sm:$0xff]   ;;  %v7646_v48 = vld [vmem:[#allocation2 + $0x3e0] sm:$0xff]  }
 0x2b6   :  { %6982 = vmatprep.subr.bf16.mxu1 %v7618_v49  ;;  %7004 = vmatprep.subr.bf16.mxu0 %v7619_v52  ;;  %v7648_v49 = vld [vmem:[#allocation2 + $0x3a0] sm:$0xff]  }
 0x2b7   :  { %v7649_v52 = vld [vmem:[#allocation2 + $0x420] sm:$0xff]  }
 0x2b9   :  { %6983 = vmatpush3.bf16.msra.mxu1 %v7620_v53  ;;  %7005 = vmatpush3.bf16.msra.mxu0 %v7621_v54  ;;  %v7650_v53 = vld [vmem:[#allocation2 + $0x3d8] sm:$0xff]  }
 0x2ba   :  { %6984 = vmatprep.subr.bf16.mxu1 %v7622_v56  ;;  %7006 = vmatprep.subr.bf16.mxu0 %v7623_v58  ;;  %v7651_v54 = vld [vmem:[#allocation2 + $0x458] sm:$0xff]  }
 0x2bb   :  { %v7652_v56 = vld [vmem:[#allocation2 + $0x398] sm:$0xff]  }
 0x2bc   :  { %v7653_v58 = vld [vmem:[#allocation2 + $0x418] sm:$0xff]  }
 0x2bd   :  { %6985 = vmatpush3.bf16.msra.mxu1 %v7624_v59  ;;  %7007 = vmatpush3.bf16.msra.mxu0 %v7625_v61  ;;  %v7654_v59 = vld [vmem:[#allocation2 + $0x3d0] sm:$0xff]  }
 0x2be   :  { %v9009_v20 = vpop.f32.mrf.mxu1  ;;  %6986 = vmatprep.subr.bf16.mxu1 %v7626_v2  ;;  %7008 = vmatprep.subr.bf16.mxu0 %v7627_v10  ;;  %v7655_v61 = vld [vmem:[#allocation2 + $0x450] sm:$0xff]   ;;  %v941_v2 = vrot.slane %v8972_v62, %v8936_v50 }
 0x2bf   :  { %v7657_v10 = vld [vmem:[#allocation2 + $0x410] sm:$0xff]  }
 0x2c0   :  { %v2227_v29 = vpop.f32.mrf.mxu1  ;;  %v2226_v11 = vadd.f32 %v9009_v20, %v941_v2  ;;  %v7688_v2 = vld [vmem:[#allocation2 + $0x490] sm:$0xff]  }
 0x2c1   :  { %v2228_v31 = vadd.f32 %v2227_v29, %v945_v4  ;;  %6987 = vmatpush3.bf16.msra.mxu1 %v7628_v5  ;;  %7009 = vmatpush3.bf16.msra.mxu0 %v7629_v7  ;;  %v949_v4 = vrot.slane %v8972_v62, %v8943_v0  ;;  %v7659_v5 = vld [vmem:[#allocation2 + $0x448] sm:$0xff]   ;;  %v961_v7 = vrot.slane %v8972_v62, %v8967_v60 }
 0x2c2   :  { %v2229_v36 = vpop.f32.mrf.mxu1  ;;  %6988 = vmatprep.subr.bf16.mxu1 %v7630_v12  ;;  %7010 = vmatprep.subr.bf16.mxu0 %v7631_v13  ;;  %v2527_v12 = vrot.slane %v8987_v8, %v8936_v50  ;;  %v2535_v29 = vrot.slane %v8987_v8, %v8943_v0 }
 0x2c3   :  { %v2615_v39 = vadd.f32 %v2531_v24, %v2228_v31  ;;  %v7661_v24 = vld [vmem:[#allocation2 + $0x408] sm:$0xff]   ;;  %v2267_v27 = vadd.f32 %v8928_v35, %v949_v4  ;;  %v2547_v31 = vrot.slane %v8987_v8, %v8967_v60 }
 0x2c4   :  { %v2230_v40 = vpop.f32.mrf.mxu1  ;;  %v2614_v36 = vadd.f32 %v2527_v12, %v2226_v11  ;;  %v7690_v4 = vld [vmem:[#allocation2 + $0x4c8] sm:$0xff]  }
 0x2c5   :  { %v2639_v45 = vpack.c.bf16 %v2615_v39, %v2615_v39  ;;  %6989 = vmatpush3.bf16.msra.mxu1 %v7632_v37  ;;  %7011 = vmatpush3.bf16.msra.mxu0 %v7633_v32  ;;  %v7663_v37 = vld [vmem:[#allocation2 + $0x440] sm:$0xff]   ;;  %v7666_v39 = vld [vmem:[#allocation2 + $0x4f8] sm:$0xff]   ;;  %v2616_v42 = vadd.f32 %v2535_v29, %v2267_v27  ;;  %v7692_v11 = vld [vmem:[#allocation2 + $0x488] sm:$0xff]  }
 0x2c6   :  { %7018 = vmatprep.subr.bf16.mxu1 %v7634_v38  ;;  %7040 = vmatprep.subr.bf16.mxu0 %v7635_v28  ;;  %v7665_v28 = vld [vmem:[#allocation2 + $0x400] sm:$0xff]   ;;  %v7667_v40 = vld [vmem:[#allocation2 + $0x578] sm:$0xff]  }
 0x2c7   :  { %v7694_v27 = vld [vmem:[#allocation2 + $0x4c0] sm:$0xff]  }
 0x2c8   :  { %4029 = vmatmul.mubr.bf16.vlgmr.msra.gmra.mxu1 %v8996_v44  ;;  %4261 = vmatmul.mubr.bf16.vlgmr.msra.gmra.mxu0 %v2636_v46  ;;  %v7647_v44 = vld [vmem:[#allocation2 + $0x460] sm:$0xff]   ;;  %v2638_v46 = vpack.c.bf16 %v2614_v36, %v2614_v36 }
 0x2c9   :  { %7019 = vmatpush3.bf16.msra.mxu1 %v7636_v41  ;;  %4300 = vmatprep.mubr.bf16.mxu1 %v2639_v45  ;;  %v7668_v41 = vld [vmem:[#allocation2 + $0x4b8] sm:$0xff]   ;;  %v7695_v29 = vld [vmem:[#allocation2 + $0x540] sm:$0xff]  }
 0x2ca   :  { %7041 = vmatpush3.bf16.msra.mxu0 %v7637_v16  ;;  %4532 = vmatprep.mubr.bf16.mxu0 %v9016_v18  ;;  %v7697_v36 = vld [vmem:[#allocation2 + $0x500] sm:$0xff]  }
 0x2cb   :  { %7020 = vmatprep.subr.bf16.mxu1 %v7638_v17  ;;  %7042 = vmatprep.subr.bf16.mxu0 %v7639_v34  ;;  %v7669_v17 = vld [vmem:[#allocation2 + $0x538] sm:$0xff]   ;;  %v9038_v34 = vpack.c.bf16 %v2616_v42, %v2616_v42 }
 0x2cd   :  { %7021 = vmatpush3.bf16.msra.mxu1 %v7640_v23  ;;  %v7670_v23 = vld [vmem:[#allocation2 + $0x4f0] sm:$0xff]  }
 0x2ce   :  { %7043 = vmatpush3.bf16.msra.mxu0 %v7641_v30  ;;  %7022 = vmatprep.subr.bf16.mxu1 %v7642_v25  ;;  %v7671_v30 = vld [vmem:[#allocation2 + $0x570] sm:$0xff]  }
 0x2cf   :  { %7044 = vmatprep.subr.bf16.mxu0 %v7643_v26  ;;  %v7672_v25 = vld [vmem:[#allocation2 + $0x4b0] sm:$0xff]  }
 0x2d0   :  { %v7673_v26 = vld [vmem:[#allocation2 + $0x530] sm:$0xff]  }
 0x2d1   :  { %7023 = vmatpush3.bf16.msra.mxu1 %v7644_v43  ;;  %v7674_v43 = vld [vmem:[#allocation2 + $0x4e8] sm:$0xff]  }
 0x2d2   :  { %7045 = vmatpush3.bf16.msra.mxu0 %v7645_v47  ;;  %7024 = vmatprep.subr.bf16.mxu1 %v7646_v48  ;;  %v7675_v47 = vld [vmem:[#allocation2 + $0x568] sm:$0xff]  }
 0x2d3   :  { %7046 = vmatprep.subr.bf16.mxu0 %v7647_v44  ;;  %v7676_v48 = vld [vmem:[#allocation2 + $0x4a8] sm:$0xff]  }
 0x2d4   :  { %v7677_v44 = vld [vmem:[#allocation2 + $0x528] sm:$0xff]  }
 0x2d5   :  { %7025 = vmatpush3.bf16.msra.mxu1 %v7648_v49  ;;  %v7678_v49 = vld [vmem:[#allocation2 + $0x4e0] sm:$0xff]  }
 0x2d6   :  { %7047 = vmatpush3.bf16.msra.mxu0 %v7649_v52  ;;  %7026 = vmatprep.subr.bf16.mxu1 %v7650_v53  ;;  %v7679_v52 = vld [vmem:[#allocation2 + $0x560] sm:$0xff]  }
 0x2d7   :  { %7048 = vmatprep.subr.bf16.mxu0 %v7651_v54  ;;  %v7680_v53 = vld [vmem:[#allocation2 + $0x4a0] sm:$0xff]  }
 0x2d8   :  { %v7681_v54 = vld [vmem:[#allocation2 + $0x520] sm:$0xff]  }
 0x2d9   :  { %7027 = vmatpush3.bf16.msra.mxu1 %v7652_v56  ;;  %v7682_v56 = vld [vmem:[#allocation2 + $0x4d8] sm:$0xff]  }
 0x2da   :  { %7049 = vmatpush3.bf16.msra.mxu0 %v7653_v58  ;;  %7028 = vmatprep.subr.bf16.mxu1 %v7654_v59  ;;  %v7683_v58 = vld [vmem:[#allocation2 + $0x558] sm:$0xff]  }
 0x2db   :  { %7050 = vmatprep.subr.bf16.mxu0 %v7655_v61  ;;  %v7685_v59 = vld [vmem:[#allocation2 + $0x518] sm:$0xff]   ;;  %v7686_v61 = vld [vmem:[#allocation2 + $0x4d0] sm:$0xff]  }
 0x2dd   :  { %7029 = vmatpush3.bf16.msra.mxu1 %v7656_v63  ;;  %v7687_v63 = vld [vmem:[#allocation2 + $0x550] sm:$0xff]  }
 0x2de   :  { %7051 = vmatpush3.bf16.msra.mxu0 %v7657_v10  ;;  %v9029_v13 = vpop.f32.mrf.mxu1  ;;  %7030 = vmatprep.subr.bf16.mxu1 %v7658_v3  ;;  %v957_v10 = vrot.slane %v8972_v62, %v8964_v55  ;;  %v7689_v3 = vld [vmem:[#allocation2 + $0x510] sm:$0xff]   ;;  %v2543_v62 = vrot.slane %v8987_v8, %v8964_v55 }
 0x2df   :  { %7052 = vmatprep.subr.bf16.mxu0 %v7659_v5  ;;  %v7691_v5 = vld [vmem:[#allocation2 + $0x548] sm:$0xff]  }
 0x2e0   :  { %v2309_v20 = vpop.f32.mrf.mxu1  ;;  %v2308_v12 = vadd.f32 %v9029_v13, %v957_v10 }
 0x2e1   :  { %v2310_v32 = vadd.f32 %v2309_v20, %v961_v7  ;;  %7031 = vmatpush3.bf16.msra.mxu1 %v7660_v9  ;;  %v9048_v7 = vld [vmem:[%s9285_s4 + $0x10] sm:$0xff]  ;;  %v7696_v20 = vld [vmem:[#allocation2 + $0x480] sm:$0xff]  }
 0x2e2   :  { %7053 = vmatpush3.bf16.msra.mxu0 %v7661_v24  ;;  %v2311_v38 = vpop.f32.mrf.mxu1  ;;  %7032 = vmatprep.subr.bf16.mxu1 %v7662_v51  ;;  %v969_v9 = vrot.slane %v9048_v7, %v8860_v21  ;;  %v7693_v51 = vld [vmem:[#allocation2 + $0x508] sm:$0xff]   ;;  %v965_v10 = vrot.slane %v9048_v7, %v8852_v15 }
 0x2e3   :  { %v2619_v35 = vadd.f32 %v2547_v31, %v2310_v32  ;;  %7054 = vmatprep.subr.bf16.mxu0 %v7663_v37  ;;  %v9060_v31 = vld [vmem:[%s9286_s5 + $0x10] sm:$0xff]  ;;  %v2618_v32 = vadd.f32 %v2543_v62, %v2308_v12  ;;  %v7698_v38 = vld [vmem:[#allocation2 + $0x5f8] sm:$0xff]   ;;  %v7725_v12 = vld [vmem:[#allocation2 + $0x608] sm:$0xff]  }
 0x2e4   :  { %v2312_v45 = vpop.f32.mrf.mxu1  ;;  %v2351_v13 = vadd.f32 %v8958_v14, %v969_v9  ;;  %v2555_v8 = vrot.slane %v9060_v31, %v8860_v21  ;;  %v7701_v14 = vld [vmem:[#allocation2 + $0x638] sm:$0xff]   ;;  %v7702_v21 = vld [vmem:[#allocation2 + $0x5f0] sm:$0xff]   ;;  %v7724_v9 = vld [vmem:[#allocation2 + $0x588] sm:$0xff]  }
 0x2e5   :  { %7033 = vmatpush3.bf16.msra.mxu1 %v7664_v33  ;;  %v9036_v16 = vpack.c.bf16 %v2619_v35, %v2619_v35  ;;  %v7700_v35 = vld [vmem:[#allocation2 + $0x5b8] sm:$0xff]   ;;  %v7726_v62 = vld [vmem:[#allocation2 + $0x5c0] sm:$0xff]  }
 0x2e6   :  { %7055 = vmatpush3.bf16.msra.mxu0 %v7665_v28  ;;  %7062 = vmatprep.subr.bf16.mxu1 %v7666_v39  ;;  %v7699_v28 = vld [vmem:[#allocation2 + $0x678] sm:$0xff]   ;;  %v2621_v42 = vadd.f32 %v2555_v8, %v2351_v13  ;;  %v2563_v8 = vrot.slane %v9060_v31, %v8924_v22 }
 0x2e7   :  { %7084 = vmatprep.subr.bf16.mxu0 %v7667_v40  ;;  %v9067_v40 = vpack.c.bf16 %v2618_v32, %v2618_v32 }
 0x2e8   :  { %4301 = vmatmul.mubr.bf16.vlgmr.msra.gmra.mxu1 %v2638_v46  ;;  %v2645_v46 = vpack.c.bf16 %v2621_v42, %v2621_v42 }
 0x2e9   :  { %4533 = vmatmul.mubr.bf16.vlgmr.msra.gmra.mxu0 %v9038_v34  ;;  %7063 = vmatpush3.bf16.msra.mxu1 %v7668_v41  ;;  %v7703_v41 = vld [vmem:[#allocation2 + $0x670] sm:$0xff]  }
 0x2ea   :  { %4572 = vmatprep.mubr.bf16.mxu1 %v9036_v16  ;;  %7085 = vmatpush3.bf16.msra.mxu0 %v7669_v17  ;;  %v7704_v17 = vld [vmem:[#allocation2 + $0x5b0] sm:$0xff]  }
 0x2eb   :  { %4804 = vmatprep.mubr.bf16.mxu0 %v9016_v18  ;;  %7064 = vmatprep.subr.bf16.mxu1 %v7670_v23  ;;  %v7684_v18 = vld [vmem:[#allocation2 + $0x498] sm:$0xff]  }
 0x2ec   :  { %7086 = vmatprep.subr.bf16.mxu0 %v7671_v30  ;;  %v7705_v30 = vld [vmem:[#allocation2 + $0x630] sm:$0xff]  }
 0x2ed   :  { %7065 = vmatpush3.bf16.msra.mxu1 %v7672_v25  ;;  %v7706_v25 = vld [vmem:[#allocation2 + $0x5e8] sm:$0xff]  }
 0x2ee   :  { %7087 = vmatpush3.bf16.msra.mxu0 %v7673_v26  ;;  %7066 = vmatprep.subr.bf16.mxu1 %v7674_v43  ;;  %v7707_v26 = vld [vmem:[#allocation2 + $0x668] sm:$0xff]  }
 0x2ef   :  { %7088 = vmatprep.subr.bf16.mxu0 %v7675_v47  ;;  %v7708_v47 = vld [vmem:[#allocation2 + $0x5a8] sm:$0xff]  }
 0x2f1   :  { %7067 = vmatpush3.bf16.msra.mxu1 %v7676_v48 }
 0x2f2   :  { %7089 = vmatpush3.bf16.msra.mxu0 %v7677_v44  ;;  %7068 = vmatprep.subr.bf16.mxu1 %v7678_v49  ;;  %v7710_v44 = vld [vmem:[#allocation2 + $0x5e0] sm:$0xff]  }
 0x2f3   :  { %7090 = vmatprep.subr.bf16.mxu0 %v7679_v52  ;;  %v7711_v49 = vld [vmem:[#allocation2 + $0x660] sm:$0xff]  }
 0x2f4   :  { %v7713_v52 = vld [vmem:[#allocation2 + $0x620] sm:$0xff]  }
 0x2f5   :  { %7069 = vmatpush3.bf16.msra.mxu1 %v7680_v53  ;;  %v7714_v53 = vld [vmem:[#allocation2 + $0x5d8] sm:$0xff]  }
 0x2f6   :  { %7091 = vmatpush3.bf16.msra.mxu0 %v7681_v54  ;;  %7070 = vmatprep.subr.bf16.mxu1 %v7682_v56  ;;  %v7715_v54 = vld [vmem:[#allocation2 + $0x658] sm:$0xff]  }
 0x2f7   :  { %7092 = vmatprep.subr.bf16.mxu0 %v7683_v58  ;;  %v7716_v56 = vld [vmem:[#allocation2 + $0x598] sm:$0xff]  }
 0x2f8   :  { %v7717_v58 = vld [vmem:[#allocation2 + $0x618] sm:$0xff]  }
 0x2f9   :  { %7071 = vmatpush3.bf16.msra.mxu1 %v7684_v18  ;;  %v7718_v18 = vld [vmem:[#allocation2 + $0x5d0] sm:$0xff]  }
 0x2fa   :  { %7093 = vmatpush3.bf16.msra.mxu0 %v7685_v59  ;;  %7072 = vmatprep.subr.bf16.mxu1 %v7686_v61  ;;  %v7719_v59 = vld [vmem:[#allocation2 + $0x650] sm:$0xff]  }
 0x2fb   :  { %7094 = vmatprep.subr.bf16.mxu0 %v7687_v63  ;;  %v7720_v61 = vld [vmem:[#allocation2 + $0x590] sm:$0xff]  }
 0x2fc   :  { %v7721_v63 = vld [vmem:[#allocation2 + $0x610] sm:$0xff]  }
 0x2fd   :  { %7073 = vmatpush3.bf16.msra.mxu1 %v7688_v2  ;;  %v7722_v2 = vld [vmem:[#allocation2 + $0x5c8] sm:$0xff]  }
 0x2fe   :  { %7095 = vmatpush3.bf16.msra.mxu0 %v7689_v3  ;;  %v9055_v24 = vpop.f32.mrf.mxu1  ;;  %7074 = vmatprep.subr.bf16.mxu1 %v7690_v4  ;;  %v7723_v3 = vld [vmem:[#allocation2 + $0x648] sm:$0xff]   ;;  %v977_v4 = vrot.slane %v9048_v7, %v8924_v22 }
 0x2ff   :  { %7096 = vmatprep.subr.bf16.mxu0 %v7691_v5  ;;  %v985_v5 = vrot.slane %v9048_v7, %v8946_v1 }
 0x300   :  { %v9062_v37 = vpop.f32.mrf.mxu1 }
 0x301   :  { %7075 = vmatpush3.bf16.msra.mxu1 %v7692_v11  ;;  %v2392_v13 = vadd.f32 %v9062_v37, %v977_v4  ;;  %v2433_v32 = vadd.f32 %v8994_v19, %v985_v5  ;;  %v7731_v37 = vld [vmem:[#allocation2 + $0x778] sm:$0xff]   ;;  %v7756_v4 = vld [vmem:[#allocation2 + $0x688] sm:$0xff]  }
 0x302   :  { %7097 = vmatpush3.bf16.msra.mxu0 %v7693_v51  ;;  %v2393_v33 = vpop.f32.mrf.mxu1  ;;  %7076 = vmatprep.subr.bf16.mxu1 %v7694_v27  ;;  %v2349_v51 = vadd.f32 %v8954_v57, %v965_v10  ;;  %v2551_v27 = vrot.slane %v9060_v31, %v8852_v15  ;;  %v7729_v15 = vld [vmem:[#allocation2 + $0x600] sm:$0xff]   ;;  %v7733_v19 = vld [vmem:[#allocation2 + $0x738] sm:$0xff]   ;;  %v993_v10 = vrot.slane %v9048_v7, %v8967_v60 }
 0x303   :  { %7098 = vmatprep.subr.bf16.mxu0 %v7695_v29  ;;  %v7727_v29 = vld [vmem:[#allocation2 + $0x640] sm:$0xff]   ;;  %v2571_v33 = vrot.slane %v9060_v31, %v8946_v1  ;;  %v7734_v1 = vld [vmem:[#allocation2 + $0x6f0] sm:$0xff]  }
 0x304   :  { %v2394_v39 = vpop.f32.mrf.mxu1 }
 0x305   :  { %7077 = vmatpush3.bf16.msra.mxu1 %v7696_v20  ;;  %v2623_v39 = vadd.f32 %v2563_v8, %v2392_v13  ;;  %v2625_v22 = vadd.f32 %v2571_v33, %v2433_v32  ;;  %v7760_v33 = vld [vmem:[#allocation2 + $0x680] sm:$0xff]  }
 0x306   :  { %7099 = vmatpush3.bf16.msra.mxu0 %v7697_v36  ;;  %7106 = vmatprep.subr.bf16.mxu1 %v7698_v38  ;;  %v7728_v36 = vld [vmem:[#allocation2 + $0x580] sm:$0xff]   ;;  %v7730_v38 = vld [vmem:[#allocation2 + $0x6f8] sm:$0xff]  }
 0x307   :  { %7128 = vmatprep.subr.bf16.mxu0 %v7699_v28  ;;  %v2620_v28 = vadd.f32 %v2551_v27, %v2349_v51  ;;  %v7757_v51 = vld [vmem:[#allocation2 + $0x708] sm:$0xff]   ;;  %v7758_v27 = vld [vmem:[#allocation2 + $0x6c0] sm:$0xff]  }
 0x308   :  { %4573 = vmatmul.mubr.bf16.vlgmr.msra.gmra.mxu1 %v9067_v40  ;;  %v9070_v45 = vpop.f32.mrf.mxu0 }
 0x309   :  { %4805 = vmatmul.mubr.bf16.vlgmr.msra.gmra.mxu0 %v9038_v34  ;;  %7107 = vmatpush3.bf16.msra.mxu1 %v7700_v35  ;;  %v7709_v34 = vld [vmem:[#allocation2 + $0x628] sm:$0xff]   ;;  %v7732_v35 = vld [vmem:[#allocation2 + $0x6b8] sm:$0xff]  }
 0x30a   :  { %4844 = vmatprep.mubr.bf16.mxu1 %v9036_v16  ;;  %7129 = vmatpush3.bf16.msra.mxu0 %v7701_v14  ;;  %v9074_v23 = vpop.f32.mrf.mxu0  ;;  %v7712_v16 = vld [vmem:[#allocation2 + $0x5a0] sm:$0xff]   ;;  %v2644_v14 = vpack.c.bf16 %v2620_v28, %v2620_v28 }
 0x30b   :  { %5076 = vmatprep.mubr.bf16.mxu0 %v2645_v46  ;;  %7108 = vmatprep.subr.bf16.mxu1 %v7702_v21  ;;  %v2647_v21 = vpack.c.bf16 %v2623_v39, %v2623_v39  ;;  %v2649_v46 = vpack.c.bf16 %v2625_v22, %v2625_v22  ;;  %v7764_v39 = vld [vmem:[#allocation4 + $0x38] sm:$0xff]   ;;  %v7907_v22 = vmov 0.0  }
 0x30c   :  { %7130 = vmatprep.subr.bf16.mxu0 %v7703_v41  ;;  %v6883_v43 = vpop.f32.mrf.mxu0  ;;  %v7735_v41 = vld [vmem:[#allocation2 + $0x770] sm:$0xff]  }
 0x30d   :  { %7109 = vmatpush3.bf16.msra.mxu1 %v7704_v17  ;;  %v7736_v17 = vld [vmem:[#allocation2 + $0x6b0] sm:$0xff]   ;;  %v7740_v43 = vld [vmem:[#allocation2 + $0x6a8] sm:$0xff]  }
 0x30e   :  { %7131 = vmatpush3.bf16.msra.mxu0 %v7705_v30  ;;  %v6884_v48 = vpop.f32.mrf.mxu0  ;;  %7110 = vmatprep.subr.bf16.mxu1 %v7706_v25  ;;  %v7737_v30 = vld [vmem:[#allocation2 + $0x730] sm:$0xff]   ;;  %v7738_v25 = vld [vmem:[#allocation2 + $0x6e8] sm:$0xff]  }
 0x30f   :  { %7132 = vmatprep.subr.bf16.mxu0 %v7707_v26  ;;  %v7739_v26 = vld [vmem:[#allocation2 + $0x768] sm:$0xff]   ;;  %v7742_v48 = vld [vmem:[#allocation2 + $0x6e0] sm:$0xff]  }
 0x311   :  { %7111 = vmatpush3.bf16.msra.mxu1 %v7708_v47  ;;  %v7741_v47 = vld [vmem:[#allocation2 + $0x728] sm:$0xff]  }
 0x312   :  { %7133 = vmatpush3.bf16.msra.mxu0 %v7709_v34  ;;  %7112 = vmatprep.subr.bf16.mxu1 %v7710_v44  ;;  %v7744_v34 = vld [vmem:[#allocation2 + $0x6a0] sm:$0xff]  }
 0x313   :  { %7134 = vmatprep.subr.bf16.mxu0 %v7711_v49  ;;  %v7745_v44 = vld [vmem:[#allocation2 + $0x720] sm:$0xff]   ;;  %v7746_v49 = vld [vmem:[#allocation2 + $0x6d8] sm:$0xff]  }
 0x315   :  { %7113 = vmatpush3.bf16.msra.mxu1 %v7712_v16  ;;  %v7747_v16 = vld [vmem:[#allocation2 + $0x758] sm:$0xff]  }
 0x316   :  { %7135 = vmatpush3.bf16.msra.mxu0 %v7713_v52  ;;  %7114 = vmatprep.subr.bf16.mxu1 %v7714_v53  ;;  %v7748_v52 = vld [vmem:[#allocation2 + $0x698] sm:$0xff]  }
 0x317   :  { %7136 = vmatprep.subr.bf16.mxu0 %v7715_v54  ;;  %v7749_v53 = vld [vmem:[#allocation2 + $0x718] sm:$0xff]   ;;  %v7750_v54 = vld [vmem:[#allocation2 + $0x6d0] sm:$0xff]  }
 0x319   :  { %7115 = vmatpush3.bf16.msra.mxu1 %v7716_v56  ;;  %v7751_v56 = vld [vmem:[#allocation2 + $0x750] sm:$0xff]  }
 0x31a   :  { %7137 = vmatpush3.bf16.msra.mxu0 %v7717_v58  ;;  %7116 = vmatprep.subr.bf16.mxu1 %v7718_v18  ;;  %v7752_v58 = vld [vmem:[#allocation2 + $0x690] sm:$0xff]   ;;  %v973_v18 = vrot.slane %v9048_v7, %v8936_v50 }
 0x31b   :  { %7138 = vmatprep.subr.bf16.mxu0 %v7719_v59  ;;  %v7753_v59 = vld [vmem:[#allocation2 + $0x710] sm:$0xff]  }
 0x31c   :  { %v2390_v5 = vadd.f32 %v9055_v24, %v973_v18  ;;  %v2575_v18 = vrot.slane %v9060_v31, %v8964_v55 }
 0x31d   :  { %7117 = vmatpush3.bf16.msra.mxu1 %v7720_v61  ;;  %v7754_v61 = vld [vmem:[#allocation2 + $0x6c8] sm:$0xff]  }
 0x31e   :  { %7139 = vmatpush3.bf16.msra.mxu0 %v7721_v63  ;;  %v9082_v11 = vpop.f32.mrf.mxu1  ;;  %7118 = vmatprep.subr.bf16.mxu1 %v7722_v2  ;;  %v981_v63 = vrot.slane %v9048_v7, %v8943_v0  ;;  %v7755_v2 = vld [vmem:[#allocation2 + $0x748] sm:$0xff]  }
 0x31f   :  { %7140 = vmatprep.subr.bf16.mxu0 %v7723_v3  ;;  %v6882_v3 = vadd.f32 %v9074_v23, %v9070_v45  ;;  %v2567_v45 = vrot.slane %v9060_v31, %v8943_v0  ;;  %v7759_v23 = vld [vmem:[#allocation2 + $0x740] sm:$0xff]  }
 0x320   :  { %v9090_v20 = vpop.f32.mrf.mxu1 }
 0x321   :  { %7119 = vmatpush3.bf16.msra.mxu1 %v7724_v9  ;;  %v2559_v9 = vrot.slane %v9060_v31, %v8936_v50  ;;  %v2474_v24 = vadd.f32 %v9090_v20, %v993_v10  ;;  %v2579_v50 = vrot.slane %v9060_v31, %v8967_v60  ;;  %v7763_v60 = vld [vmem:[#allocation2 + $0x7b8] sm:$0xff]  }
 0x322   :  { %7141 = vmatpush3.bf16.msra.mxu0 %v7725_v12  ;;  %v2475_v57 = vpop.f32.mrf.mxu1  ;;  %7120 = vmatprep.subr.bf16.mxu1 %v7726_v62  ;;  %v6503_v12 = vld [vmem:[%s9288_s7] ss:$0 sm:$0xff]  ;;  %v7789_v31 = vld [vmem:[#allocation4 + $0xb8] sm:$0xff]  }
 0x323   :  { %7142 = vmatprep.subr.bf16.mxu0 %v7727_v29  ;;  %v2431_v29 = vadd.f32 %v8982_v6, %v981_v63  ;;  %v3447_v8 = vadd.f32 %v6882_v3, %v6503_v12  ;;  %v7761_v6 = vld [vmem:[#allocation2 + $0x700] sm:$0xff]   ;;  %v2627_v28 = vadd.f32 %v2579_v50, %v2474_v24 }
 0x324   :  { %v2476_v42 = vpop.f32.mrf.mxu1 }
 0x325   :  { %7121 = vmatpush3.bf16.msra.mxu1 %v7728_v36  ;;  %v2622_v36 = vadd.f32 %v2559_v9, %v2390_v5  ;;  %v6504_v5 = vld [vmem:[%s9288_s7 + $0x1] ss:$0 sm:$0xff] }
 0x326   :  { %7143 = vmatpush3.bf16.msra.mxu0 %v7729_v15  ;;  %7150 = vmatprep.subr.bf16.mxu1 %v7730_v38  ;;  %v7762_v15 = vld [vmem:[#allocation2 + $0x7f8] sm:$0xff]   ;;  %v2624_v38 = vadd.f32 %v2567_v45, %v2431_v29  ;;  %v7791_v29 = vld [vmem:[#allocation4 + $0xb0] sm:$0xff]  }
 0x327   :  { %7172 = vmatprep.subr.bf16.mxu0 %v7731_v37  ;;  %v2646_v37 = vpack.c.bf16 %v2622_v36, %v2622_v36  ;;  %v7793_v36 = vld [vmem:[#allocation4 + $0xa8] sm:$0xff]  }
 0x328   :  { %4845 = vmatmul.mubr.bf16.vlgmr.msra.gmra.mxu1 %v9067_v40  ;;  %v7743_v40 = vld [vmem:[#allocation2 + $0x760] sm:$0xff]   ;;  %v2648_v42 = vpack.c.bf16 %v2624_v38, %v2624_v38  ;;  %v7797_v38 = vld [vmem:[#allocation4 + $0x98] sm:$0xff]  }
 0x329   :  { %5077 = vmatmul.mubr.bf16.vlgmr.msra.gmra.mxu0 %v2644_v14  ;;  %7151 = vmatpush3.bf16.msra.mxu1 %v7732_v35  ;;  %v7765_v35 = vld [vmem:[#allocation2 + $0x7f0] sm:$0xff]  }
 0x32a   :  { %5116 = vmatprep.mubr.bf16.mxu1 %v2647_v21  ;;  %7173 = vmatpush3.bf16.msra.mxu0 %v7733_v19  ;;  %v2651_v19 = vpack.c.bf16 %v2627_v28, %v2627_v28  ;;  %v7799_v28 = vld [vmem:[#allocation4 + $0x90] sm:$0xff]  }
 0x32b   :  { %5348 = vmatprep.mubr.bf16.mxu0 %v2649_v46  ;;  %7152 = vmatprep.subr.bf16.mxu1 %v7734_v1  ;;  %v7766_v1 = vld [vmem:[#allocation2 + $0x7b0] sm:$0xff]   ;;  %v7768_v46 = vld [vmem:[#allocation2 + $0x7e8] sm:$0xff]  }
 0x32c   :  { %7174 = vmatprep.subr.bf16.mxu0 %v7735_v41  ;;  %v7767_v41 = vld [vmem:[#allocation4 + $0x30] sm:$0xff]  }
 0x32d   :  { %7153 = vmatpush3.bf16.msra.mxu1 %v7736_v17 }
 0x32e   :  { %7175 = vmatpush3.bf16.msra.mxu0 %v7737_v30  ;;  %7154 = vmatprep.subr.bf16.mxu1 %v7738_v25  ;;  %v7769_v30 = vld [vmem:[#allocation2 + $0x7a8] sm:$0xff]  }
 0x32f   :  { %7176 = vmatprep.subr.bf16.mxu0 %v7739_v26  ;;  %v7770_v26 = vld [vmem:[#allocation4 + $0x28] sm:$0xff]  }
 0x331   :  { %7155 = vmatpush3.bf16.msra.mxu1 %v7740_v43  ;;  %v7771_v43 = vld [vmem:[#allocation2 + $0x7e0] sm:$0xff]  }
 0x332   :  { %7177 = vmatpush3.bf16.msra.mxu0 %v7741_v47  ;;  %7156 = vmatprep.subr.bf16.mxu1 %v7742_v48  ;;  %v7772_v47 = vld [vmem:[#allocation2 + $0x7a0] sm:$0xff]  }
 0x333   :  { %7178 = vmatprep.subr.bf16.mxu0 %v7743_v40  ;;  %v7773_v48 = vld [vmem:[#allocation4 + $0x20] sm:$0xff]   ;;  %v7774_v40 = vld [vmem:[#allocation2 + $0x7d8] sm:$0xff]  }
 0x335   :  { %7157 = vmatpush3.bf16.msra.mxu1 %v7744_v34  ;;  %v7775_v34 = vld [vmem:[#allocation2 + $0x798] sm:$0xff]  }
 0x336   :  { %7179 = vmatpush3.bf16.msra.mxu0 %v7745_v44  ;;  %7158 = vmatprep.subr.bf16.mxu1 %v7746_v49  ;;  %v7776_v44 = vld [vmem:[#allocation4 + $0x18] sm:$0xff]   ;;  %v7777_v49 = vld [vmem:[#allocation2 + $0x7d0] sm:$0xff]  }
 0x337   :  { %7180 = vmatprep.subr.bf16.mxu0 %v7747_v16  ;;  %v7778_v16 = vld [vmem:[#allocation2 + $0x790] sm:$0xff]  }
 0x339   :  { %7159 = vmatpush3.bf16.msra.mxu1 %v7748_v52  ;;  %v989_v52 = vrot.slane %v9048_v7, %v8964_v55  ;;  %v7784_v7 = vld [vmem:[#allocation2 + $0x780] sm:$0xff]  }
 0x33a   :  { %7181 = vmatpush3.bf16.msra.mxu0 %v7749_v53  ;;  %7160 = vmatprep.subr.bf16.mxu1 %v7750_v54  ;;  %v7779_v53 = vld [vmem:[#allocation4 + $0x10] sm:$0xff]   ;;  %v7780_v54 = vld [vmem:[#allocation2 + $0x7c8] sm:$0xff]  }
 0x33b   :  { %7182 = vmatprep.subr.bf16.mxu0 %v7751_v56  ;;  %v7781_v56 = vld [vmem:[#allocation2 + $0x788] sm:$0xff]  }
 0x33d   :  { %7161 = vmatpush3.bf16.msra.mxu1 %v7752_v58  ;;  %v2472_v58 = vadd.f32 %v9082_v11, %v989_v52  ;;  %v7786_v11 = vld [vmem:[#allocation4 + $0x78] sm:$0xff]  }
 0x33e   :  { %7183 = vmatpush3.bf16.msra.mxu0 %v7753_v59  ;;  %v6902_v62 = vpop.f32.mrf.mxu1  ;;  %7162 = vmatprep.subr.bf16.mxu1 %v7754_v61  ;;  %v7782_v59 = vld [vmem:[#allocation4 + $0x8] sm:$0xff]   ;;  %v7783_v61 = vld [vmem:[#allocation2 + $0x7c0] sm:$0xff]  }
 0x33f   :  { %7184 = vmatprep.subr.bf16.mxu0 %v7755_v2  ;;  %v2626_v63 = vadd.f32 %v2575_v18, %v2472_v58  ;;  %v7785_v2 = vld [vmem:[#allocation4] sm:$0xff]   ;;  %v7812_v58 = vld [vmem:[#allocation4 + $0x128] sm:$0xff]   ;;  %v7807_v18 = vld [vmem:[#allocation4 + $0xd0] sm:$0xff]  }
 0x340   :  { %v6903_v13 = vpop.f32.mrf.mxu1 }
 0x341   :  { %v6904_v32 = vadd.f32 %v6903_v13, %v6902_v62  ;;  %7163 = vmatpush3.bf16.msra.mxu1 %v7756_v4  ;;  %v2650_v55 = vpack.c.bf16 %v2626_v63, %v2626_v63  ;;  %v7787_v62 = vld [vmem:[#allocation4 + $0x70] sm:$0xff]   ;;  %v7809_v63 = vld [vmem:[#allocation4 + $0xc0] sm:$0xff]  }
 0x342   :  { %7185 = vmatpush3.bf16.msra.mxu0 %v7757_v51  ;;  %v6905_v57 = vpop.f32.mrf.mxu1  ;;  %7164 = vmatprep.subr.bf16.mxu1 %v7758_v27 }
 0x343   :  { %v9116_v0 = vadd.f32 %v6904_v32, %v3447_v8  ;;  %7186 = vmatprep.subr.bf16.mxu0 %v7759_v23  ;;  %v7788_v8 = vld [vmem:[#allocation4 + $0x68] sm:$0xff]   ;;  %v7790_v57 = vld [vmem:[#allocation4 + $0x60] sm:$0xff]  }
 0x344   :  { %v6906_v20 = vpop.f32.mrf.mxu1 }
 0x345   :  { %5396 = vst [vmem:[%s9290_s9] sm:$0x3] %v9116_v0  ;;  %7165 = vmatpush3.bf16.msra.mxu1 %v7760_v33  ;;  %v5404_v10 = vmul.f32 %v9116_v0, %v9116_v0  ;;  %v7794_v0 = vld [vmem:[#allocation4 + $0x50] sm:$0xff]   ;;  %v7796_v20 = vld [vmem:[#allocation4 + $0x48] sm:$0xff]  }
 0x346   :  { %7187 = vmatpush3.bf16.msra.mxu0 %v7761_v6  ;;  %7194 = vmatprep.subr.bf16.mxu1 %v7762_v15  ;;  %v7795_v6 = vld [vmem:[#allocation4 + $0xa0] sm:$0xff]   ;;  %v7792_v15 = vld [vmem:[#allocation4 + $0x58] sm:$0xff]  }
 0x347   :  { %7354 = vmatprep.subr.bf16.mxu0 %v7907_v22  ;;  %v5412_v3 = vpack.c.bf16 %v5404_v10, %v5404_v10 }
 0x348   :  { %5117 = vmatmul.mubr.bf16.vlgmr.msra.gmra.mxu1 %v2646_v37  ;;  %v9123_v14 = vpop.f32.mrf.mxu0  ;;  %v7798_v37 = vld [vmem:[#allocation4 + $0x40] sm:$0xff]  }
 0x349   :  { %5349 = vmatmul.mubr.bf16.vlgmr.msra.gmra.mxu0 %v2648_v42  ;;  %7195 = vmatpush3.bf16.msra.mxu1 %v7763_v60  ;;  %v7800_v60 = vld [vmem:[#allocation4 + $0x88] sm:$0xff]   ;;  %v7801_v42 = vld [vmem:[#allocation4 + $0x80] sm:$0xff]  }
 0x34a   :  { %5388 = vmatprep.mubr.bf16.mxu1 %v2651_v19  ;;  %7355 = vmatpush3.bf16.msra.mxu0 %v7764_v39  ;;  %v6925_v21 = vpop.f32.mrf.mxu0 }
 0x34b   :  { %7196 = vmatprep.subr.bf16.mxu1 %v7765_v35  ;;  %7356 = vmatprep.subr.bf16.mxu0 %v7907_v22  ;;  %v6926_v4 = vadd.f32 %v6925_v21, %v9123_v14  ;;  %v7802_v35 = vld [vmem:[#allocation4 + $0xf8] sm:$0xff]  }
 0x34c   :  { %v6927_v17 = vpop.f32.mrf.mxu0  ;;  %7370 = vmatprep.mubr.msk.bf16.mxu0 %vm7908_vm3, %v7907_v22 }
 0x34d   :  { %7197 = vmatpush3.bf16.msra.mxu1 %v7766_v1  ;;  %v3719_v45 = vadd.f32 %v6926_v4, %v6504_v5  ;;  %v6505_v1 = vld [vmem:[%s9288_s7 + $0x2] ss:$0 sm:$0xff] }
 0x34e   :  { %7357 = vmatpush3.bf16.msra.mxu0 %v7767_v41  ;;  %v6928_v25 = vpop.f32.mrf.mxu0  ;;  %7198 = vmatprep.subr.bf16.mxu1 %v7768_v46  ;;  %v7803_v46 = vld [vmem:[#allocation4 + $0xf0] sm:$0xff]  }
 0x34f   :  { %7358 = vmatprep.subr.bf16.mxu0 %v7907_v22 }
 0x351   :  { %7199 = vmatpush3.bf16.msra.mxu1 %v7769_v30 }
 0x352   :  { %7359 = vmatpush3.bf16.msra.mxu0 %v7770_v26  ;;  %7200 = vmatprep.subr.bf16.mxu1 %v7771_v43 }
 0x353   :  { %7360 = vmatprep.subr.bf16.mxu0 %v7907_v22 }
 0x355   :  { %7201 = vmatpush3.bf16.msra.mxu1 %v7772_v47 }
 0x356   :  { %7361 = vmatpush3.bf16.msra.mxu0 %v7773_v48  ;;  %7202 = vmatprep.subr.bf16.mxu1 %v7774_v40  ;;  %v7804_v40 = vld [vmem:[#allocation4 + $0xe8] sm:$0xff]  }
 0x357   :  { %7362 = vmatprep.subr.bf16.mxu0 %v7907_v22 }
 0x359   :  { %7203 = vmatpush3.bf16.msra.mxu1 %v7775_v34 }
 0x35a   :  { %7363 = vmatpush3.bf16.msra.mxu0 %v7776_v44  ;;  %7204 = vmatprep.subr.bf16.mxu1 %v7777_v49 }
 0x35b   :  { %7364 = vmatprep.subr.bf16.mxu0 %v7907_v22 }
 0x35d   :  { %7205 = vmatpush3.bf16.msra.mxu1 %v7778_v16  ;;  %v7810_v16 = vld [vmem:[#allocation4 + $0x138] sm:$0xff]  }
 0x35e   :  { %7365 = vmatpush3.bf16.msra.mxu0 %v7779_v53  ;;  %7206 = vmatprep.subr.bf16.mxu1 %v7780_v54  ;;  %v7805_v53 = vld [vmem:[#allocation4 + $0xe0] sm:$0xff]   ;;  %v7811_v54 = vld [vmem:[#allocation4 + $0x130] sm:$0xff]  }
 0x35f   :  { %7366 = vmatprep.subr.bf16.mxu0 %v7907_v22 }
 0x361   :  { %7207 = vmatpush3.bf16.msra.mxu1 %v7781_v56  ;;  %v7806_v56 = vld [vmem:[#allocation4 + $0xd8] sm:$0xff]  }
 0x362   :  { %7367 = vmatpush3.bf16.msra.mxu0 %v7782_v59  ;;  %7208 = vmatprep.subr.bf16.mxu1 %v7783_v61  ;;  %v7813_v59 = vld [vmem:[#allocation4 + $0x120] sm:$0xff]   ;;  %v7808_v61 = vld [vmem:[#allocation4 + $0xc8] sm:$0xff]  }
 0x363   :  { %7368 = vmatprep.subr.bf16.mxu0 %v7907_v22 }
 0x365   :  { %7209 = vmatpush3.bf16.msra.mxu1 %v7784_v7  ;;  %v7814_v7 = vld [vmem:[#allocation4 + $0x118] sm:$0xff]  }
 0x366   :  { %7369 = vmatpush3.bf16.msra.mxu0 %v7785_v2  ;;  %7374 = vmatprep.subr.bf16.mxu1 %v7907_v22  ;;  %v7815_v2 = vld [vmem:[#allocation4 + $0x110] sm:$0xff]  }
 0x367   :  { %7394 = vmatprep.subr.bf16.mxu0 %v7907_v22 }
 0x368   :  { %v9147_v9 = vpop.f32.mrf.mxu0  ;;  %5389 = vmatmul.mubr.bf16.vlgmr.msra.gmra.mxu1 %v2650_v55  ;;  %v6946_v12 = vpop.f32.mrf.mxu1 }
 0x369   :  { %7371 = vmatmul.mubr.bf16.vlgmr.msra.gmra.mxu0 %v5412_v3  ;;  %7375 = vmatpush3.bf16.msra.mxu1 %v7786_v11  ;;  %v6506_v11 = vld [vmem:[%s9288_s7 + $0x3] ss:$0 sm:$0xff] }
 0x36a   :  { %v6969_v51 = vpop.f32.mrf.mxu0  ;;  %v6947_v27 = vpop.f32.mrf.mxu1  ;;  %7376 = vmatprep.subr.bf16.mxu1 %v7907_v22  ;;  %7395 = vmatpush3.bf16.msra.mxu0 %v7789_v31  ;;  %v7816_v31 = vld [vmem:[#allocation4 + $0x108] sm:$0xff]  }
 0x36b   :  { %v6948_v23 = vadd.f32 %v6947_v27, %v6946_v12  ;;  %7396 = vmatprep.subr.bf16.mxu0 %v7907_v22  ;;  %7390 = vmatprep.mubr.msk.bf16.mxu1 %vm7908_vm3, %v7907_v22  ;;  %v6970_v14 = vadd.f32 %v6969_v51, %v9147_v9  ;;  %v7817_v51 = vld [vmem:[#allocation4 + $0x100] sm:$0xff]  }
 0x36c   :  { %v6971_v24 = vpop.f32.mrf.mxu0  ;;  %v6949_v50 = vpop.f32.mrf.mxu1  ;;  %7410 = vmatprep.mubr.msk.bf16.mxu0 %vm7908_vm3, %v7907_v22 }
 0x36d   :  { %v3759_v13 = vadd.f32 %v6948_v23, %v3719_v45  ;;  %7377 = vmatpush3.bf16.msra.mxu1 %v7787_v62  ;;  %v3991_v25 = vadd.f32 %v6970_v14, %v6505_v1  ;;  %v7818_v50 = vld [vmem:[#allocation4 + $0x178] sm:$0xff]  }
 0x36e   :  { %v6972_v32 = vpop.f32.mrf.mxu0  ;;  %v6950_v33 = vpop.f32.mrf.mxu1  ;;  %7378 = vmatprep.subr.bf16.mxu1 %v7907_v22  ;;  %7397 = vmatpush3.bf16.msra.mxu0 %v7791_v29 }
 0x36f   :  { %5397 = vst [vmem:[%s9290_s9 + $0x2] sm:$0x3] %v3759_v13  ;;  %7398 = vmatprep.subr.bf16.mxu0 %v7907_v22  ;;  %v5405_v39 = vmul.f32 %v3759_v13, %v3759_v13  ;;  %v7820_v32 = vld [vmem:[#allocation4 + $0x168] sm:$0xff]   ;;  %v7821_v33 = vld [vmem:[#allocation4 + $0x160] sm:$0xff]  }
 0x371   :  { %7379 = vmatpush3.bf16.msra.mxu1 %v7788_v8  ;;  %v5413_v19 = vpack.c.bf16 %v5405_v39, %v5405_v39  ;;  %v7819_v8 = vld [vmem:[#allocation4 + $0x170] sm:$0xff]  }
 0x372   :  { %7380 = vmatprep.subr.bf16.mxu1 %v7907_v22  ;;  %7399 = vmatpush3.bf16.msra.mxu0 %v7793_v36  ;;  %v7822_v36 = vld [vmem:[#allocation4 + $0x158] sm:$0xff]  }
 0x373   :  { %7400 = vmatprep.subr.bf16.mxu0 %v7907_v22 }
 0x375   :  { %7381 = vmatpush3.bf16.msra.mxu1 %v7790_v57  ;;  %v7823_v57 = vld [vmem:[#allocation4 + $0x150] sm:$0xff]  }
 0x376   :  { %7382 = vmatprep.subr.bf16.mxu1 %v7907_v22  ;;  %7401 = vmatpush3.bf16.msra.mxu0 %v7795_v6 }
 0x377   :  { %7402 = vmatprep.subr.bf16.mxu0 %v7907_v22 }
 0x379   :  { %7383 = vmatpush3.bf16.msra.mxu1 %v7792_v15  ;;  %v6507_v15 = vld [vmem:[%s9288_s7 + $0x4] ss:$0 sm:$0xff] }
 0x37a   :  { %7384 = vmatprep.subr.bf16.mxu1 %v7907_v22  ;;  %7403 = vmatpush3.bf16.msra.mxu0 %v7797_v38 }
 0x37b   :  { %7404 = vmatprep.subr.bf16.mxu0 %v7907_v22 }
 0x37d   :  { %7385 = vmatpush3.bf16.msra.mxu1 %v7794_v0  ;;  %v7824_v0 = vld [vmem:[#allocation4 + $0x148] sm:$0xff]  }
 0x37e   :  { %7386 = vmatprep.subr.bf16.mxu1 %v7907_v22  ;;  %7405 = vmatpush3.bf16.msra.mxu0 %v7799_v28 }
 0x37f   :  { %7406 = vmatprep.subr.bf16.mxu0 %v7907_v22 }
 0x381   :  { %7387 = vmatpush3.bf16.msra.mxu1 %v7796_v20 }
 0x382   :  { %7388 = vmatprep.subr.bf16.mxu1 %v7907_v22  ;;  %7407 = vmatpush3.bf16.msra.mxu0 %v7800_v60 }
 0x383   :  { %7408 = vmatprep.subr.bf16.mxu0 %v7907_v22 }
 0x385   :  { %7389 = vmatpush3.bf16.msra.mxu1 %v7798_v37 }
 0x386   :  { %7409 = vmatpush3.bf16.msra.mxu0 %v7801_v42  ;;  %7414 = vmatprep.subr.bf16.mxu1 %v7907_v22 }
 0x387   :  { %7434 = vmatprep.subr.bf16.mxu0 %v7907_v22 }
 0x388   :  { %v6990_v21 = vpop.f32.mrf.mxu1  ;;  %v7012_v41 = vpop.f32.mrf.mxu0  ;;  %7391 = vmatmul.mubr.bf16.vlgmr.msra.gmra.mxu1 %v5413_v19 }
 0x389   :  { %7415 = vmatpush3.bf16.msra.mxu1 %v7802_v35  ;;  %7430 = vmatprep.mubr.msk.bf16.mxu1 %vm7908_vm3, %v7907_v22  ;;  %v7825_v35 = vld [vmem:[#allocation4 + $0x140] sm:$0xff]  }
 0x38a   :  { %v6991_v17 = vpop.f32.mrf.mxu1  ;;  %v7013_v30 = vpop.f32.mrf.mxu0  ;;  %7416 = vmatprep.subr.bf16.mxu1 %v7907_v22 }
 0x38b   :  { %v6992_v26 = vadd.f32 %v6991_v17, %v6990_v21  ;;  %v7014_v10 = vadd.f32 %v7013_v30, %v7012_v41  ;;  %v7827_v30 = vld [vmem:[#allocation4 + $0x1b0] sm:$0xff]  }
 0x38c   :  { %v6993_v43 = vpop.f32.mrf.mxu1  ;;  %v7015_v47 = vpop.f32.mrf.mxu0 }
 0x38d   :  { %v4031_v48 = vadd.f32 %v6992_v26, %v3991_v25  ;;  %7417 = vmatpush3.bf16.msra.mxu1 %v7803_v46  ;;  %v4263_v5 = vadd.f32 %v7014_v10, %v6506_v11  ;;  %v7826_v46 = vld [vmem:[#allocation4 + $0x1b8] sm:$0xff]   ;;  %v7828_v25 = vld [vmem:[#allocation4 + $0x1a8] sm:$0xff]   ;;  %v7829_v26 = vld [vmem:[#allocation4 + $0x1a0] sm:$0xff]  }
 0x38e   :  { %v6994_v34 = vpop.f32.mrf.mxu1  ;;  %v7016_v44 = vpop.f32.mrf.mxu0  ;;  %7418 = vmatprep.subr.bf16.mxu1 %v7907_v22  ;;  %v7830_v43 = vld [vmem:[#allocation4 + $0x198] sm:$0xff]   ;;  %v7831_v47 = vld [vmem:[#allocation4 + $0x190] sm:$0xff]  }
 0x38f   :  { %5398 = vst [vmem:[%s9290_s9 + $0x4] sm:$0x3] %v4031_v48  ;;  %v5406_v49 = vmul.f32 %v4031_v48, %v4031_v48  ;;  %v7832_v44 = vld [vmem:[#allocation4 + $0x188] sm:$0xff]   ;;  %v7835_v11 = vld [vmem:[#allocation4 + $0x1f0] sm:$0xff]  }
 0x391   :  { %v5414_v52 = vpack.c.bf16 %v5406_v49, %v5406_v49  ;;  %7419 = vmatpush3.bf16.msra.mxu1 %v7804_v40  ;;  %v6508_v40 = vld [vmem:[%s9288_s7 + $0x5] ss:$0 sm:$0xff] }
 0x392   :  { %7420 = vmatprep.subr.bf16.mxu1 %v7907_v22 }
 0x393   :  { %7411 = vmatmul.mubr.bf16.vlgmr.msra.gmra.mxu0 %v5414_v52 }
 0x394   :  { %7435 = vmatpush3.bf16.msra.mxu0 %v7810_v16  ;;  %7450 = vmatprep.mubr.msk.bf16.mxu0 %vm7908_vm3, %v7907_v22 }
 0x395   :  { %7421 = vmatpush3.bf16.msra.mxu1 %v7805_v53  ;;  %7436 = vmatprep.subr.bf16.mxu0 %v7907_v22 }
 0x396   :  { %7422 = vmatprep.subr.bf16.mxu1 %v7907_v22 }
 0x398   :  { %7437 = vmatpush3.bf16.msra.mxu0 %v7811_v54 }
 0x399   :  { %7423 = vmatpush3.bf16.msra.mxu1 %v7806_v56  ;;  %7438 = vmatprep.subr.bf16.mxu0 %v7907_v22 }
 0x39a   :  { %7424 = vmatprep.subr.bf16.mxu1 %v7907_v22 }
 0x39c   :  { %7439 = vmatpush3.bf16.msra.mxu0 %v7812_v58  ;;  %v7833_v58 = vld [vmem:[#allocation4 + $0x180] sm:$0xff]  }
 0x39d   :  { %7425 = vmatpush3.bf16.msra.mxu1 %v7807_v18  ;;  %7440 = vmatprep.subr.bf16.mxu0 %v7907_v22 }
 0x39e   :  { %7426 = vmatprep.subr.bf16.mxu1 %v7907_v22 }
 0x3a0   :  { %7441 = vmatpush3.bf16.msra.mxu0 %v7813_v59 }
 0x3a1   :  { %7427 = vmatpush3.bf16.msra.mxu1 %v7808_v61  ;;  %7442 = vmatprep.subr.bf16.mxu0 %v7907_v22 }
 0x3a2   :  { %7428 = vmatprep.subr.bf16.mxu1 %v7907_v22 }
 0x3a4   :  { %7443 = vmatpush3.bf16.msra.mxu0 %v7814_v7 }
 0x3a5   :  { %7429 = vmatpush3.bf16.msra.mxu1 %v7809_v63  ;;  %7444 = vmatprep.subr.bf16.mxu0 %v7907_v22 }
 0x3a6   :  { %7454 = vmatprep.subr.bf16.mxu1 %v7907_v22 }
 0x3a8   :  { %v7034_v55 = vpop.f32.mrf.mxu1  ;;  %7445 = vmatpush3.bf16.msra.mxu0 %v7815_v2  ;;  %v7834_v2 = vld [vmem:[#allocation4 + $0x1f8] sm:$0xff]  }
 0x3a9   :  { %v7056_v3 = vpop.f32.mrf.mxu0  ;;  %7446 = vmatprep.subr.bf16.mxu0 %v7907_v22 }
 0x3aa   :  { %v7035_v4 = vpop.f32.mrf.mxu1 }
 0x3ab   :  { %v7036_v9 = vadd.f32 %v7035_v4, %v7034_v55  ;;  %v7057_v12 = vpop.f32.mrf.mxu0  ;;  %v7836_v55 = vld [vmem:[#allocation4 + $0x1e8] sm:$0xff]   ;;  %v7839_v4 = vld [vmem:[#allocation4 + $0x1d0] sm:$0xff]  }
 0x3ac   :  { %v7037_v62 = vpop.f32.mrf.mxu1  ;;  %7447 = vmatpush3.bf16.msra.mxu0 %v7816_v31  ;;  %v7058_v6 = vadd.f32 %v7057_v12, %v7056_v3  ;;  %v7837_v31 = vld [vmem:[#allocation4 + $0x1e0] sm:$0xff]   ;;  %v7838_v3 = vld [vmem:[#allocation4 + $0x1d8] sm:$0xff]  }
 0x3ad   :  { %v4303_v27 = vadd.f32 %v7036_v9, %v4263_v5  ;;  %v7059_v29 = vpop.f32.mrf.mxu0  ;;  %7448 = vmatprep.subr.bf16.mxu0 %v7907_v22  ;;  %v6509_v9 = vld [vmem:[%s9288_s7 + $0x6] ss:$0 sm:$0xff]  ;;  %v7840_v62 = vld [vmem:[#allocation4 + $0x1c8] sm:$0xff]  }
 0x3ae   :  { %v7038_v45 = vpop.f32.mrf.mxu1  ;;  %v4535_v60 = vadd.f32 %v7058_v6, %v6507_v15  ;;  %v6510_v15 = vld [vmem:[%s9288_s7 + $0x7] ss:$0 sm:$0xff] }
 0x3af   :  { %5399 = vst [vmem:[%s9290_s9 + $0x6] sm:$0x3] %v4303_v27  ;;  %v5407_v23 = vmul.f32 %v4303_v27, %v4303_v27  ;;  %v7060_v24 = vpop.f32.mrf.mxu0 }
 0x3b0   :  { %7449 = vmatpush3.bf16.msra.mxu0 %v7817_v51 }
 0x3b1   :  { %v5415_v13 = vpack.c.bf16 %v5407_v23, %v5407_v23  ;;  %7474 = vmatprep.subr.bf16.mxu0 %v7907_v22 }
 0x3b3   :  { %7431 = vmatmul.mubr.bf16.vlgmr.msra.gmra.mxu1 %v5415_v13 }
 0x3b4   :  { %7455 = vmatpush3.bf16.msra.mxu1 %v7818_v50  ;;  %7470 = vmatprep.mubr.msk.bf16.mxu1 %vm7908_vm3, %v7907_v22  ;;  %v7841_v50 = vld [vmem:[#allocation4 + $0x1c0] sm:$0xff]  }
 0x3b5   :  { %7456 = vmatprep.subr.bf16.mxu1 %v7907_v22 }
 0x3b8   :  { %7457 = vmatpush3.bf16.msra.mxu1 %v7819_v8 }
 0x3b9   :  { %7458 = vmatprep.subr.bf16.mxu1 %v7907_v22 }
 0x3bc   :  { %7459 = vmatpush3.bf16.msra.mxu1 %v7820_v32 }
 0x3bd   :  { %7460 = vmatprep.subr.bf16.mxu1 %v7907_v22 }
 0x3c0   :  { %7461 = vmatpush3.bf16.msra.mxu1 %v7821_v33 }
 0x3c1   :  { %7462 = vmatprep.subr.bf16.mxu1 %v7907_v22 }
 0x3c4   :  { %7463 = vmatpush3.bf16.msra.mxu1 %v7822_v36 }
 0x3c5   :  { %7464 = vmatprep.subr.bf16.mxu1 %v7907_v22 }
 0x3c8   :  { %v7078_v38 = vpop.f32.mrf.mxu1  ;;  %7465 = vmatpush3.bf16.msra.mxu1 %v7823_v57 }
 0x3c9   :  { %v7100_v28 = vpop.f32.mrf.mxu0  ;;  %7466 = vmatprep.subr.bf16.mxu1 %v7907_v22 }
 0x3ca   :  { %v7079_v20 = vpop.f32.mrf.mxu1 }
 0x3cb   :  { %v7080_v37 = vadd.f32 %v7079_v20, %v7078_v38  ;;  %v7101_v39 = vpop.f32.mrf.mxu0 }
 0x3cc   :  { %v7081_v42 = vpop.f32.mrf.mxu1  ;;  %7467 = vmatpush3.bf16.msra.mxu1 %v7824_v0  ;;  %v7102_v48 = vadd.f32 %v7101_v39, %v7100_v28 }
 0x3cd   :  { %v4575_v19 = vadd.f32 %v7080_v37, %v4535_v60  ;;  %v7103_v14 = vpop.f32.mrf.mxu0  ;;  %7468 = vmatprep.subr.bf16.mxu1 %v7907_v22 }
 0x3ce   :  { %v7082_v1 = vpop.f32.mrf.mxu1  ;;  %v4807_v52 = vadd.f32 %v7102_v48, %v6508_v40 }
 0x3cf   :  { %5400 = vst [vmem:[%s9290_s9 + $0x8] sm:$0x3] %v4575_v19  ;;  %v5408_v21 = vmul.f32 %v4575_v19, %v4575_v19  ;;  %v7104_v41 = vpop.f32.mrf.mxu0 }
 0x3d0   :  { %7469 = vmatpush3.bf16.msra.mxu1 %v7825_v35 }
 0x3d1   :  { %v5416_v17 = vpack.c.bf16 %v5408_v21, %v5408_v21  ;;  %7494 = vmatprep.subr.bf16.mxu1 %v7907_v22 }
 0x3d3   :  { %7451 = vmatmul.mubr.bf16.vlgmr.msra.gmra.mxu0 %v5416_v17 }
 0x3d4   :  { %7475 = vmatpush3.bf16.msra.mxu0 %v7826_v46  ;;  %7490 = vmatprep.mubr.msk.bf16.mxu0 %vm7908_vm3, %v7907_v22 }
 0x3d5   :  { %7476 = vmatprep.subr.bf16.mxu0 %v7907_v22 }
 0x3d8   :  { %7477 = vmatpush3.bf16.msra.mxu0 %v7827_v30 }
 0x3d9   :  { %7478 = vmatprep.subr.bf16.mxu0 %v7907_v22 }
 0x3dc   :  { %7479 = vmatpush3.bf16.msra.mxu0 %v7828_v25 }
 0x3dd   :  { %7480 = vmatprep.subr.bf16.mxu0 %v7907_v22 }
 0x3e0   :  { %7481 = vmatpush3.bf16.msra.mxu0 %v7829_v26 }
 0x3e1   :  { %7482 = vmatprep.subr.bf16.mxu0 %v7907_v22 }
 0x3e4   :  { %7483 = vmatpush3.bf16.msra.mxu0 %v7830_v43 }
 0x3e5   :  { %7484 = vmatprep.subr.bf16.mxu0 %v7907_v22 }
 0x3e8   :  { %v7122_v34 = vpop.f32.mrf.mxu1  ;;  %7485 = vmatpush3.bf16.msra.mxu0 %v7831_v47 }
 0x3e9   :  { %v7144_v49 = vpop.f32.mrf.mxu0  ;;  %7486 = vmatprep.subr.bf16.mxu0 %v7907_v22 }
 0x3ea   :  { %v7123_v16 = vpop.f32.mrf.mxu1 }
 0x3eb   :  { %v7124_v53 = vadd.f32 %v7123_v16, %v7122_v34  ;;  %v7145_v54 = vpop.f32.mrf.mxu0 }
 0x3ec   :  { %v7125_v56 = vpop.f32.mrf.mxu1  ;;  %7487 = vmatpush3.bf16.msra.mxu0 %v7832_v44  ;;  %v7146_v5 = vadd.f32 %v7145_v54, %v7144_v49 }
 0x3ed   :  { %v4847_v18 = vadd.f32 %v7124_v53, %v4807_v52  ;;  %v7147_v59 = vpop.f32.mrf.mxu0  ;;  %7488 = vmatprep.subr.bf16.mxu0 %v7907_v22 }
 0x3ee   :  { %v7126_v61 = vpop.f32.mrf.mxu1  ;;  %v5079_v29 = vadd.f32 %v7146_v5, %v6509_v9 }
 0x3ef   :  { %5401 = vst [vmem:[%s9290_s9 + $0xa] sm:$0x3] %v4847_v18  ;;  %v5409_v7 = vmul.f32 %v4847_v18, %v4847_v18  ;;  %v7148_v63 = vpop.f32.mrf.mxu0 }
 0x3f0   :  { %7489 = vmatpush3.bf16.msra.mxu0 %v7833_v58 }
 0x3f1   :  { %v5417_v10 = vpack.c.bf16 %v5409_v7, %v5409_v7 }
 0x3f3   :  { %7471 = vmatmul.mubr.bf16.vlgmr.msra.gmra.mxu1 %v5417_v10 }
 0x3f4   :  { %7495 = vmatpush3.bf16.msra.mxu1 %v7834_v2  ;;  %7510 = vmatprep.mubr.msk.bf16.mxu1 %vm7908_vm3, %v7907_v22 }
 0x3f5   :  { %7496 = vmatprep.subr.bf16.mxu1 %v7907_v22 }
 0x3f8   :  { %7497 = vmatpush3.bf16.msra.mxu1 %v7835_v11 }
 0x3f9   :  { %7498 = vmatprep.subr.bf16.mxu1 %v7907_v22 }
 0x3fc   :  { %7499 = vmatpush3.bf16.msra.mxu1 %v7836_v55 }
 0x3fd   :  { %7500 = vmatprep.subr.bf16.mxu1 %v7907_v22 }
 0x400   :  { %7501 = vmatpush3.bf16.msra.mxu1 %v7837_v31 }
 0x401   :  { %7502 = vmatprep.subr.bf16.mxu1 %v7907_v22 }
 0x404   :  { %7503 = vmatpush3.bf16.msra.mxu1 %v7838_v3 }
 0x405   :  { %7504 = vmatprep.subr.bf16.mxu1 %v7907_v22 }
 0x408   :  { %v7166_v12 = vpop.f32.mrf.mxu1  ;;  %7505 = vmatpush3.bf16.msra.mxu1 %v7839_v4 }
 0x409   :  { %v7188_v51 = vpop.f32.mrf.mxu0  ;;  %7506 = vmatprep.subr.bf16.mxu1 %v7907_v22 }
 0x40a   :  { %v7167_v27 = vpop.f32.mrf.mxu1 }
 0x40b   :  { %v7168_v45 = vadd.f32 %v7167_v27, %v7166_v12  ;;  %v7189_v23 = vpop.f32.mrf.mxu0 }
 0x40c   :  { %v7169_v24 = vpop.f32.mrf.mxu1  ;;  %7507 = vmatpush3.bf16.msra.mxu1 %v7840_v62  ;;  %v7190_v6 = vadd.f32 %v7189_v23, %v7188_v51 }
 0x40d   :  { %v5119_v13 = vadd.f32 %v7168_v45, %v5079_v29  ;;  %v7191_v8 = vpop.f32.mrf.mxu0  ;;  %7508 = vmatprep.subr.bf16.mxu1 %v7907_v22 }
 0x40e   :  { %v7170_v32 = vpop.f32.mrf.mxu1  ;;  %v5351_v22 = vadd.f32 %v7190_v6, %v6510_v15 }
 0x40f   :  { %5402 = vst [vmem:[%s9290_s9 + $0xc] sm:$0x3] %v5119_v13  ;;  %v5410_v33 = vmul.f32 %v5119_v13, %v5119_v13  ;;  %v7192_v36 = vpop.f32.mrf.mxu0 }
 0x410   :  { %7509 = vmatpush3.bf16.msra.mxu1 %v7841_v50 }
 0x411   :  { %v5418_v57 = vpack.c.bf16 %v5410_v33, %v5410_v33 }
 0x413   :  { %7491 = vmatmul.mubr.bf16.vlgmr.msra.gmra.mxu0 %v5418_v57 }
 0x428   :  { %v7210_v38 = vpop.f32.mrf.mxu1 }
 0x429   :  { %v5630_v0 = vpop.f32.mrf.mxu0 }
 0x42a   :  { %v5631_v28 = vadd.f32 1e-08, %v5630_v0  ;;  %v7211_v20 = vpop.f32.mrf.mxu1 }
 0x42b   :  { %v7212_v60 = vadd.f32 %v7211_v20, %v7210_v38  ;;  %v7372_v37 = vpop.f32.mrf.mxu0 }
 0x42c   :  { %7842 = vrsqrt.f32 %v5631_v28  ;;  %v7213_v39 = vpop.f32.mrf.mxu1 }
 0x42d   :  { %v5391_v42 = vadd.f32 %v7212_v60, %v5351_v22  ;;  %v5633_v35 = vpop.f32.mrf.mxu0 }
 0x42e   :  { %v7214_v19 = vpop.f32.mrf.mxu1 }
 0x42f   :  { %5403 = vst [vmem:[%s9290_s9 + $0xe] sm:$0x3] %v5391_v42  ;;  %v5411_v14 = vmul.f32 %v5391_v42, %v5391_v42  ;;  %v7373_v1 = vpop.f32.mrf.mxu0 }
 0x431   :  { %v5419_v21 = vpack.c.bf16 %v5411_v14, %v5411_v14 }
 0x433   :  { %7511 = vmatmul.mubr.bf16.vlgmr.msra.gmra.mxu1 %v5419_v21 }
 0x439   :  { %v7843_v41 = vpop.eup %7842 }
 0x43a   :  { %6260 = vst [vmem:[%s9291_s10] sm:$0x3] %v7843_v41 }
 0x448   :  { %v5718_v46 = vpop.f32.mrf.mxu1 }
 0x449   :  { %v5719_v17 = vadd.f32 1e-08, %v5718_v46 }
 0x44a   :  { %v7392_v30 = vpop.f32.mrf.mxu1 }
 0x44b   :  { %7844 = vrsqrt.f32 %v5719_v17 }
 0x44c   :  { %v5721_v25 = vpop.f32.mrf.mxu1 }
 0x44e   :  { %v7393_v26 = vpop.f32.mrf.mxu1 }
 0x453   :  { %v5806_v43 = vpop.f32.mrf.mxu0 }
 0x454   :  { %v5807_v47 = vadd.f32 1e-08, %v5806_v43 }
 0x455   :  { %v7412_v48 = vpop.f32.mrf.mxu0 }
 0x456   :  { %7846 = vrsqrt.f32 %v5807_v47 }
 0x457   :  { %v5809_v40 = vpop.f32.mrf.mxu0 }
 0x458   :  { %v7845_v34 = vpop.eup %7844 }
 0x459   :  { %6261 = vst [vmem:[%s9291_s10 + $0x2] sm:$0x3] %v7845_v34  ;;  %v7413_v44 = vpop.f32.mrf.mxu0 }
 0x463   :  { %v7847_v49 = vpop.eup %7846 }
 0x464   :  { %6262 = vst [vmem:[%s9291_s10 + $0x4] sm:$0x3] %v7847_v49 }
 0x473   :  { %v5894_v16 = vpop.f32.mrf.mxu1 }
 0x474   :  { %v5895_v52 = vadd.f32 1e-08, %v5894_v16 }
 0x475   :  { %v7432_v53 = vpop.f32.mrf.mxu1 }
 0x476   :  { %7848 = vrsqrt.f32 %v5895_v52 }
 0x477   :  { %v5897_v54 = vpop.f32.mrf.mxu1 }
 0x479   :  { %v7433_v56 = vpop.f32.mrf.mxu1 }
 0x483   :  { %v7849_v58 = vpop.eup %7848 }
 0x484   :  { %6263 = vst [vmem:[%s9291_s10 + $0x6] sm:$0x3] %v7849_v58 }
 0x493   :  { %v5982_v18 = vpop.f32.mrf.mxu0 }
 0x494   :  { %v5983_v59 = vadd.f32 1e-08, %v5982_v18 }
 0x495   :  { %v7452_v61 = vpop.f32.mrf.mxu0 }
 0x496   :  { %7850 = vrsqrt.f32 %v5983_v59 }
 0x497   :  { %v5985_v7 = vpop.f32.mrf.mxu0 }
 0x499   :  { %v7453_v63 = vpop.f32.mrf.mxu0 }
 0x4a3   :  { %v7851_v2 = vpop.eup %7850 }
 0x4a4   :  { %6264 = vst [vmem:[%s9291_s10 + $0x8] sm:$0x3] %v7851_v2 }
 0x4b3   :  { %v6070_v10 = vpop.f32.mrf.mxu1 }
 0x4b4   :  { %v6071_v11 = vadd.f32 1e-08, %v6070_v10 }
 0x4b5   :  { %v7472_v55 = vpop.f32.mrf.mxu1 }
 0x4b6   :  { %7852 = vrsqrt.f32 %v6071_v11 }
 0x4b7   :  { %v6073_v31 = vpop.f32.mrf.mxu1 }
 0x4b9   :  { %v7473_v3 = vpop.f32.mrf.mxu1 }
 0x4c3   :  { %v7853_v4 = vpop.eup %7852 }
 0x4c4   :  { %6265 = vst [vmem:[%s9291_s10 + $0xa] sm:$0x3] %v7853_v4 }
 0x4d3   :  { %v6158_v5 = vpop.f32.mrf.mxu0 }
 0x4d4   :  { %v6159_v9 = vadd.f32 1e-08, %v6158_v5 }
 0x4d5   :  { %v7492_v12 = vpop.f32.mrf.mxu0 }
 0x4d6   :  { %7854 = vrsqrt.f32 %v6159_v9 }
 0x4d7   :  { %v6161_v62 = vpop.f32.mrf.mxu0 }
 0x4d9   :  { %v7493_v51 = vpop.f32.mrf.mxu0 }
 0x4e3   :  { %v7855_v27 = vpop.eup %7854 }
 0x4e4   :  { %6266 = vst [vmem:[%s9291_s10 + $0xc] sm:$0x3] %v7855_v27 }
 0x4f3   :  { %v6246_v29 = vpop.f32.mrf.mxu1 }
 0x4f4   :  { %v6247_v45 = vadd.f32 1e-08, %v6246_v29 }
 0x4f5   :  { %v7512_v23 = vpop.f32.mrf.mxu1 }
 0x4f6   :  { %7856 = vrsqrt.f32 %v6247_v45 }
 0x4f7   :  { %v6249_v24 = vpop.f32.mrf.mxu1 }
 0x4f9   :  { %v7513_v50 = vpop.f32.mrf.mxu1 }
 0x503   :  { %v7857_v13 = vpop.eup %7856 }
 0x504   :  { %6267 = vst [vmem:[%s9291_s10 + $0xe] sm:$0x3] %v7857_v13 }
 0x505   :  { %6276 = vsyncpa [#allocation3], 1 }
 0x506   :  { %6277 = vsyncpa [#allocation5], 1 }

</bundles_post_ra>
